<compile_context>
chip_gen: v5e
topology: v5e:2x2
jax: 0.10.0
libtpu: 0.0.40
codegen_flags: <defaults>
</compile_context>

<pallas_src>
import functools

import jax
import jax.numpy as jnp
from jax import lax
from jax.experimental import pallas as pl
from jax.experimental.pallas import tpu as pltpu

# Precision knobs.  DEFAULT = single bf16-multiply / f32-accumulate MXU pass.
# HIGHEST is kept only where exactness matters: one-hot routing (scatter/gather
# must not round the routed f32 values) and the final output layer.
# (Precision.HIGH is rejected by the Mosaic dot lowering.)
MATMUL_PRECISION = lax.Precision.DEFAULT
FINAL_PRECISION = lax.Precision.HIGHEST
ROUTE_PRECISION = lax.Precision.HIGHEST

# Layer order inside the packed weight / bias slabs.
(L_ENC1, L_ENC2, L_EDGE1, L_EDGE2, L_FEAT1, L_FEAT2,
 L_GNET1, L_GNET2, L_ENET1, L_ENET2, L_OUT1, L_OUT2, L_OUT3) = range(13)
NUM_LAYERS = 13

BP = 8   # pool rows padded to one sublane tile (requires B <= 8)


def relu(v):
    return jnp.maximum(v, 0.0)


# ----------------------------------------------------------------------------
# Single fused kernel: encoders + n_graph_iters InteractionNet steps + features_out
# ----------------------------------------------------------------------------
def generator_gnn_kernel(inp_ref, idx_row_ref, idx_col_ref, w_ref, b_ref, out_ref,
                         *, N, E, H, n_graph_iters, w_offs, w_rows, w_ncols):
    def lin(h, li, prec=MATMUL_PRECISION):
        # static, 8-row-aligned slice of the packed weight slab -> one MXU dot
        w = w_ref[w_offs[li]:w_offs[li] + w_rows[li], :]
        y = jnp.dot(h, w, precision=prec, preferred_element_type=jnp.float32)
        y = y + b_ref[li:li + 1, :]            # bias row read directly from the ref
        return y[:, :w_ncols[li]]              # padded output cols are exactly zero

    def mlp2(h, l1, l2):                       # Linear-ReLU-Linear-ReLU
        return relu(lin(relu(lin(h, l1)), l2))

    def route(oh, v):                          # exact one-hot matmul routing
        return jnp.dot(oh, v, precision=ROUTE_PRECISION,
                       preferred_element_type=jnp.float32)

    # ---- fused node + graph encoders (one matmul chain on the packed slab) ----
    inp = inp_ref[...]                         # (N, c_in_pack)
    xg = mlp2(inp, L_ENC1, L_ENC2)             # (N, 2H) = [node_enc(x0) | graph_enc(gdata)]
    x = xg[:, :H]                              # (N, H)
    g = xg[:, H:2 * H]                         # (N, H)

    # ---- routing one-hots: built once, reused by every message-passing step ----
    start_c = idx_col_ref[0:E, 0:1]            # (E, 1)
    end_c = idx_col_ref[0:E, 1:2]              # (E, 1)
    batch_c = idx_col_ref[0:N, 2:3]            # (N, 1)
    end_r = idx_row_ref[1:2, 0:E]              # (1, E)
    batch_r = idx_row_ref[2:3, 0:N]            # (1, N)

    se_c = jnp.concatenate([start_c, end_c], axis=0)                    # (2E, 1)
    oh_gather_se = (lax.broadcasted_iota(jnp.int32, (2 * E, N), 1)
                    == se_c).astype(jnp.float32)                        # (2E, N)  x[start]/x[end]
    oh_pool_pad = (lax.broadcasted_iota(jnp.int32, (BP, N), 0)
                   == batch_r).astype(jnp.float32)                      # (BP, N)  add_pool
    oh_pool_se = jnp.concatenate([oh_pool_pad, oh_gather_se], axis=0)   # (BP+2E, N) fused RHS=x_out
    oh_gather_b = (lax.broadcasted_iota(jnp.int32, (N, BP), 1)
                   == batch_c).astype(jnp.float32)                      # (N, BP)  g[batch]
    oh_scatter_e = (lax.broadcasted_iota(jnp.int32, (N, E), 0)
                    == end_r).astype(jnp.float32)                       # (N, E)   scatter_add

    # ---- edge encoder: edge_encoder(cat([x[start], x[end]], -1)) ----
    xs_xe = route(oh_gather_se, x)                                      # (2E, H)
    e = mlp2(jnp.concatenate([xs_xe[:E], xs_xe[E:]], axis=-1), L_EDGE1, L_EDGE2)

    # ---- InteractionNet message-passing iterations (aggregation == 'sum') ----
    for _ in range(n_graph_iters):
        msgs = route(oh_scatter_e, e)                                   # (N, H) scatter_add(e, end)
        x_out = mlp2(jnp.concatenate([x, msgs, g], axis=-1), L_FEAT1, L_FEAT2) + x
        routed = route(oh_pool_se, x_out)                               # (BP+2E, H) pool + both gathers
        pooled = routed[:BP]                                            # (BP, H) rows >= B are zero
        xs = routed[BP:BP + E]                                          # (E, H)  x_out[start]
        xe = routed[BP + E:BP + 2 * E]                                  # (E, H)  x_out[end]
        g_out = route(oh_gather_b, mlp2(pooled, L_GNET1, L_GNET2)) + g  # repeat_interleave + residual
        e_out = mlp2(jnp.concatenate([xs, xe, e], axis=-1), L_ENET1, L_ENET2) + e
        x, e, g = x_out, e_out, g_out

    # ---- features_out: Linear-ReLU, Linear-ReLU, Linear-Tanh (lane-dense store) ----
    h = relu(lin(x, L_OUT1))
    h = relu(lin(h, L_OUT2))
    out_ref[...] = jnp.tanh(lin(h, L_OUT3, prec=FINAL_PRECISION))       # (N, H); wrapper slices c_out


# ----------------------------------------------------------------------------
# Host-side parameter packing into two flat VMEM slabs (lane width = 2H)
# ----------------------------------------------------------------------------
def pack_params(params, *, H, c_node, c_graph, c_in_pack):
    nw1, nb1, nw2, nb2 = params['node_enc']
    ew1, eb1, ew2, eb2 = params['edge_enc']
    qw1, qb1, qw2, qb2 = params['graph_enc']
    fw1, fb1, fw2, fb2 = params['feature_net']
    gw1, gb1, gw2, gb2 = params['graph_net']
    dw1, db1, dw2, db2 = params['edge_net']
    ow1, ob1, ow2, ob2, ow3, ob3 = params['features_out']

    W = 2 * H                                  # packed slab lane width
    w_list, b_list, ncols = [], [], []

    def add(rows, n_out, w_blocks, b_blocks):
        wp = jnp.zeros((rows, W), jnp.float32)
        for ro, co, w in w_blocks:
            wp = wp.at[ro:ro + w.shape[0], co:co + w.shape[1]].set(w)
        bp = jnp.zeros((1, W), jnp.float32)
        for co, b in b_blocks:
            bp = bp.at[:, co:co + b.shape[1]].set(b)
        w_list.append(wp)
        b_list.append(bp)
        ncols.append(n_out)

    # Order MUST match the L_* layer constants.
    # L_ENC1: fused node/graph encoder layer 1 -- [nw1 | qw1] column-wise, with
    # row offsets matching where x0 / gdata sit inside the packed input slab.
    add(c_in_pack, 2 * H, [(0, 0, nw1), (c_node, H, qw1)], [(0, nb1), (H, qb1)])
    # L_ENC2: block-diagonal [[nw2, 0], [0, qw2]]
    add(2 * H, 2 * H, [(0, 0, nw2), (H, H, qw2)], [(0, nb2), (H, qb2)])
    add(2 * H, H, [(0, 0, ew1)], [(0, eb1)])   # L_EDGE1
    add(H, H, [(0, 0, ew2)], [(0, eb2)])       # L_EDGE2
    add(3 * H, H, [(0, 0, fw1)], [(0, fb1)])   # L_FEAT1
    add(H, H, [(0, 0, fw2)], [(0, fb2)])       # L_FEAT2
    add(H, H, [(0, 0, gw1)], [(0, gb1)])       # L_GNET1
    add(H, H, [(0, 0, gw2)], [(0, gb2)])       # L_GNET2
    add(3 * H, H, [(0, 0, dw1)], [(0, db1)])   # L_ENET1
    add(H, H, [(0, 0, dw2)], [(0, db2)])       # L_ENET2
    add(H, H, [(0, 0, ow1)], [(0, ob1)])       # L_OUT1
    add(H, H, [(0, 0, ow2)], [(0, ob2)])       # L_OUT2
    add(H, H, [(0, 0, ow3)], [(0, ob3)])       # L_OUT3 (real cols 0:c_out; kept H-wide -> lane-dense out)

    offs, rows, acc = [], [], 0
    for w in w_list:
        r = int(w.shape[0])
        # 8-row alignment keeps every in-kernel static slice tile-aligned (no copies).
        assert r % 8 == 0, r
        offs.append(acc)
        rows.append(r)
        acc += r

    w_slab = jnp.concatenate(w_list, axis=0)   # (sum_rows, 2H)
    b_slab = jnp.concatenate(b_list, axis=0)   # (NUM_LAYERS, 2H)
    return w_slab, b_slab, tuple(offs), tuple(rows), tuple(ncols)


# ----------------------------------------------------------------------------
# Wrapper
# ----------------------------------------------------------------------------
def generator_gnn_forward(x0, graph_data, start, end, batch, params,
                          *, B, H, c_out, n_graph_iters):
    N, c_node = x0.shape
    c_graph = graph_data.shape[1]
    E = start.shape[0]
    c_in_pack = ((c_node + c_graph + 7) // 8) * 8
    assert B <= BP and N % 8 == 0 and E % 8 == 0 and H % 8 == 0 and c_out <= H

    # Packed node-input slab: [x0 | graph_data | 0-pad]  -> one DMA.
    inp = jnp.zeros((N, c_in_pack), jnp.float32)
    inp = inp.at[:, :c_node].set(x0).at[:, c_node:c_node + c_graph].set(graph_data)

    # Packed indices in both row (3,L) and column (L,3) orientation -> two DMAs.
    L = max(E, N)
    idx_row = jnp.zeros((3, L), jnp.int32)
    idx_row = (idx_row.at[0, :E].set(start.astype(jnp.int32))
                      .at[1, :E].set(end.astype(jnp.int32))
                      .at[2, :N].set(batch.astype(jnp.int32)))
    idx_col = idx_row.T                                       # (L, 3)

    w_slab, b_slab, w_offs, w_rows, w_ncols = pack_params(
        params, H=H, c_node=c_node, c_graph=c_graph, c_in_pack=c_in_pack)

    kernel = functools.partial(
        generator_gnn_kernel, N=N, E=E, H=H,
        n_graph_iters=n_graph_iters, w_offs=w_offs, w_rows=w_rows, w_ncols=w_ncols)

    # Advisory cost estimate so XLA can schedule/overlap this call in a larger graph.
    def df(m, k, n):
        return 2 * m * k * n
    flops = (df(N, c_in_pack, 2 * H) + df(N, 2 * H, 2 * H)            # fused encoders
             + df(2 * E, N, H)                                        # x[start]/x[end] gather
             + df(E, 2 * H, H) + df(E, H, H)                          # edge encoder
             + n_graph_iters * (
                 df(N, E, H)                                          # scatter_add
                 + df(N, 3 * H, H) + df(N, H, H)                      # feature_net
                 + df(BP + 2 * E, N, H)                               # fused pool + gathers
                 + 2 * df(BP, H, H)                                   # graph_net
                 + df(N, BP, H)                                       # repeat_interleave
                 + df(E, 3 * H, H) + df(E, H, H))                     # edge_net
             + 3 * df(N, H, H))                                       # features_out
    bytes_accessed = 4 * (inp.size + idx_row.size + idx_col.size
                          + w_slab.size + b_slab.size + N * H)
    cost = pl.CostEstimate(flops=flops, transcendentals=N * H,
                           bytes_accessed=bytes_accessed)

    vmem = pl.BlockSpec(memory_space=pltpu.MemorySpace.VMEM)
    out_full = pl.pallas_call(
        kernel,
        out_shape=jax.ShapeDtypeStruct((N, H), jnp.float32),          # lane-dense store
        in_specs=[vmem] * 5,
        out_specs=vmem,
        cost_estimate=cost,
    )(inp, idx_row, idx_col, w_slab, b_slab)
    return out_full[:, :c_out]                                        # slice outside the kernel


# ----------------------------------------------------------------------------
# Pure-JAX reference (exact f32, exact scatter/gather) for correctness check
# ----------------------------------------------------------------------------
def reference_forward(x0, gdata, start, end, batch, params, *, B, n_graph_iters):
    def lin(h, w, b):
        return jnp.dot(h, w, precision=lax.Precision.HIGHEST) + b

    def mlp2(h, p):
        w1, b1, w2, b2 = p
        return relu(lin(relu(lin(h, w1, b1)), w2, b2))

    N = x0.shape[0]
    x = mlp2(x0, params['node_enc'])
    e = mlp2(jnp.concatenate([x[start], x[end]], axis=-1), params['edge_enc'])
    g = mlp2(gdata, params['graph_enc'])
    H = x.shape[1]

    for _ in range(n_graph_iters):
        msgs = jnp.zeros((N, H), jnp.float32).at[end].add(e)
        x_out = mlp2(jnp.concatenate([x, msgs, g], axis=-1), params['feature_net']) + x
        pooled = jnp.zeros((B, H), jnp.float32).at[batch].add(x_out)
        g_out = mlp2(pooled, params['graph_net'])[batch] + g
        e_out = mlp2(jnp.concatenate([x_out[start], x_out[end], e], axis=-1),
                     params['edge_net']) + e
        x, e, g = x_out, e_out, g_out

    w1, b1, w2, b2, w3, b3 = params['features_out']
    h = relu(lin(x, w1, b1))
    h = relu(lin(h, w2, b2))
    return jnp.tanh(lin(h, w3, b3))


# ----------------------------------------------------------------------------
# Deterministic parameter init (torch.nn.Linear-style uniform bounds)
# ----------------------------------------------------------------------------
def init_params(key, H, c_node, c_graph, c_out):
    keys = iter(jax.random.split(key, 32))

    def lin(n_in, n_out):
        kw, kb = jax.random.split(next(keys))
        bound = 1.0 / float(n_in) ** 0.5
        w = jax.random.uniform(kw, (n_in, n_out), jnp.float32, -bound, bound)
        b = jax.random.uniform(kb, (1, n_out), jnp.float32, -bound, bound)
        return w, b

    p = {}
    p['node_enc'] = (*lin(c_node, H), *lin(H, H))
    p['edge_enc'] = (*lin(2 * H, H), *lin(H, H))
    p['graph_enc'] = (*lin(c_graph, H), *lin(H, H))
    p['feature_net'] = (*lin(3 * H, H), *lin(H, H))
    p['graph_net'] = (*lin(H, H), *lin(H, H))
    p['edge_net'] = (*lin(3 * H, H), *lin(H, H))
    p['features_out'] = (*lin(H, H), *lin(H, H), *lin(H, c_out))
    return p


if __name__ == "__main__":
    B = 4                    # number of graphs in the batch
    NODES_PER_GRAPH = 16
    N = B * NODES_PER_GRAPH  # 64 nodes
    E = 128                  # edges
    H = 32                   # hidden
    C_NODE, C_GRAPH, C_OUT = 4, 6, 3
    N_GRAPH_ITERS = 2

    key = jax.random.PRNGKey(0)
    k_x, k_g, k_eg, k_s, k_e, k_p = jax.random.split(key, 6)

    x0 = jax.random.normal(k_x, (N, C_NODE), jnp.float32)
    # graph-level features already broadcast to per-node rows (so g aligns with x)
    graph_data = jax.random.normal(k_g, (N, C_GRAPH), jnp.float32)

    edge_graph = jax.random.randint(k_eg, (E,), 0, B)
    start = (edge_graph * NODES_PER_GRAPH
             + jax.random.randint(k_s, (E,), 0, NODES_PER_GRAPH)).astype(jnp.int32)
    end = (edge_graph * NODES_PER_GRAPH
           + jax.random.randint(k_e, (E,), 0, NODES_PER_GRAPH)).astype(jnp.int32)
    batch = jnp.repeat(jnp.arange(B, dtype=jnp.int32), NODES_PER_GRAPH)
    # repeater (per-graph node counts for repeat_interleave) is implied by `batch`
    # and handled via the one-hot batch matmul inside the kernel.

    params = init_params(k_p, H, C_NODE, C_GRAPH, C_OUT)

    fwd = jax.jit(functools.partial(generator_gnn_forward,
                                    B=B, H=H, c_out=C_OUT,
                                    n_graph_iters=N_GRAPH_ITERS))
    out = fwd(x0, graph_data, start, end, batch, params)
    out = jax.block_until_ready(out)

    ref = reference_forward(x0, graph_data, start, end, batch, params,
                            B=B, n_graph_iters=N_GRAPH_ITERS)
    ref = jax.block_until_ready(ref)

    assert out.shape == (N, C_OUT), out.shape
    # Weight dots run at Precision.DEFAULT (single bf16-multiply / f32-accumulate
    # pass), so the kernel deviates from the exact-f32 reference by O(1e-3) per
    # layer; routing dots stay exact.  2e-2 comfortably bounds this depth.
    max_err = float(jnp.max(jnp.abs(out - ref)))
    assert jnp.allclose(out, ref, rtol=2e-2, atol=2e-2), max_err

    print("KERNEL_OK")
</pallas_src>

<mosaic_0001>
module attributes {stable_mosaic.version = 11 : i64} {
  func.func @generator_gnn_kernel(%arg0: memref<64x16xf32, #tpu.memory_space<vmem>>, %arg1: memref<3x128xi32, #tpu.memory_space<vmem>>, %arg2: memref<128x3xi32, #tpu.memory_space<vmem>>, %arg3: memref<592x64xf32, #tpu.memory_space<vmem>>, %arg4: memref<13x64xf32, #tpu.memory_space<vmem>>, %arg5: memref<64x32xf32, #tpu.memory_space<vmem>>) attributes {dimension_semantics = [], scalar_prefetch = 0 : i64, scratch_operands = 0 : i64, tpu.core_type = #tpu.core_type<tc>} {
    %c0 = arith.constant 0 : index
    %c0_0 = arith.constant 0 : index
    %0 = vector.load %arg0[%c0, %c0_0] : memref<64x16xf32, #tpu.memory_space<vmem>>, vector<64x16xf32>
    %c0_1 = arith.constant 0 : index
    %c0_2 = arith.constant 0 : index
    %1 = vector.load %arg3[%c0_1, %c0_2] : memref<592x64xf32, #tpu.memory_space<vmem>>, vector<16x64xf32>
    %cst = arith.constant dense<0.000000e+00> : vector<64x64xf32>
    %2 = tpu.matmul %0, %1, %cst {dimension_numbers = #tpu.dot_dimension_numbers<[1], [0], [0], [1], [0, 0, 1, 1], [], []>} : vector<64x16xf32>, vector<16x64xf32>, vector<64x64xf32> -> vector<64x64xf32>
    %c0_3 = arith.constant 0 : index
    %c0_4 = arith.constant 0 : index
    %3 = vector.load %arg4[%c0_3, %c0_4] : memref<13x64xf32, #tpu.memory_space<vmem>>, vector<1x64xf32>
    %4 = vector.broadcast %3 : vector<1x64xf32> to vector<64x64xf32>
    %5 = arith.addf %2, %4 : vector<64x64xf32>
    %cst_5 = arith.constant 0.000000e+00 : f32
    %6 = vector.broadcast %cst_5 : f32 to vector<64x64xf32>
    %7 = arith.maximumf %5, %6 : vector<64x64xf32>
    %c16 = arith.constant 16 : index
    %c0_6 = arith.constant 0 : index
    %8 = vector.load %arg3[%c16, %c0_6] : memref<592x64xf32, #tpu.memory_space<vmem>>, vector<64x64xf32>
    %cst_7 = arith.constant dense<0.000000e+00> : vector<64x64xf32>
    %9 = tpu.matmul %7, %8, %cst_7 {dimension_numbers = #tpu.dot_dimension_numbers<[1], [0], [0], [1], [0, 0, 1, 1], [], []>} : vector<64x64xf32>, vector<64x64xf32>, vector<64x64xf32> -> vector<64x64xf32>
    %c1 = arith.constant 1 : index
    %c0_8 = arith.constant 0 : index
    %10 = vector.load %arg4[%c1, %c0_8] : memref<13x64xf32, #tpu.memory_space<vmem>>, vector<1x64xf32>
    %11 = vector.broadcast %10 : vector<1x64xf32> to vector<64x64xf32>
    %12 = arith.addf %9, %11 : vector<64x64xf32>
    %cst_9 = arith.constant 0.000000e+00 : f32
    %13 = vector.broadcast %cst_9 : f32 to vector<64x64xf32>
    %14 = arith.maximumf %12, %13 : vector<64x64xf32>
    %15 = vector.extract_strided_slice %14 {offsets = [0, 0], sizes = [64, 32], strides = [1, 1]} : vector<64x64xf32> to vector<64x32xf32>
    %16 = vector.extract_strided_slice %14 {offsets = [0, 32], sizes = [64, 32], strides = [1, 1]} : vector<64x64xf32> to vector<64x32xf32>
    %c0_10 = arith.constant 0 : index
    %c0_11 = arith.constant 0 : index
    %17 = vector.load %arg2[%c0_10, %c0_11] : memref<128x3xi32, #tpu.memory_space<vmem>>, vector<128x1xi32>
    %c0_12 = arith.constant 0 : index
    %c1_13 = arith.constant 1 : index
    %18 = vector.load %arg2[%c0_12, %c1_13] : memref<128x3xi32, #tpu.memory_space<vmem>>, vector<128x1xi32>
    %c0_14 = arith.constant 0 : index
    %c2 = arith.constant 2 : index
    %19 = vector.load %arg2[%c0_14, %c2] : memref<128x3xi32, #tpu.memory_space<vmem>>, vector<64x1xi32>
    %c1_15 = arith.constant 1 : index
    %c0_16 = arith.constant 0 : index
    %20 = vector.load %arg1[%c1_15, %c0_16] : memref<3x128xi32, #tpu.memory_space<vmem>>, vector<1x128xi32>
    %c2_17 = arith.constant 2 : index
    %c0_18 = arith.constant 0 : index
    %21 = vector.load %arg1[%c2_17, %c0_18] : memref<3x128xi32, #tpu.memory_space<vmem>>, vector<1x64xi32>
    %22 = tpu.concatenate %17, %18 in 0 : vector<128x1xi32>, vector<128x1xi32> -> vector<256x1xi32>
    %23 = tpu.iota {dimensions = array<i32: 1>} : vector<256x64xi32>
    %24 = vector.broadcast %22 : vector<256x1xi32> to vector<256x64xi32>
    %25 = arith.cmpi eq, %23, %24 : vector<256x64xi32>
    %26 = arith.extui %25 : vector<256x64xi1> to vector<256x64xi32>
    %27 = arith.sitofp %26 : vector<256x64xi32> to vector<256x64xf32>
    %28 = tpu.iota {dimensions = array<i32: 0>} : vector<8x64xi32>
    %29 = vector.broadcast %21 : vector<1x64xi32> to vector<8x64xi32>
    %30 = arith.cmpi eq, %28, %29 : vector<8x64xi32>
    %31 = arith.extui %30 : vector<8x64xi1> to vector<8x64xi32>
    %32 = arith.sitofp %31 : vector<8x64xi32> to vector<8x64xf32>
    %33 = tpu.concatenate %32, %27 in 0 : vector<8x64xf32>, vector<256x64xf32> -> vector<264x64xf32>
    %34 = tpu.iota {dimensions = array<i32: 1>} : vector<64x8xi32>
    %35 = vector.broadcast %19 : vector<64x1xi32> to vector<64x8xi32>
    %36 = arith.cmpi eq, %34, %35 : vector<64x8xi32>
    %37 = arith.extui %36 : vector<64x8xi1> to vector<64x8xi32>
    %38 = arith.sitofp %37 : vector<64x8xi32> to vector<64x8xf32>
    %39 = tpu.iota {dimensions = array<i32: 0>} : vector<64x128xi32>
    %40 = vector.broadcast %20 : vector<1x128xi32> to vector<64x128xi32>
    %41 = arith.cmpi eq, %39, %40 : vector<64x128xi32>
    %42 = arith.extui %41 : vector<64x128xi1> to vector<64x128xi32>
    %43 = arith.sitofp %42 : vector<64x128xi32> to vector<64x128xf32>
    %cst_19 = arith.constant dense<0.000000e+00> : vector<256x32xf32>
    %44 = tpu.matmul %27, %15, %cst_19 {dimension_numbers = #tpu.dot_dimension_numbers<[1], [0], [0], [1], [0, 0, 1, 1], [], []>, precision = #tpu.contract_precision<fp32>} : vector<256x64xf32>, vector<64x32xf32>, vector<256x32xf32> -> vector<256x32xf32>
    %45 = vector.extract_strided_slice %44 {offsets = [0, 0], sizes = [128, 32], strides = [1, 1]} : vector<256x32xf32> to vector<128x32xf32>
    %46 = vector.extract_strided_slice %44 {offsets = [128, 0], sizes = [128, 32], strides = [1, 1]} : vector<256x32xf32> to vector<128x32xf32>
    %47 = tpu.concatenate %45, %46 in 1 : vector<128x32xf32>, vector<128x32xf32> -> vector<128x64xf32>
    %c80 = arith.constant 80 : index
    %c0_20 = arith.constant 0 : index
    %48 = vector.load %arg3[%c80, %c0_20] : memref<592x64xf32, #tpu.memory_space<vmem>>, vector<64x64xf32>
    %cst_21 = arith.constant dense<0.000000e+00> : vector<128x64xf32>
    %49 = tpu.matmul %47, %48, %cst_21 {dimension_numbers = #tpu.dot_dimension_numbers<[1], [0], [0], [1], [0, 0, 1, 1], [], []>} : vector<128x64xf32>, vector<64x64xf32>, vector<128x64xf32> -> vector<128x64xf32>
    %c2_22 = arith.constant 2 : index
    %c0_23 = arith.constant 0 : index
    %50 = vector.load %arg4[%c2_22, %c0_23] : memref<13x64xf32, #tpu.memory_space<vmem>>, vector<1x64xf32>
    %51 = vector.broadcast %50 : vector<1x64xf32> to vector<128x64xf32>
    %52 = arith.addf %49, %51 : vector<128x64xf32>
    %53 = vector.extract_strided_slice %52 {offsets = [0, 0], sizes = [128, 32], strides = [1, 1]} : vector<128x64xf32> to vector<128x32xf32>
    %cst_24 = arith.constant 0.000000e+00 : f32
    %54 = vector.broadcast %cst_24 : f32 to vector<128x32xf32>
    %55 = arith.maximumf %53, %54 : vector<128x32xf32>
    %c144 = arith.constant 144 : index
    %c0_25 = arith.constant 0 : index
    %56 = vector.load %arg3[%c144, %c0_25] : memref<592x64xf32, #tpu.memory_space<vmem>>, vector<32x64xf32>
    %cst_26 = arith.constant dense<0.000000e+00> : vector<128x64xf32>
    %57 = tpu.matmul %55, %56, %cst_26 {dimension_numbers = #tpu.dot_dimension_numbers<[1], [0], [0], [1], [0, 0, 1, 1], [], []>} : vector<128x32xf32>, vector<32x64xf32>, vector<128x64xf32> -> vector<128x64xf32>
    %c3 = arith.constant 3 : index
    %c0_27 = arith.constant 0 : index
    %58 = vector.load %arg4[%c3, %c0_27] : memref<13x64xf32, #tpu.memory_space<vmem>>, vector<1x64xf32>
    %59 = vector.broadcast %58 : vector<1x64xf32> to vector<128x64xf32>
    %60 = arith.addf %57, %59 : vector<128x64xf32>
    %61 = vector.extract_strided_slice %60 {offsets = [0, 0], sizes = [128, 32], strides = [1, 1]} : vector<128x64xf32> to vector<128x32xf32>
    %cst_28 = arith.constant 0.000000e+00 : f32
    %62 = vector.broadcast %cst_28 : f32 to vector<128x32xf32>
    %63 = arith.maximumf %61, %62 : vector<128x32xf32>
    %cst_29 = arith.constant dense<0.000000e+00> : vector<64x32xf32>
    %64 = tpu.matmul %43, %63, %cst_29 {dimension_numbers = #tpu.dot_dimension_numbers<[1], [0], [0], [1], [0, 0, 1, 1], [], []>, precision = #tpu.contract_precision<fp32>} : vector<64x128xf32>, vector<128x32xf32>, vector<64x32xf32> -> vector<64x32xf32>
    %65 = tpu.concatenate %15, %64, %16 in 1 : vector<64x32xf32>, vector<64x32xf32>, vector<64x32xf32> -> vector<64x96xf32>
    %c176 = arith.constant 176 : index
    %c0_30 = arith.constant 0 : index
    %66 = vector.load %arg3[%c176, %c0_30] : memref<592x64xf32, #tpu.memory_space<vmem>>, vector<96x64xf32>
    %cst_31 = arith.constant dense<0.000000e+00> : vector<64x64xf32>
    %67 = tpu.matmul %65, %66, %cst_31 {dimension_numbers = #tpu.dot_dimension_numbers<[1], [0], [0], [1], [0, 0, 1, 1], [], []>} : vector<64x96xf32>, vector<96x64xf32>, vector<64x64xf32> -> vector<64x64xf32>
    %c4 = arith.constant 4 : index
    %c0_32 = arith.constant 0 : index
    %68 = vector.load %arg4[%c4, %c0_32] : memref<13x64xf32, #tpu.memory_space<vmem>>, vector<1x64xf32>
    %69 = vector.broadcast %68 : vector<1x64xf32> to vector<64x64xf32>
    %70 = arith.addf %67, %69 : vector<64x64xf32>
    %71 = vector.extract_strided_slice %70 {offsets = [0, 0], sizes = [64, 32], strides = [1, 1]} : vector<64x64xf32> to vector<64x32xf32>
    %cst_33 = arith.constant 0.000000e+00 : f32
    %72 = vector.broadcast %cst_33 : f32 to vector<64x32xf32>
    %73 = arith.maximumf %71, %72 : vector<64x32xf32>
    %c272 = arith.constant 272 : index
    %c0_34 = arith.constant 0 : index
    %74 = vector.load %arg3[%c272, %c0_34] : memref<592x64xf32, #tpu.memory_space<vmem>>, vector<32x64xf32>
    %cst_35 = arith.constant dense<0.000000e+00> : vector<64x64xf32>
    %75 = tpu.matmul %73, %74, %cst_35 {dimension_numbers = #tpu.dot_dimension_numbers<[1], [0], [0], [1], [0, 0, 1, 1], [], []>} : vector<64x32xf32>, vector<32x64xf32>, vector<64x64xf32> -> vector<64x64xf32>
    %c5 = arith.constant 5 : index
    %c0_36 = arith.constant 0 : index
    %76 = vector.load %arg4[%c5, %c0_36] : memref<13x64xf32, #tpu.memory_space<vmem>>, vector<1x64xf32>
    %77 = vector.broadcast %76 : vector<1x64xf32> to vector<64x64xf32>
    %78 = arith.addf %75, %77 : vector<64x64xf32>
    %79 = vector.extract_strided_slice %78 {offsets = [0, 0], sizes = [64, 32], strides = [1, 1]} : vector<64x64xf32> to vector<64x32xf32>
    %cst_37 = arith.constant 0.000000e+00 : f32
    %80 = vector.broadcast %cst_37 : f32 to vector<64x32xf32>
    %81 = arith.maximumf %79, %80 : vector<64x32xf32>
    %82 = arith.addf %81, %15 : vector<64x32xf32>
    %cst_38 = arith.constant dense<0.000000e+00> : vector<264x32xf32>
    %83 = tpu.matmul %33, %82, %cst_38 {dimension_numbers = #tpu.dot_dimension_numbers<[1], [0], [0], [1], [0, 0, 1, 1], [], []>, precision = #tpu.contract_precision<fp32>} : vector<264x64xf32>, vector<64x32xf32>, vector<264x32xf32> -> vector<264x32xf32>
    %84 = vector.extract_strided_slice %83 {offsets = [0, 0], sizes = [8, 32], strides = [1, 1]} : vector<264x32xf32> to vector<8x32xf32>
    %85 = vector.extract_strided_slice %83 {offsets = [8, 0], sizes = [128, 32], strides = [1, 1]} : vector<264x32xf32> to vector<128x32xf32>
    %86 = vector.extract_strided_slice %83 {offsets = [136, 0], sizes = [128, 32], strides = [1, 1]} : vector<264x32xf32> to vector<128x32xf32>
    %c304 = arith.constant 304 : index
    %c0_39 = arith.constant 0 : index
    %87 = vector.load %arg3[%c304, %c0_39] : memref<592x64xf32, #tpu.memory_space<vmem>>, vector<32x64xf32>
    %cst_40 = arith.constant dense<0.000000e+00> : vector<8x64xf32>
    %88 = tpu.matmul %84, %87, %cst_40 {dimension_numbers = #tpu.dot_dimension_numbers<[1], [0], [0], [1], [0, 0, 1, 1], [], []>} : vector<8x32xf32>, vector<32x64xf32>, vector<8x64xf32> -> vector<8x64xf32>
    %c6 = arith.constant 6 : index
    %c0_41 = arith.constant 0 : index
    %89 = vector.load %arg4[%c6, %c0_41] : memref<13x64xf32, #tpu.memory_space<vmem>>, vector<1x64xf32>
    %90 = vector.broadcast %89 : vector<1x64xf32> to vector<8x64xf32>
    %91 = arith.addf %88, %90 : vector<8x64xf32>
    %92 = vector.extract_strided_slice %91 {offsets = [0, 0], sizes = [8, 32], strides = [1, 1]} : vector<8x64xf32> to vector<8x32xf32>
    %cst_42 = arith.constant 0.000000e+00 : f32
    %93 = vector.broadcast %cst_42 : f32 to vector<8x32xf32>
    %94 = arith.maximumf %92, %93 : vector<8x32xf32>
    %c336 = arith.constant 336 : index
    %c0_43 = arith.constant 0 : index
    %95 = vector.load %arg3[%c336, %c0_43] : memref<592x64xf32, #tpu.memory_space<vmem>>, vector<32x64xf32>
    %cst_44 = arith.constant dense<0.000000e+00> : vector<8x64xf32>
    %96 = tpu.matmul %94, %95, %cst_44 {dimension_numbers = #tpu.dot_dimension_numbers<[1], [0], [0], [1], [0, 0, 1, 1], [], []>} : vector<8x32xf32>, vector<32x64xf32>, vector<8x64xf32> -> vector<8x64xf32>
    %c7 = arith.constant 7 : index
    %c0_45 = arith.constant 0 : index
    %97 = vector.load %arg4[%c7, %c0_45] : memref<13x64xf32, #tpu.memory_space<vmem>>, vector<1x64xf32>
    %98 = vector.broadcast %97 : vector<1x64xf32> to vector<8x64xf32>
    %99 = arith.addf %96, %98 : vector<8x64xf32>
    %100 = vector.extract_strided_slice %99 {offsets = [0, 0], sizes = [8, 32], strides = [1, 1]} : vector<8x64xf32> to vector<8x32xf32>
    %cst_46 = arith.constant 0.000000e+00 : f32
    %101 = vector.broadcast %cst_46 : f32 to vector<8x32xf32>
    %102 = arith.maximumf %100, %101 : vector<8x32xf32>
    %cst_47 = arith.constant dense<0.000000e+00> : vector<64x32xf32>
    %103 = tpu.matmul %38, %102, %cst_47 {dimension_numbers = #tpu.dot_dimension_numbers<[1], [0], [0], [1], [0, 0, 1, 1], [], []>, precision = #tpu.contract_precision<fp32>} : vector<64x8xf32>, vector<8x32xf32>, vector<64x32xf32> -> vector<64x32xf32>
    %104 = arith.addf %103, %16 : vector<64x32xf32>
    %105 = tpu.concatenate %85, %86, %63 in 1 : vector<128x32xf32>, vector<128x32xf32>, vector<128x32xf32> -> vector<128x96xf32>
    %c368 = arith.constant 368 : index
    %c0_48 = arith.constant 0 : index
    %106 = vector.load %arg3[%c368, %c0_48] : memref<592x64xf32, #tpu.memory_space<vmem>>, vector<96x64xf32>
    %cst_49 = arith.constant dense<0.000000e+00> : vector<128x64xf32>
    %107 = tpu.matmul %105, %106, %cst_49 {dimension_numbers = #tpu.dot_dimension_numbers<[1], [0], [0], [1], [0, 0, 1, 1], [], []>} : vector<128x96xf32>, vector<96x64xf32>, vector<128x64xf32> -> vector<128x64xf32>
    %c8 = arith.constant 8 : index
    %c0_50 = arith.constant 0 : index
    %108 = vector.load %arg4[%c8, %c0_50] : memref<13x64xf32, #tpu.memory_space<vmem>>, vector<1x64xf32>
    %109 = vector.broadcast %108 : vector<1x64xf32> to vector<128x64xf32>
    %110 = arith.addf %107, %109 : vector<128x64xf32>
    %111 = vector.extract_strided_slice %110 {offsets = [0, 0], sizes = [128, 32], strides = [1, 1]} : vector<128x64xf32> to vector<128x32xf32>
    %cst_51 = arith.constant 0.000000e+00 : f32
    %112 = vector.broadcast %cst_51 : f32 to vector<128x32xf32>
    %113 = arith.maximumf %111, %112 : vector<128x32xf32>
    %c464 = arith.constant 464 : index
    %c0_52 = arith.constant 0 : index
    %114 = vector.load %arg3[%c464, %c0_52] : memref<592x64xf32, #tpu.memory_space<vmem>>, vector<32x64xf32>
    %cst_53 = arith.constant dense<0.000000e+00> : vector<128x64xf32>
    %115 = tpu.matmul %113, %114, %cst_53 {dimension_numbers = #tpu.dot_dimension_numbers<[1], [0], [0], [1], [0, 0, 1, 1], [], []>} : vector<128x32xf32>, vector<32x64xf32>, vector<128x64xf32> -> vector<128x64xf32>
    %c9 = arith.constant 9 : index
    %c0_54 = arith.constant 0 : index
    %116 = vector.load %arg4[%c9, %c0_54] : memref<13x64xf32, #tpu.memory_space<vmem>>, vector<1x64xf32>
    %117 = vector.broadcast %116 : vector<1x64xf32> to vector<128x64xf32>
    %118 = arith.addf %115, %117 : vector<128x64xf32>
    %119 = vector.extract_strided_slice %118 {offsets = [0, 0], sizes = [128, 32], strides = [1, 1]} : vector<128x64xf32> to vector<128x32xf32>
    %cst_55 = arith.constant 0.000000e+00 : f32
    %120 = vector.broadcast %cst_55 : f32 to vector<128x32xf32>
    %121 = arith.maximumf %119, %120 : vector<128x32xf32>
    %122 = arith.addf %121, %63 : vector<128x32xf32>
    %cst_56 = arith.constant dense<0.000000e+00> : vector<64x32xf32>
    %123 = tpu.matmul %43, %122, %cst_56 {dimension_numbers = #tpu.dot_dimension_numbers<[1], [0], [0], [1], [0, 0, 1, 1], [], []>, precision = #tpu.contract_precision<fp32>} : vector<64x128xf32>, vector<128x32xf32>, vector<64x32xf32> -> vector<64x32xf32>
    %124 = tpu.concatenate %82, %123, %104 in 1 : vector<64x32xf32>, vector<64x32xf32>, vector<64x32xf32> -> vector<64x96xf32>
    %c176_57 = arith.constant 176 : index
    %c0_58 = arith.constant 0 : index
    %125 = vector.load %arg3[%c176_57, %c0_58] : memref<592x64xf32, #tpu.memory_space<vmem>>, vector<96x64xf32>
    %cst_59 = arith.constant dense<0.000000e+00> : vector<64x64xf32>
    %126 = tpu.matmul %124, %125, %cst_59 {dimension_numbers = #tpu.dot_dimension_numbers<[1], [0], [0], [1], [0, 0, 1, 1], [], []>} : vector<64x96xf32>, vector<96x64xf32>, vector<64x64xf32> -> vector<64x64xf32>
    %c4_60 = arith.constant 4 : index
    %c0_61 = arith.constant 0 : index
    %127 = vector.load %arg4[%c4_60, %c0_61] : memref<13x64xf32, #tpu.memory_space<vmem>>, vector<1x64xf32>
    %128 = vector.broadcast %127 : vector<1x64xf32> to vector<64x64xf32>
    %129 = arith.addf %126, %128 : vector<64x64xf32>
    %130 = vector.extract_strided_slice %129 {offsets = [0, 0], sizes = [64, 32], strides = [1, 1]} : vector<64x64xf32> to vector<64x32xf32>
    %cst_62 = arith.constant 0.000000e+00 : f32
    %131 = vector.broadcast %cst_62 : f32 to vector<64x32xf32>
    %132 = arith.maximumf %130, %131 : vector<64x32xf32>
    %c272_63 = arith.constant 272 : index
    %c0_64 = arith.constant 0 : index
    %133 = vector.load %arg3[%c272_63, %c0_64] : memref<592x64xf32, #tpu.memory_space<vmem>>, vector<32x64xf32>
    %cst_65 = arith.constant dense<0.000000e+00> : vector<64x64xf32>
    %134 = tpu.matmul %132, %133, %cst_65 {dimension_numbers = #tpu.dot_dimension_numbers<[1], [0], [0], [1], [0, 0, 1, 1], [], []>} : vector<64x32xf32>, vector<32x64xf32>, vector<64x64xf32> -> vector<64x64xf32>
    %c5_66 = arith.constant 5 : index
    %c0_67 = arith.constant 0 : index
    %135 = vector.load %arg4[%c5_66, %c0_67] : memref<13x64xf32, #tpu.memory_space<vmem>>, vector<1x64xf32>
    %136 = vector.broadcast %135 : vector<1x64xf32> to vector<64x64xf32>
    %137 = arith.addf %134, %136 : vector<64x64xf32>
    %138 = vector.extract_strided_slice %137 {offsets = [0, 0], sizes = [64, 32], strides = [1, 1]} : vector<64x64xf32> to vector<64x32xf32>
    %cst_68 = arith.constant 0.000000e+00 : f32
    %139 = vector.broadcast %cst_68 : f32 to vector<64x32xf32>
    %140 = arith.maximumf %138, %139 : vector<64x32xf32>
    %141 = arith.addf %140, %82 : vector<64x32xf32>
    %c496 = arith.constant 496 : index
    %c0_69 = arith.constant 0 : index
    %142 = vector.load %arg3[%c496, %c0_69] : memref<592x64xf32, #tpu.memory_space<vmem>>, vector<32x64xf32>
    %cst_70 = arith.constant dense<0.000000e+00> : vector<64x64xf32>
    %143 = tpu.matmul %141, %142, %cst_70 {dimension_numbers = #tpu.dot_dimension_numbers<[1], [0], [0], [1], [0, 0, 1, 1], [], []>} : vector<64x32xf32>, vector<32x64xf32>, vector<64x64xf32> -> vector<64x64xf32>
    %c10 = arith.constant 10 : index
    %c0_71 = arith.constant 0 : index
    %144 = vector.load %arg4[%c10, %c0_71] : memref<13x64xf32, #tpu.memory_space<vmem>>, vector<1x64xf32>
    %145 = vector.broadcast %144 : vector<1x64xf32> to vector<64x64xf32>
    %146 = arith.addf %143, %145 : vector<64x64xf32>
    %147 = vector.extract_strided_slice %146 {offsets = [0, 0], sizes = [64, 32], strides = [1, 1]} : vector<64x64xf32> to vector<64x32xf32>
    %cst_72 = arith.constant 0.000000e+00 : f32
    %148 = vector.broadcast %cst_72 : f32 to vector<64x32xf32>
    %149 = arith.maximumf %147, %148 : vector<64x32xf32>
    %c528 = arith.constant 528 : index
    %c0_73 = arith.constant 0 : index
    %150 = vector.load %arg3[%c528, %c0_73] : memref<592x64xf32, #tpu.memory_space<vmem>>, vector<32x64xf32>
    %cst_74 = arith.constant dense<0.000000e+00> : vector<64x64xf32>
    %151 = tpu.matmul %149, %150, %cst_74 {dimension_numbers = #tpu.dot_dimension_numbers<[1], [0], [0], [1], [0, 0, 1, 1], [], []>} : vector<64x32xf32>, vector<32x64xf32>, vector<64x64xf32> -> vector<64x64xf32>
    %c11 = arith.constant 11 : index
    %c0_75 = arith.constant 0 : index
    %152 = vector.load %arg4[%c11, %c0_75] : memref<13x64xf32, #tpu.memory_space<vmem>>, vector<1x64xf32>
    %153 = vector.broadcast %152 : vector<1x64xf32> to vector<64x64xf32>
    %154 = arith.addf %151, %153 : vector<64x64xf32>
    %155 = vector.extract_strided_slice %154 {offsets = [0, 0], sizes = [64, 32], strides = [1, 1]} : vector<64x64xf32> to vector<64x32xf32>
    %cst_76 = arith.constant 0.000000e+00 : f32
    %156 = vector.broadcast %cst_76 : f32 to vector<64x32xf32>
    %157 = arith.maximumf %155, %156 : vector<64x32xf32>
    %c560 = arith.constant 560 : index
    %c0_77 = arith.constant 0 : index
    %158 = vector.load %arg3[%c560, %c0_77] : memref<592x64xf32, #tpu.memory_space<vmem>>, vector<32x64xf32>
    %cst_78 = arith.constant dense<0.000000e+00> : vector<64x64xf32>
    %159 = tpu.matmul %157, %158, %cst_78 {dimension_numbers = #tpu.dot_dimension_numbers<[1], [0], [0], [1], [0, 0, 1, 1], [], []>, precision = #tpu.contract_precision<fp32>} : vector<64x32xf32>, vector<32x64xf32>, vector<64x64xf32> -> vector<64x64xf32>
    %c12 = arith.constant 12 : index
    %c0_79 = arith.constant 0 : index
    %160 = vector.load %arg4[%c12, %c0_79] : memref<13x64xf32, #tpu.memory_space<vmem>>, vector<1x64xf32>
    %161 = vector.broadcast %160 : vector<1x64xf32> to vector<64x64xf32>
    %162 = arith.addf %159, %161 : vector<64x64xf32>
    %163 = vector.extract_strided_slice %162 {offsets = [0, 0], sizes = [64, 32], strides = [1, 1]} : vector<64x64xf32> to vector<64x32xf32>
    %164 = math.tanh %163 : vector<64x32xf32>
    %c0_80 = arith.constant 0 : index
    %c0_81 = arith.constant 0 : index
    %165 = vector.load %arg5[%c0_80, %c0_81] : memref<64x32xf32, #tpu.memory_space<vmem>>, vector<64x32xf32>
    tpu.vector_store %arg5[%c0_80, %c0_81], %164 {strides = array<i32>} : memref<64x32xf32, #tpu.memory_space<vmem>>, vector<64x32xf32>,
    return
  }
}

</mosaic_0001>

<bundles_post_ra>
// kernel: generator_gnn_forward.1
= control target key start
LH: loop header
LB: loop body
LE: loop exit
PB: predicated region body
PF: predicated region fallthrough
CT: control target
= control target key end

     0   :  { %v7059_v0 = vmov 0   ;;  %vm32_vm0 = vcmask 130048   ;;  %s7060_s8 = smov 127   ;;  %vm116_vm1 = vcmask 523264   ;;  %s7065_s6 = smov 64   ;;  %s11072_s3 = inlined_call_operand.vmem [shape: f32[592,64], index: 3, kind: input, shape index: {}]   ;;  %s11073_s2 = inlined_call_operand.vmem [shape: s32[128,3], index: 2, kind: input, shape index: {}]   ;;  %s11074_s0 = inlined_call_operand.vmem [shape: f32[64,16], index: 0, kind: input, shape index: {}]   ;;  %s11075_s4 = inlined_call_operand.vmem [shape: f32[13,64], index: 4, kind: input, shape index: {}]   ;;  %s11076_s1 = inlined_call_operand.vmem [shape: s32[3,128], index: 1, kind: input, shape index: {}]   ;;  %s11077_s5 = inlined_call_operand.vmem [shape: f32[64,32], index: 5, kind: output, shape index: {}]  }
   0x1   :  { %6998 = vset.pattern.permute.xlu2 %v7059_v0  ;;  %6997 = vset.pattern.permute.xlu1 %v7059_v0  ;;  %v29_v1 = vld [vmem:[%s11072_s3 + $0x8] sm:$0xff]  ;;  %v194_v2 = vld [vmem:[%s11073_s2 + $0x20] sm:$0xff]  ;;  %v192_v3 = vld [vmem:[%s11073_s2 + $0x10] sm:$0xff]  ;;  %s7066_s19 = smov 96  }
   0x2   :  { %6996 = vset.pattern.permute.xlu0 %v7059_v0  ;;  %71 = vmatpush.msra.mxu0 %v29_v1  ;;  %v190_v4 = vld [vmem:[%s11073_s2] sm:$0xff]  ;;  %v195_v7 = vld [vmem:[%s11073_s2 + $0x28] sm:$0xff]  ;;  %v193_v8 = vld [vmem:[%s11073_s2 + $0x18] sm:$0xff] }
   0x3   :  { %v28_v5 = vld [vmem:[%s11072_s3] sm:$0xff]  ;;  %255 = vperm.xlu2 %6998, %v194_v2   ;;  %249 = vperm.xlu1 %6997, %v192_v3   ;;  %v191_v9 = vld [vmem:[%s11073_s2 + $0x8] sm:$0xff]  ;;  %v7137_v12 = vld [vmem:[%s11073_s2 + $0x38] sm:$0xff] }
   0x4   :  { %v20_v6 = vld [vmem:[%s11074_s0] sm:$0xff]  ;;  %243 = vperm.xlu0 %6996, %v190_v4   ;;  %72 = vmatpush.msra.mxu0 %v28_v5  ;;  %v21_v10 = vld [vmem:[%s11074_s0 + $0x8] sm:$0xff]  ;;  %v7142_v13 = vld [vmem:[%s11073_s2 + $0x30] sm:$0xff] }
   0x5   :  { %6542 = vmatmul.msk.f32.vlgmr.msra.gmra.mxu0 %vm32_vm0, %v20_v6  ;;  %v7132_v11 = vld [vmem:[%s11073_s2 + $0x40] sm:$0xff]  ;;  %v22_v14 = vld [vmem:[%s11074_s0 + $0x10] sm:$0xff]  ;;  %v7154_v15 = vld [vmem:[%s11073_s2 + $0x58] sm:$0xff] }
   0x6   :  { %v7159_v16 = vld [vmem:[%s11073_s2 + $0x50] sm:$0xff]  ;;  %v7164_v17 = vld [vmem:[%s11073_s2 + $0x48] sm:$0xff]  ;;  %v23_v18 = vld [vmem:[%s11074_s0 + $0x18] sm:$0xff] }
   0x7   :  { %v7176_v19 = vld [vmem:[%s11073_s2 + $0x60] sm:$0xff]  ;;  %v7188_v21 = vld [vmem:[%s11073_s2 + $0x70] sm:$0xff]  ;;  %v7193_v22 = vld [vmem:[%s11073_s2 + $0x68] sm:$0xff] }
   0x8   :  { %v24_v20 = vld [vmem:[%s11074_s0 + $0x20] sm:$0xff]  ;;  %v25_v23 = vld [vmem:[%s11074_s0 + $0x28] sm:$0xff]  ;;  %v7205_v24 = vld [vmem:[%s11073_s2 + $0x78] sm:$0xff] }
   0x9   :  { %v26_v25 = vld [vmem:[%s11074_s0 + $0x30] sm:$0xff]  ;;  %v27_v26 = vld [vmem:[%s11074_s0 + $0x38] sm:$0xff]  ;;  %v113_v27 = vld [vmem:[%s11072_s3 + $0x48] sm:$0xff] }
   0xa   :  { %v112_v28 = vld [vmem:[%s11072_s3 + $0x40] sm:$0xff]  ;;  %149 = vmatpush.msra.mxu1 %v113_v27  ;;  %v111_v29 = vld [vmem:[%s11072_s3 + $0x38] sm:$0xff]  ;;  %v110_v31 = vld [vmem:[%s11072_s3 + $0x30] sm:$0xff] }
   0xb   :  { %258 = vperm.xlu2 %6998, %v195_v7   ;;  %252 = vperm.xlu1 %6997, %v193_v8   ;;  %v109_v32 = vld [vmem:[%s11072_s3 + $0x28] sm:$0xff]  ;;  %v108_v33 = vld [vmem:[%s11072_s3 + $0x20] sm:$0xff]  ;;  %v107_v35 = vld [vmem:[%s11072_s3 + $0x18] sm:$0xff] }
   0xc   :  { %246 = vperm.xlu0 %6996, %v191_v9   ;;  %150 = vmatpush.msra.mxu1 %v112_v28  ;;  %v106_v36 = vld [vmem:[%s11072_s3 + $0x10] sm:$0xff]  ;;  %v7002_v44 = vld [vmem:[%s11075_s4] ss:$0 sm:$0xff] }
   0xd   :  { %6543 = vmatmul.msk.f32.gmra.mxu0 %vm32_vm0, %v21_v10 }
   0xe   :  { %151 = vmatpush.msra.mxu1 %v111_v29 }
  0x10   :  { %152 = vmatpush.msra.mxu1 %v110_v31 }
  0x12   :  { %153 = vmatpush.msra.mxu1 %v109_v32 }
  0x13   :  { %267 = vperm.xlu2 %6998, %v7132_v11   ;;  %264 = vperm.xlu1 %6997, %v7137_v12  }
  0x14   :  { %261 = vperm.xlu0 %6996, %v7142_v13   ;;  %154 = vmatpush.msra.mxu1 %v108_v33 }
  0x15   :  { %6544 = vmatmul.msk.f32.gmra.mxu0 %vm32_vm0, %v22_v14 }
  0x16   :  { %155 = vmatpush.msra.mxu1 %v107_v35 }
  0x18   :  { %156 = vmatpush.msra.mxu1 %v106_v36 }
  0x1b   :  { %276 = vperm.xlu2 %6998, %v7154_v15   ;;  %273 = vperm.xlu1 %6997, %v7159_v16  }
  0x1c   :  { %270 = vperm.xlu0 %6996, %v7164_v17  }
  0x1d   :  { %6545 = vmatmul.msk.f32.gmra.mxu0 %vm32_vm0, %v23_v18 }
  0x23   :  { %279 = vperm.xlu1 %6997, %v7176_v19   ;;  %210 = vrot.lane.b32.xlu2 %v191_v9, %s7060_s8 }
  0x24   :  { %208 = vrot.lane.b32.xlu0 %v190_v4, %s7060_s8 }
  0x25   :  { %6546 = vmatmul.msk.f32.gmra.mxu0 %vm32_vm0, %v24_v20 }
  0x2b   :  { %212 = vrot.lane.b32.xlu1 %v192_v3, %s7060_s8  ;;  %285 = vperm.xlu2 %6998, %v7188_v21  }
  0x2c   :  { %282 = vperm.xlu0 %6996, %v7193_v22  }
  0x2d   :  { %6547 = vmatmul.msk.f32.gmra.mxu0 %vm32_vm0, %v25_v23 }
  0x33   :  { %288 = vperm.xlu1 %6997, %v7205_v24   ;;  %216 = vrot.lane.b32.xlu2 %v194_v2, %s7060_s8 }
  0x34   :  { %214 = vrot.lane.b32.xlu0 %v193_v8, %s7060_s8 }
  0x35   :  { %6548 = vmatmul.msk.f32.gmra.mxu0 %vm32_vm0, %v26_v25 }
  0x3b   :  { %218 = vrot.lane.b32.xlu1 %v195_v7, %s7060_s8 }
  0x3d   :  { %6549 = vmatmul.msk.f32.gmra.mxu0 %vm32_vm0, %v27_v26 }
  0x5d   :  { %v7228_v30 = vpop.permute.xlu2 %255 }
  0x65   :  { %v7239_v34 = vpop.permute.xlu2 %258 }
  0x6d   :  { %v7247_v37 = vpop.permute.xlu2 %267 }
  0x75   :  { %v7249_v38 = vpop.permute.xlu2 %276  ;;  %v7251_v39 = vpop.permute.xlu1 %249 }
  0x76   :  { %v7253_v40 = vpop.permute.xlu0 %243 }
  0x7d   :  { %v7255_v41 = vpop.permute.xlu1 %252  ;;  %v211_v42 = vpop.permute.xlu2 %210 }
  0x7e   :  { %v7257_v43 = vpop.permute.xlu0 %246  ;;  %294 = vperm.xlu2 %6998, %v211_v42  }
  0x82   :  { %v74_v45 = vpop.f32.mrf.mxu0 }
  0x83   :  { %v75_v46 = vadd.f32 %v7002_v44, %v74_v45 }
  0x85   :  { %v98_v47 = vmax.f32 %v75_v46, 0.0  ;;  %v7262_v48 = vpop.permute.xlu1 %264  ;;  %v7264_v49 = vpop.permute.xlu2 %285 }
  0x86   :  { %v7266_v50 = vpop.permute.xlu0 %261  ;;  %222 = vrot.lane.b32.xlu2 %v7137_v12, %s7060_s8 }
  0x87   :  { %6550 = vmatmul.msk.f32.vlgmr.msra.gmra.mxu1 %vm116_vm1, %v98_v47  ;;  %v7003_v47 = vld [vmem:[%s11075_s4 + $0x1] ss:$0 sm:$0xff] }
  0x8a   :  { %v77_v51 = vpop.f32.mrf.mxu0 }
  0x8b   :  { %v78_v52 = vadd.f32 %v7002_v44, %v77_v51 }
  0x8d   :  { %v99_v53 = vmax.f32 %v78_v52, 0.0  ;;  %v7271_v54 = vpop.permute.xlu1 %273  ;;  %v217_v55 = vpop.permute.xlu2 %216 }
  0x8e   :  { %v7273_v56 = vpop.permute.xlu0 %270  ;;  %303 = vperm.xlu2 %6998, %v217_v55  }
  0x8f   :  { %6551 = vmatmul.msk.f32.gmra.mxu1 %vm116_vm1, %v99_v53 }
  0x92   :  { %v80_v57 = vpop.f32.mrf.mxu0 }
  0x93   :  { %v81_v58 = vadd.f32 %v7002_v44, %v80_v57 }
  0x95   :  { %v100_v59 = vmax.f32 %v81_v58, 0.0  ;;  %v7276_v60 = vpop.permute.xlu1 %279 }
  0x96   :  { %v209_v61 = vpop.permute.xlu0 %208  ;;  %228 = vrot.lane.b32.xlu2 %v7159_v16, %s7060_s8 }
  0x97   :  { %291 = vperm.xlu0 %6996, %v209_v61   ;;  %6552 = vmatmul.msk.f32.gmra.mxu1 %vm116_vm1, %v100_v59 }
  0x9a   :  { %v83_v62 = vpop.f32.mrf.mxu0 }
  0x9b   :  { %v84_v63 = vadd.f32 %v7002_v44, %v83_v62 }
  0x9d   :  { %v101_v0 = vmax.f32 %v84_v63, 0.0  ;;  %v213_v1 = vpop.permute.xlu1 %212 }
  0x9e   :  { %v7281_v2 = vpop.permute.xlu0 %282  ;;  %297 = vperm.xlu1 %6997, %v213_v1  }
  0x9f   :  { %220 = vrot.lane.b32.xlu0 %v7142_v13, %s7060_s8  ;;  %6553 = vmatmul.msk.f32.gmra.mxu1 %vm116_vm1, %v101_v0  ;;  %v11082_v0 = vmov 0.0  }
  0xa2   :  { %v86_v3 = vpop.f32.mrf.mxu0 }
  0xa3   :  { %v87_v4 = vadd.f32 %v7002_v44, %v86_v3 }
  0xa5   :  { %v102_v5 = vmax.f32 %v87_v4, 0.0  ;;  %v7286_v6 = vpop.permute.xlu1 %288 }
  0xa6   :  { %v215_v7 = vpop.permute.xlu0 %214  ;;  %224 = vrot.lane.b32.xlu1 %v7132_v11, %s7060_s8 }
  0xa7   :  { %300 = vperm.xlu0 %6996, %v215_v7   ;;  %6554 = vmatmul.msk.f32.gmra.mxu1 %vm116_vm1, %v102_v5 }
  0xaa   :  { %v89_v8 = vpop.f32.mrf.mxu0 }
  0xab   :  { %v90_v9 = vadd.f32 %v7002_v44, %v89_v8 }
  0xad   :  { %v103_v10 = vmax.f32 %v90_v9, 0.0  ;;  %v219_v12 = vpop.permute.xlu1 %218 }
  0xae   :  { %306 = vperm.xlu1 %6997, %v219_v12  }
  0xaf   :  { %226 = vrot.lane.b32.xlu0 %v7164_v17, %s7060_s8  ;;  %6555 = vmatmul.msk.f32.gmra.mxu1 %vm116_vm1, %v103_v10 }
  0xb2   :  { %v92_v13 = vpop.f32.mrf.mxu0 }
  0xb3   :  { %v93_v14 = vadd.f32 %v7002_v44, %v92_v13 }
  0xb5   :  { %v104_v16 = vmax.f32 %v93_v14, 0.0 }
  0xb6   :  { %230 = vrot.lane.b32.xlu1 %v7154_v15, %s7060_s8 }
  0xb7   :  { %6556 = vmatmul.msk.f32.gmra.mxu1 %vm116_vm1, %v104_v16 }
  0xba   :  { %v95_v11 = vpop.f32.mrf.mxu0 }
  0xbb   :  { %v96_v18 = vadd.f32 %v7002_v44, %v95_v11 }
  0xbd   :  { %v105_v20 = vmax.f32 %v96_v18, 0.0 }
  0xbf   :  { %6557 = vmatmul.msk.f32.gmra.mxu1 %vm116_vm1, %v105_v20 }
  0xd8   :  { %v7298_v23 = vpop.permute.xlu2 %294 }
  0xe0   :  { %v223_v25 = vpop.permute.xlu2 %222 }
  0xe1   :  { %312 = vperm.xlu2 %6998, %v223_v25  }
  0xe8   :  { %v7300_v17 = vpop.permute.xlu2 %303 }
  0xe9   :  { %234 = vrot.lane.b32.xlu2 %v7193_v22, %s7060_s8 }
  0xf0   :  { %v229_v26 = vpop.permute.xlu2 %228 }
  0xf1   :  { %321 = vperm.xlu2 %6998, %v229_v26  }
 0x104   :  { %v158_v27 = vpop.f32.mrf.mxu1 }
 0x105   :  { %v159_v13 = vadd.f32 %v7003_v47, %v158_v27 }
 0x109   :  { %v7304_v15 = vpop.permute.xlu0 %291 }
 0x10c   :  { %v161_v28 = vpop.f32.mrf.mxu1 }
 0x110   :  { %v7306_v29 = vpop.permute.xlu1 %297 }
 0x111   :  { %v221_v31 = vpop.permute.xlu0 %220 }
 0x112   :  { %309 = vperm.xlu0 %6996, %v221_v31  }
 0x114   :  { %v164_v32 = vpop.f32.mrf.mxu1 }
 0x115   :  { %v165_v3 = vadd.f32 %v7003_v47, %v164_v32  ;;  %v7388_v32 = vmax.f32 %v159_v13, 0.0 }
 0x117   :  { %v7358_v14 = vmax.f32 %v165_v3, 0.0  ;;  %v7428_v3 = vand.u32 4294901760, %v7388_v32 }
 0x118   :  { %v225_v33 = vpop.permute.xlu1 %224 }
 0x119   :  { %v7308_v35 = vpop.permute.xlu0 %300  ;;  %315 = vperm.xlu1 %6997, %v225_v33   ;;  %11352 = vst [vmem:[#allocation9_spill] sm:$0xff] %v7358_v14 }
 0x11a   :  { %232 = vrot.lane.b32.xlu0 %v7176_v19, %s7060_s8  ;;  %v11078_v19 = vlaneseq }
 0x11c   :  { %v167_v36 = vpop.f32.mrf.mxu1 }
 0x120   :  { %v7312_v22 = vpop.permute.xlu1 %306 }
 0x121   :  { %v227_v42 = vpop.permute.xlu0 %226  ;;  %236 = vrot.lane.b32.xlu1 %v7188_v21, %s7060_s8  ;;  %v7324_v21 = vand.u32 127, %v11078_v19 }
 0x122   :  { %318 = vperm.xlu0 %6996, %v227_v42  }
 0x123   :  { %11346 = vst [vmem:[#allocation3_spill] sm:$0xff] %v7324_v21  ;;  %vm338_vm2 = vcmp.eq.s32.totalorder %v7324_v21, %v7253_v40  ;;  %v162_v40 = vadd.f32 %v7003_v47, %v161_v28  ;;  %vm339_vm3 = vcmp.eq.s32.totalorder %v7324_v21, %v7257_v43  ;;  %vm340_vm4 = vcmp.eq.s32.totalorder %v7324_v21, %v7251_v39 }
 0x124   :  { %v170_v44 = vpop.f32.mrf.mxu1  ;;  %v7338_v1 = vsel %vm338_vm2, 1.0, %v11082_v0  ;;  %v7384_v28 = vsel %vm339_vm3, 1.0, %v11082_v0  ;;  %v7463_v19 = vsel %vm340_vm4, 1.0, %v11082_v0  ;;  %vm341_vm5 = vcmp.eq.s32.totalorder %v7324_v21, %v7255_v41 }
 0x125   :  { %v171_v55 = vadd.f32 %v7003_v47, %v170_v44  ;;  %11349 = vst [vmem:[#allocation6_spill] sm:$0xff] %v7338_v1  ;;  %v521_v12 = vsel %vm116_vm1, %v7338_v1, 0  ;;  %v7370_v20 = vmax.f32 %v162_v40, 0.0  ;;  %vm342_vm6 = vcmp.eq.s32.totalorder %v7324_v21, %v7228_v30 }
 0x126   :  { %11354 = vst [vmem:[#allocation11_spill] sm:$0xff] %v7384_v28  ;;  %v7386_v31 = vsub.f32 %v521_v12, %v521_v12  ;;  %vm343_vm7 = vcmp.eq.s32.totalorder %v7324_v21, %v7239_v34  ;;  %vm344_vm8 = vcmp.eq.s32.totalorder %v7324_v21, %v7266_v50  ;;  %vm345_vm9 = vcmp.eq.s32.totalorder %v7324_v21, %v7262_v48 }
 0x127   :  { %v7330_v59 = vmax.f32 %v171_v55, 0.0  ;;  %11353 = vst [vmem:[#allocation10_spill] sm:$0xff] %v7370_v20  ;;  %vm346_vm10 = vcmp.eq.s32.totalorder %v7324_v21, %v7247_v37  ;;  %vm347_vm11 = vcmp.eq.s32.totalorder %v7324_v21, %v7273_v56  ;;  %vm348_vm12 = vcmp.eq.s32.totalorder %v7324_v21, %v7271_v54 }
 0x128   :  { %v231_v45 = vpop.permute.xlu1 %230  ;;  %11355 = vst [vmem:[#allocation12_spill] sm:$0xff] %v7386_v31  ;;  %vm349_vm13 = vcmp.eq.s32.totalorder %v7324_v21, %v7249_v38  ;;  %vm350_vm14 = vcmp.eq.s32.totalorder %v7324_v21, %v7276_v60  ;;  %vm351_vm15 = vcmp.eq.s32.totalorder %v7324_v21, %v7281_v2  ;;  %vm352_vm0 = vcmp.eq.s32.totalorder %v7324_v21, %v7264_v49 }
 0x129   :  { %324 = vperm.xlu1 %6997, %v231_v45   ;;  %11348 = vst [vmem:[#allocation5_spill] sm:$0xff] %v7330_v59  ;;  %v7352_v10 = vand.u32 4294901760, %v7330_v59  ;;  %vm353_vm2 = vcmp.eq.s32.totalorder %v7324_v21, %v7286_v6  ;;  %vm354_vm3 = vcmp.eq.s32.totalorder %v7324_v21, %v7304_v15  ;;  %vm355_vm4 = vcmp.eq.s32.totalorder %v7324_v21, %v7298_v23 }
 0x12a   :  { %238 = vrot.lane.b32.xlu0 %v7205_v24, %s7060_s8  ;;  %v168_v24 = vadd.f32 %v7003_v47, %v167_v36  ;;  %v7394_v36 = vand.u32 4294901760, %v7358_v14  ;;  %11358 = vst [vmem:[#allocation15_spill] sm:$0xff] %v7463_v19  ;;  %s7062_s8 = smov 32  }
 0x12b   :  { %v7380_v26 = vsub.f32 %v7330_v59, %v7352_v10 }
 0x12c   :  { %v173_v46 = vpop.f32.mrf.mxu1  ;;  %v7343_v7 = vmax.f32 %v168_v24, 0.0 }
 0x12d   :  { %v174_v52 = vadd.f32 %v7003_v47, %v173_v46 }
 0x12e   :  { %11350 = vst [vmem:[#allocation7_spill] sm:$0xff] %v7343_v7  ;;  %v7368_v18 = vand.u32 4294901760, %v7343_v7 }
 0x12f   :  { %v7326_v58 = vmax.f32 %v174_v52, 0.0  ;;  %v7414_v52 = vand.u32 4294901760, %v7386_v31 }
 0x130   :  { %v7400_v44 = vsub.f32 %v7343_v7, %v7368_v18 }
 0x131   :  { %11347 = vst [vmem:[#allocation4_spill] sm:$0xff] %v7326_v58  ;;  %v7341_v5 = vand.u32 4294901760, %v7326_v58 }
 0x132   :  { %11356 = vst [vmem:[#allocation13_spill] sm:$0xff] %v7414_v52 }
 0x133   :  { %v7365_v11 = vsub.f32 %v7326_v58, %v7341_v5 }
 0x134   :  { %v176_v51 = vpop.f32.mrf.mxu1 }
 0x135   :  { %v177_v53 = vadd.f32 %v7003_v47, %v176_v51  ;;  %v11081_v42 = vand.u32 4294901760, %v7365_v11  ;;  %v11080_v51 = vand.u32 4294901760, %v7380_v26  ;;  %v11364_v41 = vand.u32 4294901760, %v7365_v11 }
 0x137   :  { %v7321_v57 = vmax.f32 %v177_v53, 0.0  ;;  %v524_v53 = vsel %vm116_vm1, %v7384_v28, 0  ;;  %v920_v24 = vsub.f32 %v7365_v11, %v11081_v42  ;;  %v926_v12 = vsub.f32 %v7380_v26, %v11080_v51 }
 0x139   :  { %11345 = vst [vmem:[#allocation2_spill] sm:$0xff] %v7321_v57  ;;  %v7335_v62 = vand.u32 4294901760, %v7321_v57 }
 0x13b   :  { %v7332_v61 = vpop.permute.xlu2 %312  ;;  %v7349_v9 = vsub.f32 %v7321_v57, %v7335_v62 }
 0x13c   :  { %v179_v63 = vpop.f32.mrf.mxu1 }
 0x13d   :  { %v180_v4 = vadd.f32 %v7003_v47, %v179_v63  ;;  %v913_v27 = vand.u32 4294901760, %v7349_v9  ;;  %v7409_v47 = vand.u32 4294901760, %v7370_v20  ;;  %v7425_v63 = vsub.f32 %v7358_v14, %v7394_v36 }
 0x13f   :  { %v7345_v8 = vmax.f32 %v180_v4, 0.0  ;;  %v914_v46 = vsub.f32 %v7349_v9, %v913_v27  ;;  %v11079_v4 = vand.u32 4294901760, %v7400_v44  ;;  %v7438_v13 = vsub.f32 %v7370_v20, %v7409_v47 }
 0x141   :  { %11351 = vst [vmem:[#allocation8_spill] sm:$0xff] %v7345_v8  ;;  %v7361_v16 = vand.u32 4294901760, %v7345_v8  ;;  %v915_v40 = vand.u32 4294901760, %v914_v46  ;;  %v948_v46 = vsub.f32 %v7388_v32, %v7428_v3 }
 0x143   :  { %v235_v25 = vpop.permute.xlu2 %234  ;;  %625 = vmatpush.msra.mxu2 %v7361_v16  ;;  %1284 = vmatpush.msrb.mxu1 %v7361_v16  ;;  %v7376_v43 = vsub.f32 %v7345_v8, %v7361_v16 }
 0x144   :  { %330 = vperm.xlu0 %6996, %v235_v25   ;;  %v7444_v25 = vsub.f32 %v524_v53, %v524_v53  ;;  %v932_v53 = vsub.f32 %v7400_v44, %v11079_v4 }
 0x145   :  { %627 = vmatpush.msra.mxu2 %v7335_v62  ;;  %1092 = vmatpush.msrb.mxu0 %v7376_v43  ;;  %v907_v33 = vand.u32 4294901760, %v7376_v43 }
 0x146   :  { %1286 = vmatpush.msrb.mxu1 %v7335_v62  ;;  %11357 = vst [vmem:[#allocation14_spill] sm:$0xff] %v7444_v25  ;;  %v7472_v51 = vand.u32 4294901760, %v7444_v25  ;;  %v933_v39 = vand.u32 4294901760, %v932_v53 }
 0x147   :  { %629 = vmatpush.msra.mxu2 %v7341_v5  ;;  %1095 = vmatpush.msrb.mxu0 %v7349_v9  ;;  %v908_v45 = vsub.f32 %v7376_v43, %v907_v33  ;;  %v921_v43 = vand.u32 4294901760, %v920_v24  ;;  %v927_v24 = vand.u32 4294901760, %v926_v12  ;;  %v949_v12 = vand.u32 4294901760, %v948_v46 }
 0x148   :  { %1288 = vmatpush.msrb.mxu1 %v7341_v5  ;;  %11360 = vst [vmem:[#allocation17_spill] sm:$0xff] %v7472_v51  ;;  %v651_v53 = vsub.f32 %v7444_v25, %v7472_v51 }
 0x149   :  { %631 = vmatpush.msra.mxu2 %v7352_v10  ;;  %1098 = vmatpush.msrb.mxu0 %v7365_v11  ;;  %v909_v55 = vand.u32 4294901760, %v908_v45  ;;  %v643_v45 = vsub.f32 %v7386_v31, %v7414_v52 }
 0x14a   :  { %1290 = vmatpush.msrb.mxu1 %v7352_v10 }
 0x14b   :  { %633 = vmatpush.msra.mxu2 %v7368_v18  ;;  %910 = vmatpush.msra.mxu3 %v909_v55  ;;  %v937_v55 = vand.u32 4294901760, %v7425_v63  ;;  %v7468_v4 = vand.u32 4294901760, %v643_v45  ;;  %v527_v45 = vsel %vm116_vm1, %v7463_v19, 0 }
 0x14c   :  { %1101 = vmatpush.msrb.mxu0 %v7380_v26  ;;  %1292 = vmatpush.msrb.mxu1 %v7368_v18 }
 0x14d   :  { %635 = vmatpush.msra.mxu2 %v7394_v36  ;;  %916 = vmatpush.msra.mxu3 %v915_v40  ;;  %v943_v40 = vand.u32 4294901760, %v7438_v13  ;;  %11359 = vst [vmem:[#allocation16_spill] sm:$0xff] %v7468_v4 }
 0x14e   :  { %1104 = vmatpush.msrb.mxu0 %v7400_v44  ;;  %1294 = vmatpush.msrb.mxu1 %v7394_v36 }
 0x14f   :  { %637 = vmatpush.msra.mxu2 %v7409_v47  ;;  %922 = vmatpush.msra.mxu3 %v921_v43  ;;  %v938_v43 = vsub.f32 %v7425_v63, %v937_v55  ;;  %v944_v42 = vsub.f32 %v7438_v13, %v943_v40 }
 0x150   :  { %1107 = vmatpush.msrb.mxu0 %v7425_v63  ;;  %1296 = vmatpush.msrb.mxu1 %v7409_v47 }
 0x151   :  { %639 = vmatpush.msra.mxu2 %v7428_v3  ;;  %928 = vmatpush.msra.mxu3 %v927_v24  ;;  %v939_v63 = vand.u32 4294901760, %v938_v43  ;;  %v950_v24 = vsub.f32 %v948_v46, %v949_v12  ;;  %v945_v0 = vand.u32 4294901760, %v944_v42  ;;  %v7495_v43 = vand.u32 4294901760, %v651_v53 }
 0x152   :  { %1110 = vmatpush.msrb.mxu0 %v7438_v13  ;;  %1298 = vmatpush.msrb.mxu1 %v7428_v3  ;;  %v7488_v13 = vsub.f32 %v527_v45, %v527_v45 }
 0x153   :  { %645 = vmatmul.f32.vlgmr.msra.gmra.mxu2 %v7468_v4  ;;  %1302 = vmatmul.f32.vlgmr.msrb.gmra.mxu1 %v7414_v52  ;;  %11365 = vst [vmem:[#allocation20_spill] sm:$0xff] %v7495_v43  ;;  %v11366_v52 = vand.u32 4294901760, %v7380_v26 }
 0x154   :  { %1503 = vmatpush.msrb.mxu2 %v907_v33  ;;  %934 = vmatpush.msra.mxu3 %v933_v39  ;;  %11361 = vst [vmem:[#allocation18_spill] sm:$0xff] %v7488_v13  ;;  %v11362_v33 = vmov 0.0   ;;  %v7500_v9 = vand.u32 4294901760, %v7488_v13 }
 0x155   :  { %1113 = vmatpush.msrb.mxu0 %v948_v46  ;;  %v7491_v39 = vsel %vm341_vm5, 1.0, %v11362_v33  ;;  %v951_v46 = vand.u32 4294901760, %v950_v24  ;;  %v7520_v42 = vsel %vm342_vm6, 1.0, %v11362_v33  ;;  %vm356_vm5 = vcmp.eq.s32.totalorder %v7324_v21, %v7306_v29 }
 0x156   :  { %1116 = vmatmul.f32.vlgmr.msrb.gmra.mxu0 %v7386_v31  ;;  %1507 = vmatpush.msrb.mxu2 %v913_v27  ;;  %11363 = vst [vmem:[#allocation19_spill] sm:$0xff] %v7491_v39  ;;  %v530_v27 = vsel %vm116_vm1, %v7491_v39, 0  ;;  %v659_v11 = vsub.f32 %v7488_v13, %v7500_v9  ;;  %vm357_vm6 = vcmp.eq.s32.totalorder %v7324_v21, %v7308_v35 }
 0x157   :  { %940 = vmatpush.msra.mxu3 %v939_v63  ;;  %11367 = vst [vmem:[#allocation21_spill] sm:$0xff] %v7500_v9  ;;  %v7516_v26 = vsub.f32 %v530_v27, %v530_v27  ;;  %v7589_v63 = vsel %vm345_vm9, 1.0, %v11362_v33  ;;  %v7610_v27 = vsel %vm346_vm10, 1.0, %v11362_v33  ;;  %vm361_vm10 = vcmp.eq.s32.totalorder %v7324_v21, %v7332_v61 }
 0x158   :  { %1511 = vmatpush.msrb.mxu2 %v11364_v41  ;;  %11370 = vst [vmem:[#allocation23_spill] sm:$0xff] %v7520_v42  ;;  %v7523_v30 = vand.u32 4294901760, %v659_v11  ;;  %v542_v48 = vsel %vm116_vm1, %v7589_v63, 0  ;;  %v545_v37 = vsel %vm116_vm1, %v7610_v27, 0 }
 0x159   :  { %946 = vmatpush.msra.mxu3 %v945_v0  ;;  %v11368_v0 = vand.u32 4294901760, %v7400_v44  ;;  %11369 = vst [vmem:[#allocation22_spill] sm:$0xff] %v7516_v26  ;;  %v533_v44 = vsel %vm116_vm1, %v7520_v42, 0 }
 0x15a   :  { %1515 = vmatpush.msrb.mxu2 %v11366_v52  ;;  %11371 = vst [vmem:[#allocation24_spill] sm:$0xff] %v7523_v30 }
 0x15b   :  { %952 = vmatpush.msra.mxu3 %v951_v46  ;;  %653 = vmatmul.f32.gmra.mxu2 %v7495_v43  ;;  %11382 = vst [vmem:[#allocation35_spill] sm:$0xff] %v7589_v63  ;;  %v7607_v46 = vsub.f32 %v542_v48, %v542_v48 }
 0x15c   :  { %6607 = vmatmul.msk.f32.vlgmr.msra.gmra.mxu3 %vm116_vm1, %v7338_v1  ;;  %1308 = vmatmul.f32.gmra.mxu1 %v7472_v51  ;;  %11386 = vst [vmem:[#allocation39_spill] sm:$0xff] %v7610_v27 }
 0x15d   :  { %1519 = vmatpush.msrb.mxu2 %v11368_v0  ;;  %1670 = vmatpush.msrb.mxu3 %v7361_v16  ;;  %v7526_v16 = vand.u32 4294901760, %v7516_v26  ;;  %11385 = vst [vmem:[#allocation38_spill] sm:$0xff] %v7607_v46  ;;  %v7615_v11 = vand.u32 4294901760, %v7607_v46 }
 0x15e   :  { %1121 = vmatmul.f32.gmra.mxu0 %v7444_v25 }
 0x15f   :  { %1523 = vmatpush.msrb.mxu2 %v937_v55  ;;  %1672 = vmatpush.msrb.mxu3 %v7335_v62  ;;  %11372 = vst [vmem:[#allocation25_spill] sm:$0xff] %v7526_v16  ;;  %v667_v62 = vsub.f32 %v7516_v26, %v7526_v16 }
 0x160   :  { %11388 = vst [vmem:[#allocation41_spill] sm:$0xff] %v7615_v11 }
 0x161   :  { %1527 = vmatpush.msrb.mxu2 %v943_v40  ;;  %1674 = vmatpush.msrb.mxu3 %v7341_v5  ;;  %v7541_v5 = vsub.f32 %v533_v44, %v533_v44  ;;  %v7548_v52 = vand.u32 4294901760, %v667_v62  ;;  %v699_v62 = vsub.f32 %v7607_v46, %v7615_v11 }
 0x163   :  { %1531 = vmatpush.msrb.mxu2 %v949_v12  ;;  %1676 = vmatpush.msrb.mxu3 %v7352_v10  ;;  %11373 = vst [vmem:[#allocation26_spill] sm:$0xff] %v7541_v5  ;;  %v7545_v10 = vsel %vm343_vm7, 1.0, %v11362_v33  ;;  %v7551_v34 = vand.u32 4294901760, %v7541_v5  ;;  %vm358_vm7 = vcmp.eq.s32.totalorder %v7324_v21, %v7300_v17 }
 0x164   :  { %661 = vmatmul.f32.gmra.mxu2 %v7523_v30  ;;  %6608 = vmatmul.msk.f32.gmra.mxu3 %vm116_vm1, %v7384_v28  ;;  %11374 = vst [vmem:[#allocation27_spill] sm:$0xff] %v7545_v10 }
 0x165   :  { %1314 = vmatmul.f32.gmra.mxu1 %v7500_v9  ;;  %1678 = vmatpush.msrb.mxu3 %v7368_v18  ;;  %11375 = vst [vmem:[#allocation28_spill] sm:$0xff] %v7548_v52  ;;  %v536_v18 = vsel %vm116_vm1, %v7545_v10, 0 }
 0x166   :  { %1126 = vmatmul.f32.gmra.mxu0 %v7488_v13  ;;  %11376 = vst [vmem:[#allocation29_spill] sm:$0xff] %v7551_v34 }
 0x167   :  { %1680 = vmatpush.msrb.mxu3 %v7394_v36  ;;  %v675_v36 = vsub.f32 %v7541_v5, %v7551_v34 }
 0x169   :  { %1682 = vmatpush.msrb.mxu3 %v7409_v47  ;;  %v7565_v47 = vsub.f32 %v536_v18, %v536_v18  ;;  %v7570_v55 = vand.u32 4294901760, %v675_v36  ;;  %v7630_v18 = vsub.f32 %v545_v37, %v545_v37  ;;  %v7633_v36 = vsel %vm347_vm11, 1.0, %v11362_v33 }
 0x16a   :  { %11390 = vst [vmem:[#allocation43_spill] sm:$0xff] %v7633_v36  ;;  %v548_v56 = vsel %vm116_vm1, %v7633_v36, 0 }
 0x16b   :  { %1684 = vmatpush.msrb.mxu3 %v7428_v3  ;;  %11377 = vst [vmem:[#allocation30_spill] sm:$0xff] %v7565_v47  ;;  %v7568_v3 = vsel %vm344_vm8, 1.0, %v11362_v33  ;;  %v7573_v40 = vand.u32 4294901760, %v7565_v47  ;;  %vm359_vm8 = vcmp.eq.s32.totalorder %v7324_v21, %v7312_v22 }
 0x16c   :  { %669 = vmatmul.f32.gmra.mxu2 %v7548_v52  ;;  %6609 = vmatmul.msk.f32.gmra.mxu3 %vm116_vm1, %v7463_v19  ;;  %11378 = vst [vmem:[#allocation31_spill] sm:$0xff] %v7568_v3  ;;  %v539_v50 = vsel %vm116_vm1, %v7568_v3, 0 }
 0x16d   :  { %1320 = vmatmul.f32.gmra.mxu1 %v7526_v16  ;;  %11379 = vst [vmem:[#allocation32_spill] sm:$0xff] %v7570_v55  ;;  %v683_v12 = vsub.f32 %v7565_v47, %v7573_v40  ;;  %v7586_v45 = vsub.f32 %v539_v50, %v539_v50  ;;  %v7635_v50 = vand.u32 4294901760, %v699_v62  ;;  %v7653_v62 = vsub.f32 %v548_v56, %v548_v56 }
 0x16e   :  { %1131 = vmatmul.f32.gmra.mxu0 %v7516_v26  ;;  %11380 = vst [vmem:[#allocation33_spill] sm:$0xff] %v7573_v40 }
 0x16f   :  { %11381 = vst [vmem:[#allocation34_spill] sm:$0xff] %v7586_v45  ;;  %v7591_v24 = vand.u32 4294901760, %v683_v12  ;;  %v7594_v53 = vand.u32 4294901760, %v7586_v45  ;;  %v7638_v12 = vand.u32 4294901760, %v7630_v18 }
 0x170   :  { %11389 = vst [vmem:[#allocation42_spill] sm:$0xff] %v7630_v18 }
 0x171   :  { %11383 = vst [vmem:[#allocation36_spill] sm:$0xff] %v7591_v24  ;;  %v691_v41 = vsub.f32 %v7586_v45, %v7594_v53  ;;  %v707_v37 = vsub.f32 %v7630_v18, %v7638_v12 }
 0x172   :  { %11384 = vst [vmem:[#allocation37_spill] sm:$0xff] %v7594_v53 }
 0x173   :  { %v7612_v0 = vand.u32 4294901760, %v691_v41  ;;  %11391 = vst [vmem:[#allocation44_spill] sm:$0xff] %v7635_v50 }
 0x174   :  { %677 = vmatmul.f32.gmra.mxu2 %v7570_v55  ;;  %6610 = vmatmul.msk.f32.gmra.mxu3 %vm116_vm1, %v7491_v39  ;;  %11392 = vst [vmem:[#allocation45_spill] sm:$0xff] %v7638_v12 }
 0x175   :  { %1326 = vmatmul.f32.gmra.mxu1 %v7551_v34  ;;  %11387 = vst [vmem:[#allocation40_spill] sm:$0xff] %v7612_v0 }
 0x176   :  { %1136 = vmatmul.f32.gmra.mxu0 %v7541_v5  ;;  %11393 = vst [vmem:[#allocation46_spill] sm:$0xff] %v7653_v62 }
 0x17c   :  { %685 = vmatmul.f32.gmra.mxu2 %v7591_v24  ;;  %6611 = vmatmul.msk.f32.gmra.mxu3 %vm116_vm1, %v7520_v42 }
 0x17d   :  { %1332 = vmatmul.f32.gmra.mxu1 %v7573_v40 }
 0x17e   :  { %1141 = vmatmul.f32.gmra.mxu0 %v7565_v47  ;;  %v7847_v47 = vsel %vm357_vm6, 1.0, %v11362_v33 }
 0x17f   :  { %11430 = vst [vmem:[#allocation83_spill] sm:$0xff] %v7847_v47  ;;  %v578_v35 = vsel %vm116_vm1, %v7847_v47, 0 }
 0x184   :  { %v7619_v44 = vpop.permute.xlu0 %309  ;;  %693 = vmatmul.f32.gmra.mxu2 %v7612_v0  ;;  %6612 = vmatmul.msk.f32.gmra.mxu3 %vm116_vm1, %v7545_v10 }
 0x185   :  { %1338 = vmatmul.f32.gmra.mxu1 %v7594_v53  ;;  %v7661_v53 = vand.u32 4294901760, %v7653_v62  ;;  %vm360_vm9 = vcmp.eq.s32.totalorder %v7324_v21, %v7619_v44 }
 0x186   :  { %1146 = vmatmul.f32.gmra.mxu0 %v7586_v45  ;;  %v7656_v45 = vsel %vm348_vm12, 1.0, %v11362_v33 }
 0x187   :  { %11394 = vst [vmem:[#allocation47_spill] sm:$0xff] %v7656_v45  ;;  %v551_v54 = vsel %vm116_vm1, %v7656_v45, 0  ;;  %v715_v56 = vsub.f32 %v7653_v62, %v7661_v53 }
 0x188   :  { %11396 = vst [vmem:[#allocation49_spill] sm:$0xff] %v7661_v53 }
 0x18b   :  { %v7640_v48 = vpop.permute.xlu1 %315 }
 0x18c   :  { %v233_v41 = vpop.permute.xlu0 %232  ;;  %701 = vmatmul.f32.gmra.mxu2 %v7635_v50  ;;  %6613 = vmatmul.msk.f32.gmra.mxu3 %vm116_vm1, %v7568_v3  ;;  %v7658_v50 = vand.u32 4294901760, %v707_v37  ;;  %v7676_v37 = vsub.f32 %v551_v54, %v551_v54  ;;  %vm362_vm11 = vcmp.eq.s32.totalorder %v7324_v21, %v7640_v48 }
 0x18d   :  { %1344 = vmatmul.f32.gmra.mxu1 %v7615_v11  ;;  %327 = vperm.xlu2 %6998, %v233_v41  }
 0x18e   :  { %1151 = vmatmul.f32.gmra.mxu0 %v7607_v46  ;;  %11395 = vst [vmem:[#allocation48_spill] sm:$0xff] %v7658_v50  ;;  %v7679_v46 = vsel %vm349_vm13, 1.0, %v11362_v33  ;;  %v7684_v11 = vand.u32 4294901760, %v7676_v37 }
 0x18f   :  { %11397 = vst [vmem:[#allocation50_spill] sm:$0xff] %v7676_v37  ;;  %v554_v38 = vsel %vm116_vm1, %v7679_v46, 0 }
 0x190   :  { %11398 = vst [vmem:[#allocation51_spill] sm:$0xff] %v7679_v46  ;;  %v7697_v54 = vsub.f32 %v554_v38, %v554_v38 }
 0x191   :  { %11400 = vst [vmem:[#allocation53_spill] sm:$0xff] %v7684_v11 }
 0x192   :  { %11401 = vst [vmem:[#allocation54_spill] sm:$0xff] %v7697_v54 }
 0x193   :  { %v237_v0 = vpop.permute.xlu1 %236 }
 0x194   :  { %v7665_v41 = vpop.permute.xlu0 %318  ;;  %709 = vmatmul.f32.gmra.mxu2 %v7658_v50  ;;  %6614 = vmatmul.msk.f32.gmra.mxu3 %vm116_vm1, %v7589_v63  ;;  %v7681_v50 = vand.u32 4294901760, %v715_v56  ;;  %v7700_v56 = vsel %vm350_vm14, 1.0, %v11362_v33 }
 0x195   :  { %1350 = vmatmul.f32.gmra.mxu1 %v7638_v12  ;;  %333 = vperm.xlu1 %6997, %v237_v0   ;;  %v723_v0 = vsub.f32 %v7676_v37, %v7684_v11  ;;  %11402 = vst [vmem:[#allocation55_spill] sm:$0xff] %v7700_v56  ;;  %v557_v60 = vsel %vm116_vm1, %v7700_v56, 0  ;;  %vm363_vm12 = vcmp.eq.s32.totalorder %v7324_v21, %v7665_v41  ;;  %v322_v41 = vpop.permute.xlu2 %321 }
 0x196   :  { %1156 = vmatmul.f32.gmra.mxu0 %v7630_v18  ;;  %11399 = vst [vmem:[#allocation52_spill] sm:$0xff] %v7681_v50  ;;  %v7705_v18 = vand.u32 4294901760, %v7697_v54  ;;  %v7718_v38 = vsub.f32 %v557_v60, %v557_v60  ;;  %vm364_vm13 = vcmp.eq.s32.totalorder %v7324_v21, %v322_v41 }
 0x198   :  { %11404 = vst [vmem:[#allocation57_spill] sm:$0xff] %v7705_v18 }
 0x199   :  { %11405 = vst [vmem:[#allocation58_spill] sm:$0xff] %v7718_v38 }
 0x19b   :  { %v325_v30 = vpop.permute.xlu1 %324 }
 0x19c   :  { %v239_v12 = vpop.permute.xlu0 %238  ;;  %717 = vmatmul.f32.gmra.mxu2 %v7681_v50  ;;  %6615 = vmatmul.msk.f32.gmra.mxu3 %vm116_vm1, %v7610_v27  ;;  %v7702_v50 = vand.u32 4294901760, %v723_v0  ;;  %v7721_v0 = vsel %vm351_vm15, 1.0, %v11362_v33  ;;  %vm365_vm14 = vcmp.eq.s32.totalorder %v7324_v21, %v325_v30 }
 0x19d   :  { %1356 = vmatmul.f32.gmra.mxu1 %v7661_v53  ;;  %336 = vperm.xlu2 %6998, %v239_v12   ;;  %v731_v12 = vsub.f32 %v7697_v54, %v7705_v18  ;;  %11406 = vst [vmem:[#allocation59_spill] sm:$0xff] %v7721_v0  ;;  %v560_v2 = vsel %vm116_vm1, %v7721_v0, 0 }
 0x19e   :  { %1161 = vmatmul.f32.gmra.mxu0 %v7653_v62  ;;  %11403 = vst [vmem:[#allocation56_spill] sm:$0xff] %v7702_v50 }
 0x19f   :  { %v7723_v62 = vand.u32 4294901760, %v731_v12  ;;  %v7739_v12 = vsub.f32 %v560_v2, %v560_v2 }
 0x1a1   :  { %11407 = vst [vmem:[#allocation60_spill] sm:$0xff] %v7723_v62 }
 0x1a2   :  { %11409 = vst [vmem:[#allocation62_spill] sm:$0xff] %v7739_v12 }
 0x1a4   :  { %725 = vmatmul.f32.gmra.mxu2 %v7702_v50  ;;  %6616 = vmatmul.msk.f32.gmra.mxu3 %vm116_vm1, %v7633_v36  ;;  %v7726_v50 = vand.u32 4294901760, %v7718_v38 }
 0x1a5   :  { %1362 = vmatmul.f32.gmra.mxu1 %v7684_v11 }
 0x1a6   :  { %1166 = vmatmul.f32.gmra.mxu0 %v7676_v37  ;;  %11408 = vst [vmem:[#allocation61_spill] sm:$0xff] %v7726_v50  ;;  %v739_v60 = vsub.f32 %v7718_v38, %v7726_v50  ;;  %v7742_v37 = vsel %vm352_vm0, 1.0, %v11362_v33 }
 0x1a7   :  { %11410 = vst [vmem:[#allocation63_spill] sm:$0xff] %v7742_v37  ;;  %v563_v49 = vsel %vm116_vm1, %v7742_v37, 0 }
 0x1a8   :  { %v7744_v11 = vand.u32 4294901760, %v739_v60  ;;  %v7760_v60 = vsub.f32 %v563_v49, %v563_v49 }
 0x1aa   :  { %11411 = vst [vmem:[#allocation64_spill] sm:$0xff] %v7744_v11 }
 0x1ab   :  { %11413 = vst [vmem:[#allocation66_spill] sm:$0xff] %v7760_v60 }
 0x1ac   :  { %733 = vmatmul.f32.gmra.mxu2 %v7723_v62  ;;  %6617 = vmatmul.msk.f32.gmra.mxu3 %vm116_vm1, %v7656_v45  ;;  %v7747_v62 = vand.u32 4294901760, %v7739_v12 }
 0x1ad   :  { %1368 = vmatmul.f32.gmra.mxu1 %v7705_v18 }
 0x1ae   :  { %1171 = vmatmul.f32.gmra.mxu0 %v7697_v54  ;;  %11412 = vst [vmem:[#allocation65_spill] sm:$0xff] %v7747_v62  ;;  %v747_v2 = vsub.f32 %v7739_v12, %v7747_v62  ;;  %v7763_v54 = vsel %vm353_vm2, 1.0, %v11362_v33 }
 0x1af   :  { %11414 = vst [vmem:[#allocation67_spill] sm:$0xff] %v7763_v54  ;;  %v566_v6 = vsel %vm116_vm1, %v7763_v54, 0 }
 0x1b0   :  { %v7765_v18 = vand.u32 4294901760, %v747_v2  ;;  %v7781_v2 = vsub.f32 %v566_v6, %v566_v6 }
 0x1b2   :  { %11415 = vst [vmem:[#allocation68_spill] sm:$0xff] %v7765_v18 }
 0x1b3   :  { %11417 = vst [vmem:[#allocation70_spill] sm:$0xff] %v7781_v2 }
 0x1b4   :  { %741 = vmatmul.f32.gmra.mxu2 %v7744_v11  ;;  %6618 = vmatmul.msk.f32.gmra.mxu3 %vm116_vm1, %v7679_v46  ;;  %v7768_v11 = vand.u32 4294901760, %v7760_v60 }
 0x1b5   :  { %1374 = vmatmul.f32.gmra.mxu1 %v7726_v50 }
 0x1b6   :  { %1176 = vmatmul.f32.gmra.mxu0 %v7718_v38  ;;  %11416 = vst [vmem:[#allocation69_spill] sm:$0xff] %v7768_v11  ;;  %v755_v49 = vsub.f32 %v7760_v60, %v7768_v11  ;;  %v7784_v38 = vsel %vm354_vm3, 1.0, %v11362_v33  ;;  %v331_v43 = vpop.permute.xlu0 %330 }
 0x1b7   :  { %11418 = vst [vmem:[#allocation71_spill] sm:$0xff] %v7784_v38  ;;  %v569_v15 = vsel %vm116_vm1, %v7784_v38, 0  ;;  %vm367_vm0 = vcmp.eq.s32.totalorder %v7324_v21, %v331_v43 }
 0x1b8   :  { %v7786_v50 = vand.u32 4294901760, %v755_v49  ;;  %v7802_v49 = vsub.f32 %v569_v15, %v569_v15 }
 0x1ba   :  { %11419 = vst [vmem:[#allocation72_spill] sm:$0xff] %v7786_v50 }
 0x1bb   :  { %11421 = vst [vmem:[#allocation74_spill] sm:$0xff] %v7802_v49 }
 0x1bc   :  { %749 = vmatmul.f32.gmra.mxu2 %v7765_v18  ;;  %6619 = vmatmul.msk.f32.gmra.mxu3 %vm116_vm1, %v7700_v56  ;;  %v7789_v18 = vand.u32 4294901760, %v7781_v2 }
 0x1bd   :  { %1380 = vmatmul.f32.gmra.mxu1 %v7747_v62 }
 0x1be   :  { %1181 = vmatmul.f32.gmra.mxu0 %v7739_v12  ;;  %11420 = vst [vmem:[#allocation73_spill] sm:$0xff] %v7789_v18  ;;  %v763_v6 = vsub.f32 %v7781_v2, %v7789_v18  ;;  %v7805_v12 = vsel %vm355_vm4, 1.0, %v11362_v33  ;;  %vm1878_vm4 = vcmask 261120  }
 0x1bf   :  { %11422 = vst [vmem:[#allocation75_spill] sm:$0xff] %v7805_v12  ;;  %v572_v23 = vsel %vm116_vm1, %v7805_v12, 0 }
 0x1c0   :  { %v7807_v62 = vand.u32 4294901760, %v763_v6  ;;  %v7823_v6 = vsub.f32 %v572_v23, %v572_v23 }
 0x1c2   :  { %11423 = vst [vmem:[#allocation76_spill] sm:$0xff] %v7807_v62 }
 0x1c3   :  { %11425 = vst [vmem:[#allocation78_spill] sm:$0xff] %v7823_v6 }
 0x1c4   :  { %757 = vmatmul.f32.gmra.mxu2 %v7786_v50  ;;  %6620 = vmatmul.msk.f32.gmra.mxu3 %vm116_vm1, %v7721_v0  ;;  %v7810_v50 = vand.u32 4294901760, %v7802_v49 }
 0x1c5   :  { %1386 = vmatmul.f32.gmra.mxu1 %v7768_v11 }
 0x1c6   :  { %1186 = vmatmul.f32.gmra.mxu0 %v7760_v60  ;;  %11424 = vst [vmem:[#allocation77_spill] sm:$0xff] %v7810_v50  ;;  %v771_v15 = vsub.f32 %v7802_v49, %v7810_v50  ;;  %v7826_v60 = vsel %vm356_vm5, 1.0, %v11362_v33 }
 0x1c7   :  { %11426 = vst [vmem:[#allocation79_spill] sm:$0xff] %v7826_v60  ;;  %v575_v29 = vsel %vm116_vm1, %v7826_v60, 0 }
 0x1c8   :  { %v7828_v11 = vand.u32 4294901760, %v771_v15 }
 0x1ca   :  { %11427 = vst [vmem:[#allocation80_spill] sm:$0xff] %v7828_v11 }
 0x1cc   :  { %765 = vmatmul.f32.gmra.mxu2 %v7807_v62  ;;  %6621 = vmatmul.msk.f32.gmra.mxu3 %vm116_vm1, %v7742_v37  ;;  %v7831_v62 = vand.u32 4294901760, %v7823_v6 }
 0x1cd   :  { %1392 = vmatmul.f32.gmra.mxu1 %v7789_v18  ;;  %v7844_v18 = vsub.f32 %v575_v29, %v575_v29 }
 0x1ce   :  { %1191 = vmatmul.f32.gmra.mxu0 %v7781_v2  ;;  %11428 = vst [vmem:[#allocation81_spill] sm:$0xff] %v7831_v62  ;;  %v779_v2 = vsub.f32 %v7823_v6, %v7831_v62 }
 0x1cf   :  { %11429 = vst [vmem:[#allocation82_spill] sm:$0xff] %v7844_v18  ;;  %v7852_v40 = vand.u32 4294901760, %v7844_v18 }
 0x1d0   :  { %v1303_v23 = vpop.f32.mrf.mxu1 }
 0x1d1   :  { %11432 = vst [vmem:[#allocation85_spill] sm:$0xff] %v7852_v40 }
 0x1d3   :  { %v1117_v53 = vpop.f32.mrf.mxu0 }
 0x1d4   :  { %773 = vmatmul.f32.gmra.mxu2 %v7828_v11  ;;  %6622 = vmatmul.msk.f32.gmra.mxu3 %vm116_vm1, %v7763_v54  ;;  %v7849_v11 = vand.u32 4294901760, %v779_v2 }
 0x1d5   :  { %1398 = vmatmul.f32.gmra.mxu1 %v7810_v50  ;;  %v7865_v50 = vsub.f32 %v578_v35, %v578_v35 }
 0x1d6   :  { %1196 = vmatmul.f32.gmra.mxu0 %v7802_v49  ;;  %v646_v15 = vpop.f32.mrf.mxu2  ;;  %11431 = vst [vmem:[#allocation84_spill] sm:$0xff] %v7849_v11  ;;  %v787_v49 = vsub.f32 %v7844_v18, %v7852_v40 }
 0x1d7   :  { %11433 = vst [vmem:[#allocation86_spill] sm:$0xff] %v7865_v50  ;;  %v7873_v17 = vand.u32 4294901760, %v7865_v50 }
 0x1d8   :  { %v7870_v26 = vand.u32 4294901760, %v787_v49  ;;  %v7891_v49 = vsel %vm359_vm8, 1.0, %v11362_v33 }
 0x1d9   :  { %v1309_v5 = vpop.f32.mrf.mxu1  ;;  %11436 = vst [vmem:[#allocation89_spill] sm:$0xff] %v7873_v17 }
 0x1da   :  { %11435 = vst [vmem:[#allocation88_spill] sm:$0xff] %v7870_v26 }
 0x1db   :  { %v1122_v29 = vpop.f32.mrf.mxu0  ;;  %11438 = vst [vmem:[#allocation91_spill] sm:$0xff] %v7891_v49 }
 0x1dc   :  { %781 = vmatmul.f32.gmra.mxu2 %v7849_v11  ;;  %6623 = vmatmul.msk.f32.gmra.mxu3 %vm116_vm1, %v7784_v38  ;;  %v7868_v11 = vsel %vm358_vm7, 1.0, %v11362_v33 }
 0x1dd   :  { %1404 = vmatmul.f32.gmra.mxu1 %v7831_v62  ;;  %11434 = vst [vmem:[#allocation87_spill] sm:$0xff] %v7868_v11 }
 0x1de   :  { %1201 = vmatmul.f32.gmra.mxu0 %v7823_v6  ;;  %v654_v2 = vpop.f32.mrf.mxu2  ;;  %v581_v6 = vsel %vm116_vm1, %v7868_v11, 0 }
 0x1df   :  { %v955_v24 = vpop.f32.mrf.mxu3 }
 0x1e0   :  { %v956_v34 = vadd.f32 %v955_v24, %v646_v15  ;;  %v7888_v24 = vsub.f32 %v581_v6, %v581_v6 }
 0x1e2   :  { %v1118_v55 = vadd.f32 %v1117_v53, %v956_v34  ;;  %v795_v34 = vsub.f32 %v7865_v50, %v7873_v17  ;;  %11437 = vst [vmem:[#allocation90_spill] sm:$0xff] %v7888_v24  ;;  %v7896_v22 = vand.u32 4294901760, %v7888_v24 }
 0x1e3   :  { %v1127_v15 = vpop.f32.mrf.mxu0 }
 0x1e4   :  { %789 = vmatmul.f32.gmra.mxu2 %v7870_v26  ;;  %6624 = vmatmul.msk.f32.gmra.mxu3 %vm116_vm1, %v7805_v12  ;;  %v7880_v35 = vadd.f32 %v1303_v23, %v1118_v55  ;;  %v1315_v23 = vpop.f32.mrf.mxu1  ;;  %v7893_v62 = vand.u32 4294901760, %v795_v34  ;;  %11440 = vst [vmem:[#allocation93_spill] sm:$0xff] %v7896_v22  ;;  %v803_v6 = vsub.f32 %v7888_v24, %v7896_v22  ;;  %v7914_v34 = vsel %vm360_vm9, 1.0, %v11362_v33 }
 0x1e5   :  { %1410 = vmatmul.f32.gmra.mxu1 %v7852_v40  ;;  %11442 = vst [vmem:[#allocation95_spill] sm:$0xff] %v7914_v34 }
 0x1e6   :  { %1206 = vmatmul.f32.gmra.mxu0 %v7844_v18  ;;  %11439 = vst [vmem:[#allocation92_spill] sm:$0xff] %v7893_v62  ;;  %v584_v18 = vsel %vm116_vm1, %v7891_v49, 0  ;;  %v7916_v52 = vand.u32 4294901760, %v803_v6  ;;  %v7937_v6 = vsel %vm361_vm10, 1.0, %v11362_v33 }
 0x1e7   :  { %v662_v53 = vpop.f32.mrf.mxu2  ;;  %v959_v26 = vpop.f32.mrf.mxu3  ;;  %11446 = vst [vmem:[#allocation99_spill] sm:$0xff] %v7937_v6 }
 0x1e8   :  { %v960_v55 = vadd.f32 %v959_v26, %v654_v2  ;;  %11443 = vst [vmem:[#allocation96_spill] sm:$0xff] %v7916_v52 }
 0x1ea   :  { %v1123_v40 = vadd.f32 %v1122_v29, %v960_v55  ;;  %v7911_v29 = vsub.f32 %v584_v18, %v584_v18 }
 0x1eb   :  { %v1132_v16 = vpop.f32.mrf.mxu0 }
 0x1ec   :  { %797 = vmatmul.f32.gmra.mxu2 %v7893_v62  ;;  %6625 = vmatmul.msk.f32.gmra.mxu3 %vm116_vm1, %v7826_v60  ;;  %v7906_v26 = vadd.f32 %v1309_v5, %v1123_v40  ;;  %11441 = vst [vmem:[#allocation94_spill] sm:$0xff] %v7911_v29  ;;  %v7919_v44 = vand.u32 4294901760, %v7911_v29  ;;  %v587_v40 = vsel %vm116_vm1, %v7914_v34, 0 }
 0x1ed   :  { %1416 = vmatmul.f32.gmra.mxu1 %v7873_v17 }
 0x1ee   :  { %1211 = vmatmul.f32.gmra.mxu0 %v7865_v50  ;;  %11444 = vst [vmem:[#allocation97_spill] sm:$0xff] %v7919_v44  ;;  %v1321_v50 = vpop.f32.mrf.mxu1 }
 0x1ef   :  { %v670_v2 = vpop.f32.mrf.mxu2  ;;  %v963_v55 = vpop.f32.mrf.mxu3 }
 0x1f0   :  { %v964_v62 = vadd.f32 %v963_v55, %v662_v53  ;;  %v7934_v53 = vsub.f32 %v587_v40, %v587_v40 }
 0x1f2   :  { %v1128_v5 = vadd.f32 %v1127_v15, %v964_v62  ;;  %v811_v62 = vsub.f32 %v7911_v29, %v7919_v44  ;;  %11445 = vst [vmem:[#allocation98_spill] sm:$0xff] %v7934_v53  ;;  %v7942_v61 = vand.u32 4294901760, %v7934_v53 }
 0x1f4   :  { %805 = vmatmul.f32.gmra.mxu2 %v7916_v52  ;;  %6626 = vmatmul.msk.f32.gmra.mxu3 %vm116_vm1, %v7847_v47  ;;  %v7929_v18 = vadd.f32 %v1315_v23, %v1128_v5  ;;  %v7939_v17 = vand.u32 4294901760, %v811_v62  ;;  %11448 = vst [vmem:[#allocation101_spill] sm:$0xff] %v7942_v61  ;;  %v590_v5 = vsel %vm116_vm1, %v7937_v6, 0 }
 0x1f5   :  { %1422 = vmatmul.f32.gmra.mxu1 %v7896_v22 }
 0x1f6   :  { %1216 = vmatmul.f32.gmra.mxu0 %v7888_v24  ;;  %11447 = vst [vmem:[#allocation100_spill] sm:$0xff] %v7939_v17  ;;  %v1137_v24 = vpop.f32.mrf.mxu0  ;;  %v1327_v40 = vpop.f32.mrf.mxu1 }
 0x1f7   :  { %v678_v15 = vpop.f32.mrf.mxu2  ;;  %v967_v55 = vpop.f32.mrf.mxu3 }
 0x1f8   :  { %v968_v52 = vadd.f32 %v967_v55, %v670_v2  ;;  %v7960_v55 = vsel %vm362_vm11, 1.0, %v11362_v33 }
 0x1f9   :  { %11450 = vst [vmem:[#allocation103_spill] sm:$0xff] %v7960_v55 }
 0x1fa   :  { %v1133_v23 = vadd.f32 %v1132_v16, %v968_v52  ;;  %v819_v16 = vsub.f32 %v7934_v53, %v7942_v61  ;;  %v7957_v52 = vsub.f32 %v590_v5, %v590_v5 }
 0x1fc   :  { %813 = vmatmul.f32.gmra.mxu2 %v7939_v17  ;;  %6627 = vmatmul.msk.f32.gmra.mxu3 %vm116_vm1, %v7868_v11  ;;  %v7952_v2 = vadd.f32 %v1321_v50, %v1133_v23  ;;  %11449 = vst [vmem:[#allocation102_spill] sm:$0xff] %v7957_v52  ;;  %v7962_v13 = vand.u32 4294901760, %v819_v16  ;;  %v7965_v48 = vand.u32 4294901760, %v7957_v52  ;;  %v593_v23 = vsel %vm116_vm1, %v7960_v55, 0 }
 0x1fd   :  { %1428 = vmatmul.f32.gmra.mxu1 %v7919_v44  ;;  %v7983_v16 = vsel %vm363_vm12, 1.0, %v11362_v33 }
 0x1fe   :  { %1221 = vmatmul.f32.gmra.mxu0 %v7911_v29  ;;  %11451 = vst [vmem:[#allocation104_spill] sm:$0xff] %v7962_v13 }
 0x1ff   :  { %v686_v62 = vpop.f32.mrf.mxu2  ;;  %v971_v17 = vpop.f32.mrf.mxu3  ;;  %11452 = vst [vmem:[#allocation105_spill] sm:$0xff] %v7965_v48 }
 0x200   :  { %v972_v22 = vadd.f32 %v971_v17, %v678_v15  ;;  %v1142_v15 = vpop.f32.mrf.mxu0  ;;  %11454 = vst [vmem:[#allocation107_spill] sm:$0xff] %v7983_v16 }
 0x202   :  { %v1138_v50 = vadd.f32 %v1137_v24, %v972_v22  ;;  %v827_v24 = vsub.f32 %v7957_v52, %v7965_v48  ;;  %v7980_v22 = vsub.f32 %v593_v23, %v593_v23 }
 0x204   :  { %821 = vmatmul.f32.gmra.mxu2 %v7962_v13  ;;  %6628 = vmatmul.msk.f32.gmra.mxu3 %vm116_vm1, %v7891_v49  ;;  %v7975_v17 = vadd.f32 %v1327_v40, %v1138_v50  ;;  %11453 = vst [vmem:[#allocation106_spill] sm:$0xff] %v7980_v22  ;;  %v1333_v13 = vpop.f32.mrf.mxu1  ;;  %v7985_v9 = vand.u32 4294901760, %v827_v24  ;;  %v7988_v40 = vand.u32 4294901760, %v7980_v22 }
 0x205   :  { %1434 = vmatmul.f32.gmra.mxu1 %v7942_v61 }
 0x206   :  { %1226 = vmatmul.f32.gmra.mxu0 %v7934_v53  ;;  %11455 = vst [vmem:[#allocation108_spill] sm:$0xff] %v7985_v9  ;;  %v596_v53 = vsel %vm116_vm1, %v7983_v16, 0 }
 0x207   :  { %v694_v5 = vpop.f32.mrf.mxu2  ;;  %v975_v29 = vpop.f32.mrf.mxu3  ;;  %11456 = vst [vmem:[#allocation109_spill] sm:$0xff] %v7988_v40 }
 0x208   :  { %v976_v44 = vadd.f32 %v975_v29, %v686_v62  ;;  %v835_v62 = vsub.f32 %v7980_v22, %v7988_v40  ;;  %v1147_v24 = vpop.f32.mrf.mxu0 }
 0x20a   :  { %v1143_v50 = vadd.f32 %v1142_v15, %v976_v44  ;;  %v8002_v44 = vsub.f32 %v596_v53, %v596_v53  ;;  %v8005_v15 = vsel %vm364_vm13, 1.0, %v11362_v33  ;;  %v8007_v25 = vand.u32 4294901760, %v835_v62 }
 0x20b   :  { %11458 = vst [vmem:[#allocation111_spill] sm:$0xff] %v8005_v15  ;;  %v8027_v62 = vsel %vm365_vm14, 1.0, %v11362_v33  ;;  %vm2821_vm13 = vcmask 785408  }
 0x20c   :  { %829 = vmatmul.f32.gmra.mxu2 %v7985_v9  ;;  %6629 = vmatmul.msk.f32.gmra.mxu3 %vm116_vm1, %v7914_v34  ;;  %v7997_v29 = vadd.f32 %v1333_v13, %v1143_v50  ;;  %11457 = vst [vmem:[#allocation110_spill] sm:$0xff] %v8002_v44  ;;  %v1339_v41 = vpop.f32.mrf.mxu1  ;;  %v8010_v13 = vand.u32 4294901760, %v8002_v44 }
 0x20d   :  { %1440 = vmatmul.f32.gmra.mxu1 %v7965_v48  ;;  %11459 = vst [vmem:[#allocation112_spill] sm:$0xff] %v8007_v25  ;;  %v328_v48 = vpop.permute.xlu2 %327 }
 0x20e   :  { %1231 = vmatmul.f32.gmra.mxu0 %v7957_v52  ;;  %11460 = vst [vmem:[#allocation113_spill] sm:$0xff] %v8010_v13  ;;  %v599_v52 = vsel %vm116_vm1, %v8005_v15, 0  ;;  %v843_v53 = vsub.f32 %v8002_v44, %v8010_v13  ;;  %vm366_vm15 = vcmp.eq.s32.totalorder %v7324_v21, %v328_v48 }
 0x20f   :  { %v702_v23 = vpop.f32.mrf.mxu2  ;;  %v979_v9 = vpop.f32.mrf.mxu3  ;;  %11462 = vst [vmem:[#allocation115_spill] sm:$0xff] %v8027_v62 }
 0x210   :  { %v980_v61 = vadd.f32 %v979_v9, %v694_v5  ;;  %v1152_v51 = vpop.f32.mrf.mxu0  ;;  %v8029_v30 = vand.u32 4294901760, %v843_v53  ;;  %v8049_v53 = vsel %vm366_vm15, 1.0, %v11362_v33 }
 0x211   :  { %11466 = vst [vmem:[#allocation119_spill] sm:$0xff] %v8049_v53 }
 0x212   :  { %v1148_v50 = vadd.f32 %v1147_v24, %v980_v61  ;;  %v8024_v61 = vsub.f32 %v599_v52, %v599_v52  ;;  %11463 = vst [vmem:[#allocation116_spill] sm:$0xff] %v8029_v30 }
 0x214   :  { %837 = vmatmul.f32.gmra.mxu2 %v8007_v25  ;;  %6630 = vmatmul.msk.f32.gmra.mxu3 %vm116_vm1, %v7937_v6  ;;  %v8019_v9 = vadd.f32 %v1339_v41, %v1148_v50  ;;  %11461 = vst [vmem:[#allocation114_spill] sm:$0xff] %v8024_v61  ;;  %v8032_v41 = vand.u32 4294901760, %v8024_v61 }
 0x215   :  { %1446 = vmatmul.f32.gmra.mxu1 %v7988_v40  ;;  %v1345_v40 = vpop.f32.mrf.mxu1  ;;  %v337_v4 = vpop.permute.xlu2 %336 }
 0x216   :  { %1236 = vmatmul.f32.gmra.mxu0 %v7980_v22  ;;  %11464 = vst [vmem:[#allocation117_spill] sm:$0xff] %v8032_v41  ;;  %v602_v22 = vsel %vm116_vm1, %v8027_v62, 0  ;;  %vm369_vm3 = vcmp.eq.s32.totalorder %v7324_v21, %v337_v4 }
 0x217   :  { %v710_v5 = vpop.f32.mrf.mxu2  ;;  %v983_v24 = vpop.f32.mrf.mxu3 }
 0x218   :  { %v984_v25 = vadd.f32 %v983_v24, %v702_v23 }
 0x21a   :  { %v1153_v50 = vadd.f32 %v1152_v51, %v984_v25  ;;  %v851_v51 = vsub.f32 %v8024_v61, %v8032_v41  ;;  %v8046_v25 = vsub.f32 %v602_v22, %v602_v22 }
 0x21c   :  { %845 = vmatmul.f32.gmra.mxu2 %v8029_v30  ;;  %6631 = vmatmul.msk.f32.gmra.mxu3 %vm116_vm1, %v7960_v55  ;;  %v8041_v52 = vadd.f32 %v1345_v40, %v1153_v50  ;;  %11465 = vst [vmem:[#allocation118_spill] sm:$0xff] %v8046_v25  ;;  %v8053_v48 = vand.u32 4294901760, %v851_v51  ;;  %v8056_v40 = vand.u32 4294901760, %v8046_v25  ;;  %v605_v50 = vsel %vm116_vm1, %v8049_v53, 0 }
 0x21d   :  { %1452 = vmatmul.f32.gmra.mxu1 %v8010_v13  ;;  %v334_v13 = vpop.permute.xlu1 %333 }
 0x21e   :  { %1241 = vmatmul.f32.gmra.mxu0 %v8002_v44  ;;  %11467 = vst [vmem:[#allocation120_spill] sm:$0xff] %v8053_v48  ;;  %v859_v22 = vsub.f32 %v8046_v25, %v8056_v40  ;;  %vm368_vm2 = vcmp.eq.s32.totalorder %v7324_v21, %v334_v13 }
 0x21f   :  { %v718_v23 = vpop.f32.mrf.mxu2  ;;  %v987_v24 = vpop.f32.mrf.mxu3  ;;  %11468 = vst [vmem:[#allocation121_spill] sm:$0xff] %v8056_v40 }
 0x220   :  { %v8051_v30 = vadd.f32 %v987_v24, %v710_v5  ;;  %v8068_v5 = vsub.f32 %v605_v50, %v605_v50  ;;  %v8071_v24 = vsel %vm367_vm0, 1.0, %v11362_v33  ;;  %v8075_v31 = vand.u32 4294901760, %v859_v22 }
 0x221   :  { %11470 = vst [vmem:[#allocation123_spill] sm:$0xff] %v8071_v24  ;;  %v8093_v22 = vsel %vm368_vm2, 1.0, %v11362_v33  ;;  %vm4298_vm0 = vcmask 64512  }
 0x222   :  { %11469 = vst [vmem:[#allocation122_spill] sm:$0xff] %v8068_v5  ;;  %v8078_v43 = vand.u32 4294901760, %v8068_v5 }
 0x223   :  { %11471 = vst [vmem:[#allocation124_spill] sm:$0xff] %v8075_v31 }
 0x224   :  { %853 = vmatmul.f32.gmra.mxu2 %v8053_v48  ;;  %6632 = vmatmul.msk.f32.gmra.mxu3 %vm116_vm1, %v7983_v16  ;;  %11472 = vst [vmem:[#allocation125_spill] sm:$0xff] %v8078_v43 }
 0x225   :  { %1458 = vmatmul.f32.gmra.mxu1 %v8032_v41  ;;  %11474 = vst [vmem:[#allocation127_spill] sm:$0xff] %v8093_v22 }
 0x226   :  { %1246 = vmatmul.f32.gmra.mxu0 %v8024_v61  ;;  %v608_v61 = vsel %vm116_vm1, %v8071_v24, 0 }
 0x227   :  { %v726_v51 = vpop.f32.mrf.mxu2  ;;  %v991_v44 = vpop.f32.mrf.mxu3 }
 0x228   :  { %v8073_v48 = vadd.f32 %v991_v44, %v718_v23  ;;  %v867_v44 = vsub.f32 %v8068_v5, %v8078_v43  ;;  %v8090_v23 = vsub.f32 %v608_v61, %v608_v61 }
 0x22a   :  { %11473 = vst [vmem:[#allocation126_spill] sm:$0xff] %v8090_v23  ;;  %v8097_v8 = vand.u32 4294901760, %v867_v44  ;;  %v8100_v13 = vand.u32 4294901760, %v8090_v23  ;;  %v8115_v44 = vsel %vm369_vm3, 1.0, %v11362_v33 }
 0x22b   :  { %11478 = vst [vmem:[#allocation131_spill] sm:$0xff] %v8115_v44  ;;  %v614_v21 = vsel %vm116_vm1, %v8115_v44, 0 }
 0x22c   :  { %861 = vmatmul.f32.gmra.mxu2 %v8075_v31  ;;  %6633 = vmatmul.msk.f32.gmra.mxu3 %vm116_vm1, %v8005_v15  ;;  %11475 = vst [vmem:[#allocation128_spill] sm:$0xff] %v8097_v8  ;;  %v875_v61 = vsub.f32 %v8090_v23, %v8100_v13 }
 0x22d   :  { %1464 = vmatmul.f32.gmra.mxu1 %v8056_v40  ;;  %11476 = vst [vmem:[#allocation129_spill] sm:$0xff] %v8100_v13 }
 0x22e   :  { %1251 = vmatmul.f32.gmra.mxu0 %v8046_v25  ;;  %v611_v25 = vsel %vm116_vm1, %v8093_v22, 0  ;;  %v8119_v57 = vand.u32 4294901760, %v875_v61 }
 0x22f   :  { %v734_v50 = vpop.f32.mrf.mxu2  ;;  %v995_v41 = vpop.f32.mrf.mxu3 }
 0x230   :  { %v8095_v31 = vadd.f32 %v995_v41, %v726_v51  ;;  %v8112_v41 = vsub.f32 %v611_v25, %v611_v25  ;;  %11479 = vst [vmem:[#allocation132_spill] sm:$0xff] %v8119_v57 }
 0x232   :  { %11477 = vst [vmem:[#allocation130_spill] sm:$0xff] %v8112_v41  ;;  %v8122_v4 = vand.u32 4294901760, %v8112_v41 }
 0x234   :  { %869 = vmatmul.f32.gmra.mxu2 %v8097_v8  ;;  %6634 = vmatmul.msk.f32.gmra.mxu3 %vm116_vm1, %v8027_v62  ;;  %11480 = vst [vmem:[#allocation133_spill] sm:$0xff] %v8122_v4  ;;  %v883_v25 = vsub.f32 %v8112_v41, %v8122_v4 }
 0x235   :  { %1470 = vmatmul.f32.gmra.mxu1 %v8078_v43 }
 0x236   :  { %1256 = vmatmul.f32.gmra.mxu0 %v8068_v5  ;;  %v8137_v43 = vand.u32 4294901760, %v883_v25 }
 0x237   :  { %v742_v51 = vpop.f32.mrf.mxu2  ;;  %v999_v40 = vpop.f32.mrf.mxu3 }
 0x238   :  { %v8117_v8 = vadd.f32 %v999_v40, %v734_v50  ;;  %v8133_v40 = vsub.f32 %v614_v21, %v614_v21  ;;  %11483 = vst [vmem:[#allocation136_spill] sm:$0xff] %v8137_v43 }
 0x23a   :  { %11481 = vst [vmem:[#allocation134_spill] sm:$0xff] %v8133_v40 }
 0x23c   :  { %877 = vmatmul.f32.gmra.mxu2 %v8119_v57  ;;  %6635 = vmatmul.msk.f32.gmra.mxu3 %vm116_vm1, %v8049_v53  ;;  %v8140_v57 = vand.u32 4294901760, %v8133_v40 }
 0x23d   :  { %1476 = vmatmul.f32.gmra.mxu1 %v8100_v13 }
 0x23e   :  { %1261 = vmatmul.f32.gmra.mxu0 %v8090_v23  ;;  %11484 = vst [vmem:[#allocation137_spill] sm:$0xff] %v8140_v57  ;;  %v891_v21 = vsub.f32 %v8133_v40, %v8140_v57 }
 0x23f   :  { %v750_v50 = vpop.f32.mrf.mxu2  ;;  %v1003_v61 = vpop.f32.mrf.mxu3 }
 0x240   :  { %v8135_v5 = vadd.f32 %v1003_v61, %v742_v51  ;;  %v8151_v25 = vand.u32 4294901760, %v891_v21 }
 0x242   :  { %11482 = vst [vmem:[#allocation135_spill] sm:$0xff] %v8135_v5 }
 0x243   :  { %11486 = vst [vmem:[#allocation139_spill] sm:$0xff] %v8151_v25 }
 0x244   :  { %885 = vmatmul.f32.gmra.mxu2 %v8137_v43  ;;  %6636 = vmatmul.msk.f32.gmra.mxu3 %vm116_vm1, %v8071_v24 }
 0x245   :  { %1482 = vmatmul.f32.gmra.mxu1 %v8122_v4 }
 0x246   :  { %1266 = vmatmul.f32.gmra.mxu0 %v8112_v41 }
 0x247   :  { %v758_v23 = vpop.f32.mrf.mxu2  ;;  %v1007_v51 = vpop.f32.mrf.mxu3 }
 0x248   :  { %v8149_v61 = vadd.f32 %v1007_v51, %v750_v50 }
 0x24a   :  { %11485 = vst [vmem:[#allocation138_spill] sm:$0xff] %v8149_v61 }
 0x24c   :  { %893 = vmatmul.f32.gmra.mxu2 %v8151_v25  ;;  %6637 = vmatmul.msk.f32.gmra.mxu3 %vm116_vm1, %v8093_v22 }
 0x24d   :  { %1488 = vmatmul.f32.gmra.mxu1 %v8140_v57 }
 0x24e   :  { %1271 = vmatmul.f32.gmra.mxu0 %v8133_v40 }
 0x24f   :  { %v766_v4 = vpop.f32.mrf.mxu2  ;;  %v1011_v41 = vpop.f32.mrf.mxu3 }
 0x250   :  { %v8158_v43 = vadd.f32 %v1011_v41, %v758_v23 }
 0x252   :  { %11487 = vst [vmem:[#allocation140_spill] sm:$0xff] %v8158_v43 }
 0x254   :  { %6638 = vmatmul.msk.f32.gmra.mxu3 %vm116_vm1, %v8115_v44  ;;  %6639 = vmatmul.msk.f32.vlgmr.msrb.gmra.mxu2 %vm116_vm1, %v7338_v1 }
 0x257   :  { %v774_v50 = vpop.f32.mrf.mxu2  ;;  %v1015_v21 = vpop.f32.mrf.mxu3 }
 0x258   :  { %v8164_v51 = vadd.f32 %v1015_v21, %v766_v4 }
 0x25a   :  { %11488 = vst [vmem:[#allocation141_spill] sm:$0xff] %v8164_v51 }
 0x25c   :  { %6640 = vmatmul.msk.f32.gmra.mxu2 %vm116_vm1, %v7384_v28  ;;  %6671 = vmatmul.msk.f32.vlgmr.msrb.gmra.mxu3 %vm116_vm1, %v7338_v1 }
 0x25f   :  { %v782_v40 = vpop.f32.mrf.mxu2  ;;  %v1019_v57 = vpop.f32.mrf.mxu3 }
 0x260   :  { %v8170_v23 = vadd.f32 %v1019_v57, %v774_v50 }
 0x264   :  { %6641 = vmatmul.msk.f32.gmra.mxu2 %vm116_vm1, %v7463_v19  ;;  %6672 = vmatmul.msk.f32.gmra.mxu3 %vm116_vm1, %v7384_v28 }
 0x267   :  { %v790_v41 = vpop.f32.mrf.mxu2  ;;  %v1023_v25 = vpop.f32.mrf.mxu3 }
 0x268   :  { %v8176_v4 = vadd.f32 %v1023_v25, %v782_v40 }
 0x26c   :  { %6642 = vmatmul.msk.f32.gmra.mxu2 %vm116_vm1, %v7491_v39  ;;  %6673 = vmatmul.msk.f32.gmra.mxu3 %vm116_vm1, %v7463_v19 }
 0x26f   :  { %v798_v21 = vpop.f32.mrf.mxu2  ;;  %v1027_v13 = vpop.f32.mrf.mxu3 }
 0x270   :  { %v8182_v57 = vadd.f32 %v1027_v13, %v790_v41 }
 0x274   :  { %6643 = vmatmul.msk.f32.gmra.mxu2 %vm116_vm1, %v7520_v42  ;;  %6674 = vmatmul.msk.f32.gmra.mxu3 %vm116_vm1, %v7491_v39 }
 0x277   :  { %v806_v50 = vpop.f32.mrf.mxu2  ;;  %v1031_v28 = vpop.f32.mrf.mxu3 }
 0x278   :  { %v8188_v40 = vadd.f32 %v1031_v28, %v798_v21 }
 0x27c   :  { %6644 = vmatmul.msk.f32.gmra.mxu2 %vm116_vm1, %v7545_v10  ;;  %6675 = vmatmul.msk.f32.gmra.mxu3 %vm116_vm1, %v7520_v42 }
 0x27f   :  { %v814_v25 = vpop.f32.mrf.mxu2  ;;  %v1035_v19 = vpop.f32.mrf.mxu3 }
 0x280   :  { %v8194_v13 = vadd.f32 %v1035_v19, %v806_v50 }
 0x284   :  { %6645 = vmatmul.msk.f32.gmra.mxu2 %vm116_vm1, %v7568_v3  ;;  %6676 = vmatmul.msk.f32.gmra.mxu3 %vm116_vm1, %v7545_v10 }
 0x287   :  { %v822_v41 = vpop.f32.mrf.mxu2  ;;  %v1039_v39 = vpop.f32.mrf.mxu3 }
 0x288   :  { %v8200_v28 = vadd.f32 %v1039_v39, %v814_v25 }
 0x28c   :  { %6646 = vmatmul.msk.f32.gmra.mxu2 %vm116_vm1, %v7589_v63  ;;  %6677 = vmatmul.msk.f32.gmra.mxu3 %vm116_vm1, %v7568_v3 }
 0x28f   :  { %v830_v21 = vpop.f32.mrf.mxu2  ;;  %v1043_v42 = vpop.f32.mrf.mxu3 }
 0x290   :  { %v8206_v19 = vadd.f32 %v1043_v42, %v822_v41 }
 0x294   :  { %6647 = vmatmul.msk.f32.gmra.mxu2 %vm116_vm1, %v7610_v27  ;;  %6678 = vmatmul.msk.f32.gmra.mxu3 %vm116_vm1, %v7589_v63 }
 0x297   :  { %v838_v50 = vpop.f32.mrf.mxu2  ;;  %v1047_v10 = vpop.f32.mrf.mxu3 }
 0x298   :  { %v8212_v39 = vadd.f32 %v1047_v10, %v830_v21 }
 0x29c   :  { %6648 = vmatmul.msk.f32.gmra.mxu2 %vm116_vm1, %v7633_v36  ;;  %6679 = vmatmul.msk.f32.gmra.mxu3 %vm116_vm1, %v7610_v27 }
 0x29f   :  { %v846_v25 = vpop.f32.mrf.mxu2  ;;  %v1051_v3 = vpop.f32.mrf.mxu3 }
 0x2a0   :  { %v8218_v42 = vadd.f32 %v1051_v3, %v838_v50 }
 0x2a4   :  { %6649 = vmatmul.msk.f32.gmra.mxu2 %vm116_vm1, %v7656_v45  ;;  %6680 = vmatmul.msk.f32.gmra.mxu3 %vm116_vm1, %v7633_v36 }
 0x2a7   :  { %v854_v41 = vpop.f32.mrf.mxu2  ;;  %v1055_v63 = vpop.f32.mrf.mxu3 }
 0x2a8   :  { %v8224_v10 = vadd.f32 %v1055_v63, %v846_v25 }
 0x2ac   :  { %6650 = vmatmul.msk.f32.gmra.mxu2 %vm116_vm1, %v7679_v46  ;;  %6681 = vmatmul.msk.f32.gmra.mxu3 %vm116_vm1, %v7656_v45 }
 0x2af   :  { %v862_v21 = vpop.f32.mrf.mxu2  ;;  %v1059_v27 = vpop.f32.mrf.mxu3 }
 0x2b0   :  { %v8230_v3 = vadd.f32 %v1059_v27, %v854_v41 }
 0x2b4   :  { %6651 = vmatmul.msk.f32.gmra.mxu2 %vm116_vm1, %v7700_v56  ;;  %6682 = vmatmul.msk.f32.gmra.mxu3 %vm116_vm1, %v7679_v46 }
 0x2b7   :  { %v870_v50 = vpop.f32.mrf.mxu2  ;;  %v1063_v36 = vpop.f32.mrf.mxu3 }
 0x2b8   :  { %v8236_v63 = vadd.f32 %v1063_v36, %v862_v21 }
 0x2bc   :  { %6652 = vmatmul.msk.f32.gmra.mxu2 %vm116_vm1, %v7721_v0  ;;  %6683 = vmatmul.msk.f32.gmra.mxu3 %vm116_vm1, %v7700_v56 }
 0x2bf   :  { %v878_v25 = vpop.f32.mrf.mxu2  ;;  %v1067_v45 = vpop.f32.mrf.mxu3 }
 0x2c0   :  { %v8242_v27 = vadd.f32 %v1067_v45, %v870_v50 }
 0x2c4   :  { %6653 = vmatmul.msk.f32.gmra.mxu2 %vm116_vm1, %v7742_v37  ;;  %6684 = vmatmul.msk.f32.gmra.mxu3 %vm116_vm1, %v7721_v0 }
 0x2c7   :  { %v886_v41 = vpop.f32.mrf.mxu2  ;;  %v1071_v46 = vpop.f32.mrf.mxu3 }
 0x2c8   :  { %v8248_v36 = vadd.f32 %v1071_v46, %v878_v25 }
 0x2cc   :  { %6654 = vmatmul.msk.f32.gmra.mxu2 %vm116_vm1, %v7763_v54  ;;  %6685 = vmatmul.msk.f32.gmra.mxu3 %vm116_vm1, %v7742_v37 }
 0x2cf   :  { %v894_v21 = vpop.f32.mrf.mxu2  ;;  %v1075_v56 = vpop.f32.mrf.mxu3 }
 0x2d0   :  { %v8254_v45 = vadd.f32 %v1075_v56, %v886_v41 }
 0x2d4   :  { %6655 = vmatmul.msk.f32.gmra.mxu2 %vm116_vm1, %v7784_v38  ;;  %6686 = vmatmul.msk.f32.gmra.mxu3 %vm116_vm1, %v7763_v54  ;;  %v8277_v54 = vpop.f32.mrf.mxu0 }
 0x2d7   :  { %v1534_v50 = vpop.f32.mrf.mxu2  ;;  %v1079_v0 = vpop.f32.mrf.mxu3 }
 0x2d8   :  { %v1535_v46 = vadd.f32 %v1534_v50, %v7880_v35  ;;  %v8261_v25 = vadd.f32 %v1079_v0, %v894_v21 }
 0x2dc   :  { %6656 = vmatmul.msk.f32.gmra.mxu2 %vm116_vm1, %v7805_v12  ;;  %6687 = vmatmul.msk.f32.gmra.mxu3 %vm116_vm1, %v7784_v38 }
 0x2df   :  { %v1538_v56 = vpop.f32.mrf.mxu2  ;;  %v1687_v37 = vpop.f32.mrf.mxu3 }
 0x2e0   :  { %v1539_v41 = vadd.f32 %v1538_v56, %v7906_v26  ;;  %v8268_v1 = vadd.f32 %v1687_v37, %v1535_v46  ;;  %v8283_v37 = vpop.f32.mrf.mxu1 }
 0x2e4   :  { %6657 = vmatmul.msk.f32.gmra.mxu2 %vm116_vm1, %v7826_v60  ;;  %6688 = vmatmul.msk.f32.gmra.mxu3 %vm116_vm1, %v7805_v12 }
 0x2e7   :  { %v1542_v0 = vpop.f32.mrf.mxu2  ;;  %v1691_v21 = vpop.f32.mrf.mxu3 }
 0x2e8   :  { %v1543_v35 = vadd.f32 %v1542_v0, %v7929_v18  ;;  %v8275_v50 = vadd.f32 %v1691_v21, %v1539_v41  ;;  %v8288_v18 = vpop.f32.mrf.mxu0  ;;  %v8294_v41 = vpop.f32.mrf.mxu1 }
 0x2ec   :  { %6658 = vmatmul.msk.f32.gmra.mxu2 %vm116_vm1, %v7847_v47  ;;  %6689 = vmatmul.msk.f32.gmra.mxu3 %vm116_vm1, %v7826_v60 }
 0x2ef   :  { %v1546_v26 = vpop.f32.mrf.mxu2  ;;  %v1695_v56 = vpop.f32.mrf.mxu3 }
 0x2f0   :  { %v1547_v46 = vadd.f32 %v1546_v26, %v7952_v2  ;;  %v8286_v12 = vadd.f32 %v1695_v56, %v1543_v35  ;;  %v8303_v2 = vpop.f32.mrf.mxu0 }
 0x2f4   :  { %6659 = vmatmul.msk.f32.gmra.mxu2 %vm116_vm1, %v7868_v11  ;;  %6690 = vmatmul.msk.f32.gmra.mxu3 %vm116_vm1, %v7847_v47  ;;  %v8306_v47 = vpop.f32.mrf.mxu1 }
 0x2f7   :  { %v1550_v0 = vpop.f32.mrf.mxu2  ;;  %v1699_v60 = vpop.f32.mrf.mxu3 }
 0x2f8   :  { %v1551_v21 = vadd.f32 %v1550_v0, %v7975_v17  ;;  %v8297_v38 = vadd.f32 %v1699_v60, %v1547_v46  ;;  %v8314_v17 = vpop.f32.mrf.mxu0 }
 0x2fc   :  { %6660 = vmatmul.msk.f32.gmra.mxu2 %vm116_vm1, %v7891_v49  ;;  %6691 = vmatmul.msk.f32.gmra.mxu3 %vm116_vm1, %v7868_v11 }
 0x2ff   :  { %v1554_v35 = vpop.f32.mrf.mxu2  ;;  %v1703_v56 = vpop.f32.mrf.mxu3 }
 0x300   :  { %v1555_v26 = vadd.f32 %v1554_v35, %v7997_v29  ;;  %v8308_v58 = vadd.f32 %v1703_v56, %v1551_v21  ;;  %v8319_v29 = vpop.f32.mrf.mxu1  ;;  %v8328_v59 = vpop.f32.mrf.mxu0 }
 0x301   :  { %11489 = vst [vmem:[#allocation142_spill] sm:$0xff] %v8319_v29 }
 0x302   :  { %11490 = vst [vmem:[#allocation143_spill] sm:$0xff] %v8328_v59 }
 0x304   :  { %6661 = vmatmul.msk.f32.gmra.mxu2 %vm116_vm1, %v7914_v34  ;;  %6692 = vmatmul.msk.f32.gmra.mxu3 %vm116_vm1, %v7891_v49 }
 0x307   :  { %v1558_v60 = vpop.f32.mrf.mxu2  ;;  %v1707_v0 = vpop.f32.mrf.mxu3 }
 0x308   :  { %v1559_v46 = vadd.f32 %v1558_v60, %v8019_v9  ;;  %v8317_v11 = vadd.f32 %v1707_v0, %v1555_v26  ;;  %v8334_v9 = vpop.f32.mrf.mxu1 }
 0x309   :  { %11491 = vst [vmem:[#allocation144_spill] sm:$0xff] %v8334_v9 }
 0x30c   :  { %6662 = vmatmul.msk.f32.gmra.mxu2 %vm116_vm1, %v7937_v6  ;;  %6693 = vmatmul.msk.f32.gmra.mxu3 %vm116_vm1, %v7914_v34  ;;  %v8340_v34 = vpop.f32.mrf.mxu0 }
 0x30d   :  { %11492 = vst [vmem:[#allocation145_spill] sm:$0xff] %v8340_v34 }
 0x30f   :  { %v1562_v21 = vpop.f32.mrf.mxu2  ;;  %v1711_v56 = vpop.f32.mrf.mxu3 }
 0x310   :  { %v1563_v35 = vadd.f32 %v1562_v21, %v8041_v52  ;;  %v8326_v49 = vadd.f32 %v1711_v56, %v1559_v46  ;;  %v8346_v52 = vpop.f32.mrf.mxu1 }
 0x311   :  { %11493 = vst [vmem:[#allocation146_spill] sm:$0xff] %v8346_v52 }
 0x314   :  { %6663 = vmatmul.msk.f32.gmra.mxu2 %vm116_vm1, %v7960_v55  ;;  %6694 = vmatmul.msk.f32.gmra.mxu3 %vm116_vm1, %v7937_v6 }
 0x317   :  { %v8336_v26 = vpop.f32.mrf.mxu2  ;;  %v1715_v60 = vpop.f32.mrf.mxu3 }
 0x318   :  { %v8338_v0 = vadd.f32 %v1715_v60, %v1563_v35  ;;  %v8356_v35 = vpop.f32.mrf.mxu0  ;;  %v8362_v6 = vpop.f32.mrf.mxu1 }
 0x319   :  { %11494 = vst [vmem:[#allocation147_spill] sm:$0xff] %v8356_v35 }
 0x31a   :  { %11495 = vst [vmem:[#allocation148_spill] sm:$0xff] %v8362_v6 }
 0x31c   :  { %6664 = vmatmul.msk.f32.gmra.mxu2 %vm116_vm1, %v7983_v16  ;;  %6695 = vmatmul.msk.f32.gmra.mxu3 %vm116_vm1, %v7960_v55 }
 0x31f   :  { %v8348_v46 = vpop.f32.mrf.mxu2  ;;  %v8350_v21 = vpop.f32.mrf.mxu3 }
 0x320   :  { %v8370_v7 = vpop.f32.mrf.mxu0 }
 0x321   :  { %11497 = vst [vmem:[#allocation150_spill] sm:$0xff] %v8370_v7 }
 0x324   :  { %6665 = vmatmul.msk.f32.gmra.mxu2 %vm116_vm1, %v8005_v15  ;;  %6696 = vmatmul.msk.f32.gmra.mxu3 %vm116_vm1, %v7983_v16  ;;  %v8374_v16 = vpop.f32.mrf.mxu1 }
 0x325   :  { %11499 = vst [vmem:[#allocation152_spill] sm:$0xff] %v8374_v16 }
 0x327   :  { %v8358_v56 = vpop.f32.mrf.mxu2  ;;  %v8360_v60 = vpop.f32.mrf.mxu3 }
 0x328   :  { %v1197_v51 = vpop.f32.mrf.mxu0 }
 0x32c   :  { %6666 = vmatmul.msk.f32.gmra.mxu2 %vm116_vm1, %v8027_v62  ;;  %6697 = vmatmul.msk.f32.gmra.mxu3 %vm116_vm1, %v8005_v15  ;;  %v1399_v15 = vpop.f32.mrf.mxu1 }
 0x32f   :  { %v8368_v55 = vpop.f32.mrf.mxu2  ;;  %v8372_v14 = vpop.f32.mrf.mxu3 }
 0x330   :  { %11496 = vst [vmem:[#allocation149_spill] sm:$0xff] %v8368_v55  ;;  %v1202_v6 = vpop.f32.mrf.mxu0 }
 0x331   :  { %11498 = vst [vmem:[#allocation151_spill] sm:$0xff] %v8372_v14  ;;  %v1203_v59 = vadd.f32 %v1202_v6, %v8176_v4 }
 0x334   :  { %6667 = vmatmul.msk.f32.gmra.mxu2 %vm116_vm1, %v8049_v53  ;;  %6698 = vmatmul.msk.f32.gmra.mxu3 %vm116_vm1, %v8027_v62  ;;  %v1405_v62 = vpop.f32.mrf.mxu1 }
 0x337   :  { %v8380_v20 = vpop.f32.mrf.mxu2  ;;  %v8382_v33 = vpop.f32.mrf.mxu3 }
 0x338   :  { %11500 = vst [vmem:[#allocation153_spill] sm:$0xff] %v8380_v20 }
 0x339   :  { %11501 = vst [vmem:[#allocation154_spill] sm:$0xff] %v8382_v33 }
 0x33c   :  { %6668 = vmatmul.msk.f32.gmra.mxu2 %vm116_vm1, %v8071_v24  ;;  %6699 = vmatmul.msk.f32.gmra.mxu3 %vm116_vm1, %v8049_v53  ;;  %v1207_v53 = vpop.f32.mrf.mxu0 }
 0x33f   :  { %v8388_v7 = vpop.f32.mrf.mxu2  ;;  %v8390_v16 = vpop.f32.mrf.mxu3 }
 0x340   :  { %11502 = vst [vmem:[#allocation155_spill] sm:$0xff] %v8388_v7 }
 0x341   :  { %11503 = vst [vmem:[#allocation156_spill] sm:$0xff] %v8390_v16  ;;  %v1411_v16 = vpop.f32.mrf.mxu1 }
 0x344   :  { %6669 = vmatmul.msk.f32.gmra.mxu2 %vm116_vm1, %v8093_v22  ;;  %6700 = vmatmul.msk.f32.gmra.mxu3 %vm116_vm1, %v8071_v24  ;;  %v1212_v34 = vpop.f32.mrf.mxu0 }
 0x347   :  { %v8396_v35 = vpop.f32.mrf.mxu2  ;;  %v8398_v43 = vpop.f32.mrf.mxu3 }
 0x348   :  { %11504 = vst [vmem:[#allocation157_spill] sm:$0xff] %v8396_v35 }
 0x349   :  { %11505 = vst [vmem:[#allocation158_spill] sm:$0xff] %v8398_v43  ;;  %v1198_v43 = vadd.f32 %v1197_v51, %v8170_v23  ;;  %v1417_v61 = vpop.f32.mrf.mxu1  ;;  %v1213_v23 = vadd.f32 %v1212_v34, %v8188_v40 }
 0x34b   :  { %v1400_v20 = vadd.f32 %v1399_v15, %v1198_v43 }
 0x34c   :  { %6670 = vmatmul.msk.f32.gmra.mxu2 %vm116_vm1, %v8115_v44  ;;  %6701 = vmatmul.msk.f32.gmra.mxu3 %vm116_vm1, %v8093_v22  ;;  %v1217_v5 = vpop.f32.mrf.mxu0 }
 0x34f   :  { %v8404_v7 = vpop.f32.mrf.mxu2  ;;  %v8406_v52 = vpop.f32.mrf.mxu3 }
 0x350   :  { %11506 = vst [vmem:[#allocation159_spill] sm:$0xff] %v8404_v7 }
 0x351   :  { %11507 = vst [vmem:[#allocation160_spill] sm:$0xff] %v8406_v52  ;;  %v1423_v52 = vpop.f32.mrf.mxu1 }
 0x354   :  { %6702 = vmatmul.msk.f32.gmra.mxu3 %vm116_vm1, %v8115_v44  ;;  %v1406_v44 = vadd.f32 %v1405_v62, %v1203_v59  ;;  %v1418_v59 = vadd.f32 %v1417_v61, %v1213_v23 }
 0x357   :  { %v1598_v24 = vpop.f32.mrf.mxu2  ;;  %v8410_v35 = vpop.f32.mrf.mxu3 }
 0x358   :  { %11508 = vst [vmem:[#allocation161_spill] sm:$0xff] %v8410_v35  ;;  %v1599_v9 = vadd.f32 %v1598_v24, %v1400_v20  ;;  %v1208_v35 = vadd.f32 %v1207_v53, %v8182_v57  ;;  %v1222_v20 = vpop.f32.mrf.mxu0 }
 0x359   :  { %v1429_v24 = vpop.f32.mrf.mxu1  ;;  %v1223_v34 = vadd.f32 %v1222_v20, %v8200_v28 }
 0x35a   :  { %v1412_v15 = vadd.f32 %v1411_v16, %v1208_v35 }
 0x35b   :  { %v1430_v61 = vadd.f32 %v1429_v24, %v1223_v34 }
 0x35f   :  { %v1602_v33 = vpop.f32.mrf.mxu2  ;;  %v1751_v22 = vpop.f32.mrf.mxu3 }
 0x360   :  { %v1752_v7 = vadd.f32 %v1751_v22, %v1599_v9  ;;  %v1603_v55 = vadd.f32 %v1602_v33, %v1406_v44 }
 0x362   :  { %1830 = vrot.lane.b32.xlu0 %v1752_v7, %s7062_s8  ;;  %v1227_v7 = vpop.f32.mrf.mxu0 }
 0x367   :  { %v1606_v29 = vpop.f32.mrf.mxu2  ;;  %v1755_v14 = vpop.f32.mrf.mxu3 }
 0x368   :  { %v1756_v51 = vadd.f32 %v1755_v14, %v1603_v55  ;;  %v1607_v43 = vadd.f32 %v1606_v29, %v1412_v15  ;;  %v1218_v14 = vadd.f32 %v1217_v5, %v8194_v13  ;;  %v1435_v55 = vpop.f32.mrf.mxu1  ;;  %v1228_v5 = vadd.f32 %v1227_v7, %v8206_v19 }
 0x36a   :  { %1832 = vrot.lane.b32.xlu1 %v1756_v51, %s7062_s8  ;;  %v1424_v16 = vadd.f32 %v1423_v52, %v1218_v14  ;;  %v1232_v9 = vpop.f32.mrf.mxu0  ;;  %v1436_v23 = vadd.f32 %v1435_v55, %v1228_v5 }
 0x36b   :  { %v1233_v28 = vadd.f32 %v1232_v9, %v8212_v39 }
 0x36f   :  { %v1610_v6 = vpop.f32.mrf.mxu2  ;;  %v1759_v22 = vpop.f32.mrf.mxu3 }
 0x370   :  { %v1760_v4 = vadd.f32 %v1759_v22, %v1607_v43  ;;  %v1611_v33 = vadd.f32 %v1610_v6, %v1418_v59  ;;  %v1441_v51 = vpop.f32.mrf.mxu1 }
 0x372   :  { %1834 = vrot.lane.b32.xlu2 %v1760_v4, %s7062_s8  ;;  %v1237_v22 = vpop.f32.mrf.mxu0 }
 0x373   :  { %v1238_v7 = vadd.f32 %v1237_v22, %v8218_v42  ;;  %v1902_v42 = vld [vmem:[%s11072_s3 + $0x88] sm:$0xff] }
 0x374   :  { %1961 = vmatpush.msra.mxu0 %v1902_v42 }
 0x377   :  { %v1614_v62 = vpop.f32.mrf.mxu2  ;;  %v1763_v44 = vpop.f32.mrf.mxu3 }
 0x378   :  { %v1764_v53 = vadd.f32 %v1763_v44, %v1611_v33  ;;  %v1615_v57 = vadd.f32 %v1614_v62, %v1424_v16  ;;  %v1447_v52 = vpop.f32.mrf.mxu1  ;;  %v1442_v62 = vadd.f32 %v1441_v51, %v1233_v28 }
 0x379   :  { %v1448_v55 = vadd.f32 %v1447_v52, %v1238_v7  ;;  %v1900_v52 = vld [vmem:[%s11072_s3 + $0x78] sm:$0xff] }
 0x37a   :  { %1836 = vrot.lane.b32.xlu0 %v1764_v53, %s7062_s8  ;;  %v1242_v24 = vpop.f32.mrf.mxu0 }
 0x37b   :  { %v1243_v9 = vadd.f32 %v1242_v24, %v8224_v10  ;;  %v1901_v10 = vld [vmem:[%s11072_s3 + $0x80] sm:$0xff] }
 0x37c   :  { %1962 = vmatpush.msra.mxu0 %v1901_v10 }
 0x37e   :  { %1963 = vmatpush.msra.mxu0 %v1900_v52 }
 0x37f   :  { %v1618_v29 = vpop.f32.mrf.mxu2  ;;  %v1767_v35 = vpop.f32.mrf.mxu3 }
 0x380   :  { %v1768_v40 = vadd.f32 %v1767_v35, %v1615_v57  ;;  %v1619_v15 = vadd.f32 %v1618_v29, %v1430_v61  ;;  %v1453_v44 = vpop.f32.mrf.mxu1 }
 0x381   :  { %v1454_v51 = vadd.f32 %v1453_v44, %v1243_v9 }
 0x382   :  { %1838 = vrot.lane.b32.xlu1 %v1768_v40, %s7062_s8  ;;  %v1247_v57 = vpop.f32.mrf.mxu0 }
 0x383   :  { %v1248_v5 = vadd.f32 %v1247_v57, %v8230_v3 }
 0x387   :  { %v1622_v43 = vpop.f32.mrf.mxu2  ;;  %v1771_v6 = vpop.f32.mrf.mxu3 }
 0x388   :  { %v1772_v13 = vadd.f32 %v1771_v6, %v1619_v15  ;;  %v1623_v4 = vadd.f32 %v1622_v43, %v1436_v23  ;;  %v1459_v39 = vpop.f32.mrf.mxu1 }
 0x389   :  { %v1460_v23 = vadd.f32 %v1459_v39, %v1248_v5 }
 0x38a   :  { %1840 = vrot.lane.b32.xlu2 %v1772_v13, %s7062_s8  ;;  %v1252_v43 = vpop.f32.mrf.mxu0 }
 0x38f   :  { %v1626_v59 = vpop.f32.mrf.mxu2  ;;  %v1775_v33 = vpop.f32.mrf.mxu3 }
 0x390   :  { %v1776_v20 = vadd.f32 %v1775_v33, %v1623_v4  ;;  %v1627_v14 = vadd.f32 %v1626_v59, %v1442_v62  ;;  %v1465_v22 = vpop.f32.mrf.mxu1  ;;  %v1899_v4 = vld [vmem:[%s11072_s3 + $0x70] sm:$0xff]  ;;  %v1898_v33 = vld [vmem:[%s11072_s3 + $0x68] sm:$0xff]  ;;  %v1897_v62 = vld [vmem:[%s11072_s3 + $0x60] sm:$0xff] }
 0x391   :  { %1964 = vmatpush.msra.mxu0 %v1899_v4 }
 0x392   :  { %1842 = vrot.lane.b32.xlu0 %v1776_v20, %s7062_s8  ;;  %v1253_v20 = vadd.f32 %v1252_v43, %v8236_v63  ;;  %v1257_v44 = vpop.f32.mrf.mxu0  ;;  %v1895_v63 = vld [vmem:[%s11072_s3 + $0x50] sm:$0xff] }
 0x393   :  { %1965 = vmatpush.msra.mxu0 %v1898_v33  ;;  %v1258_v57 = vadd.f32 %v1257_v44, %v8242_v27 }
 0x395   :  { %1966 = vmatpush.msra.mxu0 %v1897_v62 }
 0x397   :  { %v1630_v53 = vpop.f32.mrf.mxu2  ;;  %v1779_v19 = vpop.f32.mrf.mxu3 }
 0x398   :  { %v1780_v16 = vadd.f32 %v1779_v19, %v1627_v14  ;;  %v1631_v29 = vadd.f32 %v1630_v53, %v1448_v55  ;;  %v1896_v14 = vld [vmem:[%s11072_s3 + $0x58] sm:$0xff]  ;;  %v1471_v53 = vpop.f32.mrf.mxu1  ;;  %v1466_v19 = vadd.f32 %v1465_v22, %v1253_v20 }
 0x399   :  { %1967 = vmatpush.msra.mxu0 %v1896_v14 }
 0x39a   :  { %1844 = vrot.lane.b32.xlu1 %v1780_v16, %s7062_s8 }
 0x39b   :  { %1968 = vmatpush.msra.mxu0 %v1895_v63 }
 0x39f   :  { %v1634_v35 = vpop.f32.mrf.mxu2  ;;  %v1783_v34 = vpop.f32.mrf.mxu3 }
 0x3a0   :  { %v1784_v40 = vadd.f32 %v1783_v34, %v1631_v29  ;;  %v1635_v61 = vadd.f32 %v1634_v35, %v1454_v51  ;;  %v1262_v35 = vpop.f32.mrf.mxu0  ;;  %v1472_v34 = vadd.f32 %v1471_v53, %v1258_v57  ;;  %v1477_v39 = vpop.f32.mrf.mxu1 }
 0x3a2   :  { %1846 = vrot.lane.b32.xlu2 %v1784_v40, %s7062_s8 }
 0x3a7   :  { %v1638_v15 = vpop.f32.mrf.mxu2  ;;  %v1787_v6 = vpop.f32.mrf.mxu3 }
 0x3a8   :  { %v1788_v13 = vadd.f32 %v1787_v6, %v1635_v61  ;;  %v1639_v3 = vadd.f32 %v1638_v15, %v1460_v23  ;;  %v1263_v61 = vadd.f32 %v1262_v35, %v8248_v36  ;;  %v1267_v43 = vpop.f32.mrf.mxu0  ;;  %v1483_v10 = vpop.f32.mrf.mxu1 }
 0x3a9   :  { %v1268_v27 = vadd.f32 %v1267_v43, %v8254_v45 }
 0x3aa   :  { %1848 = vrot.lane.b32.xlu0 %v1788_v13, %s7062_s8  ;;  %v1478_v42 = vadd.f32 %v1477_v39, %v1263_v61 }
 0x3ab   :  { %v1484_v52 = vadd.f32 %v1483_v10, %v1268_v27  ;;  %v11514_v27 = vld [vmem:[#allocation154_spill] sm:$0xff] }
 0x3af   :  { %v1642_v59 = vpop.f32.mrf.mxu2  ;;  %v1791_v28 = vpop.f32.mrf.mxu3 }
 0x3b0   :  { %v1792_v24 = vadd.f32 %v1791_v28, %v1639_v3  ;;  %v1643_v7 = vadd.f32 %v1642_v59, %v1466_v19  ;;  %v1272_v4 = vpop.f32.mrf.mxu0  ;;  %v1489_v33 = vpop.f32.mrf.mxu1 }
 0x3b1   :  { %v1273_v36 = vadd.f32 %v1272_v4, %v8261_v25  ;;  %v11517_v4 = vld [vmem:[#allocation138_spill] sm:$0xff] }
 0x3b2   :  { %1850 = vrot.lane.b32.xlu1 %v1792_v24, %s7062_s8 }
 0x3b3   :  { %v1490_v20 = vadd.f32 %v1489_v33, %v1273_v36 }
 0x3b7   :  { %v1646_v16 = vpop.f32.mrf.mxu2  ;;  %v1795_v55 = vpop.f32.mrf.mxu3 }
 0x3b8   :  { %v1796_v29 = vadd.f32 %v1795_v55, %v1643_v7  ;;  %v1647_v9 = vadd.f32 %v1646_v16, %v1472_v34 }
 0x3ba   :  { %1852 = vrot.lane.b32.xlu2 %v1796_v29, %s7062_s8 }
 0x3bf   :  { %v1650_v40 = vpop.f32.mrf.mxu2  ;;  %v1799_v51 = vpop.f32.mrf.mxu3 }
 0x3c0   :  { %v1800_v15 = vadd.f32 %v1799_v51, %v1647_v9  ;;  %v1651_v6 = vadd.f32 %v1650_v40, %v1478_v42  ;;  %v1163_v9 = vadd.f32 %v8288_v18, %v8073_v48 }
 0x3c2   :  { %1854 = vrot.lane.b32.xlu0 %v1800_v15, %s7062_s8 }
 0x3c7   :  { %v1803_v5 = vpop.f32.mrf.mxu3  ;;  %v1654_v22 = vpop.f32.mrf.mxu2 }
 0x3c8   :  { %v1804_v13 = vadd.f32 %v1803_v5, %v1651_v6  ;;  %v1655_v23 = vadd.f32 %v1654_v22, %v1484_v52  ;;  %v11512_v6 = vld [vmem:[#allocation135_spill] sm:$0xff]  ;;  %v11516_v22 = vld [vmem:[#allocation153_spill] sm:$0xff] }
 0x3c9   :  { %v11513_v5 = vld [vmem:[#allocation143_spill] sm:$0xff] }
 0x3ca   :  { %1856 = vrot.lane.b32.xlu1 %v1804_v13, %s7062_s8 }
 0x3cc   :  { %v1835_v19 = vpop.permute.xlu2 %1834 }
 0x3cf   :  { %v1807_v3 = vpop.f32.mrf.mxu3  ;;  %v1658_v28 = vpop.f32.mrf.mxu2 }
 0x3d0   :  { %v1808_v59 = vadd.f32 %v1807_v3, %v1655_v23  ;;  %v1659_v62 = vadd.f32 %v1658_v28, %v1490_v20  ;;  %v2036_v23 = vld [vmem:[%s11072_s3 + $0xa0] sm:$0xff]  ;;  %v11518_v3 = vld [vmem:[#allocation145_spill] sm:$0xff] }
 0x3d1   :  { %v1183_v36 = vadd.f32 %v11518_v3, %v11517_v4  ;;  %v2035_v20 = vld [vmem:[%s11072_s3 + $0x98] sm:$0xff] }
 0x3d2   :  { %1858 = vrot.lane.b32.xlu2 %v1808_v59, %s7062_s8  ;;  %v11519_v59 = vld [vmem:[#allocation156_spill] sm:$0xff] }
 0x3d4   :  { %v1831_v24 = vpop.permute.xlu0 %1830 }
 0x3d5   :  { %v1879_v45 = vsel %vm1878_vm4, %v8268_v1, %v1831_v24  ;;  %v1881_v1 = vsel %vm1878_vm4, %v8286_v12, %v1835_v19  ;;  %v11523_v19 = vld [vmem:[#allocation147_spill] sm:$0xff] }
 0x3d6   :  { %6703 = vmatmul.msk.f32.vlgmr.msra.gmra.mxu0 %vm116_vm1, %v1879_v45  ;;  %v2034_v45 = vld [vmem:[%s11072_s3 + $0x90] sm:$0xff] }
 0x3d7   :  { %v1811_v44 = vpop.f32.mrf.mxu3 }
 0x3d8   :  { %v1812_v14 = vadd.f32 %v1811_v44, %v1659_v62  ;;  %v11520_v62 = vld [vmem:[#allocation146_spill] sm:$0xff] }
 0x3d9   :  { %v1382_v44 = vadd.f32 %v11520_v62, %v1183_v36 }
 0x3da   :  { %2767 = vrot.lane.b32.xlu2 %v7388_v32, %s7062_s8  ;;  %1860 = vrot.lane.b32.xlu0 %v1812_v14, %s7062_s8  ;;  %v11521_v14 = vld [vmem:[#allocation155_spill] sm:$0xff] }
 0x3dc   :  { %v1833_v25 = vpop.permute.xlu1 %1832 }
 0x3dd   :  { %v1880_v53 = vsel %vm1878_vm4, %v8275_v50, %v1833_v25  ;;  %v1587_v25 = vadd.f32 %v11521_v14, %v1382_v44 }
 0x3de   :  { %6704 = vmatmul.msk.f32.gmra.mxu0 %vm116_vm1, %v1880_v53  ;;  %v11522_v53 = vld [vmem:[#allocation140_spill] sm:$0xff] }
 0x3e4   :  { %v1841_v50 = vpop.permute.xlu2 %1840 }
 0x3e5   :  { %v1884_v57 = vsel %vm1878_vm4, %v8317_v11, %v1841_v50  ;;  %v11525_v50 = vld [vmem:[#allocation148_spill] sm:$0xff] }
 0x3e6   :  { %6705 = vmatmul.msk.f32.gmra.mxu0 %vm116_vm1, %v1881_v1  ;;  %v1188_v1 = vadd.f32 %v11523_v19, %v11522_v53 }
 0x3ec   :  { %v1837_v63 = vpop.permute.xlu0 %1836 }
 0x3ed   :  { %v1882_v7 = vsel %vm1878_vm4, %v8297_v38, %v1837_v63  ;;  %v1158_v38 = vadd.f32 %v8277_v54, %v8051_v30  ;;  %v1358_v54 = vadd.f32 %v8294_v41, %v1163_v9  ;;  %v11509_v41 = vld [vmem:[#allocation151_spill] sm:$0xff]  ;;  %v11524_v63 = vld [vmem:[#allocation158_spill] sm:$0xff] }
 0x3ee   :  { %6706 = vmatmul.msk.f32.gmra.mxu0 %vm116_vm1, %v1882_v7  ;;  %v1740_v7 = vadd.f32 %v11524_v63, %v1587_v25 }
 0x3ef   :  { %v1352_v34 = vadd.f32 %v8283_v37, %v1158_v38  ;;  %v1571_v30 = vadd.f32 %v8348_v46, %v1358_v54  ;;  %v11531_v54 = vld [vmem:[#allocation159_spill] sm:$0xff] }
 0x3f1   :  { %v1567_v11 = vadd.f32 %v8336_v26, %v1352_v34  ;;  %v1724_v37 = vadd.f32 %v8360_v60, %v1571_v30  ;;  %v11511_v60 = vld [vmem:[#allocation149_spill] sm:$0xff] }
 0x3f4   :  { %v1839_v16 = vpop.permute.xlu1 %1838 }
 0x3f5   :  { %v1883_v55 = vsel %vm1878_vm4, %v8308_v58, %v1839_v16 }
 0x3f6   :  { %6707 = vmatmul.msk.f32.gmra.mxu0 %vm116_vm1, %v1883_v55 }
 0x3fc   :  { %v1847_v39 = vpop.permute.xlu2 %1846 }
 0x3fe   :  { %6708 = vmatmul.msk.f32.gmra.mxu0 %vm116_vm1, %v1884_v57  ;;  %v1388_v57 = vadd.f32 %v11525_v50, %v1188_v1 }
 0x404   :  { %v1843_v12 = vpop.permute.xlu0 %1842 }
 0x405   :  { %v1885_v29 = vsel %vm1878_vm4, %v8326_v49, %v1843_v12  ;;  %v1720_v49 = vadd.f32 %v8350_v21, %v1567_v11  ;;  %v1173_v21 = vadd.f32 %v8314_v17, %v8117_v8  ;;  %v2037_v8 = vld [vmem:[%s11072_s3 + $0xa8] sm:$0xff]  ;;  %v11515_v17 = vld [vmem:[#allocation144_spill] sm:$0xff]  ;;  %v11526_v12 = vld [vmem:[#allocation157_spill] sm:$0xff] }
 0x406   :  { %6709 = vmatmul.msk.f32.gmra.mxu0 %vm116_vm1, %v1885_v29  ;;  %2100 = vmatpush.msra.mxu1 %v2037_v8  ;;  %v1591_v29 = vadd.f32 %v11526_v12, %v1388_v57  ;;  %v11529_v11 = vld [vmem:[#allocation160_spill] sm:$0xff] }
 0x407   :  { %v1887_v40 = vsel %vm1878_vm4, %v1720_v49, %v1847_v39  ;;  %v11530_v49 = vld [vmem:[#allocation152_spill] sm:$0xff] }
 0x408   :  { %2101 = vmatpush.msra.mxu1 %v2036_v23  ;;  %v1744_v39 = vadd.f32 %v11529_v11, %v1591_v29 }
 0x40a   :  { %2102 = vmatpush.msra.mxu1 %v2035_v20 }
 0x40c   :  { %v1845_v35 = vpop.permute.xlu1 %1844  ;;  %2103 = vmatpush.msra.mxu1 %v2034_v45 }
 0x40d   :  { %v1886_v58 = vsel %vm1878_vm4, %v8338_v0, %v1845_v35  ;;  %v1168_v0 = vadd.f32 %v8303_v2, %v8095_v31  ;;  %v11510_v31 = vld [vmem:[#allocation142_spill] sm:$0xff]  ;;  %v11527_v35 = vld [vmem:[#allocation141_spill] sm:$0xff] }
 0x40e   :  { %6710 = vmatmul.msk.f32.gmra.mxu0 %vm116_vm1, %v1886_v58  ;;  %v1370_v2 = vadd.f32 %v11510_v31, %v1173_v21  ;;  %v11528_v58 = vld [vmem:[#allocation150_spill] sm:$0xff] }
 0x40f   :  { %v1364_v48 = vadd.f32 %v8306_v47, %v1168_v0  ;;  %v1178_v47 = vadd.f32 %v11513_v5, %v11512_v6  ;;  %v1193_v34 = vadd.f32 %v11528_v58, %v11527_v35  ;;  %v11532_v0 = vld [vmem:[#allocation161_spill] sm:$0xff] }
 0x410   :  { %v1579_v42 = vadd.f32 %v11511_v60, %v1370_v2 }
 0x411   :  { %v1575_v18 = vadd.f32 %v8358_v56, %v1364_v48  ;;  %v1376_v10 = vadd.f32 %v11515_v17, %v1178_v47  ;;  %v7004_v48 = vld [vmem:[%s11075_s4 + $0x2] ss:$0 sm:$0xff] }
 0x412   :  { %v1732_v56 = vadd.f32 %v11514_v27, %v1579_v42 }
 0x413   :  { %v1728_v61 = vadd.f32 %v11509_v41, %v1575_v18  ;;  %v1583_v52 = vadd.f32 %v11516_v22, %v1376_v10 }
 0x414   :  { %v1853_v43 = vpop.permute.xlu2 %1852 }
 0x415   :  { %v1890_v13 = vsel %vm1878_vm4, %v1732_v56, %v1853_v43  ;;  %v1736_v33 = vadd.f32 %v11519_v59, %v1583_v52 }
 0x416   :  { %6711 = vmatmul.msk.f32.gmra.mxu0 %vm116_vm1, %v1887_v40  ;;  %v1394_v40 = vadd.f32 %v11530_v49, %v1193_v34 }
 0x418   :  { %v1595_v30 = vadd.f32 %v11531_v54, %v1394_v40 }
 0x41c   :  { %v1849_v26 = vpop.permute.xlu0 %1848 }
 0x41d   :  { %v1888_v51 = vsel %vm1878_vm4, %v1724_v37, %v1849_v26  ;;  %v1748_v37 = vadd.f32 %v11532_v0, %v1595_v30 }
 0x41e   :  { %6712 = vmatmul.msk.f32.gmra.mxu0 %vm116_vm1, %v1888_v51 }
 0x424   :  { %v1851_v46 = vpop.permute.xlu1 %1850 }
 0x425   :  { %v1889_v15 = vsel %vm1878_vm4, %v1728_v61, %v1851_v46 }
 0x426   :  { %6713 = vmatmul.msk.f32.gmra.mxu0 %vm116_vm1, %v1889_v15 }
 0x42c   :  { %v1859_v38 = vpop.permute.xlu2 %1858 }
 0x42d   :  { %v1893_v9 = vsel %vm1878_vm4, %v1744_v39, %v1859_v38 }
 0x42e   :  { %6714 = vmatmul.msk.f32.gmra.mxu0 %vm116_vm1, %v1890_v13 }
 0x434   :  { %v1855_v28 = vpop.permute.xlu0 %1854 }
 0x435   :  { %v1891_v24 = vsel %vm1878_vm4, %v1736_v33, %v1855_v28 }
 0x436   :  { %6715 = vmatmul.msk.f32.gmra.mxu0 %vm116_vm1, %v1891_v24 }
 0x43c   :  { %v1857_v16 = vpop.permute.xlu1 %1856 }
 0x43d   :  { %v1892_v55 = vsel %vm1878_vm4, %v1740_v7, %v1857_v16 }
 0x43e   :  { %6716 = vmatmul.msk.f32.gmra.mxu0 %vm116_vm1, %v1892_v55 }
 0x446   :  { %6717 = vmatmul.msk.f32.gmra.mxu0 %vm116_vm1, %v1893_v9 }
 0x44c   :  { %v1861_v26 = vpop.permute.xlu0 %1860 }
 0x44d   :  { %v1894_v51 = vsel %vm1878_vm4, %v1748_v37, %v1861_v26 }
 0x44e   :  { %6718 = vmatmul.msk.f32.gmra.mxu0 %vm116_vm1, %v1894_v51 }
 0x453   :  { %v1970_v18 = vpop.f32.mrf.mxu0 }
 0x454   :  { %v1971_v21 = vadd.f32 %v7004_v48, %v1970_v18 }
 0x456   :  { %v2018_v41 = vmax.f32 %v1971_v21, 0.0 }
 0x458   :  { %6719 = vmatmul.msk.f32.vlgmr.msra.gmra.mxu1 %vm1878_vm4, %v2018_v41 }
 0x45b   :  { %v1973_v61 = vpop.f32.mrf.mxu0 }
 0x45c   :  { %v1974_v46 = vadd.f32 %v7004_v48, %v1973_v61 }
 0x45e   :  { %v2019_v15 = vmax.f32 %v1974_v46, 0.0 }
 0x460   :  { %6720 = vmatmul.msk.f32.gmra.mxu1 %vm1878_vm4, %v2019_v15 }
 0x463   :  { %v1976_v31 = vpop.f32.mrf.mxu0 }
 0x464   :  { %v1977_v2 = vadd.f32 %v7004_v48, %v1976_v31 }
 0x466   :  { %v2020_v60 = vmax.f32 %v1977_v2, 0.0 }
 0x468   :  { %6721 = vmatmul.msk.f32.gmra.mxu1 %vm1878_vm4, %v2020_v60 }
 0x46b   :  { %v1979_v42 = vpop.f32.mrf.mxu0 }
 0x46c   :  { %v1980_v43 = vadd.f32 %v7004_v48, %v1979_v42 }
 0x46e   :  { %v2021_v6 = vmax.f32 %v1980_v43, 0.0 }
 0x470   :  { %6722 = vmatmul.msk.f32.gmra.mxu1 %vm1878_vm4, %v2021_v6 }
 0x473   :  { %v1982_v5 = vpop.f32.mrf.mxu0 }
 0x474   :  { %v1983_v47 = vadd.f32 %v7004_v48, %v1982_v5 }
 0x476   :  { %v2022_v27 = vmax.f32 %v1983_v47, 0.0 }
 0x478   :  { %6723 = vmatmul.msk.f32.gmra.mxu1 %vm1878_vm4, %v2022_v27 }
 0x47b   :  { %v1985_v56 = vpop.f32.mrf.mxu0 }
 0x47c   :  { %v1986_v13 = vadd.f32 %v7004_v48, %v1985_v56 }
 0x47e   :  { %v2023_v8 = vmax.f32 %v1986_v13, 0.0 }
 0x480   :  { %6724 = vmatmul.msk.f32.gmra.mxu1 %vm1878_vm4, %v2023_v8 }
 0x483   :  { %v1988_v17 = vpop.f32.mrf.mxu0 }
 0x484   :  { %v1989_v10 = vadd.f32 %v7004_v48, %v1988_v17 }
 0x486   :  { %v2024_v22 = vmax.f32 %v1989_v10, 0.0 }
 0x488   :  { %6725 = vmatmul.msk.f32.gmra.mxu1 %vm1878_vm4, %v2024_v22 }
 0x48b   :  { %v1991_v52 = vpop.f32.mrf.mxu0 }
 0x48c   :  { %v1992_v23 = vadd.f32 %v7004_v48, %v1991_v52 }
 0x48e   :  { %v2025_v4 = vmax.f32 %v1992_v23, 0.0 }
 0x490   :  { %6726 = vmatmul.msk.f32.gmra.mxu1 %vm1878_vm4, %v2025_v4 }
 0x493   :  { %v1994_v3 = vpop.f32.mrf.mxu0 }
 0x494   :  { %v1995_v36 = vadd.f32 %v7004_v48, %v1994_v3 }
 0x496   :  { %v2026_v59 = vmax.f32 %v1995_v36, 0.0 }
 0x498   :  { %6727 = vmatmul.msk.f32.gmra.mxu1 %vm1878_vm4, %v2026_v59 }
 0x49b   :  { %v1997_v33 = vpop.f32.mrf.mxu0 }
 0x49c   :  { %v1998_v28 = vadd.f32 %v7004_v48, %v1997_v33 }
 0x49e   :  { %v2027_v20 = vmax.f32 %v1998_v28, 0.0 }
 0x4a0   :  { %6728 = vmatmul.msk.f32.gmra.mxu1 %vm1878_vm4, %v2027_v20 }
 0x4a3   :  { %v2000_v24 = vpop.f32.mrf.mxu0 }
 0x4a4   :  { %v2001_v45 = vadd.f32 %v7004_v48, %v2000_v24 }
 0x4a6   :  { %v2028_v62 = vmax.f32 %v2001_v45, 0.0 }
 0x4a8   :  { %6729 = vmatmul.msk.f32.gmra.mxu1 %vm1878_vm4, %v2028_v62 }
 0x4ab   :  { %v2003_v44 = vpop.f32.mrf.mxu0 }
 0x4ac   :  { %v2004_v14 = vadd.f32 %v7004_v48, %v2003_v44 }
 0x4ae   :  { %v2029_v25 = vmax.f32 %v2004_v14, 0.0 }
 0x4b0   :  { %6730 = vmatmul.msk.f32.gmra.mxu1 %vm1878_vm4, %v2029_v25 }
 0x4b3   :  { %v2006_v53 = vpop.f32.mrf.mxu0 }
 0x4b4   :  { %v2007_v19 = vadd.f32 %v7004_v48, %v2006_v53 }
 0x4b6   :  { %v2030_v1 = vmax.f32 %v2007_v19, 0.0 }
 0x4b8   :  { %6731 = vmatmul.msk.f32.gmra.mxu1 %vm1878_vm4, %v2030_v1 }
 0x4bb   :  { %v2009_v63 = vpop.f32.mrf.mxu0 }
 0x4bc   :  { %v2010_v7 = vadd.f32 %v7004_v48, %v2009_v63 }
 0x4be   :  { %v2031_v16 = vmax.f32 %v2010_v7, 0.0 }
 0x4c0   :  { %6732 = vmatmul.msk.f32.gmra.mxu1 %vm1878_vm4, %v2031_v16 }
 0x4c3   :  { %v2012_v55 = vpop.f32.mrf.mxu0 }
 0x4c4   :  { %v2013_v50 = vadd.f32 %v7004_v48, %v2012_v55 }
 0x4c6   :  { %v2032_v57 = vmax.f32 %v2013_v50, 0.0 }
 0x4c8   :  { %6733 = vmatmul.msk.f32.gmra.mxu1 %vm1878_vm4, %v2032_v57 }
 0x4cb   :  { %v2015_v12 = vpop.f32.mrf.mxu0 }
 0x4cc   :  { %v2016_v29 = vadd.f32 %v7004_v48, %v2015_v12  ;;  %v8590_v48 = vld [vmem:[%s11075_s4 + $0x3] ss:$0 sm:$0xff] }
 0x4ce   :  { %v2033_v38 = vmax.f32 %v2016_v29, 0.0 }
 0x4d0   :  { %6734 = vmatmul.msk.f32.gmra.mxu1 %vm1878_vm4, %v2033_v38 }
 0x4d5   :  { %v8581_v35 = vpop.f32.mrf.mxu1 }
 0x4dd   :  { %v8583_v58 = vpop.f32.mrf.mxu1 }
 0x4e5   :  { %v8585_v34 = vpop.f32.mrf.mxu1 }
 0x4ed   :  { %v2114_v11 = vpop.f32.mrf.mxu1 }
 0x4ee   :  { %v2115_v57 = vadd.f32 %v8590_v48, %v2114_v11  ;;  %v11543_v11 = vlaneseq }
 0x4f5   :  { %v2117_v39 = vpop.f32.mrf.mxu1 }
 0x4f6   :  { %v2118_v19 = vadd.f32 %v8590_v48, %v2117_v39 }
 0x4fd   :  { %v2120_v9 = vpop.f32.mrf.mxu1 }
 0x4fe   :  { %v2121_v45 = vadd.f32 %v8590_v48, %v2120_v9 }
 0x500   :  { %v8684_v12 = vmax.f32 %v2121_v45, 0.0 }
 0x505   :  { %v2123_v49 = vpop.f32.mrf.mxu1 }
 0x506   :  { %v2124_v36 = vadd.f32 %v8590_v48, %v2123_v49 }
 0x508   :  { %v8670_v1 = vmax.f32 %v2124_v36, 0.0 }
 0x50a   :  { %11542 = vst [vmem:[#allocation145_spill] sm:$0xff] %v8670_v1 }
 0x50d   :  { %v2126_v40 = vpop.f32.mrf.mxu1 }
 0x50e   :  { %v2127_v22 = vadd.f32 %v8590_v48, %v2126_v40  ;;  %v8698_v40 = vshrl.u32 %v11543_v11, 7 }
 0x510   :  { %v8656_v62 = vmax.f32 %v2127_v22, 0.0 }
 0x512   :  { %11541 = vst [vmem:[#allocation138_spill] sm:$0xff] %v8656_v62  ;;  %v8688_v29 = vand.u32 4294901760, %v8656_v62 }
 0x515   :  { %v2129_v54 = vpop.f32.mrf.mxu1 }
 0x516   :  { %v2130_v56 = vadd.f32 %v8590_v48, %v2129_v54  ;;  %v8703_v54 = vld [vmem:[%s11076_s1 + $0x1] ss:$0 sm:$0xff] }
 0x517   :  { %vm8737_vm5 = vcmp.eq.s32.totalorder %v8698_v40, %v8703_v54 }
 0x518   :  { %v8639_v59 = vmax.f32 %v2130_v56, 0.0 }
 0x51a   :  { %11540 = vst [vmem:[#allocation153_spill] sm:$0xff] %v8639_v59  ;;  %v8673_v63 = vand.u32 4294901760, %v8639_v59 }
 0x51d   :  { %v2132_v30 = vpop.f32.mrf.mxu1 }
 0x51e   :  { %v2133_v43 = vadd.f32 %v8590_v48, %v2132_v30  ;;  %v2112_v30 = vadd.f32 %v8590_v48, %v8585_v34  ;;  %v2109_v34 = vadd.f32 %v8590_v48, %v8583_v58 }
 0x520   :  { %v8626_v52 = vmax.f32 %v2133_v43, 0.0  ;;  %v8743_v56 = vmax.f32 %v2112_v30, 0.0 }
 0x522   :  { %11539 = vst [vmem:[#allocation144_spill] sm:$0xff] %v8626_v52  ;;  %v8659_v44 = vand.u32 4294901760, %v8626_v52 }
 0x524   :  { %v8692_v38 = vsub.f32 %v8626_v52, %v8659_v44 }
 0x525   :  { %v2135_v0 = vpop.f32.mrf.mxu1 }
 0x526   :  { %v2136_v2 = vadd.f32 %v8590_v48, %v2135_v0  ;;  %v8707_v0 = vmax.f32 %v2118_v19, 0.0  ;;  %v2304_v58 = vand.u32 4294901760, %v8692_v38  ;;  %v11547_v19 = vmov 0.0  }
 0x528   :  { %v8614_v13 = vmax.f32 %v2136_v2, 0.0  ;;  %v8747_v22 = vand.u32 4294901760, %v8707_v0 }
 0x52a   :  { %11537 = vst [vmem:[#allocation143_spill] sm:$0xff] %v8614_v13  ;;  %v8649_v20 = vand.u32 4294901760, %v8614_v13  ;;  %v8781_v11 = vsub.f32 %v8707_v0, %v8747_v22 }
 0x52c   :  { %v8681_v50 = vsub.f32 %v8614_v13, %v8649_v20 }
 0x52d   :  { %v2138_v37 = vpop.f32.mrf.mxu1 }
 0x52e   :  { %v2139_v15 = vadd.f32 %v8590_v48, %v2138_v37  ;;  %v8711_v37 = vand.u32 4294901760, %v8670_v1 }
 0x530   :  { %v8607_v5 = vmax.f32 %v2139_v15, 0.0  ;;  %v8730_v15 = vsub.f32 %v8656_v62, %v8688_v29 }
 0x532   :  { %11536 = vst [vmem:[#allocation135_spill] sm:$0xff] %v8607_v5  ;;  %v8632_v4 = vand.u32 4294901760, %v8607_v5 }
 0x534   :  { %v8667_v53 = vsub.f32 %v8607_v5, %v8632_v4 }
 0x535   :  { %v2141_v26 = vpop.f32.mrf.mxu1 }
 0x536   :  { %v2142_v61 = vadd.f32 %v8590_v48, %v2141_v26  ;;  %v2292_v49 = vand.u32 4294901760, %v8667_v53 }
 0x538   :  { %v8601_v60 = vmax.f32 %v2142_v61, 0.0  ;;  %v8726_v61 = vand.u32 4294901760, %v8684_v12  ;;  %v2293_v43 = vsub.f32 %v8667_v53, %v2292_v49 }
 0x53a   :  { %11535 = vst [vmem:[#allocation149_spill] sm:$0xff] %v8601_v60  ;;  %v8619_v17 = vand.u32 4294901760, %v8601_v60 }
 0x53c   :  { %v8653_v24 = vsub.f32 %v8601_v60, %v8619_v17 }
 0x53d   :  { %v2144_v51 = vpop.f32.mrf.mxu1 }
 0x53e   :  { %v2145_v21 = vadd.f32 %v8590_v48, %v2144_v51  ;;  %v2286_v55 = vand.u32 4294901760, %v8653_v24 }
 0x540   :  { %v8598_v31 = vmax.f32 %v2145_v21, 0.0  ;;  %v2287_v51 = vsub.f32 %v8653_v24, %v2286_v55  ;;  %v8718_v21 = vsub.f32 %v8639_v59, %v8673_v63 }
 0x542   :  { %11534 = vst [vmem:[#allocation142_spill] sm:$0xff] %v8598_v31  ;;  %v8611_v27 = vand.u32 4294901760, %v8598_v31  ;;  %v2288_v36 = vand.u32 4294901760, %v2287_v51  ;;  %v2310_v45 = vand.u32 4294901760, %v8718_v21 }
 0x544   :  { %v8636_v3 = vsub.f32 %v8598_v31, %v8611_v27 }
 0x545   :  { %v2147_v18 = vpop.f32.mrf.mxu1 }
 0x546   :  { %v2148_v41 = vadd.f32 %v8590_v48, %v2147_v18  ;;  %v2280_v25 = vand.u32 4294901760, %v8636_v3  ;;  %v2298_v18 = vand.u32 4294901760, %v8681_v50 }
 0x548   :  { %v8595_v46 = vmax.f32 %v2148_v41, 0.0  ;;  %v2281_v9 = vsub.f32 %v8636_v3, %v2280_v25  ;;  %v8722_v41 = vmax.f32 %v2115_v57, 0.0  ;;  %v2316_v57 = vand.u32 4294901760, %v8730_v15 }
 0x54a   :  { %11533 = vst [vmem:[#allocation151_spill] sm:$0xff] %v8595_v46  ;;  %v8604_v42 = vand.u32 4294901760, %v8595_v46  ;;  %v2282_v2 = vand.u32 4294901760, %v2281_v9 }
 0x54c   :  { %v8623_v10 = vsub.f32 %v8595_v46, %v8604_v42 }
 0x54d   :  { %v2150_v6 = vpop.f32.mrf.mxu1 }
 0x54e   :  { %v2151_v47 = vadd.f32 %v8590_v48, %v2150_v6  ;;  %v2274_v28 = vand.u32 4294901760, %v8623_v10  ;;  %v11544_v6 = vmov 0 }
 0x54f   :  { %v11545_v6 = vsel %vm8737_vm5, 4294967295, %v11544_v6 }
 0x550   :  { %v8616_v8 = vmax.f32 %v2151_v47, 0.0  ;;  %v2275_v16 = vsub.f32 %v8623_v10, %v2274_v28  ;;  %11546 = vst [vmem:[#allocation156_spill] sm:$0xff] %v11545_v6  ;;  %v2106_v47 = vadd.f32 %v8590_v48, %v8581_v35  ;;  %v8756_v35 = vmax.f32 %v2109_v34, 0.0  ;;  %v11705_v6 = vld [vmem:[#allocation112_spill] sm:$0xff] }
 0x551   :  { %v8760_v48 = vand.u32 4294901760, %v8722_v41 }
 0x552   :  { %11538 = vst [vmem:[#allocation154_spill] sm:$0xff] %v8616_v8  ;;  %v8629_v23 = vand.u32 4294901760, %v8616_v8  ;;  %v2276_v26 = vand.u32 4294901760, %v2275_v16  ;;  %v2294_v16 = vand.u32 4294901760, %v2293_v43  ;;  %v8773_v9 = vmax.f32 %v2106_v47, 0.0 }
 0x553   :  { %v2317_v47 = vsub.f32 %v8730_v15, %v2316_v57 }
 0x554   :  { %2170 = vmatpush.msrb.mxu0 %v8629_v23  ;;  %2663 = vmatpush.msra.mxu3 %v8629_v23  ;;  %v8645_v33 = vsub.f32 %v8616_v8, %v8629_v23  ;;  %11548 = vst [vmem:[#allocation146_spill] sm:$0xff] %v8773_v9 }
 0x556   :  { %2172 = vmatpush.msrb.mxu0 %v8604_v42  ;;  %2665 = vmatpush.msra.mxu3 %v8604_v42  ;;  %v2268_v14 = vand.u32 4294901760, %v8645_v33 }
 0x558   :  { %2174 = vmatpush.msrb.mxu0 %v8611_v27  ;;  %2568 = vmatpush.msra.mxu2 %v2268_v14  ;;  %v2269_v7 = vsub.f32 %v8645_v33, %v2268_v14  ;;  %v8754_v14 = vsub.f32 %v8670_v1, %v8711_v37 }
 0x559   :  { %2667 = vmatpush.msra.mxu3 %v8611_v27 }
 0x55a   :  { %2176 = vmatpush.msrb.mxu0 %v8619_v17  ;;  %2572 = vmatpush.msra.mxu2 %v2274_v28  ;;  %v2270_v39 = vand.u32 4294901760, %v2269_v7  ;;  %v2299_v28 = vsub.f32 %v8681_v50, %v2298_v18  ;;  %v6599_v7 = vsel %vm8737_vm5, 1.0, %v11547_v19  ;;  %v2322_v51 = vand.u32 4294901760, %v8754_v14 }
 0x55b   :  { %2669 = vmatpush.msra.mxu3 %v8619_v17  ;;  %v8786_v34 = vsub.f32 %v6599_v7, %v6599_v7 }
 0x55c   :  { %2178 = vmatpush.msrb.mxu0 %v8632_v4  ;;  %2271 = vmatpush.msrb.mxu1 %v2270_v39  ;;  %v488_v39 = vadd.s32 8, %v8698_v40  ;;  %v2300_v30 = vand.u32 4294901760, %v2299_v28  ;;  %v8806_v28 = vand.u32 4294901760, %v8773_v9 }
 0x55d   :  { %2576 = vmatpush.msra.mxu2 %v2280_v25  ;;  %2671 = vmatpush.msra.mxu3 %v8632_v4  ;;  %v8764_v25 = vsub.f32 %v8684_v12, %v8726_v61  ;;  %11549 = vst [vmem:[#allocation155_spill] sm:$0xff] %v8786_v34 }
 0x55e   :  { %2180 = vmatpush.msrb.mxu0 %v8649_v20  ;;  %2277 = vmatpush.msrb.mxu1 %v2276_v26  ;;  %v2311_v26 = vsub.f32 %v8718_v21, %v2310_v45  ;;  %vm8800_vm6 = vcmp.eq.s32.totalorder %v488_v39, %v8703_v54  ;;  %v2334_v39 = vand.u32 4294901760, %v8781_v11  ;;  %v8834_v60 = vsub.f32 %v8773_v9, %v8806_v28 }
 0x55f   :  { %2580 = vmatpush.msra.mxu2 %v2286_v55  ;;  %2673 = vmatpush.msra.mxu3 %v8649_v20  ;;  %v2305_v55 = vsub.f32 %v8692_v38, %v2304_v58  ;;  %v6600_v8 = vsel %vm8800_vm6, 1.0, %v11547_v19 }
 0x560   :  { %2182 = vmatpush.msrb.mxu0 %v8659_v44  ;;  %2283 = vmatpush.msrb.mxu1 %v2282_v2  ;;  %v8794_v2 = vsub.f32 %v8722_v41, %v8760_v48  ;;  %v8840_v13 = vsub.f32 %v6600_v8, %v6600_v8  ;;  %v2358_v8 = vand.u32 4294901760, %v8834_v60 }
 0x561   :  { %2584 = vmatpush.msra.mxu2 %v2292_v49  ;;  %2675 = vmatpush.msra.mxu3 %v8659_v44  ;;  %v8777_v49 = vand.u32 4294901760, %v8743_v56  ;;  %v2306_v43 = vand.u32 4294901760, %v2305_v55  ;;  %v2323_v55 = vsub.f32 %v8754_v14, %v2322_v51 }
 0x562   :  { %2184 = vmatpush.msrb.mxu0 %v8673_v63  ;;  %2289 = vmatpush.msrb.mxu1 %v2288_v36  ;;  %v2328_v36 = vand.u32 4294901760, %v8764_v25  ;;  %v2340_v46 = vand.u32 4294901760, %v8794_v2  ;;  %11554 = vst [vmem:[#allocation158_spill] sm:$0xff] %v8840_v13 }
 0x563   :  { %2588 = vmatpush.msra.mxu2 %v2298_v18  ;;  %2677 = vmatpush.msra.mxu3 %v8673_v63  ;;  %v8790_v18 = vand.u32 4294901760, %v8756_v35  ;;  %v8810_v7 = vsub.f32 %v8743_v56, %v8777_v49 }
 0x564   :  { %2186 = vmatpush.msrb.mxu0 %v8688_v29  ;;  %2295 = vmatpush.msrb.mxu1 %v2294_v16  ;;  %v2312_v16 = vand.u32 4294901760, %v2311_v26  ;;  %v2318_v26 = vand.u32 4294901760, %v2317_v47  ;;  %v2335_v47 = vsub.f32 %v8781_v11, %v2334_v39  ;;  %v2341_v52 = vsub.f32 %v8794_v2, %v2340_v46 }
 0x565   :  { %2592 = vmatpush.msra.mxu2 %v2304_v58  ;;  %2679 = vmatpush.msra.mxu3 %v8688_v29  ;;  %v11550_v58 = vmov 0  ;;  %v2346_v31 = vand.u32 4294901760, %v8810_v7 }
 0x566   :  { %2188 = vmatpush.msrb.mxu0 %v8711_v37  ;;  %2301 = vmatpush.msrb.mxu1 %v2300_v30  ;;  %v11551_v58 = vsel %vm8800_vm6, 4294967295, %v11550_v58  ;;  %v8816_v30 = vand.u32 4294901760, %v8786_v34 }
 0x567   :  { %11552 = vst [vmem:[#allocation140_spill] sm:$0xff] %v11551_v58  ;;  %2596 = vmatpush.msra.mxu2 %v2310_v45  ;;  %2681 = vmatpush.msra.mxu3 %v8711_v37  ;;  %v8821_v45 = vsub.f32 %v8756_v35, %v8790_v18  ;;  %v11701_v58 = vld [vmem:[#allocation108_spill] sm:$0xff] }
 0x568   :  { %2190 = vmatpush.msrb.mxu0 %v8726_v61  ;;  %2307 = vmatpush.msrb.mxu1 %v2306_v43  ;;  %11553 = vst [vmem:[#allocation147_spill] sm:$0xff] %v8816_v30  ;;  %v2329_v43 = vsub.f32 %v8764_v25, %v2328_v36  ;;  %v2204_v5 = vsub.f32 %v8786_v34, %v8816_v30 }
 0x569   :  { %2600 = vmatpush.msra.mxu2 %v2316_v57  ;;  %2683 = vmatpush.msra.mxu3 %v8726_v61  ;;  %v489_v57 = vadd.s32 16, %v8698_v40  ;;  %v2352_v59 = vand.u32 4294901760, %v8821_v45 }
 0x56a   :  { %2192 = vmatpush.msrb.mxu0 %v8747_v22  ;;  %2313 = vmatpush.msrb.mxu1 %v2312_v16  ;;  %v2324_v16 = vand.u32 4294901760, %v2323_v55  ;;  %v11555_v55 = vmov 0 }
 0x56b   :  { %2604 = vmatpush.msra.mxu2 %v2322_v51  ;;  %2685 = vmatpush.msra.mxu3 %v8747_v22  ;;  %v2330_v51 = vand.u32 4294901760, %v2329_v43  ;;  %vm8847_vm7 = vcmp.eq.s32.totalorder %v489_v57, %v8703_v54  ;;  %v2347_v43 = vsub.f32 %v8810_v7, %v2346_v31  ;;  %v2342_v57 = vand.u32 4294901760, %v2341_v52 }
 0x56c   :  { %2194 = vmatpush.msrb.mxu0 %v8760_v48  ;;  %2319 = vmatpush.msrb.mxu1 %v2318_v26  ;;  %v11556_v55 = vsel %vm8847_vm7, 4294967295, %v11555_v55  ;;  %v8854_v26 = vand.u32 4294901760, %v2204_v5  ;;  %v490_v5 = vadd.s32 24, %v8698_v40 }
 0x56d   :  { %2608 = vmatpush.msra.mxu2 %v2328_v36  ;;  %2687 = vmatpush.msra.mxu3 %v8760_v48  ;;  %11557 = vst [vmem:[#allocation148_spill] sm:$0xff] %v11556_v55  ;;  %v2336_v36 = vand.u32 4294901760, %v2335_v47  ;;  %v2353_v47 = vsub.f32 %v8821_v45, %v2352_v59 }
 0x56e   :  { %2196 = vmatpush.msrb.mxu0 %v8777_v49  ;;  %2325 = vmatpush.msrb.mxu1 %v2324_v16  ;;  %11558 = vst [vmem:[#allocation157_spill] sm:$0xff] %v8854_v26  ;;  %v8858_v16 = vand.u32 4294901760, %v8840_v13  ;;  %vm8876_vm8 = vcmp.eq.s32.totalorder %v490_v5, %v8703_v54 }
 0x56f   :  { %2612 = vmatpush.msra.mxu2 %v2334_v39  ;;  %2689 = vmatpush.msra.mxu3 %v8777_v49  ;;  %v6601_v39 = vsel %vm8847_vm7, 1.0, %v11547_v19  ;;  %v2354_v52 = vand.u32 4294901760, %v2353_v47 }
 0x570   :  { %2198 = vmatpush.msrb.mxu0 %v8790_v18  ;;  %2331 = vmatpush.msrb.mxu1 %v2330_v51  ;;  %11559 = vst [vmem:[#allocation141_spill] sm:$0xff] %v8858_v16  ;;  %v2359_v51 = vsub.f32 %v8834_v60, %v2358_v8  ;;  %v2212_v62 = vsub.f32 %v8840_v13, %v8858_v16 }
 0x571   :  { %2616 = vmatpush.msra.mxu2 %v2340_v46  ;;  %2691 = vmatpush.msra.mxu3 %v8790_v18  ;;  %v2348_v46 = vand.u32 4294901760, %v2347_v43  ;;  %v8872_v1 = vsub.f32 %v6601_v39, %v6601_v39 }
 0x572   :  { %2200 = vmatpush.msrb.mxu0 %v8806_v28  ;;  %2337 = vmatpush.msrb.mxu1 %v2336_v36  ;;  %v11281_v36 = vmov 1.0   ;;  %v2360_v43 = vand.u32 4294901760, %v2359_v51  ;;  %v8884_v39 = vand.u32 4294901760, %v2212_v62 }
 0x573   :  { %2620 = vmatpush.msra.mxu2 %v2346_v31  ;;  %2693 = vmatpush.msra.mxu3 %v8806_v28  ;;  %11560 = vst [vmem:[#allocation150_spill] sm:$0xff] %v8872_v1  ;;  %v11561_v31 = vmov 0 }
 0x574   :  { %2206 = vmatmul.f32.vlgmr.msrb.gmra.mxu0 %v8854_v26  ;;  %2343 = vmatpush.msrb.mxu1 %v2342_v57  ;;  %v11562_v31 = vsel %vm8876_vm8, 4294967295, %v11561_v31  ;;  %11564 = vst [vmem:[#allocation152_spill] sm:$0xff] %v8884_v39 }
 0x575   :  { %2397 = vmatpush.msra.mxu0 %v8645_v33  ;;  %2624 = vmatpush.msra.mxu2 %v2352_v59  ;;  %11563 = vst [vmem:[#allocation160_spill] sm:$0xff] %v11562_v31  ;;  %v8887_v59 = vand.u32 4294901760, %v8872_v1  ;;  %v6602_v33 = vsel %vm8876_vm8, 1.0, %v11547_v19  ;;  %v11689_v31 = vld [vmem:[#allocation96_spill] sm:$0xff] }
 0x576   :  { %2349 = vmatpush.msrb.mxu1 %v2348_v46  ;;  %6751 = vmatmul.msk.f32.vlgmr.msra.gmra.mxu3 %vm8737_vm5, %v11281_v36  ;;  %v8905_v62 = vsub.f32 %v6602_v33, %v6602_v33 }
 0x577   :  { %2400 = vmatpush.msra.mxu0 %v8623_v10  ;;  %2628 = vmatpush.msra.mxu2 %v2358_v8  ;;  %11565 = vst [vmem:[#allocation159_spill] sm:$0xff] %v8887_v59  ;;  %v491_v10 = vadd.s32 32, %v8698_v40 }
 0x578   :  { %2355 = vmatpush.msrb.mxu1 %v2354_v52  ;;  %6743 = vmatmul.msk.f32.vlgmr.msra.gmra.mxu2 %vm8737_vm5, %v11281_v36  ;;  %11566 = vst [vmem:[#allocation161_spill] sm:$0xff] %v8905_v62  ;;  %v8922_v8 = vand.u32 4294901760, %v8905_v62 }
 0x579   :  { %2403 = vmatpush.msra.mxu0 %v8636_v3  ;;  %v2220_v3 = vsub.f32 %v8872_v1, %v8887_v59  ;;  %vm8910_vm9 = vcmp.eq.s32.totalorder %v491_v10, %v8703_v54 }
 0x57a   :  { %2361 = vmatpush.msrb.mxu1 %v2360_v43  ;;  %11571 = vst [vmem:[#allocation164_spill] sm:$0xff] %v8922_v8 }
 0x57b   :  { %2406 = vmatpush.msra.mxu0 %v8653_v24  ;;  %6735 = vmatmul.msk.f32.vlgmr.msrb.gmra.mxu1 %vm8737_vm5, %v11281_v36  ;;  %v11567_v24 = vmov 0 }
 0x57c   :  { %2214 = vmatmul.f32.gmra.mxu0 %v8884_v39  ;;  %2485 = vmatpush.msra.mxu1 %v8629_v23  ;;  %v11568_v24 = vsel %vm8910_vm9, 4294967295, %v11567_v24  ;;  %v8919_v23 = vand.u32 4294901760, %v2220_v3 }
 0x57d   :  { %2409 = vmatpush.msra.mxu0 %v8667_v53  ;;  %11569 = vst [vmem:[#allocation162_spill] sm:$0xff] %v11568_v24  ;;  %v492_v53 = vadd.s32 40, %v8698_v40  ;;  %v11685_v24 = vld [vmem:[#allocation92_spill] sm:$0xff] }
 0x57e   :  { %2487 = vmatpush.msra.mxu1 %v8604_v42  ;;  %6752 = vmatmul.msk.f32.gmra.mxu3 %vm8800_vm6, %v11281_v36  ;;  %11570 = vst [vmem:[#allocation163_spill] sm:$0xff] %v8919_v23  ;;  %v6603_v42 = vsel %vm8910_vm9, 1.0, %v11547_v19 }
 0x57f   :  { %2412 = vmatpush.msra.mxu0 %v8681_v50  ;;  %v8941_v50 = vsub.f32 %v6603_v42, %v6603_v42  ;;  %vm8946_vm10 = vcmp.eq.s32.totalorder %v492_v53, %v8703_v54 }
 0x580   :  { %2489 = vmatpush.msra.mxu1 %v8611_v27  ;;  %6744 = vmatmul.msk.f32.gmra.mxu2 %vm8800_vm6, %v11281_v36  ;;  %v2228_v27 = vsub.f32 %v8905_v62, %v8922_v8 }
 0x581   :  { %2415 = vmatpush.msra.mxu0 %v8692_v38  ;;  %11572 = vst [vmem:[#allocation165_spill] sm:$0xff] %v8941_v50  ;;  %v8958_v38 = vand.u32 4294901760, %v8941_v50 }
 0x582   :  { %2491 = vmatpush.msra.mxu1 %v8619_v17  ;;  %v11573_v17 = vmov 0 }
 0x583   :  { %2418 = vmatpush.msra.mxu0 %v8718_v21  ;;  %6736 = vmatmul.msk.f32.gmra.mxu1 %vm8800_vm6, %v11281_v36  ;;  %v11574_v17 = vsel %vm8946_vm10, 4294967295, %v11573_v17  ;;  %11577 = vst [vmem:[#allocation168_spill] sm:$0xff] %v8958_v38  ;;  %v493_v21 = vadd.s32 48, %v8698_v40 }
 0x584   :  { %2222 = vmatmul.f32.gmra.mxu0 %v8919_v23  ;;  %2493 = vmatpush.msra.mxu1 %v8632_v4  ;;  %11575 = vst [vmem:[#allocation166_spill] sm:$0xff] %v11574_v17  ;;  %v8955_v4 = vand.u32 4294901760, %v2228_v27  ;;  %v11681_v17 = vld [vmem:[#allocation88_spill] sm:$0xff] }
 0x585   :  { %2421 = vmatpush.msra.mxu0 %v8730_v15  ;;  %vm8982_vm11 = vcmp.eq.s32.totalorder %v493_v21, %v8703_v54 }
 0x586   :  { %2495 = vmatpush.msra.mxu1 %v8649_v20  ;;  %6753 = vmatmul.msk.f32.gmra.mxu3 %vm8847_vm7, %v11281_v36  ;;  %11576 = vst [vmem:[#allocation167_spill] sm:$0xff] %v8955_v4  ;;  %v6604_v20 = vsel %vm8946_vm10, 1.0, %v11547_v19 }
 0x587   :  { %2424 = vmatpush.msra.mxu0 %v8754_v14  ;;  %v8977_v15 = vsub.f32 %v6604_v20, %v6604_v20 }
 0x588   :  { %2497 = vmatpush.msra.mxu1 %v8659_v44  ;;  %6745 = vmatmul.msk.f32.gmra.mxu2 %vm8847_vm7, %v11281_v36  ;;  %v2236_v44 = vsub.f32 %v8941_v50, %v8958_v38 }
 0x589   :  { %2427 = vmatpush.msra.mxu0 %v8764_v25  ;;  %11578 = vst [vmem:[#allocation169_spill] sm:$0xff] %v8977_v15  ;;  %v8994_v14 = vand.u32 4294901760, %v8977_v15  ;;  %v494_v25 = vadd.s32 56, %v8698_v40 }
 0x58a   :  { %2499 = vmatpush.msra.mxu1 %v8673_v63  ;;  %v11579_v63 = vmov 0 }
 0x58b   :  { %2430 = vmatpush.msra.mxu0 %v8781_v11  ;;  %6737 = vmatmul.msk.f32.gmra.mxu1 %vm8847_vm7, %v11281_v36  ;;  %v11580_v63 = vsel %vm8982_vm11, 4294967295, %v11579_v63  ;;  %11583 = vst [vmem:[#allocation172_spill] sm:$0xff] %v8994_v14  ;;  %vm9017_vm12 = vcmp.eq.s32.totalorder %v494_v25, %v8703_v54 }
 0x58c   :  { %2230 = vmatmul.f32.gmra.mxu0 %v8955_v4  ;;  %2501 = vmatpush.msra.mxu1 %v8688_v29  ;;  %11581 = vst [vmem:[#allocation170_spill] sm:$0xff] %v11580_v63  ;;  %v8991_v29 = vand.u32 4294901760, %v2236_v44  ;;  %v6606_v54 = vsel %vm9017_vm12, 1.0, %v11547_v19 }
 0x58d   :  { %2433 = vmatpush.msra.mxu0 %v8794_v2 }
 0x58e   :  { %2503 = vmatpush.msra.mxu1 %v8711_v37  ;;  %6754 = vmatmul.msk.f32.gmra.mxu3 %vm8876_vm8, %v11281_v36  ;;  %11582 = vst [vmem:[#allocation171_spill] sm:$0xff] %v8991_v29  ;;  %v6605_v37 = vsel %vm8982_vm11, 1.0, %v11547_v19 }
 0x58f   :  { %2436 = vmatpush.msra.mxu0 %v8810_v7  ;;  %v9013_v11 = vsub.f32 %v6605_v37, %v6605_v37 }
 0x590   :  { %2505 = vmatpush.msra.mxu1 %v8726_v61  ;;  %6746 = vmatmul.msk.f32.gmra.mxu2 %vm8876_vm8, %v11281_v36  ;;  %v2244_v61 = vsub.f32 %v8977_v15, %v8994_v14 }
 0x591   :  { %2439 = vmatpush.msra.mxu0 %v8821_v45  ;;  %11584 = vst [vmem:[#allocation173_spill] sm:$0xff] %v9013_v11 }
 0x592   :  { %2507 = vmatpush.msra.mxu1 %v8747_v22  ;;  %v11585_v22 = vmov 0 }
 0x593   :  { %2442 = vmatpush.msra.mxu0 %v8834_v60  ;;  %6738 = vmatmul.msk.f32.gmra.mxu1 %vm8876_vm8, %v11281_v36  ;;  %v11586_v22 = vsel %vm9017_vm12, 4294967295, %v11585_v22  ;;  %v9025_v60 = vand.u32 4294901760, %v2244_v61 }
 0x594   :  { %2238 = vmatmul.f32.gmra.mxu0 %v8991_v29  ;;  %2509 = vmatpush.msra.mxu1 %v8760_v48  ;;  %11587 = vst [vmem:[#allocation174_spill] sm:$0xff] %v11586_v22  ;;  %v9028_v48 = vand.u32 4294901760, %v9013_v11 }
 0x595   :  { %11588 = vst [vmem:[#allocation175_spill] sm:$0xff] %v9025_v60 }
 0x596   :  { %2511 = vmatpush.msra.mxu1 %v8777_v49  ;;  %6755 = vmatmul.msk.f32.gmra.mxu3 %vm8910_vm9, %v11281_v36  ;;  %11589 = vst [vmem:[#allocation176_spill] sm:$0xff] %v9028_v48  ;;  %v2252_v49 = vsub.f32 %v9013_v11, %v9028_v48 }
 0x598   :  { %2513 = vmatpush.msra.mxu1 %v8790_v18  ;;  %6747 = vmatmul.msk.f32.gmra.mxu2 %vm8910_vm9, %v11281_v36  ;;  %v9043_v18 = vsub.f32 %v6606_v54, %v6606_v54  ;;  %v9048_v2 = vand.u32 4294901760, %v2252_v49 }
 0x59a   :  { %2515 = vmatpush.msra.mxu1 %v8806_v28  ;;  %11590 = vst [vmem:[#allocation177_spill] sm:$0xff] %v9043_v18  ;;  %v9051_v7 = vand.u32 4294901760, %v9043_v18 }
 0x59b   :  { %6739 = vmatmul.msk.f32.gmra.mxu1 %vm8910_vm9, %v11281_v36  ;;  %11591 = vst [vmem:[#allocation178_spill] sm:$0xff] %v9048_v2 }
 0x59c   :  { %2246 = vmatmul.f32.gmra.mxu0 %v9025_v60  ;;  %11592 = vst [vmem:[#allocation179_spill] sm:$0xff] %v9051_v7  ;;  %v2260_v28 = vsub.f32 %v9043_v18, %v9051_v7 }
 0x59e   :  { %6756 = vmatmul.msk.f32.gmra.mxu3 %vm8946_vm10, %v11281_v36  ;;  %v9065_v45 = vand.u32 4294901760, %v2260_v28 }
 0x5a0   :  { %6748 = vmatmul.msk.f32.gmra.mxu2 %vm8946_vm10, %v11281_v36  ;;  %11593 = vst [vmem:[#allocation180_spill] sm:$0xff] %v9065_v45 }
 0x5a3   :  { %6740 = vmatmul.msk.f32.gmra.mxu1 %vm8946_vm10, %v11281_v36 }
 0x5a4   :  { %2254 = vmatmul.f32.gmra.mxu0 %v9048_v2 }
 0x5a6   :  { %6757 = vmatmul.msk.f32.gmra.mxu3 %vm8982_vm11, %v11281_v36 }
 0x5a8   :  { %6749 = vmatmul.msk.f32.gmra.mxu2 %vm8982_vm11, %v11281_v36 }
 0x5ab   :  { %6741 = vmatmul.msk.f32.gmra.mxu1 %vm8982_vm11, %v11281_v36 }
 0x5ac   :  { %2262 = vmatmul.f32.gmra.mxu0 %v9065_v45  ;;  %v11680_v45 = vld [vmem:[#allocation78_spill] sm:$0xff] }
 0x5ae   :  { %6758 = vmatmul.msk.f32.gmra.mxu3 %vm9017_vm12, %v11281_v36 }
 0x5b0   :  { %6750 = vmatmul.msk.f32.gmra.mxu2 %vm9017_vm12, %v11281_v36 }
 0x5b3   :  { %6742 = vmatmul.msk.f32.gmra.mxu1 %vm9017_vm12, %v11281_v36 }
 0x5b4   :  { %2445 = vmatmul.f32.vlgmr.msra.gmra.mxu0 %v8786_v34 }
 0x5bb   :  { %2519 = vmatmul.f32.vlgmr.msra.gmra.mxu1 %v8816_v30 }
 0x5bc   :  { %2450 = vmatmul.f32.gmra.mxu0 %v8840_v13 }
 0x5c3   :  { %2525 = vmatmul.f32.gmra.mxu1 %v8858_v16 }
 0x5c4   :  { %2455 = vmatmul.f32.gmra.mxu0 %v8872_v1 }
 0x5cb   :  { %2531 = vmatmul.f32.gmra.mxu1 %v8887_v59 }
 0x5cc   :  { %2460 = vmatmul.f32.gmra.mxu0 %v8905_v62 }
 0x5d3   :  { %2537 = vmatmul.f32.gmra.mxu1 %v8922_v8 }
 0x5d4   :  { %2465 = vmatmul.f32.gmra.mxu0 %v8941_v50 }
 0x5db   :  { %2543 = vmatmul.f32.gmra.mxu1 %v8958_v38 }
 0x5dc   :  { %2470 = vmatmul.f32.gmra.mxu0 %v8977_v15 }
 0x5e3   :  { %2549 = vmatmul.f32.gmra.mxu1 %v8994_v14 }
 0x5e4   :  { %2475 = vmatmul.f32.gmra.mxu0 %v9013_v11 }
 0x5eb   :  { %2555 = vmatmul.f32.gmra.mxu1 %v9028_v48 }
 0x5ec   :  { %2480 = vmatmul.f32.gmra.mxu0 %v9043_v18 }
 0x5f1   :  { %v2207_v57 = vpop.f32.mrf.mxu0 }
 0x5f3   :  { %2561 = vmatmul.f32.gmra.mxu1 %v9051_v7 }
 0x5f8   :  { %v2364_v47 = vpop.f32.mrf.mxu1 }
 0x5f9   :  { %v2215_v5 = vpop.f32.mrf.mxu0  ;;  %v2696_v37 = vpop.f32.mrf.mxu3  ;;  %v2365_v49 = vadd.f32 %v2364_v47, %v2207_v57  ;;  %v11594_v47 = vld [vmem:[#allocation10_spill] sm:$0xff] }
 0x5fb   :  { %v2631_v44 = vpop.f32.mrf.mxu2 }
 0x600   :  { %v2368_v46 = vpop.f32.mrf.mxu1 }
 0x601   :  { %v2223_v51 = vpop.f32.mrf.mxu0  ;;  %v2700_v28 = vpop.f32.mrf.mxu3  ;;  %v2369_v14 = vadd.f32 %v2368_v46, %v2215_v5 }
 0x603   :  { %v2635_v54 = vpop.f32.mrf.mxu2 }
 0x608   :  { %v2372_v52 = vpop.f32.mrf.mxu1 }
 0x609   :  { %v2231_v43 = vpop.f32.mrf.mxu0  ;;  %v2704_v62 = vpop.f32.mrf.mxu3  ;;  %v2373_v13 = vadd.f32 %v2372_v52, %v2223_v51 }
 0x60b   :  { %v2639_v38 = vpop.f32.mrf.mxu2 }
 0x610   :  { %v2376_v33 = vpop.f32.mrf.mxu1 }
 0x611   :  { %v2239_v10 = vpop.f32.mrf.mxu0 }
 0x618   :  { %v2380_v3 = vpop.f32.mrf.mxu1 }
 0x619   :  { %v9099_v42 = vpop.f32.mrf.mxu0  ;;  %v2381_v51 = vadd.f32 %v2380_v3, %v2239_v10 }
 0x620   :  { %v2384_v53 = vpop.f32.mrf.mxu1 }
 0x621   :  { %v9101_v27 = vpop.f32.mrf.mxu0 }
 0x628   :  { %v9103_v20 = vpop.f32.mrf.mxu1 }
 0x629   :  { %v9105_v21 = vpop.f32.mrf.mxu0 }
 0x630   :  { %v9107_v25 = vpop.f32.mrf.mxu1 }
 0x631   :  { %v2446_v61 = vpop.f32.mrf.mxu0 }
 0x632   :  { %v2447_v36 = vadd.f32 %v2446_v61, %v2365_v49  ;;  %v2385_v49 = vadd.f32 %v2384_v53, %v9099_v42  ;;  %v11598_v42 = vld [vmem:[#allocation4_spill] sm:$0xff] }
 0x638   :  { %v2520_v7 = vpop.f32.mrf.mxu1 }
 0x639   :  { %v2451_v18 = vpop.f32.mrf.mxu0  ;;  %v2521_v48 = vadd.f32 %v2520_v7, %v2447_v36 }
 0x63a   :  { %v2452_v50 = vadd.f32 %v2451_v18, %v2369_v14  ;;  %v2708_v14 = vpop.f32.mrf.mxu3 }
 0x63b   :  { %v2632_v11 = vadd.f32 %v2631_v44, %v2521_v48  ;;  %v2643_v48 = vpop.f32.mrf.mxu2 }
 0x63d   :  { %v2697_v15 = vadd.f32 %v2696_v37, %v2632_v11  ;;  %v11596_v37 = vld [vmem:[#allocation7_spill] sm:$0xff] }
 0x63f   :  { %2735 = vrot.lane.b32.xlu1 %v2697_v15, %s7062_s8  ;;  %v2377_v15 = vadd.f32 %v2376_v33, %v2231_v43 }
 0x640   :  { %v2526_v8 = vpop.f32.mrf.mxu1 }
 0x641   :  { %v2456_v59 = vpop.f32.mrf.mxu0  ;;  %v2527_v1 = vadd.f32 %v2526_v8, %v2452_v50 }
 0x642   :  { %v2457_v57 = vadd.f32 %v2456_v59, %v2373_v13  ;;  %v2712_v50 = vpop.f32.mrf.mxu3 }
 0x643   :  { %v2636_v16 = vadd.f32 %v2635_v54, %v2527_v1  ;;  %v11595_v1 = vld [vmem:[#allocation9_spill] sm:$0xff]  ;;  %v2647_v59 = vpop.f32.mrf.mxu2 }
 0x645   :  { %v2701_v30 = vadd.f32 %v2700_v28, %v2636_v16 }
 0x647   :  { %2737 = vrot.lane.b32.xlu0 %v2701_v30, %s7062_s8  ;;  %2769 = vrot.lane.b32.xlu1 %v11594_v47, %s7062_s8 }
 0x648   :  { %v2532_v36 = vpop.f32.mrf.mxu1 }
 0x649   :  { %v2461_v11 = vpop.f32.mrf.mxu0  ;;  %v2533_v7 = vadd.f32 %v2532_v36, %v2457_v57  ;;  %v11597_v57 = vld [vmem:[#allocation5_spill] sm:$0xff] }
 0x64a   :  { %v2462_v46 = vadd.f32 %v2461_v11, %v2377_v15  ;;  %v2716_v10 = vpop.f32.mrf.mxu3 }
 0x64b   :  { %v2640_v18 = vadd.f32 %v2639_v38, %v2533_v7  ;;  %v7064_v38 = vmov 2   ;;  %v2651_v54 = vpop.f32.mrf.mxu2 }
 0x64c   :  { %7000 = vset.pattern.permute.xlu0 %v7064_v38  ;;  %6999 = vset.pattern.permute.xlu2 %v7064_v38 }
 0x64d   :  { %v2705_v5 = vadd.f32 %v2704_v62, %v2640_v18  ;;  %7001 = vset.pattern.permute.xlu1 %v7064_v38 }
 0x64f   :  { %2739 = vrot.lane.b32.xlu2 %v2705_v5, %s7062_s8  ;;  %2771 = vrot.lane.b32.xlu0 %v11595_v1, %s7062_s8 }
 0x650   :  { %v2538_v13 = vpop.f32.mrf.mxu1 }
 0x651   :  { %v2466_v16 = vpop.f32.mrf.mxu0  ;;  %v2539_v30 = vadd.f32 %v2538_v13, %v2462_v46 }
 0x652   :  { %v2467_v44 = vadd.f32 %v2466_v16, %v2381_v51  ;;  %v2720_v46 = vpop.f32.mrf.mxu3  ;;  %v2817_v51 = vld [vmem:[%s11072_s3 + $0x100] sm:$0xff] }
 0x653   :  { %v2644_v8 = vadd.f32 %v2643_v48, %v2539_v30  ;;  %v2655_v15 = vpop.f32.mrf.mxu2 }
 0x655   :  { %v2709_v52 = vadd.f32 %v2708_v14, %v2644_v8  ;;  %v2389_v14 = vadd.f32 %v9103_v20, %v9101_v27  ;;  %v11599_v27 = vld [vmem:[#allocation2_spill] sm:$0xff]  ;;  %v2818_v20 = vld [vmem:[%s11072_s3 + $0x108] sm:$0xff] }
 0x656   :  { %2850 = vmatpush.msrb.mxu0 %v2818_v20 }
 0x657   :  { %2773 = vrot.lane.b32.xlu2 %v11596_v37, %s7062_s8  ;;  %2741 = vrot.lane.b32.xlu1 %v2709_v52, %s7062_s8 }
 0x658   :  { %v2544_v62 = vpop.f32.mrf.mxu1  ;;  %2851 = vmatpush.msrb.mxu0 %v2817_v51 }
 0x659   :  { %v2471_v43 = vpop.f32.mrf.mxu0  ;;  %v2545_v33 = vadd.f32 %v2544_v62, %v2467_v44 }
 0x65a   :  { %v2472_v3 = vadd.f32 %v2471_v43, %v2385_v49  ;;  %v2815_v43 = vld [vmem:[%s11072_s3 + $0xf0] sm:$0xff]  ;;  %v2813_v49 = vld [vmem:[%s11072_s3 + $0xe0] sm:$0xff] }
 0x65b   :  { %v2648_v61 = vadd.f32 %v2647_v59, %v2545_v33  ;;  %v2393_v59 = vadd.f32 %v9107_v25, %v9105_v21  ;;  %v2659_v44 = vpop.f32.mrf.mxu2  ;;  %v2816_v21 = vld [vmem:[%s11072_s3 + $0xf8] sm:$0xff]  ;;  %v2724_v25 = vpop.f32.mrf.mxu3 }
 0x65c   :  { %2852 = vmatpush.msrb.mxu0 %v2816_v21 }
 0x65d   :  { %v2713_v28 = vadd.f32 %v2712_v50, %v2648_v61  ;;  %v2814_v61 = vld [vmem:[%s11072_s3 + $0xe8] sm:$0xff] }
 0x65e   :  { %2853 = vmatpush.msrb.mxu0 %v2815_v43 }
 0x65f   :  { %2743 = vrot.lane.b32.xlu0 %v2713_v28, %s7062_s8  ;;  %2775 = vrot.lane.b32.xlu1 %v11597_v57, %s7062_s8  ;;  %v7033_v28 = vld [vmem:[%s11073_s2] sm:$0xff] }
 0x660   :  { %v2550_v36 = vpop.f32.mrf.mxu1  ;;  %2854 = vmatpush.msrb.mxu0 %v2814_v61 }
 0x661   :  { %v2551_v48 = vadd.f32 %v2550_v36, %v2472_v3  ;;  %v2476_v11 = vpop.f32.mrf.mxu0  ;;  %v7034_v3 = vld [vmem:[%s11073_s2 + $0x8] sm:$0xff]  ;;  %v7035_v36 = vld [vmem:[%s11073_s2 + $0x10] sm:$0xff] }
 0x662   :  { %v2477_v5 = vadd.f32 %v2476_v11, %v2389_v14  ;;  %2855 = vmatpush.msrb.mxu0 %v2813_v49  ;;  %v7037_v11 = vld [vmem:[%s11073_s2 + $0x30] sm:$0xff]  ;;  %v7039_v14 = vld [vmem:[%s11073_s2 + $0x28] sm:$0xff] }
 0x663   :  { %v2652_v7 = vadd.f32 %v2651_v54, %v2551_v48  ;;  %v11600_v54 = vld [vmem:[#allocation8_spill] sm:$0xff]  ;;  %v7036_v48 = vld [vmem:[%s11073_s2 + $0x18] sm:$0xff] }
 0x665   :  { %v2717_v18 = vadd.f32 %v2716_v10, %v2652_v7  ;;  %v2812_v10 = vld [vmem:[%s11072_s3 + $0xd8] sm:$0xff]  ;;  %v7038_v7 = vld [vmem:[%s11073_s2 + $0x20] sm:$0xff] }
 0x666   :  { %2856 = vmatpush.msrb.mxu0 %v2812_v10 }
 0x667   :  { %2745 = vrot.lane.b32.xlu2 %v2717_v18, %s7062_s8  ;;  %2777 = vrot.lane.b32.xlu0 %v11598_v42, %s7062_s8  ;;  %v2811_v18 = vld [vmem:[%s11072_s3 + $0xd0] sm:$0xff] }
 0x668   :  { %v2556_v53 = vpop.f32.mrf.mxu1  ;;  %2857 = vmatpush.msrb.mxu0 %v2811_v18  ;;  %v2898_v18 = vld [vmem:[%s11072_s3 + $0x128] sm:$0xff] }
 0x669   :  { %v2557_v13 = vadd.f32 %v2556_v53, %v2477_v5  ;;  %v2481_v30 = vpop.f32.mrf.mxu0  ;;  %v2809_v5 = vld [vmem:[%s11072_s3 + $0xc0] sm:$0xff]  ;;  %v2808_v53 = vld [vmem:[%s11072_s3 + $0xb8] sm:$0xff]  ;;  %2937 = vmatpush.msrb.mxu1 %v2898_v18 }
 0x66a   :  { %v2482_v50 = vadd.f32 %v2481_v30, %v2393_v59  ;;  %v2768_v30 = vpop.permute.xlu2 %2767 }
 0x66b   :  { %v2656_v16 = vadd.f32 %v2655_v15, %v2557_v13  ;;  %v2810_v15 = vld [vmem:[%s11072_s3 + $0xc8] sm:$0xff]  ;;  %v2807_v13 = vld [vmem:[%s11072_s3 + $0xb0] sm:$0xff] }
 0x66c   :  { %2858 = vmatpush.msrb.mxu0 %v2810_v15 }
 0x66d   :  { %v2721_v8 = vadd.f32 %v2720_v46, %v2656_v16  ;;  %v7040_v46 = vld [vmem:[%s11073_s2 + $0x38] sm:$0xff] }
 0x66e   :  { %2859 = vmatpush.msrb.mxu0 %v2809_v5 }
 0x66f   :  { %2779 = vrot.lane.b32.xlu2 %v11599_v27, %s7062_s8  ;;  %2747 = vrot.lane.b32.xlu1 %v2721_v8, %s7062_s8 }
 0x670   :  { %v2562_v52 = vpop.f32.mrf.mxu1  ;;  %2860 = vmatpush.msrb.mxu0 %v2808_v53 }
 0x671   :  { %v2563_v62 = vadd.f32 %v2562_v52, %v2482_v50 }
 0x672   :  { %2861 = vmatpush.msrb.mxu0 %v2807_v13 }
 0x673   :  { %v2660_v38 = vadd.f32 %v2659_v44, %v2563_v62 }
 0x675   :  { %v2725_v33 = vadd.f32 %v2724_v25, %v2660_v38 }
 0x677   :  { %2781 = vrot.lane.b32.xlu1 %v11600_v54, %s7062_s8  ;;  %2749 = vrot.lane.b32.xlu0 %v2725_v33, %s7062_s8 }
 0x678   :  { %441 = vperm.xlu2 %6999, %v7033_v28  }
 0x67f   :  { %444 = vperm.xlu0 %7000, %v7034_v3   ;;  %447 = vperm.xlu1 %7001, %v7035_v36  }
 0x680   :  { %450 = vperm.xlu2 %6999, %v7036_v48  }
 0x687   :  { %459 = vperm.xlu0 %7000, %v7037_v11   ;;  %453 = vperm.xlu1 %7001, %v7038_v7  }
 0x688   :  { %456 = vperm.xlu2 %6999, %v7039_v14  }
 0x68f   :  { %4766 = vrot.lane.b32.xlu0 %v8773_v9, %s7065_s6  ;;  %462 = vperm.xlu1 %7001, %v7040_v46  }
 0x6a9   :  { %v2740_v44 = vpop.permute.xlu2 %2739 }
 0x6aa   :  { %v2793_v62 = vsel %vm1878_vm4, %v11595_v1, %v2740_v44 }
 0x6b1   :  { %v2736_v16 = vpop.permute.xlu1 %2735  ;;  %v2774_v43 = vpop.permute.xlu2 %2773 }
 0x6b2   :  { %v2791_v59 = vsel %vm1878_vm4, %v7388_v32, %v2736_v16 }
 0x6b3   :  { %v2799_v8 = vsel %vm116_vm1, %v2791_v59, %v2768_v30  ;;  %v2897_v59 = vld [vmem:[%s11072_s3 + $0x120] sm:$0xff] }
 0x6b4   :  { %6759 = vmatmul.msk.f32.vlgmr.msrb.gmra.mxu0 %vm2821_vm13, %v2799_v8  ;;  %2938 = vmatpush.msrb.mxu1 %v2897_v59  ;;  %v2896_v8 = vld [vmem:[%s11072_s3 + $0x118] sm:$0xff] }
 0x6b6   :  { %2939 = vmatpush.msrb.mxu1 %v2896_v8 }
 0x6b9   :  { %v2738_v50 = vpop.permute.xlu0 %2737  ;;  %v2770_v20 = vpop.permute.xlu1 %2769 }
 0x6ba   :  { %v2792_v51 = vsel %vm1878_vm4, %v11594_v47, %v2738_v50  ;;  %v2895_v50 = vld [vmem:[%s11072_s3 + $0x110] sm:$0xff] }
 0x6bb   :  { %v2800_v52 = vsel %vm116_vm1, %v2792_v51, %v2770_v20  ;;  %2940 = vmatpush.msrb.mxu1 %v2895_v50  ;;  %v7007_v20 = vld [vmem:[%s11075_s4 + $0x4] ss:$0 sm:$0xff] }
 0x6bc   :  { %6760 = vmatmul.msk.f32.gmra.mxu0 %vm2821_vm13, %v2800_v52 }
 0x6c1   :  { %v2772_v21 = vpop.permute.xlu0 %2771  ;;  %v2746_v36 = vpop.permute.xlu2 %2745 }
 0x6c2   :  { %v2801_v25 = vsel %vm116_vm1, %v2793_v62, %v2772_v21  ;;  %v2796_v48 = vsel %vm1878_vm4, %v11598_v42, %v2746_v36 }
 0x6c4   :  { %6761 = vmatmul.msk.f32.gmra.mxu0 %vm2821_vm13, %v2801_v25 }
 0x6c9   :  { %v2742_v38 = vpop.permute.xlu1 %2741  ;;  %v2780_v15 = vpop.permute.xlu2 %2779 }
 0x6ca   :  { %v2794_v33 = vsel %vm1878_vm4, %v11596_v37, %v2742_v38 }
 0x6cb   :  { %v2802_v61 = vsel %vm116_vm1, %v2794_v33, %v2774_v43 }
 0x6cc   :  { %6762 = vmatmul.msk.f32.gmra.mxu0 %vm2821_vm13, %v2802_v61 }
 0x6d1   :  { %v2744_v49 = vpop.permute.xlu0 %2743  ;;  %v2776_v28 = vpop.permute.xlu1 %2775 }
 0x6d2   :  { %v2795_v10 = vsel %vm1878_vm4, %v11597_v57, %v2744_v49 }
 0x6d3   :  { %v2803_v3 = vsel %vm116_vm1, %v2795_v10, %v2776_v28 }
 0x6d4   :  { %6763 = vmatmul.msk.f32.gmra.mxu0 %vm2821_vm13, %v2803_v3 }
 0x6d9   :  { %v2778_v11 = vpop.permute.xlu0 %2777 }
 0x6da   :  { %v2804_v7 = vsel %vm116_vm1, %v2796_v48, %v2778_v11 }
 0x6dc   :  { %6764 = vmatmul.msk.f32.gmra.mxu0 %vm2821_vm13, %v2804_v7 }
 0x6e1   :  { %v2748_v14 = vpop.permute.xlu1 %2747 }
 0x6e2   :  { %v2797_v5 = vsel %vm1878_vm4, %v11599_v27, %v2748_v14 }
 0x6e3   :  { %v2805_v53 = vsel %vm116_vm1, %v2797_v5, %v2780_v15 }
 0x6e4   :  { %6765 = vmatmul.msk.f32.gmra.mxu0 %vm2821_vm13, %v2805_v53 }
 0x6e9   :  { %v2782_v46 = vpop.permute.xlu1 %2781  ;;  %v2750_v13 = vpop.permute.xlu0 %2749 }
 0x6ea   :  { %v2798_v16 = vsel %vm1878_vm4, %v11600_v54, %v2750_v13 }
 0x6eb   :  { %v2806_v30 = vsel %vm116_vm1, %v2798_v16, %v2782_v46 }
 0x6ec   :  { %6766 = vmatmul.msk.f32.gmra.mxu0 %vm2821_vm13, %v2806_v30 }
 0x731   :  { %v2863_v51 = vpop.f32.mrf.mxu0 }
 0x732   :  { %v2864_v52 = vadd.f32 %v7007_v20, %v2863_v51  ;;  %v7008_v51 = vld [vmem:[%s11075_s4 + $0x5] ss:$0 sm:$0xff] }
 0x734   :  { %v2887_v44 = vmax.f32 %v2864_v52, 0.0 }
 0x736   :  { %6767 = vmatmul.msk.f32.vlgmr.msrb.gmra.mxu1 %vm1878_vm4, %v2887_v44 }
 0x739   :  { %v2866_v62 = vpop.f32.mrf.mxu0 }
 0x73a   :  { %v2867_v21 = vadd.f32 %v7007_v20, %v2866_v62 }
 0x73c   :  { %v2888_v25 = vmax.f32 %v2867_v21, 0.0 }
 0x73e   :  { %6768 = vmatmul.msk.f32.gmra.mxu1 %vm1878_vm4, %v2888_v25 }
 0x741   :  { %v2869_v38 = vpop.f32.mrf.mxu0 }
 0x742   :  { %v2870_v43 = vadd.f32 %v7007_v20, %v2869_v38 }
 0x744   :  { %v2889_v33 = vmax.f32 %v2870_v43, 0.0  ;;  %v7009_v43 = vld [vmem:[%s11076_s1 + $0x2] ss:$0 sm:$0xff] }
 0x745   :  { %vm437_vm14 = vcmp.eq.s32.totalorder %v8698_v40, %v7009_v43 }
 0x746   :  { %6769 = vmatmul.msk.f32.gmra.mxu1 %vm1878_vm4, %v2889_v33 }
 0x749   :  { %v2872_v61 = vpop.f32.mrf.mxu0 }
 0x74a   :  { %v2873_v49 = vadd.f32 %v7007_v20, %v2872_v61 }
 0x74c   :  { %v2890_v28 = vmax.f32 %v2873_v49, 0.0 }
 0x74e   :  { %6770 = vmatmul.msk.f32.gmra.mxu1 %vm1878_vm4, %v2890_v28 }
 0x751   :  { %v2875_v10 = vpop.f32.mrf.mxu0 }
 0x752   :  { %v2876_v3 = vadd.f32 %v7007_v20, %v2875_v10 }
 0x754   :  { %v2891_v36 = vmax.f32 %v2876_v3, 0.0 }
 0x756   :  { %6771 = vmatmul.msk.f32.gmra.mxu1 %vm1878_vm4, %v2891_v36 }
 0x759   :  { %v2878_v48 = vpop.f32.mrf.mxu0 }
 0x75a   :  { %v2879_v11 = vadd.f32 %v7007_v20, %v2878_v48 }
 0x75c   :  { %v2892_v7 = vmax.f32 %v2879_v11, 0.0 }
 0x75e   :  { %6772 = vmatmul.msk.f32.gmra.mxu1 %vm1878_vm4, %v2892_v7 }
 0x761   :  { %v2881_v14 = vpop.f32.mrf.mxu0 }
 0x762   :  { %v2882_v18 = vadd.f32 %v7007_v20, %v2881_v14 }
 0x764   :  { %v2893_v15 = vmax.f32 %v2882_v18, 0.0 }
 0x766   :  { %6773 = vmatmul.msk.f32.gmra.mxu1 %vm1878_vm4, %v2893_v15 }
 0x769   :  { %v2884_v5 = vpop.f32.mrf.mxu0 }
 0x76a   :  { %v2885_v53 = vadd.f32 %v7007_v20, %v2884_v5 }
 0x76c   :  { %v2894_v46 = vmax.f32 %v2885_v53, 0.0  ;;  %v9276_v53 = vsel %vm437_vm14, 1.0, %v11547_v19 }
 0x76e   :  { %6774 = vmatmul.msk.f32.gmra.mxu1 %vm1878_vm4, %v2894_v46 }
 0x7b3   :  { %v2942_v13 = vpop.f32.mrf.mxu1 }
 0x7b4   :  { %v2943_v14 = vadd.f32 %v7008_v51, %v2942_v13 }
 0x7bb   :  { %v2945_v16 = vpop.f32.mrf.mxu1 }
 0x7bc   :  { %v2946_v10 = vadd.f32 %v7008_v51, %v2945_v16 }
 0x7be   :  { %v2967_v46 = vmax.f32 %v2946_v10, 0.0 }
 0x7c3   :  { %v2948_v30 = vpop.f32.mrf.mxu1 }
 0x7c4   :  { %v2949_v49 = vadd.f32 %v7008_v51, %v2948_v30 }
 0x7c6   :  { %v2968_v18 = vmax.f32 %v2949_v49, 0.0 }
 0x7cb   :  { %v2951_v59 = vpop.f32.mrf.mxu1 }
 0x7cc   :  { %v2952_v20 = vadd.f32 %v7008_v51, %v2951_v59  ;;  %v2983_v59 = vsel %vm116_vm1, %v9276_v53, 0 }
 0x7ce   :  { %v2969_v3 = vmax.f32 %v2952_v20, 0.0  ;;  %v9318_v20 = vsub.f32 %v2983_v59, %v2983_v59 }
 0x7d0   :  { %v9279_v16 = vadd.f32 %v2969_v3, %v11596_v37 }
 0x7d2   :  { %11604 = vst [vmem:[#allocation181_spill] sm:$0xff] %v9279_v16 }
 0x7d3   :  { %v2954_v8 = vpop.f32.mrf.mxu1 }
 0x7d4   :  { %v2955_v62 = vadd.f32 %v7008_v51, %v2954_v8  ;;  %v2966_v8 = vmax.f32 %v2943_v14, 0.0 }
 0x7d6   :  { %v2970_v33 = vmax.f32 %v2955_v62, 0.0  ;;  %v9307_v62 = vand.u32 4294901760, %v9279_v16  ;;  %v9321_v43 = vadd.f32 %v2966_v8, %v7388_v32 }
 0x7d8   :  { %v9267_v48 = vadd.f32 %v2970_v33, %v11597_v57  ;;  %11608 = vst [vmem:[#allocation185_spill] sm:$0xff] %v9321_v43  ;;  %v9331_v3 = vsub.f32 %v9279_v16, %v9307_v62 }
 0x7da   :  { %11603 = vst [vmem:[#allocation7_spill] sm:$0xff] %v9267_v48  ;;  %v9289_v13 = vand.u32 4294901760, %v9267_v48 }
 0x7db   :  { %v2957_v50 = vpop.f32.mrf.mxu1 }
 0x7dc   :  { %v2958_v52 = vadd.f32 %v7008_v51, %v2957_v50  ;;  %v9294_v50 = vadd.f32 %v2968_v18, %v11595_v1 }
 0x7de   :  { %v2971_v25 = vmax.f32 %v2958_v52, 0.0  ;;  %11606 = vst [vmem:[#allocation183_spill] sm:$0xff] %v9294_v50  ;;  %v9325_v49 = vand.u32 4294901760, %v9294_v50 }
 0x7e0   :  { %v9263_v28 = vadd.f32 %v2971_v25, %v11598_v42  ;;  %v9315_v25 = vsub.f32 %v9267_v48, %v9289_v13  ;;  %v3313_v8 = vsub.f32 %v9294_v50, %v9325_v49 }
 0x7e2   :  { %11602 = vst [vmem:[#allocation9_spill] sm:$0xff] %v9263_v28  ;;  %v9273_v5 = vand.u32 4294901760, %v9263_v28  ;;  %v3302_v18 = vand.u32 4294901760, %v9315_v25 }
 0x7e3   :  { %v2960_v44 = vpop.f32.mrf.mxu1 }
 0x7e4   :  { %v2961_v21 = vadd.f32 %v7008_v51, %v2960_v44  ;;  %v9301_v52 = vsub.f32 %v9263_v28, %v9273_v5  ;;  %v9304_v44 = vadd.f32 %v2967_v46, %v11594_v47 }
 0x7e6   :  { %v2972_v38 = vmax.f32 %v2961_v21, 0.0  ;;  %11607 = vst [vmem:[#allocation184_spill] sm:$0xff] %v9304_v44  ;;  %v3296_v10 = vand.u32 4294901760, %v9301_v52 }
 0x7e8   :  { %v9260_v61 = vadd.f32 %v2972_v38, %v11599_v27  ;;  %v3297_v59 = vsub.f32 %v9301_v52, %v3296_v10 }
 0x7ea   :  { %11601 = vst [vmem:[#allocation10_spill] sm:$0xff] %v9260_v61  ;;  %v9270_v7 = vand.u32 4294901760, %v9260_v61  ;;  %v3298_v28 = vand.u32 4294901760, %v3297_v59 }
 0x7eb   :  { %v2963_v36 = vpop.f32.mrf.mxu1 }
 0x7ec   :  { %v2964_v11 = vadd.f32 %v7008_v51, %v2963_v36  ;;  %v9286_v30 = vsub.f32 %v9260_v61, %v9270_v7  ;;  %v9334_v36 = vand.u32 4294901760, %v9304_v44  ;;  %v3303_v61 = vsub.f32 %v9315_v25, %v3302_v18 }
 0x7ee   :  { %v2973_v15 = vmax.f32 %v2964_v11, 0.0  ;;  %v11298_v38 = vand.u32 4294901760, %v9286_v30 }
 0x7f0   :  { %v9282_v40 = vadd.f32 %v2973_v15, %v11600_v54  ;;  %v3291_v14 = vsub.f32 %v9286_v30, %v11298_v38  ;;  %v3011_v15 = vand.u32 4294901760, %v9318_v20  ;;  %v3308_v38 = vand.u32 4294901760, %v9331_v3 }
 0x7f2   :  { %11605 = vst [vmem:[#allocation182_spill] sm:$0xff] %v9282_v40  ;;  %v9297_v51 = vand.u32 4294901760, %v9282_v40 }
 0x7f4   :  { %2994 = vmatpush.msrb.mxu2 %v9297_v51  ;;  %3670 = vmatpush.msra.mxu1 %v9297_v51  ;;  %v3283_v21 = vsub.f32 %v9282_v40, %v9297_v51  ;;  %v3292_v40 = vand.u32 4294901760, %v3291_v14  ;;  %v3309_v14 = vsub.f32 %v9331_v3, %v3308_v38 }
 0x7f6   :  { %2996 = vmatpush.msrb.mxu2 %v9270_v7  ;;  %3473 = vmatpush.msra.mxu0 %v3283_v21  ;;  %v3284_v33 = vand.u32 4294901760, %v3283_v21 }
 0x7f7   :  { %3672 = vmatpush.msra.mxu1 %v9270_v7 }
 0x7f8   :  { %2998 = vmatpush.msrb.mxu2 %v9273_v5  ;;  %3476 = vmatpush.msra.mxu0 %v9286_v30  ;;  %v3285_v11 = vsub.f32 %v3283_v21, %v3284_v33  ;;  %v9350_v21 = vand.u32 4294901760, %v9321_v43 }
 0x7f9   :  { %3674 = vmatpush.msra.mxu1 %v9273_v5 }
 0x7fa   :  { %3000 = vmatpush.msrb.mxu2 %v9289_v13  ;;  %3479 = vmatpush.msra.mxu0 %v9301_v52  ;;  %v3286_v46 = vand.u32 4294901760, %v3285_v11  ;;  %v3319_v11 = vsub.f32 %v9304_v44, %v9334_v36  ;;  %v3012_v52 = vsub.f32 %v9318_v20, %v3011_v15  ;;  %v3325_v48 = vsub.f32 %v9321_v43, %v9350_v21 }
 0x7fb   :  { %3676 = vmatpush.msra.mxu1 %v9289_v13  ;;  %v3310_v44 = vand.u32 4294901760, %v3309_v14  ;;  %v11631_v14 = vld [vmem:[#allocation33_spill] sm:$0xff] }
 0x7fc   :  { %3002 = vmatpush.msrb.mxu2 %v9307_v62  ;;  %3287 = vmatpush.msrb.mxu3 %v3286_v46  ;;  %v3314_v46 = vand.u32 4294901760, %v3313_v8  ;;  %v3013_v16 = vand.u32 4294901760, %v3012_v52  ;;  %v3320_v50 = vand.u32 4294901760, %v3319_v11  ;;  %v3326_v59 = vand.u32 4294901760, %v3325_v48 }
 0x7fd   :  { %3482 = vmatpush.msra.mxu0 %v9315_v25  ;;  %3678 = vmatpush.msra.mxu1 %v9307_v62  ;;  %v3304_v25 = vand.u32 4294901760, %v3303_v61  ;;  %v11609_v52 = vand.u32 4294901760, %v9286_v30  ;;  %v11613_v30 = vld [vmem:[#allocation20_spill] sm:$0xff] }
 0x7fe   :  { %3004 = vmatpush.msrb.mxu2 %v9325_v49  ;;  %3293 = vmatpush.msrb.mxu3 %v3292_v40  ;;  %v3315_v40 = vsub.f32 %v3313_v8, %v3314_v46 }
 0x7ff   :  { %3485 = vmatpush.msra.mxu0 %v9331_v3  ;;  %3680 = vmatpush.msra.mxu1 %v9325_v49  ;;  %v3321_v3 = vsub.f32 %v3319_v11, %v3320_v50 }
 0x800   :  { %3006 = vmatpush.msrb.mxu2 %v9334_v36  ;;  %3299 = vmatpush.msrb.mxu3 %v3298_v28  ;;  %v3316_v61 = vand.u32 4294901760, %v3315_v40  ;;  %v3327_v28 = vsub.f32 %v3325_v48, %v3326_v59  ;;  %v11632_v40 = vld [vmem:[#allocation30_spill] sm:$0xff] }
 0x801   :  { %3488 = vmatpush.msra.mxu0 %v3313_v8  ;;  %3682 = vmatpush.msra.mxu1 %v9334_v36  ;;  %v3322_v8 = vand.u32 4294901760, %v3321_v3  ;;  %v11634_v3 = vld [vmem:[#allocation27_spill] sm:$0xff] }
 0x802   :  { %3008 = vmatpush.msrb.mxu2 %v9350_v21  ;;  %3305 = vmatpush.msrb.mxu3 %v3304_v25  ;;  %v3328_v25 = vand.u32 4294901760, %v3327_v28  ;;  %v11636_v28 = vld [vmem:[#allocation34_spill] sm:$0xff] }
 0x803   :  { %3491 = vmatpush.msra.mxu0 %v3319_v11  ;;  %3684 = vmatpush.msra.mxu1 %v9350_v21  ;;  %v11629_v11 = vld [vmem:[#allocation36_spill] sm:$0xff] }
 0x804   :  { %3014 = vmatmul.f32.vlgmr.msrb.gmra.mxu2 %v3013_v16  ;;  %3688 = vmatmul.f32.vlgmr.msra.gmra.mxu1 %v3011_v15  ;;  %v11610_v16 = vld [vmem:[#allocation16_spill] sm:$0xff]  ;;  %v11627_v15 = vld [vmem:[#allocation29_spill] sm:$0xff] }
 0x805   :  { %3895 = vmatpush.msra.mxu2 %v3284_v33  ;;  %3311 = vmatpush.msrb.mxu3 %v3310_v44  ;;  %v11611_v44 = vld [vmem:[#allocation13_spill] sm:$0xff] }
 0x806   :  { %3494 = vmatpush.msra.mxu0 %v3325_v48  ;;  %v11612_v48 = vld [vmem:[#allocation12_spill] sm:$0xff]  ;;  %v11615_v33 = vld [vmem:[#allocation17_spill] sm:$0xff] }
 0x807   :  { %3497 = vmatmul.f32.vlgmr.msra.gmra.mxu0 %v9318_v20  ;;  %3899 = vmatpush.msra.mxu2 %v11609_v52  ;;  %v11614_v20 = vld [vmem:[#allocation6_spill] sm:$0xff]  ;;  %v11637_v52 = vld [vmem:[#allocation44_spill] sm:$0xff] }
 0x808   :  { %3317 = vmatpush.msrb.mxu3 %v3316_v61  ;;  %v11635_v61 = vld [vmem:[#allocation37_spill] sm:$0xff] }
 0x809   :  { %3903 = vmatpush.msra.mxu2 %v3296_v10  ;;  %v11623_v10 = vld [vmem:[#allocation25_spill] sm:$0xff] }
 0x80a   :  { %3323 = vmatpush.msrb.mxu3 %v3322_v8  ;;  %v11638_v8 = vld [vmem:[#allocation31_spill] sm:$0xff] }
 0x80b   :  { %3907 = vmatpush.msra.mxu2 %v3302_v18  ;;  %v11626_v18 = vld [vmem:[#allocation19_spill] sm:$0xff] }
 0x80c   :  { %3329 = vmatpush.msrb.mxu3 %v3328_v25  ;;  %3022 = vmatmul.f32.gmra.mxu2 %v11610_v16  ;;  %v11639_v25 = vld [vmem:[#allocation41_spill] sm:$0xff]  ;;  %v11640_v16 = vld [vmem:[#allocation38_spill] sm:$0xff] }
 0x80d   :  { %6775 = vmatmul.msk.f32.vlgmr.msrb.gmra.mxu3 %vm116_vm1, %v9276_v53  ;;  %3694 = vmatmul.f32.gmra.mxu1 %v11611_v44  ;;  %v11641_v44 = vld [vmem:[#allocation48_spill] sm:$0xff] }
 0x80e   :  { %3911 = vmatpush.msra.mxu2 %v3308_v38  ;;  %4066 = vmatpush.msra.mxu3 %v9297_v51  ;;  %v11616_v51 = vld [vmem:[#allocation14_spill] sm:$0xff]  ;;  %v11621_v38 = vld [vmem:[#allocation28_spill] sm:$0xff] }
 0x80f   :  { %3502 = vmatmul.f32.gmra.mxu0 %v11612_v48  ;;  %v11642_v48 = vld [vmem:[#allocation35_spill] sm:$0xff] }
 0x810   :  { %3915 = vmatpush.msra.mxu2 %v3314_v46  ;;  %4068 = vmatpush.msra.mxu3 %v9270_v7  ;;  %v11617_v7 = vld [vmem:[#allocation24_spill] sm:$0xff]  ;;  %v11630_v46 = vld [vmem:[#allocation23_spill] sm:$0xff] }
 0x812   :  { %3919 = vmatpush.msra.mxu2 %v3320_v50  ;;  %4070 = vmatpush.msra.mxu3 %v9273_v5  ;;  %v11618_v5 = vld [vmem:[#allocation11_spill] sm:$0xff]  ;;  %v11620_v50 = vld [vmem:[#allocation18_spill] sm:$0xff] }
 0x814   :  { %3923 = vmatpush.msra.mxu2 %v3326_v59  ;;  %4072 = vmatpush.msra.mxu3 %v9289_v13  ;;  %v11619_v13 = vld [vmem:[#allocation21_spill] sm:$0xff]  ;;  %v11633_v59 = vld [vmem:[#allocation40_spill] sm:$0xff] }
 0x815   :  { %3030 = vmatmul.f32.gmra.mxu2 %v11613_v30  ;;  %6776 = vmatmul.msk.f32.gmra.mxu3 %vm116_vm1, %v11614_v20  ;;  %v11643_v30 = vld [vmem:[#allocation45_spill] sm:$0xff] }
 0x816   :  { %3700 = vmatmul.f32.gmra.mxu1 %v11615_v33  ;;  %4074 = vmatpush.msra.mxu3 %v9307_v62  ;;  %v11622_v62 = vld [vmem:[#allocation15_spill] sm:$0xff]  ;;  %v11644_v33 = vld [vmem:[#allocation42_spill] sm:$0xff] }
 0x817   :  { %3507 = vmatmul.f32.gmra.mxu0 %v11616_v51  ;;  %v11645_v51 = vld [vmem:[#allocation52_spill] sm:$0xff] }
 0x818   :  { %4076 = vmatpush.msra.mxu3 %v9325_v49  ;;  %v11624_v49 = vld [vmem:[#allocation22_spill] sm:$0xff] }
 0x81a   :  { %4078 = vmatpush.msra.mxu3 %v9334_v36  ;;  %v11625_v36 = vld [vmem:[#allocation32_spill] sm:$0xff] }
 0x81c   :  { %4080 = vmatpush.msra.mxu3 %v9350_v21  ;;  %v11628_v21 = vld [vmem:[#allocation26_spill] sm:$0xff] }
 0x81d   :  { %3038 = vmatmul.f32.gmra.mxu2 %v11617_v7  ;;  %6777 = vmatmul.msk.f32.gmra.mxu3 %vm116_vm1, %v11618_v5  ;;  %v11646_v7 = vld [vmem:[#allocation39_spill] sm:$0xff] }
 0x81e   :  { %3706 = vmatmul.f32.gmra.mxu1 %v11619_v13  ;;  %v11647_v13 = vld [vmem:[#allocation49_spill] sm:$0xff] }
 0x81f   :  { %3512 = vmatmul.f32.gmra.mxu0 %v11620_v50  ;;  %v11648_v50 = vld [vmem:[#allocation46_spill] sm:$0xff] }
 0x825   :  { %3046 = vmatmul.f32.gmra.mxu2 %v11621_v38  ;;  %6778 = vmatmul.msk.f32.gmra.mxu3 %vm116_vm1, %v11622_v62  ;;  %v11649_v38 = vld [vmem:[#allocation56_spill] sm:$0xff] }
 0x826   :  { %3712 = vmatmul.f32.gmra.mxu1 %v11623_v10  ;;  %v11650_v10 = vld [vmem:[#allocation43_spill] sm:$0xff] }
 0x827   :  { %3517 = vmatmul.f32.gmra.mxu0 %v11624_v49  ;;  %v11651_v49 = vld [vmem:[#allocation53_spill] sm:$0xff] }
 0x82d   :  { %3054 = vmatmul.f32.gmra.mxu2 %v11625_v36  ;;  %6779 = vmatmul.msk.f32.gmra.mxu3 %vm116_vm1, %v11626_v18  ;;  %v11652_v36 = vld [vmem:[#allocation50_spill] sm:$0xff] }
 0x82e   :  { %3718 = vmatmul.f32.gmra.mxu1 %v11627_v15  ;;  %v11653_v15 = vld [vmem:[#allocation60_spill] sm:$0xff] }
 0x82f   :  { %3522 = vmatmul.f32.gmra.mxu0 %v11628_v21  ;;  %v11654_v21 = vld [vmem:[#allocation47_spill] sm:$0xff] }
 0x835   :  { %3062 = vmatmul.f32.gmra.mxu2 %v11629_v11  ;;  %6780 = vmatmul.msk.f32.gmra.mxu3 %vm116_vm1, %v11630_v46  ;;  %v11655_v11 = vld [vmem:[#allocation57_spill] sm:$0xff] }
 0x836   :  { %3724 = vmatmul.f32.gmra.mxu1 %v11631_v14  ;;  %v11656_v14 = vld [vmem:[#allocation54_spill] sm:$0xff] }
 0x837   :  { %3527 = vmatmul.f32.gmra.mxu0 %v11632_v40  ;;  %v11657_v40 = vld [vmem:[#allocation64_spill] sm:$0xff] }
 0x83d   :  { %3070 = vmatmul.f32.gmra.mxu2 %v11633_v59  ;;  %6781 = vmatmul.msk.f32.gmra.mxu3 %vm116_vm1, %v11634_v3  ;;  %v11658_v59 = vld [vmem:[#allocation51_spill] sm:$0xff] }
 0x83e   :  { %3730 = vmatmul.f32.gmra.mxu1 %v11635_v61  ;;  %v11659_v61 = vld [vmem:[#allocation61_spill] sm:$0xff] }
 0x83f   :  { %3532 = vmatmul.f32.gmra.mxu0 %v11636_v28  ;;  %v11660_v28 = vld [vmem:[#allocation58_spill] sm:$0xff] }
 0x845   :  { %3078 = vmatmul.f32.gmra.mxu2 %v11637_v52  ;;  %6782 = vmatmul.msk.f32.gmra.mxu3 %vm116_vm1, %v11638_v8  ;;  %v11661_v52 = vld [vmem:[#allocation68_spill] sm:$0xff] }
 0x846   :  { %3736 = vmatmul.f32.gmra.mxu1 %v11639_v25  ;;  %v11662_v25 = vld [vmem:[#allocation55_spill] sm:$0xff] }
 0x847   :  { %3537 = vmatmul.f32.gmra.mxu0 %v11640_v16  ;;  %v11663_v16 = vld [vmem:[#allocation65_spill] sm:$0xff] }
 0x84d   :  { %3086 = vmatmul.f32.gmra.mxu2 %v11641_v44  ;;  %6783 = vmatmul.msk.f32.gmra.mxu3 %vm116_vm1, %v11642_v48  ;;  %v11664_v44 = vld [vmem:[#allocation62_spill] sm:$0xff] }
 0x84e   :  { %3742 = vmatmul.f32.gmra.mxu1 %v11643_v30  ;;  %v11665_v30 = vld [vmem:[#allocation72_spill] sm:$0xff] }
 0x84f   :  { %3542 = vmatmul.f32.gmra.mxu0 %v11644_v33  ;;  %v11666_v33 = vld [vmem:[#allocation59_spill] sm:$0xff] }
 0x855   :  { %3094 = vmatmul.f32.gmra.mxu2 %v11645_v51  ;;  %6784 = vmatmul.msk.f32.gmra.mxu3 %vm116_vm1, %v11646_v7  ;;  %v11667_v51 = vld [vmem:[#allocation69_spill] sm:$0xff] }
 0x856   :  { %3748 = vmatmul.f32.gmra.mxu1 %v11647_v13  ;;  %v11668_v13 = vld [vmem:[#allocation66_spill] sm:$0xff] }
 0x857   :  { %3547 = vmatmul.f32.gmra.mxu0 %v11648_v50 }
 0x85d   :  { %3102 = vmatmul.f32.gmra.mxu2 %v11649_v38  ;;  %6785 = vmatmul.msk.f32.gmra.mxu3 %vm116_vm1, %v11650_v10 }
 0x85e   :  { %3754 = vmatmul.f32.gmra.mxu1 %v11651_v49  ;;  %v11669_v49 = vld [vmem:[#allocation76_spill] sm:$0xff] }
 0x85f   :  { %3552 = vmatmul.f32.gmra.mxu0 %v11652_v36  ;;  %v11670_v36 = vld [vmem:[#allocation63_spill] sm:$0xff] }
 0x865   :  { %3110 = vmatmul.f32.gmra.mxu2 %v11653_v15  ;;  %6786 = vmatmul.msk.f32.gmra.mxu3 %vm116_vm1, %v11654_v21  ;;  %v11671_v15 = vld [vmem:[#allocation73_spill] sm:$0xff] }
 0x866   :  { %3760 = vmatmul.f32.gmra.mxu1 %v11655_v11  ;;  %v11672_v11 = vld [vmem:[#allocation70_spill] sm:$0xff] }
 0x867   :  { %3557 = vmatmul.f32.gmra.mxu0 %v11656_v14 }
 0x86d   :  { %3118 = vmatmul.f32.gmra.mxu2 %v11657_v40  ;;  %6787 = vmatmul.msk.f32.gmra.mxu3 %vm116_vm1, %v11658_v59 }
 0x86e   :  { %3766 = vmatmul.f32.gmra.mxu1 %v11659_v61 }
 0x86f   :  { %3562 = vmatmul.f32.gmra.mxu0 %v11660_v28  ;;  %v11673_v28 = vld [vmem:[#allocation80_spill] sm:$0xff] }
 0x875   :  { %3126 = vmatmul.f32.gmra.mxu2 %v11661_v52  ;;  %6788 = vmatmul.msk.f32.gmra.mxu3 %vm116_vm1, %v11662_v25  ;;  %v11674_v52 = vld [vmem:[#allocation67_spill] sm:$0xff] }
 0x876   :  { %3772 = vmatmul.f32.gmra.mxu1 %v11663_v16  ;;  %v11675_v16 = vld [vmem:[#allocation77_spill] sm:$0xff] }
 0x877   :  { %3567 = vmatmul.f32.gmra.mxu0 %v11664_v44  ;;  %v11676_v44 = vld [vmem:[#allocation74_spill] sm:$0xff] }
 0x87d   :  { %3134 = vmatmul.f32.gmra.mxu2 %v11665_v30  ;;  %6789 = vmatmul.msk.f32.gmra.mxu3 %vm116_vm1, %v11666_v33 }
 0x87e   :  { %3778 = vmatmul.f32.gmra.mxu1 %v11667_v51 }
 0x87f   :  { %3572 = vmatmul.f32.gmra.mxu0 %v11668_v13 }
 0x881   :  { %v3689_v50 = vpop.f32.mrf.mxu1 }
 0x884   :  { %v3498_v38 = vpop.f32.mrf.mxu0 }
 0x885   :  { %3142 = vmatmul.f32.gmra.mxu2 %v11669_v49  ;;  %6790 = vmatmul.msk.f32.gmra.mxu3 %vm116_vm1, %v11670_v36 }
 0x886   :  { %3784 = vmatmul.f32.gmra.mxu1 %v11671_v15  ;;  %v11677_v15 = vld [vmem:[#allocation84_spill] sm:$0xff] }
 0x887   :  { %3577 = vmatmul.f32.gmra.mxu0 %v11672_v11  ;;  %v3015_v14 = vpop.f32.mrf.mxu2  ;;  %v11678_v11 = vld [vmem:[#allocation71_spill] sm:$0xff] }
 0x88a   :  { %v3695_v61 = vpop.f32.mrf.mxu1 }
 0x88c   :  { %v3503_v40 = vpop.f32.mrf.mxu0 }
 0x88d   :  { %3150 = vmatmul.f32.gmra.mxu2 %v11673_v28  ;;  %6791 = vmatmul.msk.f32.gmra.mxu3 %vm116_vm1, %v11674_v52  ;;  %v11679_v28 = vld [vmem:[#allocation81_spill] sm:$0xff] }
 0x88e   :  { %3790 = vmatmul.f32.gmra.mxu1 %v11675_v16 }
 0x88f   :  { %3582 = vmatmul.f32.gmra.mxu0 %v11676_v44  ;;  %v3023_v30 = vpop.f32.mrf.mxu2 }
 0x890   :  { %v3332_v51 = vpop.f32.mrf.mxu3 }
 0x891   :  { %v3333_v13 = vadd.f32 %v3332_v51, %v3015_v14  ;;  %v11683_v51 = vld [vmem:[#allocation85_spill] sm:$0xff] }
 0x893   :  { %v3499_v49 = vadd.f32 %v3498_v38, %v3333_v13  ;;  %v3701_v22 = vpop.f32.mrf.mxu1  ;;  %v11682_v38 = vld [vmem:[#allocation75_spill] sm:$0xff]  ;;  %v11684_v13 = vld [vmem:[#allocation82_spill] sm:$0xff] }
 0x894   :  { %v3508_v43 = vpop.f32.mrf.mxu0 }
 0x895   :  { %3158 = vmatmul.f32.gmra.mxu2 %v11677_v15  ;;  %6792 = vmatmul.msk.f32.gmra.mxu3 %vm116_vm1, %v11678_v11  ;;  %v9470_v34 = vadd.f32 %v3689_v50, %v3499_v49 }
 0x896   :  { %3796 = vmatmul.f32.gmra.mxu1 %v11679_v28 }
 0x897   :  { %3587 = vmatmul.f32.gmra.mxu0 %v11680_v45 }
 0x898   :  { %v3031_v16 = vpop.f32.mrf.mxu2  ;;  %v3336_v63 = vpop.f32.mrf.mxu3 }
 0x899   :  { %v3337_v44 = vadd.f32 %v3336_v63, %v3023_v30  ;;  %v11686_v63 = vld [vmem:[#allocation79_spill] sm:$0xff] }
 0x89b   :  { %v3504_v2 = vadd.f32 %v3503_v40, %v3337_v44  ;;  %v3707_v28 = vpop.f32.mrf.mxu1  ;;  %v11687_v40 = vld [vmem:[#allocation89_spill] sm:$0xff] }
 0x89c   :  { %v3513_v50 = vpop.f32.mrf.mxu0 }
 0x89d   :  { %3166 = vmatmul.f32.gmra.mxu2 %v11681_v17  ;;  %6793 = vmatmul.msk.f32.gmra.mxu3 %vm116_vm1, %v11682_v38  ;;  %v9477_v14 = vadd.f32 %v3695_v61, %v3504_v2  ;;  %v11688_v2 = vld [vmem:[#allocation86_spill] sm:$0xff] }
 0x89e   :  { %3802 = vmatmul.f32.gmra.mxu1 %v11683_v51 }
 0x89f   :  { %3592 = vmatmul.f32.gmra.mxu0 %v11684_v13 }
 0x8a0   :  { %v3039_v49 = vpop.f32.mrf.mxu2  ;;  %v3340_v15 = vpop.f32.mrf.mxu3 }
 0x8a1   :  { %v3341_v45 = vadd.f32 %v3340_v15, %v3031_v16  ;;  %v11691_v16 = vld [vmem:[#allocation93_spill] sm:$0xff] }
 0x8a3   :  { %v3509_v60 = vadd.f32 %v3508_v43, %v3341_v45  ;;  %v3713_v13 = vpop.f32.mrf.mxu1  ;;  %v11690_v43 = vld [vmem:[#allocation83_spill] sm:$0xff] }
 0x8a4   :  { %v3518_v44 = vpop.f32.mrf.mxu0 }
 0x8a5   :  { %3174 = vmatmul.f32.gmra.mxu2 %v11685_v24  ;;  %6794 = vmatmul.msk.f32.gmra.mxu3 %vm116_vm1, %v11686_v63  ;;  %v9484_v17 = vadd.f32 %v3701_v22, %v3509_v60  ;;  %v11692_v22 = vld [vmem:[#allocation90_spill] sm:$0xff] }
 0x8a6   :  { %3808 = vmatmul.f32.gmra.mxu1 %v11687_v40 }
 0x8a7   :  { %3597 = vmatmul.f32.gmra.mxu0 %v11688_v2 }
 0x8a8   :  { %v3047_v61 = vpop.f32.mrf.mxu2  ;;  %v3344_v30 = vpop.f32.mrf.mxu3 }
 0x8a9   :  { %v3345_v51 = vadd.f32 %v3344_v30, %v3039_v49  ;;  %v11693_v49 = vld [vmem:[#allocation100_spill] sm:$0xff]  ;;  %v11695_v30 = vld [vmem:[#allocation97_spill] sm:$0xff] }
 0x8ab   :  { %v3514_v29 = vadd.f32 %v3513_v50, %v3345_v51  ;;  %v3719_v4 = vpop.f32.mrf.mxu1  ;;  %v11694_v50 = vld [vmem:[#allocation87_spill] sm:$0xff] }
 0x8ac   :  { %v3523_v40 = vpop.f32.mrf.mxu0 }
 0x8ad   :  { %3182 = vmatmul.f32.gmra.mxu2 %v11689_v31  ;;  %6795 = vmatmul.msk.f32.gmra.mxu3 %vm116_vm1, %v11690_v43  ;;  %v9491_v24 = vadd.f32 %v3707_v28, %v3514_v29  ;;  %v11696_v29 = vld [vmem:[#allocation94_spill] sm:$0xff] }
 0x8ae   :  { %3814 = vmatmul.f32.gmra.mxu1 %v11691_v16 }
 0x8af   :  { %3602 = vmatmul.f32.gmra.mxu0 %v11692_v22 }
 0x8b0   :  { %v3055_v60 = vpop.f32.mrf.mxu2  ;;  %v3348_v15 = vpop.f32.mrf.mxu3 }
 0x8b1   :  { %v3349_v45 = vadd.f32 %v3348_v15, %v3047_v61  ;;  %v11697_v61 = vld [vmem:[#allocation104_spill] sm:$0xff] }
 0x8b3   :  { %v3519_v2 = vadd.f32 %v3518_v44, %v3349_v45  ;;  %v11698_v44 = vld [vmem:[#allocation91_spill] sm:$0xff]  ;;  %v11699_v45 = vld [vmem:[#allocation101_spill] sm:$0xff] }
 0x8b4   :  { %v3528_v55 = vpop.f32.mrf.mxu0 }
 0x8b5   :  { %3190 = vmatmul.f32.gmra.mxu2 %v11693_v49  ;;  %6796 = vmatmul.msk.f32.gmra.mxu3 %vm116_vm1, %v11694_v50  ;;  %v9498_v31 = vadd.f32 %v3713_v13, %v3519_v2  ;;  %v3725_v13 = vpop.f32.mrf.mxu1  ;;  %v11700_v2 = vld [vmem:[#allocation98_spill] sm:$0xff] }
 0x8b6   :  { %3820 = vmatmul.f32.gmra.mxu1 %v11695_v30 }
 0x8b7   :  { %3607 = vmatmul.f32.gmra.mxu0 %v11696_v29 }
 0x8b8   :  { %v3063_v28 = vpop.f32.mrf.mxu2  ;;  %v3352_v51 = vpop.f32.mrf.mxu3 }
 0x8b9   :  { %v3353_v16 = vadd.f32 %v3352_v51, %v3055_v60  ;;  %v11702_v60 = vld [vmem:[#allocation95_spill] sm:$0xff]  ;;  %v11703_v51 = vld [vmem:[#allocation105_spill] sm:$0xff] }
 0x8bb   :  { %v3524_v22 = vadd.f32 %v3523_v40, %v3353_v16  ;;  %v11704_v16 = vld [vmem:[#allocation102_spill] sm:$0xff] }
 0x8bd   :  { %3198 = vmatmul.f32.gmra.mxu2 %v11697_v61  ;;  %6797 = vmatmul.msk.f32.gmra.mxu3 %vm116_vm1, %v11698_v44  ;;  %v9505_v15 = vadd.f32 %v3719_v4, %v3524_v22  ;;  %v3533_v4 = vpop.f32.mrf.mxu0 }
 0x8be   :  { %3826 = vmatmul.f32.gmra.mxu1 %v11699_v45 }
 0x8bf   :  { %3612 = vmatmul.f32.gmra.mxu0 %v11700_v2  ;;  %v3731_v2 = vpop.f32.mrf.mxu1 }
 0x8c0   :  { %v3071_v49 = vpop.f32.mrf.mxu2  ;;  %v3356_v30 = vpop.f32.mrf.mxu3 }
 0x8c1   :  { %v3357_v29 = vadd.f32 %v3356_v30, %v3063_v28  ;;  %v11707_v28 = vld [vmem:[#allocation109_spill] sm:$0xff] }
 0x8c3   :  { %v3529_v23 = vadd.f32 %v3528_v55, %v3357_v29  ;;  %v11706_v55 = vld [vmem:[#allocation99_spill] sm:$0xff] }
 0x8c5   :  { %3206 = vmatmul.f32.gmra.mxu2 %v11701_v58  ;;  %6798 = vmatmul.msk.f32.gmra.mxu3 %vm116_vm1, %v11702_v60  ;;  %v9512_v40 = vadd.f32 %v3725_v13, %v3529_v23  ;;  %v11708_v23 = vld [vmem:[#allocation106_spill] sm:$0xff] }
 0x8c6   :  { %3832 = vmatmul.f32.gmra.mxu1 %v11703_v51  ;;  %v3538_v51 = vpop.f32.mrf.mxu0 }
 0x8c7   :  { %3617 = vmatmul.f32.gmra.mxu0 %v11704_v16  ;;  %v3737_v26 = vpop.f32.mrf.mxu1 }
 0x8c8   :  { %v3079_v22 = vpop.f32.mrf.mxu2  ;;  %v3360_v61 = vpop.f32.mrf.mxu3 }
 0x8c9   :  { %v3361_v45 = vadd.f32 %v3360_v61, %v3071_v49  ;;  %v11709_v49 = vld [vmem:[#allocation116_spill] sm:$0xff]  ;;  %v11711_v61 = vld [vmem:[#allocation113_spill] sm:$0xff] }
 0x8cb   :  { %v3534_v39 = vadd.f32 %v3533_v4, %v3361_v45  ;;  %v11710_v4 = vld [vmem:[#allocation103_spill] sm:$0xff] }
 0x8cd   :  { %3214 = vmatmul.f32.gmra.mxu2 %v11705_v6  ;;  %6799 = vmatmul.msk.f32.gmra.mxu3 %vm116_vm1, %v11706_v55  ;;  %v9519_v58 = vadd.f32 %v3731_v2, %v3534_v39  ;;  %v11712_v39 = vld [vmem:[#allocation110_spill] sm:$0xff] }
 0x8ce   :  { %3838 = vmatmul.f32.gmra.mxu1 %v11707_v28 }
 0x8cf   :  { %3622 = vmatmul.f32.gmra.mxu0 %v11708_v23  ;;  %v11714_v23 = vld [vmem:[#allocation120_spill] sm:$0xff] }
 0x8d0   :  { %v3087_v13 = vpop.f32.mrf.mxu2  ;;  %v3364_v30 = vpop.f32.mrf.mxu3 }
 0x8d1   :  { %v3365_v29 = vadd.f32 %v3364_v30, %v3079_v22  ;;  %v11715_v22 = vld [vmem:[#allocation107_spill] sm:$0xff]  ;;  %v11716_v30 = vld [vmem:[#allocation117_spill] sm:$0xff] }
 0x8d3   :  { %v3539_v16 = vadd.f32 %v3538_v51, %v3365_v29  ;;  %v11717_v29 = vld [vmem:[#allocation114_spill] sm:$0xff] }
 0x8d5   :  { %3222 = vmatmul.f32.gmra.mxu2 %v11709_v49  ;;  %6800 = vmatmul.msk.f32.gmra.mxu3 %vm116_vm1, %v11710_v4  ;;  %v9526_v6 = vadd.f32 %v3737_v26, %v3539_v16  ;;  %v11719_v49 = vld [vmem:[#allocation124_spill] sm:$0xff] }
 0x8d6   :  { %3844 = vmatmul.f32.gmra.mxu1 %v11711_v61  ;;  %v11720_v61 = vld [vmem:[#allocation111_spill] sm:$0xff] }
 0x8d7   :  { %3627 = vmatmul.f32.gmra.mxu0 %v11712_v39  ;;  %v11722_v39 = vld [vmem:[#allocation118_spill] sm:$0xff] }
 0x8d8   :  { %v3095_v45 = vpop.f32.mrf.mxu2  ;;  %v3368_v2 = vpop.f32.mrf.mxu3 }
 0x8d9   :  { %v9530_v28 = vadd.f32 %v3368_v2, %v3087_v13  ;;  %v11721_v13 = vld [vmem:[#allocation121_spill] sm:$0xff] }
 0x8db   :  { %11713 = vst [vmem:[#allocation16_spill] sm:$0xff] %v9530_v28 }
 0x8dd   :  { %3230 = vmatmul.f32.gmra.mxu2 %v11714_v23  ;;  %6801 = vmatmul.msk.f32.gmra.mxu3 %vm116_vm1, %v11715_v22 }
 0x8de   :  { %3850 = vmatmul.f32.gmra.mxu1 %v11716_v30  ;;  %v11724_v30 = vld [vmem:[#allocation128_spill] sm:$0xff] }
 0x8df   :  { %3632 = vmatmul.f32.gmra.mxu0 %v11717_v29  ;;  %v11725_v29 = vld [vmem:[#allocation115_spill] sm:$0xff] }
 0x8e0   :  { %v3103_v51 = vpop.f32.mrf.mxu2  ;;  %v3372_v26 = vpop.f32.mrf.mxu3 }
 0x8e1   :  { %v9537_v16 = vadd.f32 %v3372_v26, %v3095_v45  ;;  %v11726_v45 = vld [vmem:[#allocation125_spill] sm:$0xff]  ;;  %v11727_v26 = vld [vmem:[#allocation122_spill] sm:$0xff] }
 0x8e3   :  { %11718 = vst [vmem:[#allocation13_spill] sm:$0xff] %v9537_v16 }
 0x8e5   :  { %3238 = vmatmul.f32.gmra.mxu2 %v11719_v49  ;;  %6802 = vmatmul.msk.f32.gmra.mxu3 %vm116_vm1, %v11720_v61 }
 0x8e6   :  { %3856 = vmatmul.f32.gmra.mxu1 %v11721_v13  ;;  %v11729_v13 = vld [vmem:[#allocation132_spill] sm:$0xff] }
 0x8e7   :  { %3637 = vmatmul.f32.gmra.mxu0 %v11722_v39  ;;  %v11730_v39 = vld [vmem:[#allocation119_spill] sm:$0xff] }
 0x8e8   :  { %v3111_v2 = vpop.f32.mrf.mxu2  ;;  %v3376_v23 = vpop.f32.mrf.mxu3 }
 0x8e9   :  { %v9544_v9 = vadd.f32 %v3376_v23, %v3103_v51  ;;  %v11731_v51 = vld [vmem:[#allocation129_spill] sm:$0xff]  ;;  %v11732_v23 = vld [vmem:[#allocation126_spill] sm:$0xff] }
 0x8eb   :  { %11723 = vst [vmem:[#allocation12_spill] sm:$0xff] %v9544_v9 }
 0x8ed   :  { %3246 = vmatmul.f32.gmra.mxu2 %v11724_v30  ;;  %6803 = vmatmul.msk.f32.gmra.mxu3 %vm116_vm1, %v11725_v29 }
 0x8ee   :  { %3862 = vmatmul.f32.gmra.mxu1 %v11726_v45  ;;  %v11734_v45 = vld [vmem:[#allocation136_spill] sm:$0xff] }
 0x8ef   :  { %3642 = vmatmul.f32.gmra.mxu0 %v11727_v26  ;;  %v11735_v26 = vld [vmem:[#allocation123_spill] sm:$0xff] }
 0x8f0   :  { %v3119_v49 = vpop.f32.mrf.mxu2  ;;  %v3380_v16 = vpop.f32.mrf.mxu3 }
 0x8f1   :  { %v9551_v28 = vadd.f32 %v3380_v16, %v3111_v2  ;;  %v11736_v16 = vld [vmem:[#allocation133_spill] sm:$0xff]  ;;  %v11737_v2 = vld [vmem:[#allocation130_spill] sm:$0xff] }
 0x8f3   :  { %11728 = vst [vmem:[#allocation20_spill] sm:$0xff] %v9551_v28 }
 0x8f5   :  { %3254 = vmatmul.f32.gmra.mxu2 %v11729_v13  ;;  %6804 = vmatmul.msk.f32.gmra.mxu3 %vm116_vm1, %v11730_v39 }
 0x8f6   :  { %3868 = vmatmul.f32.gmra.mxu1 %v11731_v51  ;;  %v11739_v51 = vld [vmem:[#allocation139_spill] sm:$0xff] }
 0x8f7   :  { %3647 = vmatmul.f32.gmra.mxu0 %v11732_v23  ;;  %v11740_v23 = vld [vmem:[#allocation127_spill] sm:$0xff] }
 0x8f8   :  { %v3127_v30 = vpop.f32.mrf.mxu2  ;;  %v3384_v9 = vpop.f32.mrf.mxu3 }
 0x8f9   :  { %v9558_v54 = vadd.f32 %v3384_v9, %v3119_v49  ;;  %v11741_v9 = vld [vmem:[#allocation137_spill] sm:$0xff]  ;;  %v11742_v49 = vld [vmem:[#allocation134_spill] sm:$0xff] }
 0x8fb   :  { %11733 = vst [vmem:[#allocation6_spill] sm:$0xff] %v9558_v54 }
 0x8fd   :  { %3262 = vmatmul.f32.gmra.mxu2 %v11734_v45  ;;  %6805 = vmatmul.msk.f32.gmra.mxu3 %vm116_vm1, %v11735_v26 }
 0x8fe   :  { %3874 = vmatmul.f32.gmra.mxu1 %v11736_v16  ;;  %v11744_v16 = vld [vmem:[#allocation131_spill] sm:$0xff] }
 0x8ff   :  { %3652 = vmatmul.f32.gmra.mxu0 %v11737_v2 }
 0x900   :  { %v3135_v13 = vpop.f32.mrf.mxu2  ;;  %v3388_v28 = vpop.f32.mrf.mxu3 }
 0x901   :  { %v9565_v57 = vadd.f32 %v3388_v28, %v3127_v30 }
 0x903   :  { %11738 = vst [vmem:[#allocation17_spill] sm:$0xff] %v9565_v57 }
 0x905   :  { %3270 = vmatmul.f32.gmra.mxu2 %v11739_v51  ;;  %6806 = vmatmul.msk.f32.gmra.mxu3 %vm116_vm1, %v11740_v23 }
 0x906   :  { %3880 = vmatmul.f32.gmra.mxu1 %v11741_v9 }
 0x907   :  { %3657 = vmatmul.f32.gmra.mxu0 %v11742_v49 }
 0x908   :  { %v3143_v45 = vpop.f32.mrf.mxu2  ;;  %v3392_v54 = vpop.f32.mrf.mxu3 }
 0x909   :  { %v9572_v27 = vadd.f32 %v3392_v54, %v3135_v13 }
 0x90b   :  { %11743 = vst [vmem:[#allocation14_spill] sm:$0xff] %v9572_v27 }
 0x90d   :  { %6807 = vmatmul.msk.f32.gmra.mxu3 %vm116_vm1, %v11744_v16  ;;  %6808 = vmatmul.msk.f32.vlgmr.msra.gmra.mxu2 %vm116_vm1, %v9276_v53 }
 0x910   :  { %v3151_v28 = vpop.f32.mrf.mxu2  ;;  %v3396_v30 = vpop.f32.mrf.mxu3 }
 0x911   :  { %v9578_v2 = vadd.f32 %v3396_v30, %v3143_v45 }
 0x913   :  { %11745 = vst [vmem:[#allocation24_spill] sm:$0xff] %v9578_v2 }
 0x915   :  { %6809 = vmatmul.msk.f32.gmra.mxu2 %vm116_vm1, %v11614_v20  ;;  %6841 = vmatmul.msk.f32.vlgmr.msra.gmra.mxu3 %vm116_vm1, %v9276_v53 }
 0x918   :  { %v3159_v51 = vpop.f32.mrf.mxu2  ;;  %v3400_v9 = vpop.f32.mrf.mxu3 }
 0x919   :  { %v9584_v54 = vadd.f32 %v3400_v9, %v3151_v28  ;;  %v9598_v9 = vpop.f32.mrf.mxu0 }
 0x91a   :  { %11746 = vst [vmem:[#allocation11_spill] sm:$0xff] %v9598_v9 }
 0x91d   :  { %6810 = vmatmul.msk.f32.gmra.mxu2 %vm116_vm1, %v11618_v5  ;;  %6842 = vmatmul.msk.f32.gmra.mxu3 %vm116_vm1, %v11614_v20 }
 0x920   :  { %v3167_v13 = vpop.f32.mrf.mxu2  ;;  %v3404_v49 = vpop.f32.mrf.mxu3 }
 0x921   :  { %v9590_v45 = vadd.f32 %v3404_v49, %v3159_v51  ;;  %v9606_v2 = vpop.f32.mrf.mxu0 }
 0x922   :  { %11747 = vst [vmem:[#allocation21_spill] sm:$0xff] %v9606_v2 }
 0x925   :  { %6811 = vmatmul.msk.f32.gmra.mxu2 %vm116_vm1, %v11622_v62  ;;  %6843 = vmatmul.msk.f32.gmra.mxu3 %vm116_vm1, %v11618_v5 }
 0x928   :  { %v3175_v53 = vpop.f32.mrf.mxu2  ;;  %v3408_v30 = vpop.f32.mrf.mxu3 }
 0x929   :  { %v9596_v28 = vadd.f32 %v3408_v30, %v3167_v13 }
 0x92d   :  { %6812 = vmatmul.msk.f32.gmra.mxu2 %vm116_vm1, %v11626_v18  ;;  %6844 = vmatmul.msk.f32.gmra.mxu3 %vm116_vm1, %v11622_v62  ;;  %v9618_v62 = vpop.f32.mrf.mxu0 }
 0x92e   :  { %11748 = vst [vmem:[#allocation18_spill] sm:$0xff] %v9618_v62 }
 0x930   :  { %v3183_v20 = vpop.f32.mrf.mxu2  ;;  %v3412_v51 = vpop.f32.mrf.mxu3 }
 0x931   :  { %v9604_v49 = vadd.f32 %v3412_v51, %v3175_v53 }
 0x935   :  { %6813 = vmatmul.msk.f32.gmra.mxu2 %vm116_vm1, %v11630_v46  ;;  %6845 = vmatmul.msk.f32.gmra.mxu3 %vm116_vm1, %v11626_v18 }
 0x938   :  { %v3191_v5 = vpop.f32.mrf.mxu2  ;;  %v3416_v13 = vpop.f32.mrf.mxu3 }
 0x939   :  { %v9612_v30 = vadd.f32 %v3416_v13, %v3183_v20  ;;  %v9626_v13 = vpop.f32.mrf.mxu0 }
 0x93a   :  { %11749 = vst [vmem:[#allocation28_spill] sm:$0xff] %v9626_v13 }
 0x93d   :  { %6814 = vmatmul.msk.f32.gmra.mxu2 %vm116_vm1, %v11634_v3  ;;  %6846 = vmatmul.msk.f32.gmra.mxu3 %vm116_vm1, %v11630_v46 }
 0x940   :  { %v3199_v53 = vpop.f32.mrf.mxu2  ;;  %v3420_v51 = vpop.f32.mrf.mxu3 }
 0x941   :  { %v9620_v27 = vadd.f32 %v3420_v51, %v3191_v5  ;;  %v9636_v62 = vpop.f32.mrf.mxu0 }
 0x942   :  { %11750 = vst [vmem:[#allocation15_spill] sm:$0xff] %v9636_v62 }
 0x945   :  { %6815 = vmatmul.msk.f32.gmra.mxu2 %vm116_vm1, %v11638_v8  ;;  %6847 = vmatmul.msk.f32.gmra.mxu3 %vm116_vm1, %v11634_v3 }
 0x948   :  { %v3207_v18 = vpop.f32.mrf.mxu2  ;;  %v3424_v20 = vpop.f32.mrf.mxu3 }
 0x949   :  { %v9628_v57 = vadd.f32 %v3424_v20, %v3199_v53  ;;  %v9644_v13 = vpop.f32.mrf.mxu0 }
 0x94a   :  { %11751 = vst [vmem:[#allocation25_spill] sm:$0xff] %v9644_v13 }
 0x94d   :  { %6816 = vmatmul.msk.f32.gmra.mxu2 %vm116_vm1, %v11642_v48  ;;  %6848 = vmatmul.msk.f32.gmra.mxu3 %vm116_vm1, %v11638_v8 }
 0x950   :  { %v3215_v46 = vpop.f32.mrf.mxu2  ;;  %v3428_v5 = vpop.f32.mrf.mxu3 }
 0x951   :  { %v9634_v51 = vadd.f32 %v3428_v5, %v3207_v18 }
 0x955   :  { %6817 = vmatmul.msk.f32.gmra.mxu2 %vm116_vm1, %v11646_v7  ;;  %6849 = vmatmul.msk.f32.gmra.mxu3 %vm116_vm1, %v11642_v48  ;;  %v9656_v48 = vpop.f32.mrf.mxu0 }
 0x956   :  { %11752 = vst [vmem:[#allocation22_spill] sm:$0xff] %v9656_v48 }
 0x958   :  { %v3223_v3 = vpop.f32.mrf.mxu2  ;;  %v3432_v53 = vpop.f32.mrf.mxu3 }
 0x959   :  { %v9642_v20 = vadd.f32 %v3432_v53, %v3215_v46 }
 0x95d   :  { %6818 = vmatmul.msk.f32.gmra.mxu2 %vm116_vm1, %v11650_v10  ;;  %6850 = vmatmul.msk.f32.gmra.mxu3 %vm116_vm1, %v11646_v7 }
 0x960   :  { %v3231_v8 = vpop.f32.mrf.mxu2  ;;  %v3436_v18 = vpop.f32.mrf.mxu3 }
 0x961   :  { %v9650_v5 = vadd.f32 %v3436_v18, %v3223_v3  ;;  %v9664_v18 = vpop.f32.mrf.mxu0 }
 0x962   :  { %11753 = vst [vmem:[#allocation32_spill] sm:$0xff] %v9664_v18 }
 0x965   :  { %6819 = vmatmul.msk.f32.gmra.mxu2 %vm116_vm1, %v11654_v21  ;;  %6851 = vmatmul.msk.f32.gmra.mxu3 %vm116_vm1, %v11650_v10  ;;  %v4217_v10 = vld [vmem:[%s11072_s3 + $0x148] sm:$0xff] }
 0x966   :  { %4235 = vmatpush.msrb.mxu0 %v4217_v10  ;;  %v4214_v10 = vld [vmem:[%s11072_s3 + $0x130] sm:$0xff] }
 0x968   :  { %v3239_v46 = vpop.f32.mrf.mxu2  ;;  %v3440_v53 = vpop.f32.mrf.mxu3 }
 0x969   :  { %v9658_v13 = vadd.f32 %v3440_v53, %v3231_v8  ;;  %v9686_v18 = vpop.f32.mrf.mxu0 }
 0x96d   :  { %6820 = vmatmul.msk.f32.gmra.mxu2 %vm116_vm1, %v11658_v59  ;;  %6852 = vmatmul.msk.f32.gmra.mxu3 %vm116_vm1, %v11654_v21  ;;  %v4216_v21 = vld [vmem:[%s11072_s3 + $0x140] sm:$0xff] }
 0x96e   :  { %4236 = vmatpush.msrb.mxu0 %v4216_v21 }
 0x970   :  { %v3247_v7 = vpop.f32.mrf.mxu2  ;;  %v3444_v3 = vpop.f32.mrf.mxu3 }
 0x971   :  { %v9666_v62 = vadd.f32 %v3444_v3, %v3239_v46  ;;  %v4215_v46 = vld [vmem:[%s11072_s3 + $0x138] sm:$0xff] }
 0x972   :  { %4237 = vmatpush.msrb.mxu0 %v4215_v46 }
 0x974   :  { %4238 = vmatpush.msrb.mxu0 %v4214_v10 }
 0x975   :  { %6821 = vmatmul.msk.f32.gmra.mxu2 %vm116_vm1, %v11662_v25  ;;  %6853 = vmatmul.msk.f32.gmra.mxu3 %vm116_vm1, %v11658_v59 }
 0x978   :  { %v3255_v8 = vpop.f32.mrf.mxu2  ;;  %v3448_v53 = vpop.f32.mrf.mxu3 }
 0x979   :  { %v9681_v3 = vadd.f32 %v3448_v53, %v3247_v7  ;;  %v9694_v7 = vpop.f32.mrf.mxu0 }
 0x97d   :  { %6822 = vmatmul.msk.f32.gmra.mxu2 %vm116_vm1, %v11666_v33  ;;  %6854 = vmatmul.msk.f32.gmra.mxu3 %vm116_vm1, %v11662_v25 }
 0x980   :  { %v3263_v59 = vpop.f32.mrf.mxu2  ;;  %v3452_v21 = vpop.f32.mrf.mxu3 }
 0x981   :  { %v9692_v48 = vadd.f32 %v3452_v21, %v3255_v8  ;;  %v9706_v25 = vpop.f32.mrf.mxu0 }
 0x985   :  { %6823 = vmatmul.msk.f32.gmra.mxu2 %vm116_vm1, %v11670_v36  ;;  %6855 = vmatmul.msk.f32.gmra.mxu3 %vm116_vm1, %v11666_v33 }
 0x988   :  { %v3271_v53 = vpop.f32.mrf.mxu2  ;;  %v3456_v46 = vpop.f32.mrf.mxu3 }
 0x989   :  { %v9700_v10 = vadd.f32 %v3456_v46, %v3263_v59  ;;  %v9715_v9 = vpop.f32.mrf.mxu0 }
 0x98d   :  { %6824 = vmatmul.msk.f32.gmra.mxu2 %vm116_vm1, %v11674_v52  ;;  %6856 = vmatmul.msk.f32.gmra.mxu3 %vm116_vm1, %v11670_v36 }
 0x990   :  { %v3460_v8 = vpop.f32.mrf.mxu3  ;;  %v3926_v21 = vpop.f32.mrf.mxu2 }
 0x991   :  { %v9708_v2 = vadd.f32 %v3460_v8, %v3271_v53  ;;  %v3927_v33 = vadd.f32 %v3926_v21, %v9470_v34  ;;  %v9726_v21 = vpop.f32.mrf.mxu0 }
 0x995   :  { %6825 = vmatmul.msk.f32.gmra.mxu2 %vm116_vm1, %v11678_v11  ;;  %6857 = vmatmul.msk.f32.gmra.mxu3 %vm116_vm1, %v11674_v52 }
 0x998   :  { %v3930_v59 = vpop.f32.mrf.mxu2  ;;  %v4083_v46 = vpop.f32.mrf.mxu3 }
 0x999   :  { %v3931_v36 = vadd.f32 %v3930_v59, %v9477_v14  ;;  %v4084_v42 = vadd.f32 %v4083_v46, %v3927_v33  ;;  %v9737_v46 = vpop.f32.mrf.mxu0 }
 0x99b   :  { %6874 = vmatmul.msk.f32.vlgmr.msrb.gmra.mxu0 %vm1878_vm4, %v4084_v42 }
 0x99d   :  { %6826 = vmatmul.msk.f32.gmra.mxu2 %vm116_vm1, %v11682_v38  ;;  %6858 = vmatmul.msk.f32.gmra.mxu3 %vm116_vm1, %v11678_v11  ;;  %v9735_v11 = vpop.f32.mrf.mxu1 }
 0x99e   :  { %11754 = vst [vmem:[#allocation19_spill] sm:$0xff] %v9735_v11 }
 0x9a0   :  { %v3934_v53 = vpop.f32.mrf.mxu2  ;;  %v4087_v8 = vpop.f32.mrf.mxu3 }
 0x9a1   :  { %v3935_v52 = vadd.f32 %v3934_v53, %v9484_v17  ;;  %v9724_v34 = vadd.f32 %v4087_v8, %v3931_v36  ;;  %v9752_v8 = vpop.f32.mrf.mxu0 }
 0x9a5   :  { %6827 = vmatmul.msk.f32.gmra.mxu2 %vm116_vm1, %v11686_v63  ;;  %6859 = vmatmul.msk.f32.gmra.mxu3 %vm116_vm1, %v11682_v38 }
 0x9a8   :  { %v3938_v42 = vpop.f32.mrf.mxu2  ;;  %v4091_v14 = vpop.f32.mrf.mxu3 }
 0x9a9   :  { %v3939_v33 = vadd.f32 %v3938_v42, %v9491_v24  ;;  %v9733_v59 = vadd.f32 %v4091_v14, %v3935_v52  ;;  %v9750_v24 = vpop.f32.mrf.mxu1 }
 0x9aa   :  { %11755 = vst [vmem:[#allocation29_spill] sm:$0xff] %v9750_v24 }
 0x9ad   :  { %6828 = vmatmul.msk.f32.gmra.mxu2 %vm116_vm1, %v11690_v43  ;;  %6860 = vmatmul.msk.f32.gmra.mxu3 %vm116_vm1, %v11686_v63 }
 0x9b0   :  { %v3942_v17 = vpop.f32.mrf.mxu2  ;;  %v4095_v36 = vpop.f32.mrf.mxu3 }
 0x9b1   :  { %v3943_v38 = vadd.f32 %v3942_v17, %v9498_v31  ;;  %v9744_v53 = vadd.f32 %v4095_v36, %v3939_v33  ;;  %v9761_v17 = vpop.f32.mrf.mxu1 }
 0x9b2   :  { %11757 = vst [vmem:[#allocation36_spill] sm:$0xff] %v9761_v17 }
 0x9b5   :  { %6829 = vmatmul.msk.f32.gmra.mxu2 %vm116_vm1, %v11694_v50  ;;  %6861 = vmatmul.msk.f32.gmra.mxu3 %vm116_vm1, %v11690_v43  ;;  %v9763_v43 = vpop.f32.mrf.mxu0 }
 0x9b8   :  { %v3946_v52 = vpop.f32.mrf.mxu2  ;;  %v4099_v42 = vpop.f32.mrf.mxu3 }
 0x9b9   :  { %v3947_v63 = vadd.f32 %v3946_v52, %v9505_v15  ;;  %v9755_v14 = vadd.f32 %v4099_v42, %v3943_v38  ;;  %v9775_v42 = vpop.f32.mrf.mxu1 }
 0x9ba   :  { %11760 = vst [vmem:[#allocation30_spill] sm:$0xff] %v9775_v42  ;;  %v4245_v42 = vld [vmem:[%s11072_s3 + $0x158] sm:$0xff] }
 0x9bb   :  { %11756 = vst [vmem:[#allocation26_spill] sm:$0xff] %v9755_v14 }
 0x9bd   :  { %6830 = vmatmul.msk.f32.gmra.mxu2 %vm116_vm1, %v11698_v44  ;;  %6862 = vmatmul.msk.f32.gmra.mxu3 %vm116_vm1, %v11694_v50  ;;  %v9777_v17 = vpop.f32.mrf.mxu0 }
 0x9c0   :  { %v3950_v31 = vpop.f32.mrf.mxu2  ;;  %v4103_v33 = vpop.f32.mrf.mxu3 }
 0x9c1   :  { %v3951_v36 = vadd.f32 %v3950_v31, %v9512_v40  ;;  %v9766_v24 = vadd.f32 %v4103_v33, %v3947_v63  ;;  %v9786_v33 = vpop.f32.mrf.mxu1 }
 0x9c2   :  { %11762 = vst [vmem:[#allocation27_spill] sm:$0xff] %v9786_v33 }
 0x9c3   :  { %11758 = vst [vmem:[#allocation23_spill] sm:$0xff] %v9766_v24 }
 0x9c5   :  { %6831 = vmatmul.msk.f32.gmra.mxu2 %vm116_vm1, %v11702_v60  ;;  %6863 = vmatmul.msk.f32.gmra.mxu3 %vm116_vm1, %v11698_v44 }
 0x9c8   :  { %v3954_v15 = vpop.f32.mrf.mxu2  ;;  %v4107_v38 = vpop.f32.mrf.mxu3 }
 0x9c9   :  { %v3955_v50 = vadd.f32 %v3954_v15, %v9519_v58  ;;  %v9773_v52 = vadd.f32 %v4107_v38, %v3951_v36  ;;  %v9788_v58 = vpop.f32.mrf.mxu0 }
 0x9cb   :  { %11759 = vst [vmem:[#allocation33_spill] sm:$0xff] %v9773_v52 }
 0x9cd   :  { %6832 = vmatmul.msk.f32.gmra.mxu2 %vm116_vm1, %v11706_v55  ;;  %6864 = vmatmul.msk.f32.gmra.mxu3 %vm116_vm1, %v11702_v60 }
 0x9d0   :  { %v3958_v40 = vpop.f32.mrf.mxu2  ;;  %v4111_v63 = vpop.f32.mrf.mxu3 }
 0x9d1   :  { %v3959_v44 = vadd.f32 %v3958_v40, %v9526_v6  ;;  %v9784_v31 = vadd.f32 %v4111_v63, %v3955_v50  ;;  %v9802_v6 = vpop.f32.mrf.mxu1  ;;  %v9804_v38 = vpop.f32.mrf.mxu0 }
 0x9d2   :  { %11765 = vst [vmem:[#allocation44_spill] sm:$0xff] %v9802_v6 }
 0x9d3   :  { %11761 = vst [vmem:[#allocation40_spill] sm:$0xff] %v9784_v31  ;;  %v3589_v31 = vadd.f32 %v9694_v7, %v9590_v45 }
 0x9d5   :  { %6833 = vmatmul.msk.f32.gmra.mxu2 %vm116_vm1, %v11710_v4  ;;  %6865 = vmatmul.msk.f32.gmra.mxu3 %vm116_vm1, %v11706_v55 }
 0x9d8   :  { %v9794_v36 = vpop.f32.mrf.mxu2  ;;  %v4115_v15 = vpop.f32.mrf.mxu3 }
 0x9d9   :  { %11763 = vst [vmem:[#allocation37_spill] sm:$0xff] %v9794_v36  ;;  %v9796_v60 = vadd.f32 %v4115_v15, %v3959_v44  ;;  %v9818_v44 = vpop.f32.mrf.mxu1 }
 0x9da   :  { %11770 = vst [vmem:[#allocation35_spill] sm:$0xff] %v9818_v44  ;;  %v4247_v44 = vld [vmem:[%s11072_s3 + $0x168] sm:$0xff] }
 0x9db   :  { %11764 = vst [vmem:[#allocation34_spill] sm:$0xff] %v9796_v60  ;;  %4265 = vmatpush.msra.mxu0 %v4247_v44 }
 0x9dd   :  { %6834 = vmatmul.msk.f32.gmra.mxu2 %vm116_vm1, %v11715_v22  ;;  %6866 = vmatmul.msk.f32.gmra.mxu3 %vm116_vm1, %v11710_v4  ;;  %v9820_v4 = vpop.f32.mrf.mxu0 }
 0x9e0   :  { %v9806_v50 = vpop.f32.mrf.mxu2  ;;  %v9808_v40 = vpop.f32.mrf.mxu3 }
 0x9e1   :  { %11766 = vst [vmem:[#allocation31_spill] sm:$0xff] %v9806_v50  ;;  %v9830_v33 = vpop.f32.mrf.mxu1 }
 0x9e2   :  { %11767 = vst [vmem:[#allocation41_spill] sm:$0xff] %v9808_v40 }
 0x9e3   :  { %11773 = vst [vmem:[#allocation52_spill] sm:$0xff] %v9830_v33  ;;  %v4246_v33 = vld [vmem:[%s11072_s3 + $0x160] sm:$0xff] }
 0x9e4   :  { %4266 = vmatpush.msra.mxu0 %v4246_v33 }
 0x9e5   :  { %6835 = vmatmul.msk.f32.gmra.mxu2 %vm116_vm1, %v11720_v61  ;;  %6867 = vmatmul.msk.f32.gmra.mxu3 %vm116_vm1, %v11715_v22  ;;  %v9832_v22 = vpop.f32.mrf.mxu0 }
 0x9e6   :  { %4267 = vmatpush.msra.mxu0 %v4245_v42 }
 0x9e8   :  { %v9814_v55 = vpop.f32.mrf.mxu2  ;;  %v9816_v63 = vpop.f32.mrf.mxu3 }
 0x9e9   :  { %11768 = vst [vmem:[#allocation38_spill] sm:$0xff] %v9814_v55 }
 0x9ea   :  { %11769 = vst [vmem:[#allocation48_spill] sm:$0xff] %v9816_v63 }
 0x9ed   :  { %6836 = vmatmul.msk.f32.gmra.mxu2 %vm116_vm1, %v11725_v29  ;;  %6868 = vmatmul.msk.f32.gmra.mxu3 %vm116_vm1, %v11720_v61  ;;  %v9854_v44 = vpop.f32.mrf.mxu0 }
 0x9f0   :  { %v9826_v15 = vpop.f32.mrf.mxu2  ;;  %v9828_v6 = vpop.f32.mrf.mxu3 }
 0x9f1   :  { %11771 = vst [vmem:[#allocation45_spill] sm:$0xff] %v9826_v15 }
 0x9f2   :  { %11772 = vst [vmem:[#allocation42_spill] sm:$0xff] %v9828_v6  ;;  %v3791_v6 = vpop.f32.mrf.mxu1 }
 0x9f5   :  { %6837 = vmatmul.msk.f32.gmra.mxu2 %vm116_vm1, %v11730_v39  ;;  %6869 = vmatmul.msk.f32.gmra.mxu3 %vm116_vm1, %v11725_v29  ;;  %v4244_v29 = vld [vmem:[%s11072_s3 + $0x150] sm:$0xff] }
 0x9f6   :  { %4268 = vmatpush.msra.mxu0 %v4244_v29 }
 0x9f8   :  { %v9841_v61 = vpop.f32.mrf.mxu2  ;;  %v9843_v15 = vpop.f32.mrf.mxu3 }
 0x9f9   :  { %11774 = vst [vmem:[#allocation39_spill] sm:$0xff] %v9841_v61 }
 0x9fa   :  { %11775 = vst [vmem:[#allocation49_spill] sm:$0xff] %v9843_v15  ;;  %v3797_v42 = vpop.f32.mrf.mxu1  ;;  %v9868_v15 = vpop.f32.mrf.mxu0 }
 0x9fb   :  { %v3798_v24 = vadd.f32 %v3797_v42, %v3589_v31 }
 0x9fd   :  { %6838 = vmatmul.msk.f32.gmra.mxu2 %vm116_vm1, %v11735_v26  ;;  %6870 = vmatmul.msk.f32.gmra.mxu3 %vm116_vm1, %v11730_v39 }
 0xa00   :  { %v9860_v33 = vpop.f32.mrf.mxu2  ;;  %v9862_v61 = vpop.f32.mrf.mxu3 }
 0xa01   :  { %11776 = vst [vmem:[#allocation46_spill] sm:$0xff] %v9860_v33 }
 0xa02   :  { %11777 = vst [vmem:[#allocation56_spill] sm:$0xff] %v9862_v61  ;;  %v3803_v33 = vpop.f32.mrf.mxu1  ;;  %v9882_v61 = vpop.f32.mrf.mxu0 }
 0xa05   :  { %6839 = vmatmul.msk.f32.gmra.mxu2 %vm116_vm1, %v11740_v23  ;;  %6871 = vmatmul.msk.f32.gmra.mxu3 %vm116_vm1, %v11735_v26  ;;  %v7010_v26 = vld [vmem:[%s11075_s4 + $0x6] ss:$0 sm:$0xff] }
 0xa08   :  { %v9870_v55 = vpop.f32.mrf.mxu2  ;;  %v9872_v63 = vpop.f32.mrf.mxu3 }
 0xa09   :  { %11778 = vst [vmem:[#allocation43_spill] sm:$0xff] %v9870_v55 }
 0xa0a   :  { %11779 = vst [vmem:[#allocation53_spill] sm:$0xff] %v9872_v63  ;;  %v3809_v40 = vpop.f32.mrf.mxu1 }
 0xa0d   :  { %6840 = vmatmul.msk.f32.gmra.mxu2 %vm116_vm1, %v11744_v16  ;;  %6872 = vmatmul.msk.f32.gmra.mxu3 %vm116_vm1, %v11740_v23  ;;  %v3584_v23 = vadd.f32 %v9686_v18, %v9584_v54 }
 0xa0f   :  { %v3792_v36 = vadd.f32 %v3791_v6, %v3584_v23 }
 0xa10   :  { %v9878_v39 = vpop.f32.mrf.mxu2  ;;  %v9880_v29 = vpop.f32.mrf.mxu3 }
 0xa11   :  { %11780 = vst [vmem:[#allocation50_spill] sm:$0xff] %v9878_v39 }
 0xa12   :  { %11781 = vst [vmem:[#allocation60_spill] sm:$0xff] %v9880_v29 }
 0xa15   :  { %6873 = vmatmul.msk.f32.gmra.mxu3 %vm116_vm1, %v11744_v16 }
 0xa18   :  { %v3994_v55 = vpop.f32.mrf.mxu2  ;;  %v9889_v63 = vpop.f32.mrf.mxu3 }
 0xa19   :  { %11782 = vst [vmem:[#allocation47_spill] sm:$0xff] %v9889_v63  ;;  %v4240_v50 = vpop.f32.mrf.mxu0  ;;  %v3995_v11 = vadd.f32 %v3994_v55, %v3792_v36  ;;  %v3815_v63 = vpop.f32.mrf.mxu1 }
 0xa1a   :  { %v4241_v39 = vadd.f32 %v7010_v26, %v4240_v50  ;;  %v3594_v50 = vadd.f32 %v9706_v25, %v9596_v28 }
 0xa1c   :  { %v4243_v29 = vmax.f32 %v4241_v39, 0.0  ;;  %v3804_v36 = vadd.f32 %v3803_v33, %v3594_v50 }
 0xa1e   :  { %6875 = vmatmul.msk.f32.vlgmr.msra.gmra.mxu0 %vm1878_vm4, %v4243_v29 }
 0xa20   :  { %v3998_v60 = vpop.f32.mrf.mxu2  ;;  %v4151_v16 = vpop.f32.mrf.mxu3 }
 0xa21   :  { %v4152_v52 = vadd.f32 %v4151_v16, %v3995_v11  ;;  %v3999_v14 = vadd.f32 %v3998_v60, %v3798_v24  ;;  %v3821_v55 = vpop.f32.mrf.mxu1  ;;  %v3604_v60 = vadd.f32 %v9726_v21, %v9612_v30 }
 0xa23   :  { %4702 = vrot.lane.b32.xlu2 %v4152_v52, %s7062_s8  ;;  %v3599_v52 = vadd.f32 %v9715_v9, %v9604_v49  ;;  %v3816_v9 = vadd.f32 %v3815_v63, %v3604_v60  ;;  %v3614_v63 = vadd.f32 %v9752_v8, %v9628_v57 }
 0xa25   :  { %v3810_v28 = vadd.f32 %v3809_v40, %v3599_v52  ;;  %v3609_v40 = vadd.f32 %v9737_v46, %v9620_v27 }
 0xa27   :  { %v3822_v30 = vadd.f32 %v3821_v55, %v3609_v40  ;;  %v3619_v55 = vadd.f32 %v9763_v43, %v9634_v51  ;;  %v3634_v40 = vadd.f32 %v9804_v38, %v9658_v13 }
 0xa28   :  { %v4002_v54 = vpop.f32.mrf.mxu2  ;;  %v4155_v18 = vpop.f32.mrf.mxu3 }
 0xa29   :  { %v4156_v6 = vadd.f32 %v4155_v18, %v3999_v14  ;;  %v4003_v45 = vadd.f32 %v4002_v54, %v3804_v36  ;;  %v3827_v33 = vpop.f32.mrf.mxu1 }
 0xa2a   :  { %v3828_v46 = vadd.f32 %v3827_v33, %v3614_v63 }
 0xa2b   :  { %4704 = vrot.lane.b32.xlu1 %v4156_v6, %s7062_s8  ;;  %4768 = vrot.lane.b32.xlu2 %v8756_v35, %s7065_s6 }
 0xa30   :  { %v4006_v7 = vpop.f32.mrf.mxu2  ;;  %v4159_v11 = vpop.f32.mrf.mxu3 }
 0xa31   :  { %v4160_v24 = vadd.f32 %v4159_v11, %v4003_v45  ;;  %v4007_v25 = vadd.f32 %v4006_v7, %v3810_v28  ;;  %v3833_v23 = vpop.f32.mrf.mxu1  ;;  %v11783_v7 = vld [vmem:[#allocation145_spill] sm:$0xff]  ;;  %v3624_v28 = vadd.f32 %v9777_v17, %v9642_v20 }
 0xa32   :  { %v3834_v57 = vadd.f32 %v3833_v23, %v3619_v55  ;;  %v11788_v55 = vld [vmem:[#allocation135_spill] sm:$0xff] }
 0xa33   :  { %4706 = vrot.lane.b32.xlu0 %v4160_v24, %s7062_s8  ;;  %4770 = vrot.lane.b32.xlu1 %v8743_v56, %s7065_s6 }
 0xa38   :  { %v4010_v14 = vpop.f32.mrf.mxu2  ;;  %v4163_v31 = vpop.f32.mrf.mxu3 }
 0xa39   :  { %v4164_v42 = vadd.f32 %v4163_v31, %v4007_v25  ;;  %v4011_v49 = vadd.f32 %v4010_v14, %v3816_v9  ;;  %v3839_v27 = vpop.f32.mrf.mxu1  ;;  %v11784_v14 = vld [vmem:[#allocation138_spill] sm:$0xff] }
 0xa3a   :  { %v3840_v51 = vadd.f32 %v3839_v27, %v3624_v28 }
 0xa3b   :  { %4772 = vrot.lane.b32.xlu0 %v8722_v41, %s7065_s6  ;;  %4708 = vrot.lane.b32.xlu2 %v4164_v42, %s7062_s8  ;;  %v3629_v42 = vadd.f32 %v9788_v58, %v9650_v5 }
 0xa40   :  { %v4014_v39 = vpop.f32.mrf.mxu2  ;;  %v4167_v29 = vpop.f32.mrf.mxu3 }
 0xa41   :  { %v4168_v26 = vadd.f32 %v4167_v29, %v4011_v49  ;;  %v4015_v21 = vadd.f32 %v4014_v39, %v3822_v30  ;;  %v3845_v8 = vpop.f32.mrf.mxu1  ;;  %v11785_v49 = vld [vmem:[#allocation153_spill] sm:$0xff]  ;;  %v11786_v30 = vld [vmem:[#allocation144_spill] sm:$0xff] }
 0xa42   :  { %v3846_v20 = vadd.f32 %v3845_v8, %v3629_v42 }
 0xa43   :  { %4710 = vrot.lane.b32.xlu1 %v4168_v26, %s7062_s8  ;;  %4774 = vrot.lane.b32.xlu2 %v8707_v0, %s7065_s6 }
 0xa48   :  { %v4018_v16 = vpop.f32.mrf.mxu2  ;;  %v4171_v54 = vpop.f32.mrf.mxu3 }
 0xa49   :  { %v4172_v18 = vadd.f32 %v4171_v54, %v4015_v21  ;;  %v4019_v50 = vadd.f32 %v4018_v16, %v3828_v46  ;;  %v3851_v33 = vpop.f32.mrf.mxu1  ;;  %v3639_v54 = vadd.f32 %v9820_v4, %v9666_v62 }
 0xa4a   :  { %v3852_v5 = vadd.f32 %v3851_v33, %v3634_v40 }
 0xa4b   :  { %4712 = vrot.lane.b32.xlu0 %v4172_v18, %s7062_s8  ;;  %4776 = vrot.lane.b32.xlu1 %v8684_v12, %s7065_s6  ;;  %v11787_v18 = vld [vmem:[#allocation143_spill] sm:$0xff] }
 0xa50   :  { %v4022_v6 = vpop.f32.mrf.mxu2  ;;  %v4175_v36 = vpop.f32.mrf.mxu3 }
 0xa51   :  { %v4176_v45 = vadd.f32 %v4175_v36, %v4019_v50  ;;  %v4023_v11 = vadd.f32 %v4022_v6, %v3834_v57  ;;  %v3857_v23 = vpop.f32.mrf.mxu1  ;;  %v3644_v6 = vadd.f32 %v9832_v22, %v9681_v3 }
 0xa52   :  { %v3858_v38 = vadd.f32 %v3857_v23, %v3639_v54 }
 0xa53   :  { %4778 = vrot.lane.b32.xlu0 %v11783_v7, %s7065_s6  ;;  %4714 = vrot.lane.b32.xlu2 %v4176_v45, %s7062_s8 }
 0xa58   :  { %v4026_v52 = vpop.f32.mrf.mxu2  ;;  %v4179_v24 = vpop.f32.mrf.mxu3 }
 0xa59   :  { %v4180_v25 = vadd.f32 %v4179_v24, %v4023_v11  ;;  %v4027_v43 = vadd.f32 %v4026_v52, %v3840_v51  ;;  %v3863_v13 = vpop.f32.mrf.mxu1  ;;  %v3649_v11 = vadd.f32 %v9854_v44, %v9692_v48  ;;  %v11789_v24 = vld [vmem:[#allocation149_spill] sm:$0xff]  ;;  %v11790_v48 = vld [vmem:[#allocation142_spill] sm:$0xff]  ;;  %v11791_v44 = vld [vmem:[#allocation3_spill] sm:$0xff] }
 0xa5a   :  { %v3864_v62 = vadd.f32 %v3863_v13, %v3644_v6  ;;  %v448_v13 = vpop.permute.xlu1 %447 }
 0xa5b   :  { %4716 = vrot.lane.b32.xlu1 %v4180_v25, %s7062_s8  ;;  %4780 = vrot.lane.b32.xlu2 %v11784_v14, %s7065_s6  ;;  %v3654_v25 = vadd.f32 %v9868_v15, %v9700_v10  ;;  %v3659_v10 = vadd.f32 %v9882_v61, %v9708_v2  ;;  %vm466_vm3 = vcmp.eq.s32.totalorder %v11791_v44, %v448_v13 }
 0xa60   :  { %v4030_v31 = vpop.f32.mrf.mxu2  ;;  %v4183_v60 = vpop.f32.mrf.mxu3 }
 0xa61   :  { %v4184_v9 = vadd.f32 %v4183_v60, %v4027_v43  ;;  %v4031_v17 = vadd.f32 %v4030_v31, %v3846_v20  ;;  %v3869_v4 = vpop.f32.mrf.mxu1  ;;  %v442_v60 = vpop.permute.xlu2 %441 }
 0xa62   :  { %v3870_v3 = vadd.f32 %v3869_v4, %v3649_v11  ;;  %vm464_vm15 = vcmp.eq.s32.totalorder %v11791_v44, %v442_v60 }
 0xa63   :  { %4718 = vrot.lane.b32.xlu0 %v4184_v9, %s7062_s8  ;;  %4782 = vrot.lane.b32.xlu1 %v11785_v49, %s7065_s6  ;;  %v9964_v42 = vsel %vm464_vm15, 1.0, %v11547_v19 }
 0xa68   :  { %v4034_v39 = vpop.f32.mrf.mxu2  ;;  %v4187_v29 = vpop.f32.mrf.mxu3 }
 0xa69   :  { %v4188_v26 = vadd.f32 %v4187_v29, %v4031_v17  ;;  %v4035_v58 = vadd.f32 %v4034_v39, %v3852_v5  ;;  %v3875_v43 = vpop.f32.mrf.mxu1  ;;  %v4300_v17 = vsel %vm4298_vm0, %v9964_v42, 0  ;;  %v445_v39 = vpop.permute.xlu0 %444  ;;  %v11792_v29 = vld [vmem:[#allocation151_spill] sm:$0xff] }
 0xa6a   :  { %v3876_v33 = vadd.f32 %v3875_v43, %v3654_v25  ;;  %vm465_vm2 = vcmp.eq.s32.totalorder %v11791_v44, %v445_v39  ;;  %v9974_v23 = vsub.f32 %v4300_v17, %v4300_v17  ;;  %v451_v11 = vpop.permute.xlu2 %450 }
 0xa6b   :  { %4784 = vrot.lane.b32.xlu0 %v11786_v30, %s7065_s6  ;;  %4720 = vrot.lane.b32.xlu2 %v4188_v26, %s7062_s8  ;;  %vm467_vm14 = vcmp.eq.s32.totalorder %v11791_v44, %v451_v11 }
 0xa70   :  { %v4038_v21 = vpop.f32.mrf.mxu2  ;;  %v4191_v16 = vpop.f32.mrf.mxu3 }
 0xa71   :  { %v4192_v63 = vadd.f32 %v4191_v16, %v4035_v58  ;;  %v4039_v27 = vadd.f32 %v4038_v21, %v3858_v38  ;;  %v3881_v40 = vpop.f32.mrf.mxu1  ;;  %v9977_v58 = vsel %vm465_vm2, 1.0, %v11547_v19  ;;  %v7011_v21 = vld [vmem:[%s11075_s4 + $0x7] ss:$0 sm:$0xff]  ;;  %v4342_v16 = vand.u32 4294901760, %v9974_v23  ;;  %v460_v13 = vpop.permute.xlu0 %459 }
 0xa72   :  { %v3882_v5 = vadd.f32 %v3881_v40, %v3659_v10  ;;  %v457_v40 = vpop.permute.xlu2 %456 }
 0xa73   :  { %4722 = vrot.lane.b32.xlu1 %v4192_v63, %s7062_s8  ;;  %4786 = vrot.lane.b32.xlu2 %v11787_v18, %s7065_s6  ;;  %v4303_v63 = vsel %vm4298_vm0, %v9977_v58, 0  ;;  %v4343_v6 = vsub.f32 %v9974_v23, %v4342_v16  ;;  %vm469_vm2 = vcmp.eq.s32.totalorder %v11791_v44, %v457_v40  ;;  %v4849_v40 = vld [vmem:[%s11072_s3 + $0x188] sm:$0xff] }
 0xa78   :  { %v4042_v46 = vpop.f32.mrf.mxu2  ;;  %v4195_v50 = vpop.f32.mrf.mxu3 }
 0xa79   :  { %v4196_v36 = vadd.f32 %v4195_v50, %v4039_v27  ;;  %v4043_v45 = vadd.f32 %v4042_v46, %v3864_v62  ;;  %v11793_v27 = vld [vmem:[#allocation154_spill] sm:$0xff]  ;;  %v9991_v50 = vsub.f32 %v4303_v63, %v4303_v63  ;;  %v9997_v62 = vsel %vm466_vm3, 1.0, %v11547_v19 }
 0xa7a   :  { %vm470_vm3 = vcmp.eq.s32.totalorder %v11791_v44, %v460_v13 }
 0xa7b   :  { %4724 = vrot.lane.b32.xlu0 %v4196_v36, %s7062_s8  ;;  %4788 = vrot.lane.b32.xlu1 %v11788_v55, %s7065_s6 }
 0xa80   :  { %v4046_v57 = vpop.f32.mrf.mxu2  ;;  %v4199_v8 = vpop.f32.mrf.mxu3 }
 0xa81   :  { %v4200_v52 = vadd.f32 %v4199_v8, %v4043_v45  ;;  %v4047_v22 = vadd.f32 %v4046_v57, %v3870_v3  ;;  %v4344_v45 = vand.u32 4294901760, %v4343_v6  ;;  %v4350_v57 = vand.u32 4294901760, %v9991_v50 }
 0xa82   :  { %v10051_v6 = vsel %vm470_vm3, 1.0, %v11547_v19 }
 0xa83   :  { %4790 = vrot.lane.b32.xlu0 %v11789_v24, %s7065_s6  ;;  %4726 = vrot.lane.b32.xlu2 %v4200_v52, %s7062_s8 }
 0xa88   :  { %v4203_v28 = vpop.f32.mrf.mxu3  ;;  %v4050_v31 = vpop.f32.mrf.mxu2 }
 0xa89   :  { %v4204_v51 = vadd.f32 %v4203_v28, %v4047_v22  ;;  %v4051_v9 = vadd.f32 %v4050_v31, %v3876_v33  ;;  %v4351_v22 = vsub.f32 %v9991_v50, %v4350_v57  ;;  %v454_v31 = vpop.permute.xlu1 %453  ;;  %v11795_v33 = vld [vmem:[#allocation2_spill] sm:$0xff] }
 0xa8a   :  { %vm468_vm15 = vcmp.eq.s32.totalorder %v11791_v44, %v454_v31 }
 0xa8b   :  { %4728 = vrot.lane.b32.xlu1 %v4204_v51, %s7062_s8  ;;  %4792 = vrot.lane.b32.xlu2 %v11790_v48, %s7065_s6  ;;  %v4352_v51 = vand.u32 4294901760, %v4351_v22  ;;  %v10033_v10 = vsel %vm468_vm15, 1.0, %v11547_v19 }
 0xa8c   :  { %v4312_v39 = vsel %vm4298_vm0, %v10033_v10, 0 }
 0xa90   :  { %v4207_v20 = vpop.f32.mrf.mxu3  ;;  %v4054_v26 = vpop.f32.mrf.mxu2 }
 0xa91   :  { %v4208_v15 = vadd.f32 %v4207_v20, %v4051_v9  ;;  %v4055_v2 = vadd.f32 %v4054_v26, %v3882_v5  ;;  %v11796_v20 = vld [vmem:[#allocation5_spill] sm:$0xff]  ;;  %v4373_v26 = vsub.f32 %v4312_v39, %v4312_v39  ;;  %v11797_v5 = vld [vmem:[#allocation8_spill] sm:$0xff] }
 0xa92   :  { %v4851_v39 = vld [vmem:[%s11072_s3 + $0x198] sm:$0xff] }
 0xa93   :  { %4730 = vrot.lane.b32.xlu0 %v4208_v15, %s7062_s8  ;;  %4794 = vrot.lane.b32.xlu1 %v11792_v29, %s7065_s6 }
 0xa98   :  { %v4211_v61 = vpop.f32.mrf.mxu3 }
 0xa99   :  { %v4212_v54 = vadd.f32 %v4211_v61, %v4055_v2  ;;  %v10043_v61 = vsel %vm469_vm2, 1.0, %v11547_v19 }
 0xa9a   :  { %v4315_v63 = vsel %vm4298_vm0, %v10043_v61, 0 }
 0xa9b   :  { %v4270_v38 = vpop.f32.mrf.mxu0  ;;  %4796 = vrot.lane.b32.xlu0 %v11793_v27, %s7065_s6  ;;  %4274 = vrot.lane.b32.xlu1 %v7388_v32, %s7066_s19  ;;  %v4306_v32 = vsel %vm4298_vm0, %v9997_v62, 0 }
 0xa9c   :  { %v4271_v46 = vadd.f32 %v7011_v21, %v4270_v38  ;;  %4732 = vrot.lane.b32.xlu2 %v4212_v54, %s7062_s8  ;;  %v10007_v3 = vsub.f32 %v4306_v32, %v4306_v32  ;;  %v4374_v54 = vand.u32 4294901760, %v4373_v26  ;;  %v4381_v38 = vsub.f32 %v4315_v63, %v4315_v63  ;;  %v463_v32 = vpop.permute.xlu1 %462  ;;  %v4846_v63 = vld [vmem:[%s11072_s3 + $0x170] sm:$0xff] }
 0xa9e   :  { %v4273_v36 = vmax.f32 %v4271_v46, 0.0  ;;  %v4375_v46 = vsub.f32 %v4373_v26, %v4374_v54 }
 0xaa0   :  { %v4338_v4 = vand.u32 4294901760, %v4273_v36 }
 0xaa2   :  { %v4421_v8 = vsub.f32 %v4273_v36, %v4338_v4  ;;  %4339 = vmatpush.msrb.mxu1 %v4338_v4  ;;  %v4376_v36 = vand.u32 4294901760, %v4375_v46 }
 0xaa3   :  { %4345 = vmatmul.f32.vlgmr.msrb.gmra.mxu1 %v4344_v45  ;;  %4278 = vrot.lane.b32.xlu0 %v11595_v1, %s7066_s19  ;;  %v10015_v1 = vsel %vm467_vm14, 1.0, %v11547_v19  ;;  %v4318_v45 = vsel %vm4298_vm0, %v10051_v6, 0  ;;  %vm471_vm14 = vcmp.eq.s32.totalorder %v11791_v44, %v463_v32 }
 0xaa4   :  { %4280 = vrot.lane.b32.xlu1 %v11596_v37, %s7066_s19  ;;  %4476 = vmatpush.msra.mxu1 %v4421_v8  ;;  %v4422_v52 = vand.u32 4294901760, %v4421_v8  ;;  %v4358_v37 = vand.u32 4294901760, %v10007_v3  ;;  %v4309_v43 = vsel %vm4298_vm0, %v10015_v1, 0 }
 0xaa5   :  { %4276 = vrot.lane.b32.xlu2 %v11594_v47, %s7066_s19  ;;  %v11794_v47 = vld [vmem:[#allocation4_spill] sm:$0xff]  ;;  %v4365_v60 = vsub.f32 %v4309_v43, %v4309_v43 }
 0xaa6   :  { %4602 = vmatpush.msrb.mxu1 %v4422_v52  ;;  %v4423_v28 = vsub.f32 %v4421_v8, %v4422_v52  ;;  %v4359_v9 = vsub.f32 %v10007_v3, %v4358_v37  ;;  %v4389_v8 = vsub.f32 %v4318_v45, %v4318_v45  ;;  %v10059_v52 = vsel %vm471_vm14, 1.0, %v11547_v19 }
 0xaa7   :  { %v4366_v17 = vand.u32 4294901760, %v4365_v60 }
 0xaa8   :  { %v4424_v25 = vand.u32 4294901760, %v4423_v28  ;;  %v4360_v15 = vand.u32 4294901760, %v4359_v9  ;;  %v4390_v28 = vand.u32 4294901760, %v4389_v8  ;;  %v4853_v9 = vld [vmem:[%s11072_s3 + $0x1a8] sm:$0xff] }
 0xaa9   :  { %v4367_v2 = vsub.f32 %v4365_v60, %v4366_v17 }
 0xaaa   :  { %4425 = vmatpush.msrb.mxu0 %v4424_v25  ;;  %v4321_v25 = vsel %vm4298_vm0, %v10059_v52, 0  ;;  %v4391_v43 = vsub.f32 %v4389_v8, %v4390_v28 }
 0xaab   :  { %4353 = vmatmul.f32.gmra.mxu1 %v4352_v51  ;;  %6876 = vmatmul.msk.f32.vlgmr.msrb.gmra.mxu0 %vm4298_vm0, %v9964_v42  ;;  %v4368_v21 = vand.u32 4294901760, %v4367_v2  ;;  %v4397_v51 = vsub.f32 %v4321_v25, %v4321_v25 }
 0xaac   :  { %4534 = vmatpush.msra.mxu0 %v4338_v4  ;;  %4284 = vrot.lane.b32.xlu0 %v11794_v47, %s7066_s19  ;;  %v4392_v31 = vand.u32 4294901760, %v4391_v43 }
 0xaad   :  { %4286 = vrot.lane.b32.xlu1 %v11795_v33, %s7066_s19  ;;  %4282 = vrot.lane.b32.xlu2 %v11796_v20, %s7066_s19  ;;  %v4398_v47 = vand.u32 4294901760, %v4397_v51  ;;  %v4852_v20 = vld [vmem:[%s11072_s3 + $0x1a0] sm:$0xff] }
 0xaae   :  { %4652 = vmatpush.msrb.mxu0 %v4338_v4  ;;  %v4382_v4 = vand.u32 4294901760, %v4381_v38 }
 0xaaf   :  { %v4399_v44 = vsub.f32 %v4397_v51, %v4398_v47 }
 0xab0   :  { %v4383_v11 = vsub.f32 %v4381_v38, %v4382_v4 }
 0xab1   :  { %v4400_v19 = vand.u32 4294901760, %v4399_v44 }
 0xab2   :  { %v4384_v22 = vand.u32 4294901760, %v4383_v11 }
 0xab3   :  { %4361 = vmatmul.f32.gmra.mxu1 %v4360_v15  ;;  %6877 = vmatmul.msk.f32.gmra.mxu0 %vm4298_vm0, %v9977_v58 }
 0xab5   :  { %4288 = vrot.lane.b32.xlu1 %v11797_v5, %s7066_s19 }
 0xabb   :  { %4369 = vmatmul.f32.gmra.mxu1 %v4368_v21  ;;  %6878 = vmatmul.msk.f32.gmra.mxu0 %vm4298_vm0, %v9997_v62  ;;  %v4703_v21 = vpop.permute.xlu2 %4702 }
 0xac3   :  { %4377 = vmatmul.f32.gmra.mxu1 %v4376_v36  ;;  %6879 = vmatmul.msk.f32.gmra.mxu0 %vm4298_vm0, %v10015_v1  ;;  %v4769_v46 = vpop.permute.xlu2 %4768 }
 0xacb   :  { %4385 = vmatmul.f32.gmra.mxu1 %v4384_v22  ;;  %6880 = vmatmul.msk.f32.gmra.mxu0 %vm4298_vm0, %v10033_v10  ;;  %v4709_v32 = vpop.permute.xlu2 %4708 }
 0xad3   :  { %4393 = vmatmul.f32.gmra.mxu1 %v4392_v31  ;;  %6881 = vmatmul.msk.f32.gmra.mxu0 %vm4298_vm0, %v10043_v61 }
 0xadb   :  { %4401 = vmatmul.f32.gmra.mxu1 %v4400_v19  ;;  %6882 = vmatmul.msk.f32.gmra.mxu0 %vm4298_vm0, %v10051_v6 }
 0xae3   :  { %6883 = vmatmul.msk.f32.gmra.mxu0 %vm4298_vm0, %v10059_v52  ;;  %4479 = vmatmul.f32.vlgmr.msra.gmra.mxu1 %v9974_v23 }
 0xaeb   :  { %4484 = vmatmul.f32.gmra.mxu1 %v9991_v50  ;;  %4538 = vmatmul.f32.vlgmr.msra.gmra.mxu0 %v4342_v16  ;;  %v4857_v50 = vld [vmem:[%s11072_s3 + $0x1c8] sm:$0xff] }
 0xaec   :  { %4912 = vmatpush.msra.mxu1 %v4857_v50 }
 0xaf3   :  { %4489 = vmatmul.f32.gmra.mxu1 %v10007_v3  ;;  %4544 = vmatmul.f32.gmra.mxu0 %v4350_v57  ;;  %v4856_v57 = vld [vmem:[%s11072_s3 + $0x1c0] sm:$0xff] }
 0xaf4   :  { %4913 = vmatpush.msra.mxu1 %v4856_v57 }
 0xafb   :  { %4494 = vmatmul.f32.gmra.mxu1 %v4365_v60  ;;  %4550 = vmatmul.f32.gmra.mxu0 %v4358_v37  ;;  %v4855_v60 = vld [vmem:[%s11072_s3 + $0x1b8] sm:$0xff] }
 0xafc   :  { %4914 = vmatpush.msra.mxu1 %v4855_v60 }
 0xb03   :  { %4499 = vmatmul.f32.gmra.mxu1 %v4373_v26  ;;  %4556 = vmatmul.f32.gmra.mxu0 %v4366_v17  ;;  %v4848_v26 = vld [vmem:[%s11072_s3 + $0x180] sm:$0xff] }
 0xb0b   :  { %4504 = vmatmul.f32.gmra.mxu1 %v4381_v38  ;;  %4562 = vmatmul.f32.gmra.mxu0 %v4374_v54  ;;  %v4705_v54 = vpop.permute.xlu1 %4704 }
 0xb13   :  { %4509 = vmatmul.f32.gmra.mxu1 %v4389_v8  ;;  %4568 = vmatmul.f32.gmra.mxu0 %v4382_v4  ;;  %v4771_v36 = vpop.permute.xlu1 %4770 }
 0xb1b   :  { %4514 = vmatmul.f32.gmra.mxu1 %v4397_v51  ;;  %4574 = vmatmul.f32.gmra.mxu0 %v4390_v28  ;;  %v4711_v8 = vpop.permute.xlu1 %4710  ;;  %v4814_v28 = vsel %vm1878_vm4, %v9724_v34, %v4703_v21 }
 0xb20   :  { %v10080_v33 = vpop.f32.mrf.mxu1 }
 0xb23   :  { %4580 = vmatmul.f32.gmra.mxu0 %v4398_v47  ;;  %6884 = vmatmul.msk.f32.vlgmr.msrb.gmra.mxu1 %vm4298_vm0, %v9964_v42  ;;  %v4777_v22 = vpop.permute.xlu1 %4776 }
 0xb28   :  { %v10084_v23 = vpop.f32.mrf.mxu1  ;;  %v10086_v16 = vpop.f32.mrf.mxu0 }
 0xb2b   :  { %6885 = vmatmul.msk.f32.gmra.mxu1 %vm4298_vm0, %v9977_v58  ;;  %6892 = vmatmul.msk.f32.vlgmr.msrb.gmra.mxu0 %vm4298_vm0, %v9964_v42  ;;  %v4854_v42 = vld [vmem:[%s11072_s3 + $0x1b0] sm:$0xff]  ;;  %v4717_v47 = vpop.permute.xlu1 %4716 }
 0xb2c   :  { %4915 = vmatpush.msra.mxu1 %v4854_v42 }
 0xb2e   :  { %4916 = vmatpush.msra.mxu1 %v4853_v9 }
 0xb30   :  { %v10098_v3 = vpop.f32.mrf.mxu1  ;;  %v10100_v37 = vpop.f32.mrf.mxu0  ;;  %4917 = vmatpush.msra.mxu1 %v4852_v20 }
 0xb32   :  { %4918 = vmatpush.msra.mxu1 %v4851_v39 }
 0xb33   :  { %6886 = vmatmul.msk.f32.gmra.mxu1 %vm4298_vm0, %v9997_v62  ;;  %6893 = vmatmul.msk.f32.gmra.mxu0 %vm4298_vm0, %v9977_v58  ;;  %v4850_v58 = vld [vmem:[%s11072_s3 + $0x190] sm:$0xff]  ;;  %v4783_v60 = vpop.permute.xlu1 %4782 }
 0xb34   :  { %4919 = vmatpush.msra.mxu1 %v4850_v58 }
 0xb36   :  { %4920 = vmatpush.msra.mxu1 %v4849_v40 }
 0xb38   :  { %v10118_v15 = vpop.f32.mrf.mxu1  ;;  %v10120_v17 = vpop.f32.mrf.mxu0  ;;  %4921 = vmatpush.msra.mxu1 %v4848_v26 }
 0xb3b   :  { %6887 = vmatmul.msk.f32.gmra.mxu1 %vm4298_vm0, %v10015_v1  ;;  %6894 = vmatmul.msk.f32.gmra.mxu0 %vm4298_vm0, %v9997_v62  ;;  %v4847_v62 = vld [vmem:[%s11072_s3 + $0x178] sm:$0xff]  ;;  %v10204_v58 = vpop.permute.xlu1 %4722 }
 0xb3c   :  { %4922 = vmatpush.msra.mxu1 %v4847_v62  ;;  %v11804_v62 = vld [vmem:[#allocation23_spill] sm:$0xff] }
 0xb3e   :  { %4923 = vmatpush.msra.mxu1 %v4846_v63  ;;  %v4818_v63 = vsel %vm1878_vm4, %v11804_v62, %v4711_v8 }
 0xb40   :  { %v10138_v5 = vpop.f32.mrf.mxu1  ;;  %v10140_v2 = vpop.f32.mrf.mxu0 }
 0xb43   :  { %6888 = vmatmul.msk.f32.gmra.mxu1 %vm4298_vm0, %v10033_v10  ;;  %6895 = vmatmul.msk.f32.gmra.mxu0 %vm4298_vm0, %v10015_v1 }
 0xb48   :  { %v10152_v13 = vpop.f32.mrf.mxu1  ;;  %v10154_v38 = vpop.f32.mrf.mxu0 }
 0xb4b   :  { %6889 = vmatmul.msk.f32.gmra.mxu1 %vm4298_vm0, %v10043_v61  ;;  %6896 = vmatmul.msk.f32.gmra.mxu0 %vm4298_vm0, %v10033_v10  ;;  %v4775_v10 = vpop.permute.xlu2 %4774 }
 0xb50   :  { %v10160_v4 = vpop.f32.mrf.mxu1  ;;  %v10162_v45 = vpop.f32.mrf.mxu0 }
 0xb51   :  { %11798 = vst [vmem:[#allocation57_spill] sm:$0xff] %v10160_v4 }
 0xb52   :  { %11799 = vst [vmem:[#allocation54_spill] sm:$0xff] %v10162_v45 }
 0xb53   :  { %6890 = vmatmul.msk.f32.gmra.mxu1 %vm4298_vm0, %v10051_v6  ;;  %6897 = vmatmul.msk.f32.gmra.mxu0 %vm4298_vm0, %v10043_v61  ;;  %v4767_v61 = vpop.permute.xlu0 %4766  ;;  %v4715_v31 = vpop.permute.xlu2 %4714 }
 0xb54   :  { %v4830_v43 = vsel %vm116_vm1, %v4814_v28, %v4767_v61  ;;  %v10222_v61 = vpop.permute.xlu1 %4788 }
 0xb58   :  { %v10168_v1 = vpop.f32.mrf.mxu1  ;;  %v10170_v11 = vpop.f32.mrf.mxu0 }
 0xb59   :  { %11800 = vst [vmem:[#allocation64_spill] sm:$0xff] %v10168_v1 }
 0xb5a   :  { %11801 = vst [vmem:[#allocation51_spill] sm:$0xff] %v10170_v11  ;;  %v11815_v11 = vld [vmem:[#allocation19_spill] sm:$0xff] }
 0xb5b   :  { %6891 = vmatmul.msk.f32.gmra.mxu1 %vm4298_vm0, %v10059_v52  ;;  %6898 = vmatmul.msk.f32.gmra.mxu0 %vm4298_vm0, %v10051_v6  ;;  %v4815_v6 = vsel %vm1878_vm4, %v9733_v59, %v4705_v54  ;;  %v4707_v50 = vpop.permute.xlu0 %4706 }
 0xb5c   :  { %v4831_v19 = vsel %vm116_vm1, %v4815_v6, %v4769_v46  ;;  %v4816_v57 = vsel %vm1878_vm4, %v9744_v53, %v4707_v50  ;;  %v11803_v53 = vld [vmem:[#allocation26_spill] sm:$0xff]  ;;  %v11805_v6 = vld [vmem:[#allocation33_spill] sm:$0xff] }
 0xb5d   :  { %v4832_v59 = vsel %vm116_vm1, %v4816_v57, %v4771_v36  ;;  %v4817_v21 = vsel %vm1878_vm4, %v11803_v53, %v4709_v32 }
 0xb60   :  { %v10178_v25 = vpop.f32.mrf.mxu0  ;;  %v10180_v51 = vpop.f32.mrf.mxu1 }
 0xb61   :  { %11802 = vst [vmem:[#allocation61_spill] sm:$0xff] %v10178_v25 }
 0xb63   :  { %6899 = vmatmul.msk.f32.gmra.mxu0 %vm4298_vm0, %v10059_v52  ;;  %6900 = vmatmul.msk.f32.vlgmr.msra.gmra.mxu1 %vm2821_vm13, %v4830_v43  ;;  %v4781_v52 = vpop.permute.xlu2 %4780  ;;  %v4773_v20 = vpop.permute.xlu0 %4772  ;;  %v4834_v43 = vsel %vm116_vm1, %v4818_v63, %v4775_v10 }
 0xb64   :  { %v4833_v54 = vsel %vm116_vm1, %v4817_v21, %v4773_v20 }
 0xb68   :  { %v10188_v44 = vpop.f32.mrf.mxu1  ;;  %v10190_v34 = vpop.f32.mrf.mxu0 }
 0xb6b   :  { %6901 = vmatmul.msk.f32.gmra.mxu1 %vm2821_vm13, %v4831_v19  ;;  %v10202_v39 = vpop.permute.xlu2 %4720  ;;  %v4713_v32 = vpop.permute.xlu0 %4712 }
 0xb6c   :  { %v4819_v19 = vsel %vm1878_vm4, %v11805_v6, %v4713_v32  ;;  %v11810_v6 = vld [vmem:[#allocation16_spill] sm:$0xff] }
 0xb6d   :  { %v4835_v20 = vsel %vm116_vm1, %v4819_v19, %v4777_v22  ;;  %v11811_v22 = vld [vmem:[#allocation11_spill] sm:$0xff] }
 0xb6e   :  { %v3544_v19 = vadd.f32 %v11811_v22, %v11810_v6 }
 0xb70   :  { %v10196_v42 = vpop.f32.mrf.mxu1  ;;  %v10198_v9 = vpop.f32.mrf.mxu0 }
 0xb73   :  { %6902 = vmatmul.msk.f32.gmra.mxu1 %vm2821_vm13, %v4832_v59  ;;  %v10220_v28 = vpop.permute.xlu2 %4786  ;;  %v10234_v59 = vpop.permute.xlu1 %4728 }
 0xb74   :  { %v4779_v53 = vpop.permute.xlu0 %4778 }
 0xb78   :  { %v10206_v40 = vpop.f32.mrf.mxu1  ;;  %v10208_v26 = vpop.f32.mrf.mxu0 }
 0xb7b   :  { %6903 = vmatmul.msk.f32.gmra.mxu1 %vm2821_vm13, %v4833_v54  ;;  %v10232_v8 = vpop.permute.xlu2 %4726  ;;  %v11809_v54 = vld [vmem:[#allocation40_spill] sm:$0xff]  ;;  %v10248_v32 = vpop.permute.xlu1 %4794 }
 0xb7c   :  { %v4820_v62 = vsel %vm1878_vm4, %v11809_v54, %v4715_v31  ;;  %v3744_v31 = vadd.f32 %v11815_v11, %v3544_v19  ;;  %v11816_v54 = vld [vmem:[#allocation37_spill] sm:$0xff] }
 0xb7d   :  { %v4836_v63 = vsel %vm116_vm1, %v4820_v62, %v4779_v53 }
 0xb7e   :  { %v3963_v62 = vadd.f32 %v11816_v54, %v3744_v31  ;;  %v11821_v31 = vld [vmem:[#allocation29_spill] sm:$0xff] }
 0xb80   :  { %v10216_v46 = vpop.f32.mrf.mxu1  ;;  %v10218_v36 = vpop.f32.mrf.mxu0 }
 0xb83   :  { %6904 = vmatmul.msk.f32.gmra.mxu1 %vm2821_vm13, %v4834_v43  ;;  %v10246_v43 = vpop.permute.xlu2 %4792  ;;  %v4275_v22 = vpop.permute.xlu1 %4274 }
 0xb88   :  { %v10228_v50 = vpop.f32.mrf.mxu1  ;;  %v10230_v57 = vpop.f32.mrf.mxu0 }
 0xb89   :  { %11806 = vst [vmem:[#allocation58_spill] sm:$0xff] %v10228_v50  ;;  %v11818_v50 = vld [vmem:[#allocation13_spill] sm:$0xff] }
 0xb8b   :  { %6905 = vmatmul.msk.f32.gmra.mxu1 %vm2821_vm13, %v4835_v20  ;;  %v11812_v20 = vld [vmem:[#allocation34_spill] sm:$0xff]  ;;  %v10262_v4 = vpop.permute.xlu2 %4732 }
 0xb8c   :  { %v4821_v25 = vsel %vm1878_vm4, %v11812_v20, %v4717_v47  ;;  %v11819_v47 = vld [vmem:[#allocation21_spill] sm:$0xff] }
 0xb8d   :  { %v4837_v53 = vsel %vm116_vm1, %v4821_v25, %v4781_v52  ;;  %v3549_v20 = vadd.f32 %v11819_v47, %v11818_v50  ;;  %v11824_v47 = vld [vmem:[#allocation31_spill] sm:$0xff] }
 0xb90   :  { %v10238_v10 = vpop.f32.mrf.mxu1  ;;  %v10240_v21 = vpop.f32.mrf.mxu0 }
 0xb91   :  { %11807 = vst [vmem:[#allocation68_spill] sm:$0xff] %v10238_v10 }
 0xb92   :  { %11808 = vst [vmem:[#allocation55_spill] sm:$0xff] %v10240_v21  ;;  %v11817_v21 = vld [vmem:[#allocation41_spill] sm:$0xff] }
 0xb93   :  { %6906 = vmatmul.msk.f32.gmra.mxu1 %vm2821_vm13, %v4836_v63  ;;  %v4719_v63 = vpop.permute.xlu0 %4718  ;;  %v4120_v6 = vadd.f32 %v11817_v21, %v3963_v62  ;;  %v11822_v21 = vld [vmem:[#allocation12_spill] sm:$0xff]  ;;  %v11823_v62 = vld [vmem:[#allocation18_spill] sm:$0xff] }
 0xb94   :  { %v3554_v50 = vadd.f32 %v11823_v62, %v11822_v21 }
 0xb98   :  { %v10254_v1 = vpop.f32.mrf.mxu1  ;;  %v10256_v10 = vpop.f32.mrf.mxu0 }
 0xb99   :  { %11813 = vst [vmem:[#allocation65_spill] sm:$0xff] %v10254_v1  ;;  %v4822_v1 = vsel %vm1878_vm4, %v4120_v6, %v4719_v63  ;;  %v4277_v6 = vpop.permute.xlu2 %4276 }
 0xb9a   :  { %11814 = vst [vmem:[#allocation62_spill] sm:$0xff] %v10256_v10  ;;  %v4347_v10 = vadd.f32 %v10080_v33, %v4275_v22  ;;  %v4838_v19 = vsel %vm116_vm1, %v4822_v1, %v4783_v60  ;;  %v11825_v22 = vld [vmem:[#allocation48_spill] sm:$0xff] }
 0xb9b   :  { %6907 = vmatmul.msk.f32.gmra.mxu1 %vm2821_vm13, %v4837_v53  ;;  %v3750_v53 = vadd.f32 %v11821_v31, %v3549_v20  ;;  %v4785_v45 = vpop.permute.xlu0 %4784  ;;  %v11826_v20 = vld [vmem:[#allocation36_spill] sm:$0xff] }
 0xb9c   :  { %v4429_v52 = vadd.f32 %v10086_v16, %v4347_v10  ;;  %v4355_v16 = vadd.f32 %v10084_v23, %v4277_v6  ;;  %v11828_v23 = vld [vmem:[#allocation20_spill] sm:$0xff] }
 0xb9d   :  { %v3967_v63 = vadd.f32 %v11824_v47, %v3750_v53 }
 0xb9e   :  { %v4481_v54 = vadd.f32 %v10180_v51, %v4429_v52  ;;  %v3756_v51 = vadd.f32 %v11826_v20, %v3554_v50  ;;  %v11830_v50 = vld [vmem:[#allocation42_spill] sm:$0xff] }
 0xba0   :  { %v10269_v11 = vpop.f32.mrf.mxu0  ;;  %v4605_v25 = vpop.f32.mrf.mxu1  ;;  %v4540_v33 = vadd.f32 %v10190_v34, %v4481_v54  ;;  %v11827_v34 = vld [vmem:[#allocation38_spill] sm:$0xff] }
 0xba1   :  { %11820 = vst [vmem:[#allocation72_spill] sm:$0xff] %v10269_v11  ;;  %v4124_v11 = vadd.f32 %v11825_v22, %v3967_v63  ;;  %v3971_v54 = vadd.f32 %v11827_v34, %v3756_v51  ;;  %v4992_v34 = vld [vmem:[%s11072_s3 + $0x1e8] sm:$0xff] }
 0xba2   :  { %v4606_v1 = vadd.f32 %v4605_v25, %v4540_v33  ;;  %v11829_v25 = vld [vmem:[#allocation28_spill] sm:$0xff]  ;;  %v11831_v33 = vld [vmem:[#allocation30_spill] sm:$0xff]  ;;  %5055 = vmatpush.msra.mxu0 %v4992_v34 }
 0xba3   :  { %6908 = vmatmul.msk.f32.gmra.mxu1 %vm2821_vm13, %v4838_v19  ;;  %v4823_v52 = vsel %vm1878_vm4, %v4124_v11, %v10202_v39  ;;  %v4433_v19 = vadd.f32 %v10100_v37, %v4355_v16  ;;  %v3559_v62 = vadd.f32 %v11829_v25, %v11828_v23  ;;  %v4128_v47 = vadd.f32 %v11830_v50, %v3971_v54  ;;  %v11832_v16 = vld [vmem:[#allocation45_spill] sm:$0xff]  ;;  %v11839_v25 = vld [vmem:[#allocation39_spill] sm:$0xff]  ;;  %v11840_v50 = vld [vmem:[#allocation56_spill] sm:$0xff] }
 0xba4   :  { %v4839_v53 = vsel %vm116_vm1, %v4823_v52, %v4785_v45  ;;  %v11837_v54 = vld [vmem:[#allocation17_spill] sm:$0xff] }
 0xba5   :  { %v4486_v21 = vadd.f32 %v10188_v44, %v4433_v19  ;;  %v4824_v37 = vsel %vm1878_vm4, %v4128_v47, %v10204_v58  ;;  %v3762_v44 = vadd.f32 %v11831_v33, %v3559_v62  ;;  %v11834_v58 = vld [vmem:[#allocation6_spill] sm:$0xff] }
 0xba6   :  { %v4840_v22 = vsel %vm116_vm1, %v4824_v37, %v10220_v28  ;;  %v11836_v28 = vld [vmem:[#allocation27_spill] sm:$0xff]  ;;  %v4991_v33 = vld [vmem:[%s11072_s3 + $0x1e0] sm:$0xff] }
 0xba7   :  { %v4546_v39 = vadd.f32 %v10198_v9, %v4486_v21  ;;  %v4725_v9 = vpop.permute.xlu0 %4724  ;;  %v11838_v21 = vld [vmem:[#allocation25_spill] sm:$0xff]  ;;  %5056 = vmatpush.msra.mxu0 %v4991_v33  ;;  %v11855_v33 = vld [vmem:[#allocation47_spill] sm:$0xff] }
 0xba8   :  { %v4609_v60 = vpop.f32.mrf.mxu1  ;;  %v4655_v10 = vpop.f32.mrf.mxu0  ;;  %v3569_v23 = vadd.f32 %v11838_v21, %v11837_v54  ;;  %v11849_v21 = vld [vmem:[#allocation60_spill] sm:$0xff] }
 0xba9   :  { %v4656_v31 = vadd.f32 %v4655_v10, %v4606_v1  ;;  %v4610_v11 = vadd.f32 %v4609_v60, %v4546_v39  ;;  %v3975_v1 = vadd.f32 %v11832_v16, %v3762_v44  ;;  %v11833_v10 = vld [vmem:[#allocation49_spill] sm:$0xff]  ;;  %v11835_v60 = vld [vmem:[#allocation15_spill] sm:$0xff] }
 0xbaa   :  { %v3564_v51 = vadd.f32 %v11835_v60, %v11834_v58  ;;  %v4990_v16 = vld [vmem:[%s11072_s3 + $0x1d8] sm:$0xff] }
 0xbab   :  { %5738 = vrot.lane.b32.xlu0 %v4656_v31, %s7065_s6  ;;  %6909 = vmatmul.msk.f32.gmra.mxu1 %vm2821_vm13, %v4839_v53  ;;  %v4132_v20 = vadd.f32 %v11833_v10, %v3975_v1  ;;  %v4989_v1 = vld [vmem:[%s11072_s3 + $0x1d0] sm:$0xff] }
 0xbac   :  { %v3768_v53 = vadd.f32 %v11836_v28, %v3564_v51  ;;  %5057 = vmatpush.msra.mxu0 %v4990_v16 }
 0xbad   :  { %v4825_v52 = vsel %vm1878_vm4, %v4132_v20, %v4725_v9  ;;  %v11844_v9 = vld [vmem:[#allocation22_spill] sm:$0xff]  ;;  %v11845_v20 = vld [vmem:[#allocation53_spill] sm:$0xff] }
 0xbae   :  { %v4841_v31 = vsel %vm116_vm1, %v4825_v52, %v10222_v61  ;;  %v3979_v62 = vadd.f32 %v11839_v25, %v3768_v53  ;;  %v11841_v61 = vld [vmem:[#allocation44_spill] sm:$0xff]  ;;  %5058 = vmatpush.msra.mxu0 %v4989_v1  ;;  %v11847_v52 = vld [vmem:[#allocation35_spill] sm:$0xff] }
 0xbaf   :  { %v4791_v39 = vpop.permute.xlu0 %4790  ;;  %v11848_v53 = vld [vmem:[#allocation43_spill] sm:$0xff]  ;;  %v11850_v25 = vld [vmem:[#allocation24_spill] sm:$0xff] }
 0xbb0   :  { %v10297_v45 = vpop.f32.mrf.mxu1  ;;  %v4659_v63 = vpop.f32.mrf.mxu0  ;;  %v4136_v47 = vadd.f32 %v11840_v50, %v3979_v62  ;;  %v11851_v62 = vld [vmem:[#allocation32_spill] sm:$0xff] }
 0xbb1   :  { %v4660_v6 = vadd.f32 %v4659_v63, %v4610_v11  ;;  %v3774_v11 = vadd.f32 %v11841_v61, %v3569_v23  ;;  %v3579_v50 = vadd.f32 %v11851_v62, %v11850_v25  ;;  %v11853_v61 = vld [vmem:[#allocation52_spill] sm:$0xff] }
 0xbb2   :  { %v4826_v63 = vsel %vm1878_vm4, %v4136_v47, %v10232_v8  ;;  %v11843_v8 = vld [vmem:[#allocation14_spill] sm:$0xff] }
 0xbb3   :  { %5740 = vrot.lane.b32.xlu0 %v4660_v6, %s7065_s6  ;;  %6910 = vmatmul.msk.f32.gmra.mxu1 %vm2821_vm13, %v4840_v22  ;;  %v4842_v44 = vsel %vm116_vm1, %v4826_v63, %v4791_v39  ;;  %v11842_v6 = vld [vmem:[#allocation46_spill] sm:$0xff]  ;;  %v3574_v10 = vadd.f32 %v11844_v9, %v11843_v8 }
 0xbb4   :  { %v3983_v22 = vadd.f32 %v11842_v6, %v3774_v11  ;;  %v3786_v11 = vadd.f32 %v11853_v61, %v3579_v50 }
 0xbb6   :  { %v4140_v58 = vadd.f32 %v11845_v20, %v3983_v22 }
 0xbb7   :  { %v4731_v54 = vpop.permute.xlu0 %4730 }
 0xbb8   :  { %v10309_v19 = vpop.f32.mrf.mxu1  ;;  %v4827_v60 = vsel %vm1878_vm4, %v4140_v58, %v10234_v59 }
 0xbb9   :  { %v4843_v28 = vsel %vm116_vm1, %v4827_v60, %v10246_v43  ;;  %v11854_v43 = vld [vmem:[#allocation50_spill] sm:$0xff] }
 0xbba   :  { %v3991_v63 = vadd.f32 %v11854_v43, %v3786_v11 }
 0xbbb   :  { %6911 = vmatmul.msk.f32.gmra.mxu1 %vm2821_vm13, %v4841_v31  ;;  %v3780_v31 = vadd.f32 %v11847_v52, %v3574_v10 }
 0xbbd   :  { %v3987_v34 = vadd.f32 %v11848_v53, %v3780_v31 }
 0xbbf   :  { %v4144_v23 = vadd.f32 %v11849_v21, %v3987_v34  ;;  %v4797_v6 = vpop.permute.xlu0 %4796 }
 0xbc0   :  { %v10322_v37 = vpop.f32.mrf.mxu1 }
 0xbc1   :  { %v4828_v47 = vsel %vm1878_vm4, %v4144_v23, %v4731_v54 }
 0xbc2   :  { %v4844_v39 = vsel %vm116_vm1, %v4828_v47, %v10248_v32  ;;  %v10372_v32 = vld [vmem:[%s11075_s4 + $0x8] ss:$0 sm:$0xff] }
 0xbc3   :  { %6912 = vmatmul.msk.f32.gmra.mxu1 %vm2821_vm13, %v4842_v44  ;;  %v4148_v44 = vadd.f32 %v11855_v33, %v3991_v63 }
 0xbc5   :  { %v4829_v16 = vsel %vm1878_vm4, %v4148_v44, %v10262_v4 }
 0xbc6   :  { %v4845_v1 = vsel %vm116_vm1, %v4829_v16, %v4797_v6  ;;  %v10392_v16 = vpop.f32.mrf.mxu0 }
 0xbc8   :  { %v10344_v51 = vpop.f32.mrf.mxu1 }
 0xbc9   :  { %11846 = vst [vmem:[#allocation59_spill] sm:$0xff] %v10344_v51 }
 0xbcb   :  { %6913 = vmatmul.msk.f32.gmra.mxu1 %vm2821_vm13, %v4843_v28 }
 0xbd0   :  { %v10355_v59 = vpop.f32.mrf.mxu1 }
 0xbd1   :  { %11852 = vst [vmem:[#allocation69_spill] sm:$0xff] %v10355_v59 }
 0xbd3   :  { %6914 = vmatmul.msk.f32.gmra.mxu1 %vm2821_vm13, %v4844_v39 }
 0xbd8   :  { %v10363_v22 = vpop.f32.mrf.mxu1 }
 0xbd9   :  { %11856 = vst [vmem:[#allocation66_spill] sm:$0xff] %v10363_v22 }
 0xbdb   :  { %6915 = vmatmul.msk.f32.gmra.mxu1 %vm2821_vm13, %v4845_v1 }
 0xbe0   :  { %v4925_v8 = vpop.f32.mrf.mxu1 }
 0xbe1   :  { %v4926_v9 = vadd.f32 %v10372_v32, %v4925_v8 }
 0xbe3   :  { %v4973_v10 = vmax.f32 %v4926_v9, 0.0 }
 0xbe5   :  { %6916 = vmatmul.msk.f32.vlgmr.msra.gmra.mxu0 %vm1878_vm4, %v4973_v10 }
 0xbe8   :  { %v4928_v20 = vpop.f32.mrf.mxu1 }
 0xbe9   :  { %v4929_v58 = vadd.f32 %v10372_v32, %v4928_v20 }
 0xbeb   :  { %v4974_v60 = vmax.f32 %v4929_v58, 0.0  ;;  %v10397_v58 = vpop.f32.mrf.mxu0 }
 0xbed   :  { %6917 = vmatmul.msk.f32.gmra.mxu0 %vm1878_vm4, %v4974_v60 }
 0xbf0   :  { %v4931_v4 = vpop.f32.mrf.mxu1 }
 0xbf1   :  { %v4932_v52 = vadd.f32 %v10372_v32, %v4931_v4 }
 0xbf3   :  { %v4975_v31 = vmax.f32 %v4932_v52, 0.0 }
 0xbf5   :  { %6918 = vmatmul.msk.f32.gmra.mxu0 %vm1878_vm4, %v4975_v31 }
 0xbf8   :  { %v4934_v28 = vpop.f32.mrf.mxu1 }
 0xbf9   :  { %v4935_v53 = vadd.f32 %v10372_v32, %v4934_v28  ;;  %v10401_v28 = vpop.f32.mrf.mxu0 }
 0xbfb   :  { %v4976_v34 = vmax.f32 %v4935_v53, 0.0 }
 0xbfd   :  { %6919 = vmatmul.msk.f32.gmra.mxu0 %vm1878_vm4, %v4976_v34 }
 0xc00   :  { %v4937_v54 = vpop.f32.mrf.mxu1 }
 0xc01   :  { %v4938_v21 = vadd.f32 %v10372_v32, %v4937_v54 }
 0xc03   :  { %v4977_v23 = vmax.f32 %v4938_v21, 0.0  ;;  %v10406_v21 = vpop.f32.mrf.mxu0 }
 0xc04   :  { %11857 = vst [vmem:[#allocation76_spill] sm:$0xff] %v10406_v21 }
 0xc05   :  { %6920 = vmatmul.msk.f32.gmra.mxu0 %vm1878_vm4, %v4977_v23 }
 0xc08   :  { %v4940_v25 = vpop.f32.mrf.mxu1 }
 0xc09   :  { %v4941_v62 = vadd.f32 %v10372_v32, %v4940_v25 }
 0xc0b   :  { %v4978_v50 = vmax.f32 %v4941_v62, 0.0 }
 0xc0d   :  { %6921 = vmatmul.msk.f32.gmra.mxu0 %vm1878_vm4, %v4978_v50  ;;  %v10410_v50 = vpop.f32.mrf.mxu0 }
 0xc0e   :  { %11858 = vst [vmem:[#allocation63_spill] sm:$0xff] %v10410_v50 }
 0xc10   :  { %v4943_v47 = vpop.f32.mrf.mxu1 }
 0xc11   :  { %v4944_v39 = vadd.f32 %v10372_v32, %v4943_v47 }
 0xc13   :  { %v4979_v61 = vmax.f32 %v4944_v39, 0.0 }
 0xc15   :  { %6922 = vmatmul.msk.f32.gmra.mxu0 %vm1878_vm4, %v4979_v61 }
 0xc18   :  { %v4946_v11 = vpop.f32.mrf.mxu1 }
 0xc19   :  { %v4947_v43 = vadd.f32 %v10372_v32, %v4946_v11 }
 0xc1b   :  { %v4980_v63 = vmax.f32 %v4947_v43, 0.0 }
 0xc1d   :  { %6923 = vmatmul.msk.f32.gmra.mxu0 %vm1878_vm4, %v4980_v63  ;;  %v10415_v63 = vpop.f32.mrf.mxu0 }
 0xc1e   :  { %11859 = vst [vmem:[#allocation73_spill] sm:$0xff] %v10415_v63 }
 0xc20   :  { %v4949_v33 = vpop.f32.mrf.mxu1 }
 0xc21   :  { %v4950_v44 = vadd.f32 %v10372_v32, %v4949_v33 }
 0xc23   :  { %v4981_v6 = vmax.f32 %v4950_v44, 0.0 }
 0xc25   :  { %6924 = vmatmul.msk.f32.gmra.mxu0 %vm1878_vm4, %v4981_v6 }
 0xc28   :  { %v4952_v1 = vpop.f32.mrf.mxu1 }
 0xc29   :  { %v4953_v8 = vadd.f32 %v10372_v32, %v4952_v1 }
 0xc2b   :  { %v4982_v9 = vmax.f32 %v4953_v8, 0.0 }
 0xc2d   :  { %6925 = vmatmul.msk.f32.gmra.mxu0 %vm1878_vm4, %v4982_v9 }
 0xc30   :  { %v4955_v10 = vpop.f32.mrf.mxu1 }
 0xc31   :  { %v4956_v20 = vadd.f32 %v10372_v32, %v4955_v10 }
 0xc33   :  { %v4983_v60 = vmax.f32 %v4956_v20, 0.0 }
 0xc35   :  { %6926 = vmatmul.msk.f32.gmra.mxu0 %vm1878_vm4, %v4983_v60 }
 0xc38   :  { %v4958_v4 = vpop.f32.mrf.mxu1 }
 0xc39   :  { %v4959_v52 = vadd.f32 %v10372_v32, %v4958_v4 }
 0xc3b   :  { %v4984_v31 = vmax.f32 %v4959_v52, 0.0 }
 0xc3d   :  { %6927 = vmatmul.msk.f32.gmra.mxu0 %vm1878_vm4, %v4984_v31 }
 0xc40   :  { %v4961_v53 = vpop.f32.mrf.mxu1 }
 0xc41   :  { %v4962_v34 = vadd.f32 %v10372_v32, %v4961_v53 }
 0xc43   :  { %v4985_v54 = vmax.f32 %v4962_v34, 0.0 }
 0xc45   :  { %6928 = vmatmul.msk.f32.gmra.mxu0 %vm1878_vm4, %v4985_v54  ;;  %v10427_v54 = vld [vmem:[%s11075_s4 + $0x9] ss:$0 sm:$0xff] }
 0xc48   :  { %v4964_v23 = vpop.f32.mrf.mxu1 }
 0xc49   :  { %v4965_v25 = vadd.f32 %v10372_v32, %v4964_v23 }
 0xc4b   :  { %v4986_v62 = vmax.f32 %v4965_v25, 0.0 }
 0xc4d   :  { %6929 = vmatmul.msk.f32.gmra.mxu0 %vm1878_vm4, %v4986_v62 }
 0xc50   :  { %v4967_v47 = vpop.f32.mrf.mxu1 }
 0xc51   :  { %v4968_v39 = vadd.f32 %v10372_v32, %v4967_v47 }
 0xc53   :  { %v4987_v61 = vmax.f32 %v4968_v39, 0.0 }
 0xc55   :  { %6930 = vmatmul.msk.f32.gmra.mxu0 %vm1878_vm4, %v4987_v61 }
 0xc58   :  { %v4970_v11 = vpop.f32.mrf.mxu1 }
 0xc59   :  { %v4971_v43 = vadd.f32 %v10372_v32, %v4970_v11 }
 0xc5b   :  { %v4988_v33 = vmax.f32 %v4971_v43, 0.0 }
 0xc5d   :  { %6931 = vmatmul.msk.f32.gmra.mxu0 %vm1878_vm4, %v4988_v33 }
 0xc62   :  { %v10418_v44 = vpop.f32.mrf.mxu0 }
 0xc6a   :  { %v10420_v6 = vpop.f32.mrf.mxu0 }
 0xc72   :  { %v10422_v1 = vpop.f32.mrf.mxu0 }
 0xc7a   :  { %v5069_v8 = vpop.f32.mrf.mxu0 }
 0xc82   :  { %v5072_v9 = vpop.f32.mrf.mxu0 }
 0xc8a   :  { %v5075_v10 = vpop.f32.mrf.mxu0 }
 0xc92   :  { %v5078_v20 = vpop.f32.mrf.mxu0 }
 0xc9a   :  { %v5081_v60 = vpop.f32.mrf.mxu0 }
 0xca2   :  { %v5084_v4 = vpop.f32.mrf.mxu0 }
 0xcaa   :  { %v5087_v52 = vpop.f32.mrf.mxu0 }
 0xcab   :  { %v5088_v22 = vadd.f32 %v10427_v54, %v5087_v52 }
 0xcb2   :  { %v5090_v31 = vpop.f32.mrf.mxu0 }
 0xcb3   :  { %v5091_v43 = vadd.f32 %v10427_v54, %v5090_v31  ;;  %v5082_v31 = vadd.f32 %v10427_v54, %v5081_v60  ;;  %v5076_v60 = vadd.f32 %v10427_v54, %v5075_v10 }
 0xcba   :  { %v5093_v32 = vpop.f32.mrf.mxu0 }
 0xcbb   :  { %v5094_v39 = vadd.f32 %v10427_v54, %v5093_v32 }
 0xcbd   :  { %v5119_v50 = vmax.f32 %v5094_v39, 0.0 }
 0xcc2   :  { %v5096_v53 = vpop.f32.mrf.mxu0 }
 0xcc3   :  { %v5097_v62 = vadd.f32 %v10427_v54, %v5096_v53  ;;  %v5118_v53 = vmax.f32 %v5091_v43, 0.0 }
 0xcc5   :  { %v5120_v33 = vmax.f32 %v5097_v62, 0.0 }
 0xcca   :  { %v5099_v34 = vpop.f32.mrf.mxu0 }
 0xccb   :  { %v5100_v23 = vadd.f32 %v10427_v54, %v5099_v34  ;;  %v5085_v34 = vadd.f32 %v10427_v54, %v5084_v4  ;;  %v5134_v4 = vadd.f32 %v5118_v53, %v11787_v18  ;;  %v5073_v18 = vadd.f32 %v10427_v54, %v5072_v9 }
 0xccc   :  { %v5113_v9 = vmax.f32 %v5076_v60, 0.0 }
 0xccd   :  { %v5121_v61 = vmax.f32 %v5100_v23, 0.0  ;;  %v5117_v23 = vmax.f32 %v5088_v22, 0.0  ;;  %v5115_v22 = vmax.f32 %v5082_v31, 0.0  ;;  %v10465_v43 = vand.u32 4294901760, %v5134_v4 }
 0xccf   :  { %v5137_v59 = vadd.f32 %v5121_v61, %v11790_v48  ;;  %v5079_v48 = vadd.f32 %v10427_v54, %v5078_v20 }
 0xcd1   :  { %v10444_v62 = vand.u32 4294901760, %v5137_v59 }
 0xcd2   :  { %v5102_v25 = vpop.f32.mrf.mxu0 }
 0xcd3   :  { %v5103_v47 = vadd.f32 %v10427_v54, %v5102_v25  ;;  %v5136_v25 = vadd.f32 %v5120_v33, %v11789_v24  ;;  %v10459_v61 = vsub.f32 %v5137_v59, %v10444_v62  ;;  %v5070_v59 = vadd.f32 %v10427_v54, %v5069_v8 }
 0xcd4   :  { %v5131_v33 = vadd.f32 %v5115_v22, %v11784_v14  ;;  %v5112_v8 = vmax.f32 %v5073_v18, 0.0 }
 0xcd5   :  { %v5122_v11 = vmax.f32 %v5103_v47, 0.0  ;;  %v5116_v47 = vmax.f32 %v5085_v34, 0.0  ;;  %v10448_v39 = vand.u32 4294901760, %v5136_v25 }
 0xcd7   :  { %v5138_v63 = vadd.f32 %v5122_v11, %v11792_v29  ;;  %v5135_v29 = vadd.f32 %v5119_v50, %v11788_v55  ;;  %v5133_v55 = vadd.f32 %v5117_v23, %v11786_v30  ;;  %v5114_v11 = vmax.f32 %v5079_v48, 0.0 }
 0xcd8   :  { %v10493_v23 = vsub.f32 %v5134_v4, %v10465_v43 }
 0xcd9   :  { %v10439_v51 = vand.u32 4294901760, %v5138_v63  ;;  %v10456_v50 = vand.u32 4294901760, %v5135_v29  ;;  %v5130_v31 = vadd.f32 %v5114_v11, %v11783_v7  ;;  %v5129_v7 = vadd.f32 %v5113_v9, %v8684_v12 }
 0xcda   :  { %v5105_v21 = vpop.f32.mrf.mxu0  ;;  %v5128_v12 = vadd.f32 %v5112_v8, %v8707_v0 }
 0xcdb   :  { %v5106_v32 = vadd.f32 %v10427_v54, %v5105_v21  ;;  %v10451_v24 = vsub.f32 %v5138_v63, %v10439_v51  ;;  %v5132_v63 = vadd.f32 %v5116_v47, %v11785_v49  ;;  %v10478_v49 = vand.u32 4294901760, %v5133_v55 }
 0xcdc   :  { %v10481_v34 = vsub.f32 %v5135_v29, %v10456_v50  ;;  %v5111_v47 = vmax.f32 %v5070_v59, 0.0  ;;  %v10514_v59 = vand.u32 4294901760, %v5130_v31 }
 0xcdd   :  { %v5123_v52 = vmax.f32 %v5106_v32, 0.0  ;;  %v5245_v30 = vand.u32 4294901760, %v10451_v24  ;;  %v5067_v32 = vadd.f32 %v10427_v54, %v10422_v1  ;;  %v10490_v14 = vand.u32 4294901760, %v5132_v63 }
 0xcde   :  { %v5064_v1 = vadd.f32 %v10427_v54, %v10420_v6  ;;  %v10506_v4 = vsub.f32 %v5133_v55, %v10478_v49  ;;  %v5263_v18 = vand.u32 4294901760, %v10481_v34  ;;  %v5061_v6 = vadd.f32 %v10427_v54, %v10418_v44 }
 0xcdf   :  { %v5139_v21 = vadd.f32 %v5123_v52, %v11793_v27  ;;  %v10468_v27 = vsub.f32 %v5136_v25, %v10448_v39  ;;  %v5251_v25 = vand.u32 4294901760, %v10459_v61  ;;  %v5246_v52 = vsub.f32 %v10451_v24, %v5245_v30 }
 0xce0   :  { %v5110_v11 = vmax.f32 %v5067_v32, 0.0  ;;  %v10518_v55 = vsub.f32 %v5132_v63, %v10490_v14  ;;  %v5127_v44 = vadd.f32 %v5111_v47, %v8722_v41  ;;  %v10524_v54 = vand.u32 4294901760, %v5129_v7 }
 0xce1   :  { %v10461_v20 = vand.u32 4294901760, %v5139_v21  ;;  %v5257_v48 = vand.u32 4294901760, %v10468_v27  ;;  %v5252_v22 = vsub.f32 %v10459_v61, %v5251_v25  ;;  %v5264_v32 = vsub.f32 %v10481_v34, %v5263_v18 }
 0xce2   :  { %v5275_v8 = vand.u32 4294901760, %v10506_v4  ;;  %v10534_v41 = vand.u32 4294901760, %v5128_v12 }
 0xce3   :  { %v10471_v10 = vsub.f32 %v5139_v21, %v10461_v20  ;;  %5141 = vmatpush.msrb.mxu2 %v10461_v20  ;;  %5634 = vmatpush.msrb.mxu0 %v10461_v20  ;;  %v10502_v21 = vand.u32 4294901760, %v5131_v33  ;;  %v5258_v9 = vsub.f32 %v10468_v27, %v5257_v48  ;;  %v5253_v63 = vand.u32 4294901760, %v5252_v22 }
 0xce5   :  { %5143 = vmatpush.msrb.mxu2 %v10439_v51  ;;  %5636 = vmatpush.msrb.mxu0 %v10439_v51  ;;  %v5239_v53 = vand.u32 4294901760, %v10471_v10  ;;  %v10528_v0 = vsub.f32 %v5131_v33, %v10502_v21  ;;  %v5259_v33 = vand.u32 4294901760, %v5258_v9 }
 0xce7   :  { %5145 = vmatpush.msrb.mxu2 %v10444_v62  ;;  %5539 = vmatpush.msrb.mxu1 %v5239_v53  ;;  %v5240_v29 = vsub.f32 %v10471_v10, %v5239_v53  ;;  %v5269_v53 = vand.u32 4294901760, %v10493_v23 }
 0xce8   :  { %5638 = vmatpush.msrb.mxu0 %v10444_v62 }
 0xce9   :  { %5147 = vmatpush.msrb.mxu2 %v10448_v39  ;;  %5543 = vmatpush.msrb.mxu1 %v5245_v30  ;;  %v5241_v60 = vand.u32 4294901760, %v5240_v29  ;;  %v5247_v30 = vand.u32 4294901760, %v5246_v52  ;;  %v5109_v29 = vmax.f32 %v5064_v1, 0.0  ;;  %v5108_v52 = vmax.f32 %v5061_v6, 0.0 }
 0xcea   :  { %5640 = vmatpush.msrb.mxu0 %v10448_v39  ;;  %v5126_v1 = vadd.f32 %v5110_v11, %v8743_v56  ;;  %v5270_v47 = vsub.f32 %v10493_v23, %v5269_v53  ;;  %v10544_v6 = vand.u32 4294901760, %v5127_v44  ;;  %v10548_v56 = vsub.f32 %v5129_v7, %v10524_v54 }
 0xceb   :  { %5149 = vmatpush.msrb.mxu2 %v10456_v50  ;;  %5242 = vmatpush.msrb.mxu3 %v5241_v60  ;;  %v5281_v60 = vand.u32 4294901760, %v10518_v55  ;;  %v5125_v22 = vadd.f32 %v5109_v29, %v8756_v35  ;;  %v5287_v11 = vand.u32 4294901760, %v10528_v0  ;;  %v10558_v35 = vsub.f32 %v5128_v12, %v10534_v41 }
 0xcec   :  { %5547 = vmatpush.msrb.mxu1 %v5251_v25  ;;  %5642 = vmatpush.msrb.mxu0 %v10456_v50  ;;  %v10538_v25 = vsub.f32 %v5130_v31, %v10514_v59  ;;  %v5265_v31 = vand.u32 4294901760, %v5264_v32  ;;  %v5271_v7 = vand.u32 4294901760, %v5270_v47 }
 0xced   :  { %5151 = vmatpush.msrb.mxu2 %v10465_v43  ;;  %5248 = vmatpush.msrb.mxu3 %v5247_v30  ;;  %v11860_v30 = vld [vmem:[#allocation146_spill] sm:$0xff]  ;;  %v10563_v32 = vand.u32 4294901760, %v5125_v22 }
 0xcee   :  { %5551 = vmatpush.msrb.mxu1 %v5257_v48  ;;  %5644 = vmatpush.msrb.mxu0 %v10465_v43  ;;  %v5276_v48 = vsub.f32 %v10506_v4, %v5275_v8  ;;  %v5124_v9 = vadd.f32 %v5108_v52, %v11860_v30  ;;  %v5293_v29 = vand.u32 4294901760, %v10538_v25  ;;  %v5288_v52 = vsub.f32 %v10528_v0, %v5287_v11 }
 0xcef   :  { %5153 = vmatpush.msrb.mxu2 %v10478_v49  ;;  %5254 = vmatpush.msrb.mxu3 %v5253_v63  ;;  %v10554_v63 = vand.u32 4294901760, %v5126_v1  ;;  %v10583_v30 = vsub.f32 %v5125_v22, %v10563_v32 }
 0xcf0   :  { %5555 = vmatpush.msrb.mxu1 %v5263_v18  ;;  %5646 = vmatpush.msrb.mxu0 %v10478_v49  ;;  %v5282_v18 = vsub.f32 %v10518_v55, %v5281_v60  ;;  %v5277_v12 = vand.u32 4294901760, %v5276_v48  ;;  %v10572_v47 = vand.u32 4294901760, %v5124_v9  ;;  %v5305_v48 = vand.u32 4294901760, %v10558_v35 }
 0xcf1   :  { %5155 = vmatpush.msrb.mxu2 %v10490_v14  ;;  %5260 = vmatpush.msrb.mxu3 %v5259_v33  ;;  %v5299_v33 = vand.u32 4294901760, %v10548_v56 }
 0xcf2   :  { %5559 = vmatpush.msrb.mxu1 %v5269_v53  ;;  %5648 = vmatpush.msrb.mxu0 %v10490_v14  ;;  %v10567_v53 = vsub.f32 %v5127_v44, %v10544_v6  ;;  %v5283_v44 = vand.u32 4294901760, %v5282_v18  ;;  %v10590_v18 = vsub.f32 %v5124_v9, %v10572_v47  ;;  %v5306_v22 = vsub.f32 %v10558_v35, %v5305_v48 }
 0xcf3   :  { %5157 = vmatpush.msrb.mxu2 %v10502_v21  ;;  %5266 = vmatpush.msrb.mxu3 %v5265_v31  ;;  %v5294_v31 = vsub.f32 %v10538_v25, %v5293_v29  ;;  %v5323_v9 = vand.u32 4294901760, %v10583_v30 }
 0xcf4   :  { %5563 = vmatpush.msrb.mxu1 %v5275_v8  ;;  %5650 = vmatpush.msrb.mxu0 %v10502_v21  ;;  %v10576_v8 = vsub.f32 %v5126_v1, %v10554_v63  ;;  %v5300_v1 = vsub.f32 %v10548_v56, %v5299_v33 }
 0xcf5   :  { %5159 = vmatpush.msrb.mxu2 %v10514_v59  ;;  %5272 = vmatpush.msrb.mxu3 %v5271_v7  ;;  %v5311_v7 = vand.u32 4294901760, %v10567_v53 }
 0xcf6   :  { %5567 = vmatpush.msrb.mxu1 %v5281_v60  ;;  %5652 = vmatpush.msrb.mxu0 %v10514_v59  ;;  %v5289_v60 = vand.u32 4294901760, %v5288_v52 }
 0xcf7   :  { %5161 = vmatpush.msrb.mxu2 %v10524_v54  ;;  %5278 = vmatpush.msrb.mxu3 %v5277_v12  ;;  %v5317_v12 = vand.u32 4294901760, %v10576_v8  ;;  %v5312_v52 = vsub.f32 %v10567_v53, %v5311_v7 }
 0xcf8   :  { %5571 = vmatpush.msrb.mxu1 %v5287_v11  ;;  %5654 = vmatpush.msrb.mxu0 %v10524_v54  ;;  %v5295_v11 = vand.u32 4294901760, %v5294_v31 }
 0xcf9   :  { %5163 = vmatpush.msrb.mxu2 %v10534_v41  ;;  %5284 = vmatpush.msrb.mxu3 %v5283_v44  ;;  %v5307_v44 = vand.u32 4294901760, %v5306_v22  ;;  %v5318_v31 = vsub.f32 %v10576_v8, %v5317_v12  ;;  %v11861_v22 = vld [vmem:[#allocation157_spill] sm:$0xff] }
 0xcfa   :  { %5575 = vmatpush.msrb.mxu1 %v5293_v29  ;;  %5656 = vmatpush.msrb.mxu0 %v10534_v41  ;;  %v5301_v29 = vand.u32 4294901760, %v5300_v1  ;;  %v5324_v1 = vsub.f32 %v10583_v30, %v5323_v9 }
 0xcfb   :  { %5165 = vmatpush.msrb.mxu2 %v10544_v6  ;;  %5290 = vmatpush.msrb.mxu3 %v5289_v60  ;;  %v5313_v60 = vand.u32 4294901760, %v5312_v52  ;;  %v11891_v52 = vld [vmem:[#allocation176_spill] sm:$0xff] }
 0xcfc   :  { %5579 = vmatpush.msrb.mxu1 %v5299_v33  ;;  %5658 = vmatpush.msrb.mxu0 %v10544_v6  ;;  %v5329_v33 = vand.u32 4294901760, %v10590_v18 }
 0xcfd   :  { %5167 = vmatpush.msrb.mxu2 %v10554_v63  ;;  %5296 = vmatpush.msrb.mxu3 %v5295_v11 }
 0xcfe   :  { %5583 = vmatpush.msrb.mxu1 %v5305_v48  ;;  %5660 = vmatpush.msrb.mxu0 %v10554_v63  ;;  %v5319_v48 = vand.u32 4294901760, %v5318_v31  ;;  %v5330_v11 = vsub.f32 %v10590_v18, %v5329_v33  ;;  %v11882_v31 = vld [vmem:[#allocation150_spill] sm:$0xff] }
 0xcff   :  { %5169 = vmatpush.msrb.mxu2 %v10563_v32  ;;  %5302 = vmatpush.msrb.mxu3 %v5301_v29  ;;  %v11862_v29 = vmov 1.0  }
 0xd00   :  { %5587 = vmatpush.msrb.mxu1 %v5311_v7  ;;  %5662 = vmatpush.msrb.mxu0 %v10563_v32  ;;  %v5325_v7 = vand.u32 4294901760, %v5324_v1  ;;  %v11885_v1 = vld [vmem:[#allocation164_spill] sm:$0xff] }
 0xd01   :  { %5171 = vmatpush.msrb.mxu2 %v10572_v47  ;;  %5308 = vmatpush.msrb.mxu3 %v5307_v44  ;;  %v11881_v44 = vld [vmem:[#allocation141_spill] sm:$0xff] }
 0xd02   :  { %5591 = vmatpush.msrb.mxu1 %v5317_v12  ;;  %5664 = vmatpush.msrb.mxu0 %v10572_v47  ;;  %v11879_v12 = vld [vmem:[#allocation147_spill] sm:$0xff] }
 0xd03   :  { %5368 = vmatpush.msra.mxu2 %v10471_v10  ;;  %5314 = vmatpush.msrb.mxu3 %v5313_v60  ;;  %v5331_v10 = vand.u32 4294901760, %v5330_v11  ;;  %v11884_v60 = vld [vmem:[#allocation161_spill] sm:$0xff]  ;;  %v11887_v11 = vld [vmem:[#allocation168_spill] sm:$0xff] }
 0xd04   :  { %5595 = vmatpush.msrb.mxu1 %v5323_v9  ;;  %5177 = vmatmul.f32.vlgmr.msrb.gmra.mxu2 %v11861_v22  ;;  %v11880_v9 = vld [vmem:[#allocation158_spill] sm:$0xff]  ;;  %v11888_v22 = vld [vmem:[#allocation169_spill] sm:$0xff] }
 0xd05   :  { %5371 = vmatpush.msra.mxu2 %v10451_v24  ;;  %5320 = vmatpush.msrb.mxu3 %v5319_v48  ;;  %v11864_v24 = vld [vmem:[#allocation152_spill] sm:$0xff]  ;;  %v11886_v48 = vld [vmem:[#allocation165_spill] sm:$0xff] }
 0xd06   :  { %5599 = vmatpush.msrb.mxu1 %v5329_v33  ;;  %6948 = vmatmul.msk.f32.vlgmr.msrb.gmra.mxu0 %vm8737_vm5, %v11862_v29  ;;  %v11883_v33 = vld [vmem:[#allocation159_spill] sm:$0xff] }
 0xd07   :  { %5374 = vmatpush.msra.mxu2 %v10459_v61  ;;  %5326 = vmatpush.msrb.mxu3 %v5325_v7  ;;  %v11889_v7 = vld [vmem:[#allocation172_spill] sm:$0xff] }
 0xd08   :  { %6940 = vmatmul.msk.f32.vlgmr.msrb.gmra.mxu1 %vm8737_vm5, %v11862_v29 }
 0xd09   :  { %5377 = vmatpush.msra.mxu2 %v10468_v27  ;;  %5332 = vmatpush.msrb.mxu3 %v5331_v10  ;;  %v7042_v27 = vld [vmem:[%s11072_s3 + $0x100] sm:$0xff]  ;;  %v11892_v10 = vld [vmem:[#allocation177_spill] sm:$0xff] }
 0xd0a   :  { %6932 = vmatmul.msk.f32.vlgmr.msrb.gmra.mxu3 %vm8737_vm5, %v11862_v29 }
 0xd0b   :  { %5380 = vmatpush.msra.mxu2 %v10481_v34  ;;  %5456 = vmatpush.msra.mxu3 %v10461_v20  ;;  %v7041_v20 = vld [vmem:[%s11072_s3 + $0x108] sm:$0xff]  ;;  %v7043_v34 = vld [vmem:[%s11072_s3 + $0xf8] sm:$0xff] }
 0xd0c   :  { %5185 = vmatmul.f32.gmra.mxu2 %v11864_v24  ;;  %v11893_v24 = vld [vmem:[#allocation179_spill] sm:$0xff] }
 0xd0d   :  { %5383 = vmatpush.msra.mxu2 %v10493_v23  ;;  %5458 = vmatpush.msra.mxu3 %v10439_v51  ;;  %v11866_v51 = vld [vmem:[#allocation163_spill] sm:$0xff] }
 0xd0e   :  { %6949 = vmatmul.msk.f32.gmra.mxu0 %vm8800_vm6, %v11862_v29  ;;  %v7045_v23 = vld [vmem:[%s11072_s3 + $0xe8] sm:$0xff] }
 0xd0f   :  { %5386 = vmatpush.msra.mxu2 %v10506_v4  ;;  %5460 = vmatpush.msra.mxu3 %v10444_v62  ;;  %v11872_v4 = vld [vmem:[#allocation175_spill] sm:$0xff] }
 0xd10   :  { %6941 = vmatmul.msk.f32.gmra.mxu1 %vm8800_vm6, %v11862_v29 }
 0xd11   :  { %5389 = vmatpush.msra.mxu2 %v10518_v55  ;;  %5462 = vmatpush.msra.mxu3 %v10448_v39  ;;  %v11868_v39 = vld [vmem:[#allocation167_spill] sm:$0xff]  ;;  %v7048_v55 = vld [vmem:[%s11072_s3 + $0x120] sm:$0xff] }
 0xd12   :  { %6933 = vmatmul.msk.f32.gmra.mxu3 %vm8800_vm6, %v11862_v29 }
 0xd13   :  { %5392 = vmatpush.msra.mxu2 %v10528_v0  ;;  %5464 = vmatpush.msra.mxu3 %v10456_v50  ;;  %v7049_v0 = vld [vmem:[%s11072_s3 + $0xd8] sm:$0xff] }
 0xd14   :  { %5193 = vmatmul.f32.gmra.mxu2 %v11866_v51 }
 0xd15   :  { %5395 = vmatpush.msra.mxu2 %v10538_v25  ;;  %5466 = vmatpush.msra.mxu3 %v10465_v43  ;;  %v11870_v43 = vld [vmem:[#allocation171_spill] sm:$0xff]  ;;  %v7051_v25 = vld [vmem:[%s11072_s3 + $0xd0] sm:$0xff] }
 0xd16   :  { %6950 = vmatmul.msk.f32.gmra.mxu0 %vm8847_vm7, %v11862_v29 }
 0xd17   :  { %5398 = vmatpush.msra.mxu2 %v10548_v56  ;;  %5468 = vmatpush.msra.mxu3 %v10478_v49  ;;  %v7053_v56 = vld [vmem:[%s11072_s3 + $0xc8] sm:$0xff] }
 0xd18   :  { %6942 = vmatmul.msk.f32.gmra.mxu1 %vm8847_vm7, %v11862_v29 }
 0xd19   :  { %5401 = vmatpush.msra.mxu2 %v10558_v35  ;;  %5470 = vmatpush.msra.mxu3 %v10490_v14  ;;  %v7044_v14 = vld [vmem:[%s11072_s3 + $0xf0] sm:$0xff]  ;;  %v7054_v35 = vld [vmem:[%s11072_s3 + $0xc0] sm:$0xff] }
 0xd1a   :  { %6934 = vmatmul.msk.f32.gmra.mxu3 %vm8847_vm7, %v11862_v29 }
 0xd1b   :  { %5404 = vmatpush.msra.mxu2 %v10567_v53  ;;  %5472 = vmatpush.msra.mxu3 %v10502_v21  ;;  %v7046_v21 = vld [vmem:[%s11072_s3 + $0x128] sm:$0xff]  ;;  %v7055_v53 = vld [vmem:[%s11072_s3 + $0xb8] sm:$0xff] }
 0xd1c   :  { %5201 = vmatmul.f32.gmra.mxu2 %v11868_v39 }
 0xd1d   :  { %5407 = vmatpush.msra.mxu2 %v10576_v8  ;;  %5474 = vmatpush.msra.mxu3 %v10514_v59  ;;  %v7047_v59 = vld [vmem:[%s11072_s3 + $0xe0] sm:$0xff]  ;;  %v11876_v8 = vld [vmem:[#allocation180_spill] sm:$0xff] }
 0xd1e   :  { %6951 = vmatmul.msk.f32.gmra.mxu0 %vm8876_vm8, %v11862_v29 }
 0xd1f   :  { %5410 = vmatpush.msra.mxu2 %v10583_v30  ;;  %5476 = vmatpush.msra.mxu3 %v10524_v54 }
 0xd20   :  { %6943 = vmatmul.msk.f32.gmra.mxu1 %vm8876_vm8, %v11862_v29 }
 0xd21   :  { %5413 = vmatpush.msra.mxu2 %v10590_v18  ;;  %5478 = vmatpush.msra.mxu3 %v10534_v41  ;;  %v7050_v41 = vld [vmem:[%s11072_s3 + $0x118] sm:$0xff]  ;;  %v11878_v18 = vld [vmem:[#allocation155_spill] sm:$0xff] }
 0xd22   :  { %6935 = vmatmul.msk.f32.gmra.mxu3 %vm8876_vm8, %v11862_v29 }
 0xd23   :  { %5806 = vmatpush.msrb.mxu2 %v7041_v20  ;;  %5480 = vmatpush.msra.mxu3 %v10544_v6  ;;  %v7052_v6 = vld [vmem:[%s11072_s3 + $0x110] sm:$0xff] }
 0xd24   :  { %5209 = vmatmul.f32.gmra.mxu2 %v11870_v43 }
 0xd25   :  { %5482 = vmatpush.msra.mxu3 %v10554_v63  ;;  %5807 = vmatpush.msrb.mxu2 %v7042_v27  ;;  %v11874_v63 = vld [vmem:[#allocation178_spill] sm:$0xff] }
 0xd26   :  { %6952 = vmatmul.msk.f32.gmra.mxu0 %vm8910_vm9, %v11862_v29 }
 0xd27   :  { %5484 = vmatpush.msra.mxu3 %v10563_v32  ;;  %5808 = vmatpush.msrb.mxu2 %v7043_v34 }
 0xd28   :  { %6944 = vmatmul.msk.f32.gmra.mxu1 %vm8910_vm9, %v11862_v29 }
 0xd29   :  { %5486 = vmatpush.msra.mxu3 %v10572_v47  ;;  %5809 = vmatpush.msrb.mxu2 %v7044_v14  ;;  %v7056_v47 = vld [vmem:[%s11072_s3 + $0xb0] sm:$0xff] }
 0xd2a   :  { %6936 = vmatmul.msk.f32.gmra.mxu3 %vm8910_vm9, %v11862_v29 }
 0xd2b   :  { %5810 = vmatpush.msrb.mxu2 %v7045_v23  ;;  %5887 = vmatpush.msrb.mxu3 %v7046_v21 }
 0xd2c   :  { %5217 = vmatmul.f32.gmra.mxu2 %v11872_v4 }
 0xd2d   :  { %5811 = vmatpush.msrb.mxu2 %v7047_v59  ;;  %5888 = vmatpush.msrb.mxu3 %v7048_v55 }
 0xd2e   :  { %6953 = vmatmul.msk.f32.gmra.mxu0 %vm8946_vm10, %v11862_v29 }
 0xd2f   :  { %5812 = vmatpush.msrb.mxu2 %v7049_v0  ;;  %5889 = vmatpush.msrb.mxu3 %v7050_v41 }
 0xd30   :  { %6945 = vmatmul.msk.f32.gmra.mxu1 %vm8946_vm10, %v11862_v29 }
 0xd31   :  { %5813 = vmatpush.msrb.mxu2 %v7051_v25  ;;  %5890 = vmatpush.msrb.mxu3 %v7052_v6 }
 0xd32   :  { %6937 = vmatmul.msk.f32.gmra.mxu3 %vm8946_vm10, %v11862_v29 }
 0xd33   :  { %5814 = vmatpush.msrb.mxu2 %v7053_v56 }
 0xd34   :  { %5225 = vmatmul.f32.gmra.mxu2 %v11874_v63 }
 0xd35   :  { %5815 = vmatpush.msrb.mxu2 %v7054_v35 }
 0xd36   :  { %6954 = vmatmul.msk.f32.gmra.mxu0 %vm8982_vm11, %v11862_v29 }
 0xd37   :  { %5816 = vmatpush.msrb.mxu2 %v7055_v53 }
 0xd38   :  { %6946 = vmatmul.msk.f32.gmra.mxu1 %vm8982_vm11, %v11862_v29 }
 0xd39   :  { %5817 = vmatpush.msrb.mxu2 %v7056_v47 }
 0xd3a   :  { %6938 = vmatmul.msk.f32.gmra.mxu3 %vm8982_vm11, %v11862_v29 }
 0xd3c   :  { %5233 = vmatmul.f32.gmra.mxu2 %v11876_v8 }
 0xd3e   :  { %6955 = vmatmul.msk.f32.gmra.mxu0 %vm9017_vm12, %v11862_v29 }
 0xd40   :  { %6947 = vmatmul.msk.f32.gmra.mxu1 %vm9017_vm12, %v11862_v29 }
 0xd42   :  { %6939 = vmatmul.msk.f32.gmra.mxu3 %vm9017_vm12, %v11862_v29  ;;  %v11890_v29 = vld [vmem:[#allocation173_spill] sm:$0xff] }
 0xd44   :  { %5416 = vmatmul.f32.vlgmr.msra.gmra.mxu2 %v11878_v18 }
 0xd4a   :  { %5490 = vmatmul.f32.vlgmr.msra.gmra.mxu3 %v11879_v12 }
 0xd4c   :  { %5421 = vmatmul.f32.gmra.mxu2 %v11880_v9 }
 0xd52   :  { %5496 = vmatmul.f32.gmra.mxu3 %v11881_v44 }
 0xd54   :  { %5426 = vmatmul.f32.gmra.mxu2 %v11882_v31 }
 0xd5a   :  { %5502 = vmatmul.f32.gmra.mxu3 %v11883_v33  ;;  %v4279_v33 = vpop.permute.xlu0 %4278 }
 0xd5c   :  { %5431 = vmatmul.f32.gmra.mxu2 %v11884_v60 }
 0xd62   :  { %5508 = vmatmul.f32.gmra.mxu3 %v11885_v1  ;;  %v4363_v1 = vadd.f32 %v10098_v3, %v4279_v33 }
 0xd64   :  { %5436 = vmatmul.f32.gmra.mxu2 %v11886_v48 }
 0xd6a   :  { %5514 = vmatmul.f32.gmra.mxu3 %v11887_v11  ;;  %v4437_v11 = vadd.f32 %v10120_v17, %v4363_v1  ;;  %v11895_v1 = vld [vmem:[#allocation58_spill] sm:$0xff] }
 0xd6c   :  { %5441 = vmatmul.f32.gmra.mxu2 %v11888_v22 }
 0xd72   :  { %5520 = vmatmul.f32.gmra.mxu3 %v11889_v7 }
 0xd74   :  { %5446 = vmatmul.f32.gmra.mxu2 %v11890_v29  ;;  %v4491_v29 = vadd.f32 %v10196_v42, %v4437_v11  ;;  %v11896_v11 = vld [vmem:[#allocation55_spill] sm:$0xff] }
 0xd7a   :  { %5526 = vmatmul.f32.gmra.mxu3 %v11891_v52 }
 0xd7c   :  { %5451 = vmatmul.f32.gmra.mxu2 %v11892_v10 }
 0xd82   :  { %5532 = vmatmul.f32.gmra.mxu3 %v11893_v24 }
 0xd83   :  { %v5667_v54 = vpop.f32.mrf.mxu0 }
 0xd85   :  { %v5602_v55 = vpop.f32.mrf.mxu1 }
 0xd87   :  { %v5178_v61 = vpop.f32.mrf.mxu2 }
 0xd8b   :  { %v5671_v56 = vpop.f32.mrf.mxu0 }
 0xd8d   :  { %v5335_v51 = vpop.f32.mrf.mxu3  ;;  %v5606_v25 = vpop.f32.mrf.mxu1 }
 0xd8e   :  { %v5336_v6 = vadd.f32 %v5335_v51, %v5178_v61  ;;  %v4281_v61 = vpop.permute.xlu1 %4280  ;;  %v4552_v51 = vadd.f32 %v10208_v26, %v4491_v29 }
 0xd8f   :  { %v5186_v62 = vpop.f32.mrf.mxu2  ;;  %v4371_v3 = vadd.f32 %v10118_v15, %v4281_v61 }
 0xd93   :  { %v5675_v44 = vpop.f32.mrf.mxu0 }
 0xd95   :  { %v5339_v39 = vpop.f32.mrf.mxu3  ;;  %v5610_v18 = vpop.f32.mrf.mxu1 }
 0xd96   :  { %v5340_v8 = vadd.f32 %v5339_v39, %v5186_v62 }
 0xd97   :  { %v5194_v50 = vpop.f32.mrf.mxu2 }
 0xd9d   :  { %v5343_v20 = vpop.f32.mrf.mxu3  ;;  %v5614_v24 = vpop.f32.mrf.mxu1 }
 0xd9e   :  { %v5344_v22 = vadd.f32 %v5343_v20, %v5194_v50  ;;  %v4441_v50 = vadd.f32 %v10140_v2, %v4371_v3 }
 0xd9f   :  { %v5202_v43 = vpop.f32.mrf.mxu2 }
 0xda5   :  { %v5347_v27 = vpop.f32.mrf.mxu3 }
 0xda6   :  { %v5348_v20 = vadd.f32 %v5347_v27, %v5202_v43 }
 0xda7   :  { %v10784_v49 = vpop.f32.mrf.mxu2 }
 0xdad   :  { %v10786_v34 = vpop.f32.mrf.mxu3 }
 0xdaf   :  { %v10788_v14 = vpop.f32.mrf.mxu2 }
 0xdb5   :  { %v10790_v23 = vpop.f32.mrf.mxu3 }
 0xdb7   :  { %v10792_v21 = vpop.f32.mrf.mxu2 }
 0xdbd   :  { %v10794_v4 = vpop.f32.mrf.mxu3 }
 0xdbf   :  { %v10796_v59 = vpop.f32.mrf.mxu2 }
 0xdc5   :  { %v10798_v0 = vpop.f32.mrf.mxu3 }
 0xdc7   :  { %v5417_v41 = vpop.f32.mrf.mxu2 }
 0xdc8   :  { %v5418_v63 = vadd.f32 %v5417_v41, %v5336_v6 }
 0xdcd   :  { %v5491_v35 = vpop.f32.mrf.mxu3 }
 0xdce   :  { %v5492_v32 = vadd.f32 %v5491_v35, %v5418_v63  ;;  %v5618_v35 = vpop.f32.mrf.mxu1 }
 0xdcf   :  { %v5422_v53 = vpop.f32.mrf.mxu2 }
 0xdd0   :  { %v5603_v47 = vadd.f32 %v5602_v55, %v5492_v32  ;;  %v5423_v12 = vadd.f32 %v5422_v53, %v5340_v8  ;;  %v5679_v55 = vpop.f32.mrf.mxu0  ;;  %v5352_v53 = vadd.f32 %v10786_v34, %v10784_v49  ;;  %v11894_v34 = vld [vmem:[#allocation54_spill] sm:$0xff] }
 0xdd2   :  { %v5668_v30 = vadd.f32 %v5667_v54, %v5603_v47  ;;  %v4614_v54 = vadd.f32 %v10297_v45, %v4552_v51  ;;  %v11900_v51 = vld [vmem:[#allocation76_spill] sm:$0xff] }
 0xdd4   :  { %5706 = vrot.lane.b32.xlu2 %v5668_v30, %s7062_s8  ;;  %v4664_v42 = vadd.f32 %v10392_v16, %v4614_v54  ;;  %v11901_v54 = vld [vmem:[#allocation68_spill] sm:$0xff] }
 0xdd5   :  { %v5497_v9 = vpop.f32.mrf.mxu3 }
 0xdd6   :  { %v5498_v31 = vadd.f32 %v5497_v9, %v5423_v12  ;;  %v5622_v49 = vpop.f32.mrf.mxu1 }
 0xdd7   :  { %v5427_v60 = vpop.f32.mrf.mxu2 }
 0xdd8   :  { %v5607_v48 = vadd.f32 %v5606_v25, %v5498_v31  ;;  %v5428_v52 = vadd.f32 %v5427_v60, %v5344_v22  ;;  %v4496_v25 = vadd.f32 %v10206_v40, %v4441_v50  ;;  %v5683_v27 = vpop.f32.mrf.mxu0  ;;  %v5356_v31 = vadd.f32 %v10790_v23, %v10788_v14  ;;  %v11899_v23 = vld [vmem:[#allocation51_spill] sm:$0xff] }
 0xdda   :  { %v5672_v7 = vadd.f32 %v5671_v56, %v5607_v48  ;;  %v4283_v56 = vpop.permute.xlu2 %4282  ;;  %v4558_v15 = vadd.f32 %v10218_v36, %v4496_v25 }
 0xddb   :  { %v4379_v2 = vadd.f32 %v10138_v5, %v4283_v56  ;;  %v11903_v56 = vld [vmem:[#allocation64_spill] sm:$0xff] }
 0xddc   :  { %5708 = vrot.lane.b32.xlu2 %v5672_v7, %s7062_s8  ;;  %v4618_v16 = vadd.f32 %v10309_v19, %v4558_v15 }
 0xddd   :  { %v5503_v10 = vpop.f32.mrf.mxu3  ;;  %v4445_v40 = vadd.f32 %v10154_v38, %v4379_v2 }
 0xdde   :  { %v5504_v62 = vadd.f32 %v5503_v10, %v5428_v52  ;;  %v4668_v32 = vadd.f32 %v10397_v58, %v4618_v16  ;;  %v11897_v52 = vld [vmem:[#allocation57_spill] sm:$0xff]  ;;  %v11898_v10 = vld [vmem:[#allocation59_spill] sm:$0xff]  ;;  %v5626_v3 = vpop.f32.mrf.mxu1 }
 0xddf   :  { %v5432_v39 = vpop.f32.mrf.mxu2  ;;  %v4501_v8 = vadd.f32 %v10216_v46, %v4445_v40  ;;  %v11906_v16 = vld [vmem:[#allocation63_spill] sm:$0xff] }
 0xde0   :  { %v5611_v17 = vadd.f32 %v5610_v18, %v5504_v62  ;;  %v5433_v6 = vadd.f32 %v5432_v39, %v5348_v20  ;;  %v4285_v18 = vpop.permute.xlu0 %4284  ;;  %v5687_v60 = vpop.f32.mrf.mxu0  ;;  %v5360_v39 = vadd.f32 %v10794_v4, %v10792_v21 }
 0xde1   :  { %v4564_v19 = vadd.f32 %v10230_v57, %v4501_v8  ;;  %v4387_v38 = vadd.f32 %v10152_v13, %v4285_v18  ;;  %v4287_v13 = vpop.permute.xlu1 %4286 }
 0xde2   :  { %v5676_v41 = vadd.f32 %v5675_v44, %v5611_v17 }
 0xde3   :  { %v4622_v58 = vadd.f32 %v10322_v37, %v4564_v19  ;;  %v4449_v44 = vadd.f32 %v11894_v34, %v4387_v38 }
 0xde4   :  { %5710 = vrot.lane.b32.xlu1 %v5676_v41, %s7062_s8  ;;  %5742 = vrot.lane.b32.xlu2 %v4664_v42, %s7065_s6  ;;  %v11902_v41 = vld [vmem:[#allocation62_spill] sm:$0xff] }
 0xde5   :  { %v5509_v26 = vpop.f32.mrf.mxu3  ;;  %v4672_v46 = vadd.f32 %v10401_v28, %v4622_v58  ;;  %v4506_v57 = vadd.f32 %v11895_v1, %v4449_v44  ;;  %v4395_v28 = vadd.f32 %v11897_v52, %v4287_v13  ;;  %v11911_v44 = vld [vmem:[#allocation185_spill] sm:$0xff]  ;;  %v11912_v1 = vld [vmem:[#allocation184_spill] sm:$0xff] }
 0xde6   :  { %v5510_v63 = vadd.f32 %v5509_v26, %v5433_v6 }
 0xde7   :  { %v5437_v45 = vpop.f32.mrf.mxu2  ;;  %v4570_v22 = vadd.f32 %v11896_v11, %v4506_v57  ;;  %v4453_v61 = vadd.f32 %v11899_v23, %v4395_v28  ;;  %v11913_v11 = vld [vmem:[#allocation183_spill] sm:$0xff]  ;;  %v11914_v28 = vld [vmem:[#allocation181_spill] sm:$0xff] }
 0xde8   :  { %v5615_v43 = vadd.f32 %v5614_v24, %v5510_v63  ;;  %v5438_v36 = vadd.f32 %v5437_v45, %v5352_v53  ;;  %v5691_v20 = vpop.f32.mrf.mxu0  ;;  %v11904_v63 = vld [vmem:[#allocation69_spill] sm:$0xff]  ;;  %v11915_v23 = vld [vmem:[#allocation7_spill] sm:$0xff] }
 0xde9   :  { %v4626_v24 = vadd.f32 %v11898_v10, %v4570_v22  ;;  %v4511_v17 = vadd.f32 %v11901_v54, %v4453_v61  ;;  %v4289_v26 = vpop.permute.xlu1 %4288 }
 0xdea   :  { %v5680_v47 = vadd.f32 %v5679_v55, %v5615_v43  ;;  %v4403_v15 = vadd.f32 %v11903_v56, %v4289_v26  ;;  %v11918_v26 = vld [vmem:[#allocation182_spill] sm:$0xff] }
 0xdeb   :  { %v4676_v62 = vadd.f32 %v11900_v51, %v4626_v24  ;;  %v4576_v25 = vadd.f32 %v11902_v41, %v4511_v17 }
 0xdec   :  { %5712 = vrot.lane.b32.xlu0 %v5680_v47, %s7062_s8  ;;  %5744 = vrot.lane.b32.xlu1 %v4668_v32, %s7065_s6  ;;  %v11907_v32 = vld [vmem:[#allocation65_spill] sm:$0xff] }
 0xded   :  { %v5515_v5 = vpop.f32.mrf.mxu3  ;;  %v4630_v45 = vadd.f32 %v11904_v63, %v4576_v25 }
 0xdee   :  { %v5516_v30 = vadd.f32 %v5515_v5, %v5438_v36  ;;  %v5630_v36 = vpop.f32.mrf.mxu1  ;;  %v11908_v5 = vld [vmem:[#allocation72_spill] sm:$0xff] }
 0xdef   :  { %v5442_v12 = vpop.f32.mrf.mxu2  ;;  %v4680_v43 = vadd.f32 %v11906_v16, %v4630_v45 }
 0xdf0   :  { %v5619_v9 = vadd.f32 %v5618_v35, %v5516_v30  ;;  %v5443_v48 = vadd.f32 %v5442_v12, %v5356_v31  ;;  %v11905_v35 = vld [vmem:[#allocation61_spill] sm:$0xff]  ;;  %v5695_v18 = vpop.f32.mrf.mxu0  ;;  %v11909_v12 = vld [vmem:[#allocation66_spill] sm:$0xff] }
 0xdf1   :  { %v4457_v2 = vadd.f32 %v11905_v35, %v4403_v15 }
 0xdf2   :  { %v5684_v33 = vadd.f32 %v5683_v27, %v5619_v9  ;;  %v5364_v27 = vadd.f32 %v10798_v0, %v10796_v59  ;;  %v11910_v9 = vld [vmem:[#allocation73_spill] sm:$0xff]  ;;  %v5739_v0 = vpop.permute.xlu0 %5738 }
 0xdf3   :  { %v4516_v53 = vadd.f32 %v11907_v32, %v4457_v2 }
 0xdf4   :  { %5746 = vrot.lane.b32.xlu0 %v4672_v46, %s7065_s6  ;;  %5714 = vrot.lane.b32.xlu2 %v5684_v33, %s7062_s8 }
 0xdf5   :  { %v5521_v37 = vpop.f32.mrf.mxu3  ;;  %v4582_v19 = vadd.f32 %v11908_v5, %v4516_v53 }
 0xdf6   :  { %v5522_v7 = vadd.f32 %v5521_v37, %v5443_v48 }
 0xdf7   :  { %v5447_v29 = vpop.f32.mrf.mxu2  ;;  %v4634_v38 = vadd.f32 %v11909_v12, %v4582_v19 }
 0xdf8   :  { %v5623_v14 = vadd.f32 %v5622_v49, %v5522_v7  ;;  %v5448_v50 = vadd.f32 %v5447_v29, %v5360_v39 }
 0xdf9   :  { %v4684_v49 = vadd.f32 %v11910_v9, %v4634_v38 }
 0xdfa   :  { %v5688_v55 = vadd.f32 %v5687_v60, %v5623_v14  ;;  %v5741_v60 = vpop.permute.xlu0 %5740 }
 0xdfc   :  { %5716 = vrot.lane.b32.xlu1 %v5688_v55, %s7062_s8  ;;  %5748 = vrot.lane.b32.xlu2 %v4676_v62, %s7065_s6 }
 0xdfd   :  { %v5527_v42 = vpop.f32.mrf.mxu3 }
 0xdfe   :  { %v5528_v6 = vadd.f32 %v5527_v42, %v5448_v50 }
 0xdff   :  { %v5452_v4 = vpop.f32.mrf.mxu2 }
 0xe00   :  { %v5627_v21 = vadd.f32 %v5626_v3, %v5528_v6  ;;  %v5453_v47 = vadd.f32 %v5452_v4, %v5364_v27  ;;  %v11916_v3 = vld [vmem:[#allocation9_spill] sm:$0xff] }
 0xe02   :  { %v5692_v40 = vadd.f32 %v5691_v20, %v5627_v21  ;;  %v11917_v20 = vld [vmem:[#allocation10_spill] sm:$0xff] }
 0xe03   :  { %v7057_v21 = vld [vmem:[%s11075_s4 + $0x4] ss:$0 sm:$0xff] }
 0xe04   :  { %5718 = vrot.lane.b32.xlu0 %v5692_v40, %s7062_s8  ;;  %5750 = vrot.lane.b32.xlu1 %v4680_v43, %s7065_s6 }
 0xe05   :  { %v5533_v8 = vpop.f32.mrf.mxu3 }
 0xe06   :  { %v5534_v30 = vadd.f32 %v5533_v8, %v5453_v47 }
 0xe08   :  { %v5631_v58 = vadd.f32 %v5630_v36, %v5534_v30 }
 0xe0a   :  { %v5696_v59 = vadd.f32 %v5695_v18, %v5631_v58 }
 0xe0c   :  { %5752 = vrot.lane.b32.xlu0 %v4684_v49, %s7065_s6  ;;  %5720 = vrot.lane.b32.xlu2 %v5696_v59, %s7062_s8 }
 0xe2e   :  { %v5707_v34 = vpop.permute.xlu2 %5706 }
 0xe2f   :  { %v5762_v46 = vsel %vm1878_vm4, %v11911_v44, %v5707_v34  ;;  %v5935_v34 = vld [vmem:[%s11072_s3 + $0x208] sm:$0xff] }
 0xe30   :  { %v5770_v31 = vsel %vm116_vm1, %v5762_v46, %v5739_v0  ;;  %5974 = vmatpush.msra.mxu1 %v5935_v34  ;;  %v5934_v46 = vld [vmem:[%s11072_s3 + $0x200] sm:$0xff] }
 0xe31   :  { %6956 = vmatmul.msk.f32.vlgmr.msrb.gmra.mxu2 %vm2821_vm13, %v5770_v31  ;;  %v5933_v31 = vld [vmem:[%s11072_s3 + $0x1f8] sm:$0xff] }
 0xe32   :  { %5975 = vmatpush.msra.mxu1 %v5934_v46 }
 0xe34   :  { %5976 = vmatpush.msra.mxu1 %v5933_v31  ;;  %v6093_v31 = vld [vmem:[%s11072_s3 + $0x248] sm:$0xff] }
 0xe36   :  { %v5709_v33 = vpop.permute.xlu2 %5708 }
 0xe37   :  { %v5763_v57 = vsel %vm1878_vm4, %v11912_v1, %v5709_v33  ;;  %v5932_v33 = vld [vmem:[%s11072_s3 + $0x1f0] sm:$0xff] }
 0xe38   :  { %v5771_v48 = vsel %vm116_vm1, %v5763_v57, %v5741_v60  ;;  %5977 = vmatpush.msra.mxu1 %v5932_v33  ;;  %v7058_v57 = vld [vmem:[%s11075_s4 + $0x5] ss:$0 sm:$0xff]  ;;  %v6132_v33 = vand.u32 4294901760, %v6093_v31 }
 0xe39   :  { %6957 = vmatmul.msk.f32.gmra.mxu2 %vm2821_vm13, %v5771_v48 }
 0xe3a   :  { %6133 = vmatpush.msra.mxu2 %v6132_v33 }
 0xe3e   :  { %v5743_v37 = vpop.permute.xlu2 %5742 }
 0xe4e   :  { %v5715_v14 = vpop.permute.xlu2 %5714 }
 0xe4f   :  { %v5766_v61 = vsel %vm1878_vm4, %v11915_v23, %v5715_v14 }
 0xe56   :  { %v5711_v13 = vpop.permute.xlu1 %5710  ;;  %v5749_v55 = vpop.permute.xlu2 %5748 }
 0xe57   :  { %v5764_v22 = vsel %vm1878_vm4, %v11913_v11, %v5711_v13 }
 0xe58   :  { %v5772_v7 = vsel %vm116_vm1, %v5764_v22, %v5743_v37 }
 0xe59   :  { %6958 = vmatmul.msk.f32.gmra.mxu2 %vm2821_vm13, %v5772_v7 }
 0xe5e   :  { %v5745_v29 = vpop.permute.xlu1 %5744  ;;  %v5713_v52 = vpop.permute.xlu0 %5712 }
 0xe5f   :  { %v5765_v10 = vsel %vm1878_vm4, %v11914_v28, %v5713_v52 }
 0xe60   :  { %v5773_v24 = vsel %vm116_vm1, %v5765_v10, %v5745_v29 }
 0xe61   :  { %6959 = vmatmul.msk.f32.gmra.mxu2 %vm2821_vm13, %v5773_v24 }
 0xe66   :  { %v5747_v51 = vpop.permute.xlu0 %5746  ;;  %v5721_v6 = vpop.permute.xlu2 %5720 }
 0xe67   :  { %v5774_v62 = vsel %vm116_vm1, %v5766_v61, %v5747_v51  ;;  %v5769_v56 = vsel %vm1878_vm4, %v11918_v26, %v5721_v6 }
 0xe69   :  { %6960 = vmatmul.msk.f32.gmra.mxu2 %vm2821_vm13, %v5774_v62 }
 0xe6e   :  { %v5717_v39 = vpop.permute.xlu1 %5716 }
 0xe6f   :  { %v5767_v54 = vsel %vm1878_vm4, %v11916_v3, %v5717_v39 }
 0xe70   :  { %v5775_v17 = vsel %vm116_vm1, %v5767_v54, %v5749_v55 }
 0xe71   :  { %6961 = vmatmul.msk.f32.gmra.mxu2 %vm2821_vm13, %v5775_v17 }
 0xe76   :  { %v5751_v50 = vpop.permute.xlu1 %5750  ;;  %v5719_v42 = vpop.permute.xlu0 %5718 }
 0xe77   :  { %v5768_v41 = vsel %vm1878_vm4, %v11917_v20, %v5719_v42 }
 0xe78   :  { %v5776_v25 = vsel %vm116_vm1, %v5768_v41, %v5751_v50 }
 0xe79   :  { %6962 = vmatmul.msk.f32.gmra.mxu2 %vm2821_vm13, %v5776_v25 }
 0xe7e   :  { %v5753_v15 = vpop.permute.xlu0 %5752 }
 0xe7f   :  { %v5777_v63 = vsel %vm116_vm1, %v5769_v56, %v5753_v15 }
 0xe81   :  { %6963 = vmatmul.msk.f32.gmra.mxu2 %vm2821_vm13, %v5777_v63 }
 0xeb4   :  { %v5819_v45 = vpop.f32.mrf.mxu2 }
 0xeb5   :  { %v5820_v4 = vadd.f32 %v7057_v21, %v5819_v45 }
 0xeb7   :  { %v5843_v35 = vmax.f32 %v5820_v4, 0.0  ;;  %v6012_v4 = vld [vmem:[%s11072_s3 + $0x218] sm:$0xff] }
 0xeb9   :  { %6964 = vmatmul.msk.f32.vlgmr.msrb.gmra.mxu3 %vm1878_vm4, %v5843_v35 }
 0xebc   :  { %v5822_v2 = vpop.f32.mrf.mxu2 }
 0xebd   :  { %v5823_v16 = vadd.f32 %v7057_v21, %v5822_v2 }
 0xebf   :  { %v5844_v43 = vmax.f32 %v5823_v16, 0.0 }
 0xec1   :  { %6965 = vmatmul.msk.f32.gmra.mxu3 %vm1878_vm4, %v5844_v43 }
 0xedc   :  { %v5825_v27 = vpop.f32.mrf.mxu2 }
 0xedd   :  { %v5826_v40 = vadd.f32 %v7057_v21, %v5825_v27 }
 0xedf   :  { %v5845_v32 = vmax.f32 %v5826_v40, 0.0 }
 0xee1   :  { %6966 = vmatmul.msk.f32.gmra.mxu3 %vm1878_vm4, %v5845_v32 }
 0xee4   :  { %v5828_v53 = vpop.f32.mrf.mxu2 }
 0xee5   :  { %v5829_v47 = vadd.f32 %v7057_v21, %v5828_v53 }
 0xee7   :  { %v5846_v8 = vmax.f32 %v5829_v47, 0.0 }
 0xee9   :  { %6967 = vmatmul.msk.f32.gmra.mxu3 %vm1878_vm4, %v5846_v8 }
 0xeec   :  { %v5831_v36 = vpop.f32.mrf.mxu2 }
 0xeed   :  { %v5832_v5 = vadd.f32 %v7057_v21, %v5831_v36 }
 0xeef   :  { %v5847_v19 = vmax.f32 %v5832_v5, 0.0 }
 0xef1   :  { %6968 = vmatmul.msk.f32.gmra.mxu3 %vm1878_vm4, %v5847_v19 }
 0xef4   :  { %v5834_v30 = vpop.f32.mrf.mxu2 }
 0xef5   :  { %v5835_v18 = vadd.f32 %v7057_v21, %v5834_v30 }
 0xef7   :  { %v5848_v12 = vmax.f32 %v5835_v18, 0.0 }
 0xef9   :  { %6969 = vmatmul.msk.f32.gmra.mxu3 %vm1878_vm4, %v5848_v12 }
 0xefc   :  { %v5837_v38 = vpop.f32.mrf.mxu2 }
 0xefd   :  { %v5838_v58 = vadd.f32 %v7057_v21, %v5837_v38 }
 0xeff   :  { %v5849_v9 = vmax.f32 %v5838_v58, 0.0 }
 0xf01   :  { %6970 = vmatmul.msk.f32.gmra.mxu3 %vm1878_vm4, %v5849_v9 }
 0xf04   :  { %v5840_v49 = vpop.f32.mrf.mxu2 }
 0xf05   :  { %v5841_v59 = vadd.f32 %v7057_v21, %v5840_v49 }
 0xf07   :  { %v5850_v0 = vmax.f32 %v5841_v59, 0.0 }
 0xf09   :  { %6971 = vmatmul.msk.f32.gmra.mxu3 %vm1878_vm4, %v5850_v0 }
 0xf3c   :  { %v5892_v60 = vpop.f32.mrf.mxu3 }
 0xf3d   :  { %v5893_v48 = vadd.f32 %v7058_v57, %v5892_v60  ;;  %v6092_v60 = vld [vmem:[%s11072_s3 + $0x240] sm:$0xff] }
 0xf3f   :  { %v5916_v13 = vmax.f32 %v5893_v48, 0.0  ;;  %v6134_v48 = vand.u32 4294901760, %v6092_v60 }
 0xf41   :  { %v5924_v37 = vadd.f32 %v5916_v13, %v11911_v44  ;;  %v6091_v13 = vld [vmem:[%s11072_s3 + $0x238] sm:$0xff]  ;;  %6135 = vmatpush.msra.mxu2 %v6134_v48 }
 0xf43   :  { %6972 = vmatmul.msk.f32.vlgmr.msra.gmra.mxu1 %vm1878_vm4, %v5924_v37 }
 0xf44   :  { %v5895_v22 = vpop.f32.mrf.mxu3 }
 0xf45   :  { %v5896_v7 = vadd.f32 %v7058_v57, %v5895_v22  ;;  %v6224_v22 = vsub.f32 %v6092_v60, %v6134_v48 }
 0xf47   :  { %v5917_v29 = vmax.f32 %v5896_v7, 0.0  ;;  %v6136_v7 = vand.u32 4294901760, %v6091_v13 }
 0xf49   :  { %v5925_v52 = vadd.f32 %v5917_v29, %v11912_v1  ;;  %v6014_v1 = vld [vmem:[%s11072_s3 + $0x228] sm:$0xff]  ;;  %v6090_v29 = vld [vmem:[%s11072_s3 + $0x230] sm:$0xff]  ;;  %6137 = vmatpush.msra.mxu2 %v6136_v7 }
 0xf4a   :  { %6053 = vmatpush.msra.mxu0 %v6014_v1 }
 0xf4b   :  { %6973 = vmatmul.msk.f32.gmra.mxu1 %vm1878_vm4, %v5925_v52 }
 0xf64   :  { %v5898_v10 = vpop.f32.mrf.mxu3 }
 0xf65   :  { %v5899_v24 = vadd.f32 %v7058_v57, %v5898_v10  ;;  %v6225_v10 = vand.u32 4294901760, %v6224_v22 }
 0xf67   :  { %v5918_v14 = vmax.f32 %v5899_v24, 0.0  ;;  %v6230_v24 = vsub.f32 %v6091_v13, %v6136_v7 }
 0xf69   :  { %v5926_v61 = vadd.f32 %v5918_v14, %v11913_v11  ;;  %v6138_v14 = vand.u32 4294901760, %v6090_v29 }
 0xf6b   :  { %6974 = vmatmul.msk.f32.gmra.mxu1 %vm1878_vm4, %v5926_v61  ;;  %6139 = vmatpush.msra.mxu2 %v6138_v14 }
 0xf6c   :  { %v5901_v51 = vpop.f32.mrf.mxu3 }
 0xf6d   :  { %v5902_v62 = vadd.f32 %v7058_v57, %v5901_v51  ;;  %v6226_v51 = vsub.f32 %v6224_v22, %v6225_v10 }
 0xf6f   :  { %v5919_v39 = vmax.f32 %v5902_v62, 0.0  ;;  %v6231_v62 = vand.u32 4294901760, %v6230_v24 }
 0xf71   :  { %v5927_v44 = vadd.f32 %v5919_v39, %v11914_v28  ;;  %v6236_v39 = vsub.f32 %v6090_v29, %v6138_v14  ;;  %v6232_v1 = vsub.f32 %v6230_v24, %v6231_v62 }
 0xf73   :  { %6975 = vmatmul.msk.f32.gmra.mxu1 %vm1878_vm4, %v5927_v44  ;;  %v6227_v44 = vand.u32 4294901760, %v6226_v51 }
 0xf74   :  { %v5904_v55 = vpop.f32.mrf.mxu3 }
 0xf75   :  { %v5905_v54 = vadd.f32 %v7058_v57, %v5904_v55  ;;  %v6237_v55 = vand.u32 4294901760, %v6236_v39 }
 0xf77   :  { %v5920_v17 = vmax.f32 %v5905_v54, 0.0  ;;  %v6233_v54 = vand.u32 4294901760, %v6232_v1 }
 0xf79   :  { %v5928_v50 = vadd.f32 %v5920_v17, %v11915_v23  ;;  %v6238_v17 = vsub.f32 %v6236_v39, %v6237_v55 }
 0xf7b   :  { %6976 = vmatmul.msk.f32.gmra.mxu1 %vm1878_vm4, %v5928_v50  ;;  %v6239_v50 = vand.u32 4294901760, %v6238_v17 }
 0xf7c   :  { %v5907_v11 = vpop.f32.mrf.mxu3 }
 0xf7d   :  { %v5908_v42 = vadd.f32 %v7058_v57, %v5907_v11  ;;  %v10970_v11 = vld [vmem:[%s11075_s4 + $0xb] ss:$0 sm:$0xff] }
 0xf7f   :  { %v5921_v41 = vmax.f32 %v5908_v42, 0.0 }
 0xf81   :  { %v5929_v25 = vadd.f32 %v5921_v41, %v11916_v3  ;;  %v6013_v3 = vld [vmem:[%s11072_s3 + $0x220] sm:$0xff] }
 0xf82   :  { %6054 = vmatpush.msra.mxu0 %v6013_v3 }
 0xf83   :  { %6977 = vmatmul.msk.f32.gmra.mxu1 %vm1878_vm4, %v5929_v25 }
 0xf84   :  { %v5910_v28 = vpop.f32.mrf.mxu3  ;;  %6055 = vmatpush.msra.mxu0 %v6012_v4 }
 0xf85   :  { %v5911_v6 = vadd.f32 %v7058_v57, %v5910_v28 }
 0xf87   :  { %v5922_v56 = vmax.f32 %v5911_v6, 0.0 }
 0xf89   :  { %v5930_v15 = vadd.f32 %v5922_v56, %v11917_v20  ;;  %v6011_v20 = vld [vmem:[%s11072_s3 + $0x210] sm:$0xff] }
 0xf8a   :  { %6056 = vmatpush.msra.mxu0 %v6011_v20 }
 0xf8b   :  { %6978 = vmatmul.msk.f32.gmra.mxu1 %vm1878_vm4, %v5930_v15 }
 0xf8c   :  { %v5913_v63 = vpop.f32.mrf.mxu3  ;;  %6352 = vmatpush.msrb.mxu0 %v6132_v33 }
 0xf8d   :  { %v5914_v45 = vadd.f32 %v7058_v57, %v5913_v63  ;;  %v6218_v57 = vsub.f32 %v6093_v31, %v6132_v33 }
 0xf8e   :  { %6354 = vmatpush.msrb.mxu0 %v6134_v48 }
 0xf8f   :  { %v5923_v21 = vmax.f32 %v5914_v45, 0.0  ;;  %v6219_v37 = vand.u32 4294901760, %v6218_v57  ;;  %6288 = vmatpush.msrb.mxu1 %v6218_v57 }
 0xf90   :  { %6356 = vmatpush.msrb.mxu0 %v6136_v7 }
 0xf91   :  { %v5931_v23 = vadd.f32 %v5923_v21, %v11918_v26  ;;  %v7014_v26 = vld [vmem:[%s11075_s4 + $0xa] ss:$0 sm:$0xff]  ;;  %v6220_v52 = vsub.f32 %v6218_v57, %v6219_v37  ;;  %6291 = vmatpush.msrb.mxu1 %v6224_v22  ;;  %6423 = vmatpush.msrb.mxu2 %v6219_v37 }
 0xf92   :  { %6358 = vmatpush.msrb.mxu0 %v6138_v14 }
 0xf93   :  { %6979 = vmatmul.msk.f32.gmra.mxu1 %vm1878_vm4, %v5931_v23  ;;  %v6221_v61 = vand.u32 4294901760, %v6220_v52  ;;  %6427 = vmatpush.msrb.mxu2 %v6225_v10 }
 0xf94   :  { %6294 = vmatpush.msrb.mxu1 %v6230_v24 }
 0xf95   :  { %6222 = vmatpush.msra.mxu3 %v6221_v61  ;;  %6431 = vmatpush.msrb.mxu2 %v6231_v62 }
 0xf96   :  { %6297 = vmatpush.msrb.mxu1 %v6236_v39 }
 0xf97   :  { %6228 = vmatpush.msra.mxu3 %v6227_v44  ;;  %6435 = vmatpush.msrb.mxu2 %v6237_v55 }
 0xf99   :  { %6234 = vmatpush.msra.mxu3 %v6233_v54 }
 0xf9b   :  { %6240 = vmatpush.msra.mxu3 %v6239_v50 }
 0xf9d   :  { %6482 = vmatpush.msrb.mxu3 %v6132_v33 }
 0xf9f   :  { %6484 = vmatpush.msrb.mxu3 %v6134_v48 }
 0xfa1   :  { %6486 = vmatpush.msrb.mxu3 %v6136_v7 }
 0xfa3   :  { %6488 = vmatpush.msrb.mxu3 %v6138_v14 }
 0xfc0   :  { %v5979_v35 = vpop.f32.mrf.mxu1 }
 0xfc1   :  { %v5980_v2 = vadd.f32 %v7014_v26, %v5979_v35 }
 0xfc3   :  { %v6003_v16 = vmax.f32 %v5980_v2, 0.0 }
 0xfc5   :  { %6980 = vmatmul.msk.f32.vlgmr.msra.gmra.mxu0 %vm1878_vm4, %v6003_v16 }
 0xfc8   :  { %v5982_v43 = vpop.f32.mrf.mxu1 }
 0xfc9   :  { %v5983_v27 = vadd.f32 %v7014_v26, %v5982_v43 }
 0xfcb   :  { %v6004_v40 = vmax.f32 %v5983_v27, 0.0 }
 0xfcd   :  { %6981 = vmatmul.msk.f32.gmra.mxu0 %vm1878_vm4, %v6004_v40 }
 0xfe8   :  { %v5985_v32 = vpop.f32.mrf.mxu1 }
 0xfe9   :  { %v5986_v53 = vadd.f32 %v7014_v26, %v5985_v32 }
 0xfeb   :  { %v6005_v47 = vmax.f32 %v5986_v53, 0.0 }
 0xfed   :  { %6982 = vmatmul.msk.f32.gmra.mxu0 %vm1878_vm4, %v6005_v47 }
 0xff0   :  { %v5988_v8 = vpop.f32.mrf.mxu1 }
 0xff1   :  { %v5989_v36 = vadd.f32 %v7014_v26, %v5988_v8 }
 0xff3   :  { %v6006_v5 = vmax.f32 %v5989_v36, 0.0 }
 0xff5   :  { %6983 = vmatmul.msk.f32.gmra.mxu0 %vm1878_vm4, %v6006_v5 }
 0xff8   :  { %v5991_v19 = vpop.f32.mrf.mxu1 }
 0xff9   :  { %v5992_v30 = vadd.f32 %v7014_v26, %v5991_v19 }
 0xffb   :  { %v6007_v18 = vmax.f32 %v5992_v30, 0.0 }
 0xffd   :  { %6984 = vmatmul.msk.f32.gmra.mxu0 %vm1878_vm4, %v6007_v18 }
0x1000   :  { %v5994_v12 = vpop.f32.mrf.mxu1 }
0x1001   :  { %v5995_v38 = vadd.f32 %v7014_v26, %v5994_v12 }
0x1003   :  { %v6008_v58 = vmax.f32 %v5995_v38, 0.0 }
0x1005   :  { %6985 = vmatmul.msk.f32.gmra.mxu0 %vm1878_vm4, %v6008_v58 }
0x1008   :  { %v5997_v9 = vpop.f32.mrf.mxu1 }
0x1009   :  { %v5998_v49 = vadd.f32 %v7014_v26, %v5997_v9 }
0x100b   :  { %v6009_v59 = vmax.f32 %v5998_v49, 0.0 }
0x100d   :  { %6986 = vmatmul.msk.f32.gmra.mxu0 %vm1878_vm4, %v6009_v59 }
0x1010   :  { %v6000_v0 = vpop.f32.mrf.mxu1 }
0x1011   :  { %v6001_v34 = vadd.f32 %v7014_v26, %v6000_v0 }
0x1013   :  { %v6010_v46 = vmax.f32 %v6001_v34, 0.0 }
0x1015   :  { %6987 = vmatmul.msk.f32.gmra.mxu0 %vm1878_vm4, %v6010_v46 }
0x1042   :  { %v6058_v42 = vpop.f32.mrf.mxu0 }
0x1043   :  { %v6059_v41 = vadd.f32 %v10970_v11, %v6058_v42 }
0x1045   :  { %v6082_v25 = vmax.f32 %v6059_v41, 0.0 }
0x1047   :  { %v6097_v28 = vsel %vm1878_vm4, %v6082_v25, 0 }
0x1048   :  { %v10974_v6 = vand.u32 4294901760, %v6097_v28 }
0x104a   :  { %v6141_v56 = vsub.f32 %v6097_v28, %v10974_v6  ;;  %v6061_v15 = vpop.f32.mrf.mxu0  ;;  %6242 = vmatmul.f32.vlgmr.msra.gmra.mxu3 %v10974_v6 }
0x104b   :  { %v6062_v63 = vadd.f32 %v10970_v11, %v6061_v15 }
0x104c   :  { %v6142_v45 = vand.u32 4294901760, %v6141_v56  ;;  %6300 = vmatmul.f32.vlgmr.msrb.gmra.mxu1 %v6141_v56 }
0x104d   :  { %v6083_v21 = vmax.f32 %v6062_v63, 0.0 }
0x104e   :  { %v6143_v23 = vsub.f32 %v6141_v56, %v6142_v45  ;;  %6362 = vmatmul.f32.vlgmr.msrb.gmra.mxu0 %v6142_v45 }
0x104f   :  { %v6100_v3 = vsel %vm1878_vm4, %v6083_v21, 0 }
0x1050   :  { %v6144_v4 = vand.u32 4294901760, %v6143_v23  ;;  %v10980_v20 = vand.u32 4294901760, %v6100_v3 }
0x1052   :  { %6145 = vmatmul.f32.vlgmr.msra.gmra.mxu2 %v6144_v4  ;;  %6246 = vmatmul.f32.gmra.mxu3 %v10980_v20  ;;  %v6149_v26 = vsub.f32 %v6100_v3, %v10980_v20 }
0x1054   :  { %6305 = vmatmul.f32.gmra.mxu1 %v6149_v26  ;;  %v6150_v35 = vand.u32 4294901760, %v6149_v26 }
0x1056   :  { %6368 = vmatmul.f32.gmra.mxu0 %v6150_v35  ;;  %v6151_v2 = vsub.f32 %v6149_v26, %v6150_v35 }
0x1058   :  { %v6152_v16 = vand.u32 4294901760, %v6151_v2 }
0x105a   :  { %6153 = vmatmul.f32.gmra.mxu2 %v6152_v16 }
0x106a   :  { %v6064_v43 = vpop.f32.mrf.mxu0 }
0x106b   :  { %v6065_v27 = vadd.f32 %v10970_v11, %v6064_v43 }
0x106d   :  { %v6084_v40 = vmax.f32 %v6065_v27, 0.0 }
0x106f   :  { %v6103_v32 = vsel %vm1878_vm4, %v6084_v40, 0 }
0x1070   :  { %v10986_v53 = vand.u32 4294901760, %v6103_v32 }
0x1072   :  { %v6067_v47 = vpop.f32.mrf.mxu0  ;;  %6250 = vmatmul.f32.gmra.mxu3 %v10986_v53  ;;  %v6157_v8 = vsub.f32 %v6103_v32, %v10986_v53 }
0x1073   :  { %v6068_v36 = vadd.f32 %v10970_v11, %v6067_v47 }
0x1074   :  { %6310 = vmatmul.f32.gmra.mxu1 %v6157_v8  ;;  %v6158_v5 = vand.u32 4294901760, %v6157_v8 }
0x1075   :  { %v6085_v19 = vmax.f32 %v6068_v36, 0.0 }
0x1076   :  { %6374 = vmatmul.f32.gmra.mxu0 %v6158_v5  ;;  %v6159_v30 = vsub.f32 %v6157_v8, %v6158_v5 }
0x1077   :  { %v6106_v18 = vsel %vm1878_vm4, %v6085_v19, 0 }
0x1078   :  { %v10992_v12 = vand.u32 4294901760, %v6106_v18  ;;  %v6160_v38 = vand.u32 4294901760, %v6159_v30 }
0x107a   :  { %v6070_v58 = vpop.f32.mrf.mxu0  ;;  %6161 = vmatmul.f32.gmra.mxu2 %v6160_v38  ;;  %6254 = vmatmul.f32.gmra.mxu3 %v10992_v12  ;;  %v6165_v9 = vsub.f32 %v6106_v18, %v10992_v12 }
0x107b   :  { %v6071_v49 = vadd.f32 %v10970_v11, %v6070_v58 }
0x107c   :  { %6315 = vmatmul.f32.gmra.mxu1 %v6165_v9  ;;  %v6166_v59 = vand.u32 4294901760, %v6165_v9 }
0x107d   :  { %v6086_v0 = vmax.f32 %v6071_v49, 0.0 }
0x107e   :  { %6380 = vmatmul.f32.gmra.mxu0 %v6166_v59  ;;  %v6167_v34 = vsub.f32 %v6165_v9, %v6166_v59 }
0x107f   :  { %v6109_v46 = vsel %vm1878_vm4, %v6086_v0, 0 }
0x1080   :  { %v6172_v31 = vand.u32 4294901760, %v6109_v46  ;;  %v6168_v33 = vand.u32 4294901760, %v6167_v34 }
0x1082   :  { %v6073_v60 = vpop.f32.mrf.mxu0  ;;  %6169 = vmatmul.f32.gmra.mxu2 %v6168_v33  ;;  %6258 = vmatmul.f32.gmra.mxu3 %v6172_v31  ;;  %v6173_v57 = vsub.f32 %v6109_v46, %v6172_v31 }
0x1083   :  { %v6074_v48 = vadd.f32 %v10970_v11, %v6073_v60 }
0x1084   :  { %6320 = vmatmul.f32.gmra.mxu1 %v6173_v57  ;;  %v6174_v13 = vand.u32 4294901760, %v6173_v57 }
0x1085   :  { %v6087_v37 = vmax.f32 %v6074_v48, 0.0 }
0x1086   :  { %6386 = vmatmul.f32.gmra.mxu0 %v6174_v13  ;;  %v6175_v22 = vsub.f32 %v6173_v57, %v6174_v13 }
0x1087   :  { %v6112_v7 = vsel %vm1878_vm4, %v6087_v37, 0 }
0x1088   :  { %v6180_v29 = vand.u32 4294901760, %v6112_v7  ;;  %v6176_v52 = vand.u32 4294901760, %v6175_v22 }
0x108a   :  { %v6076_v10 = vpop.f32.mrf.mxu0  ;;  %6177 = vmatmul.f32.gmra.mxu2 %v6176_v52  ;;  %6262 = vmatmul.f32.gmra.mxu3 %v6180_v29  ;;  %v6181_v24 = vsub.f32 %v6112_v7, %v6180_v29 }
0x108b   :  { %v6077_v14 = vadd.f32 %v10970_v11, %v6076_v10 }
0x108c   :  { %6325 = vmatmul.f32.gmra.mxu1 %v6181_v24  ;;  %v6182_v61 = vand.u32 4294901760, %v6181_v24 }
0x108d   :  { %v6088_v51 = vmax.f32 %v6077_v14, 0.0 }
0x108e   :  { %6392 = vmatmul.f32.gmra.mxu0 %v6182_v61  ;;  %v6183_v62 = vsub.f32 %v6181_v24, %v6182_v61 }
0x108f   :  { %v6115_v39 = vsel %vm1878_vm4, %v6088_v51, 0 }
0x1090   :  { %v6188_v44 = vand.u32 4294901760, %v6115_v39  ;;  %v6184_v1 = vand.u32 4294901760, %v6183_v62 }
0x1092   :  { %v6079_v55 = vpop.f32.mrf.mxu0  ;;  %6185 = vmatmul.f32.gmra.mxu2 %v6184_v1  ;;  %6266 = vmatmul.f32.gmra.mxu3 %v6188_v44  ;;  %v6189_v54 = vsub.f32 %v6115_v39, %v6188_v44 }
0x1093   :  { %v6080_v17 = vadd.f32 %v10970_v11, %v6079_v55 }
0x1094   :  { %6330 = vmatmul.f32.gmra.mxu1 %v6189_v54  ;;  %v6190_v50 = vand.u32 4294901760, %v6189_v54 }
0x1095   :  { %v6089_v42 = vmax.f32 %v6080_v17, 0.0 }
0x1096   :  { %6398 = vmatmul.f32.gmra.mxu0 %v6190_v50  ;;  %v6191_v41 = vsub.f32 %v6189_v54, %v6190_v50 }
0x1097   :  { %v6118_v25 = vsel %vm1878_vm4, %v6089_v42, 0 }
0x1098   :  { %v6196_v28 = vand.u32 4294901760, %v6118_v25  ;;  %v6192_v56 = vand.u32 4294901760, %v6191_v41 }
0x109a   :  { %6193 = vmatmul.f32.gmra.mxu2 %v6192_v56  ;;  %6270 = vmatmul.f32.gmra.mxu3 %v6196_v28  ;;  %v6197_v15 = vsub.f32 %v6118_v25, %v6196_v28 }
0x109c   :  { %6335 = vmatmul.f32.gmra.mxu1 %v6197_v15  ;;  %v6198_v63 = vand.u32 4294901760, %v6197_v15 }
0x109e   :  { %6404 = vmatmul.f32.gmra.mxu0 %v6198_v63  ;;  %v6199_v45 = vsub.f32 %v6197_v15, %v6198_v63 }
0x10a0   :  { %v6200_v21 = vand.u32 4294901760, %v6199_v45 }
0x10a2   :  { %6201 = vmatmul.f32.gmra.mxu2 %v6200_v21  ;;  %6490 = vmatmul.f32.vlgmr.msrb.gmra.mxu3 %v10974_v6 }
0x10aa   :  { %6437 = vmatmul.f32.vlgmr.msrb.gmra.mxu2 %v10974_v6  ;;  %6494 = vmatmul.f32.gmra.mxu3 %v10980_v20 }
0x10b2   :  { %6441 = vmatmul.f32.gmra.mxu2 %v10980_v20  ;;  %6498 = vmatmul.f32.gmra.mxu3 %v10986_v53 }
0x10ba   :  { %6445 = vmatmul.f32.gmra.mxu2 %v10986_v53  ;;  %6502 = vmatmul.f32.gmra.mxu3 %v10992_v12  ;;  %v11019_v53 = vld [vmem:[%s11075_s4 + $0xc] ss:$0 sm:$0xff] }
0x10c2   :  { %6449 = vmatmul.f32.gmra.mxu2 %v10992_v12  ;;  %6506 = vmatmul.f32.gmra.mxu3 %v6172_v31 }
0x10c9   :  { %v6301_v32 = vpop.f32.mrf.mxu1 }
0x10ca   :  { %6453 = vmatmul.f32.gmra.mxu2 %v6172_v31  ;;  %6510 = vmatmul.f32.gmra.mxu3 %v6180_v29 }
0x10cb   :  { %v6363_v36 = vpop.f32.mrf.mxu0 }
0x10cd   :  { %v6243_v11 = vpop.f32.mrf.mxu3 }
0x10d1   :  { %v6306_v19 = vpop.f32.mrf.mxu1 }
0x10d2   :  { %6457 = vmatmul.f32.gmra.mxu2 %v6180_v29  ;;  %6514 = vmatmul.f32.gmra.mxu3 %v6188_v44 }
0x10d3   :  { %v6369_v9 = vpop.f32.mrf.mxu0 }
0x10d5   :  { %v6146_v6 = vpop.f32.mrf.mxu2  ;;  %v6247_v23 = vpop.f32.mrf.mxu3 }
0x10d6   :  { %v6147_v5 = vadd.f32 %v11019_v53, %v6146_v6 }
0x10d8   :  { %v6244_v30 = vadd.f32 %v6243_v11, %v6147_v5 }
0x10da   :  { %6461 = vmatmul.f32.gmra.mxu2 %v6188_v44  ;;  %6518 = vmatmul.f32.gmra.mxu3 %v6196_v28  ;;  %v6302_v58 = vadd.f32 %v6301_v32, %v6244_v30 }
0x10dc   :  { %v6364_v0 = vadd.f32 %v6363_v36, %v6302_v58 }
0x10dd   :  { %v6154_v3 = vpop.f32.mrf.mxu2 }
0x10de   :  { %v6155_v38 = vadd.f32 %v11019_v53, %v6154_v3 }
0x10e0   :  { %v6248_v49 = vadd.f32 %v6247_v23, %v6155_v38 }
0x10e2   :  { %6465 = vmatmul.f32.gmra.mxu2 %v6196_v28  ;;  %v6307_v57 = vadd.f32 %v6306_v19, %v6248_v49 }
0x10e4   :  { %v6370_v37 = vadd.f32 %v6369_v9, %v6307_v57 }
0x10f1   :  { %v6311_v59 = vpop.f32.mrf.mxu1 }
0x10f3   :  { %v6375_v48 = vpop.f32.mrf.mxu0 }
0x10f5   :  { %v6251_v4 = vpop.f32.mrf.mxu3 }
0x10f9   :  { %v6316_v52 = vpop.f32.mrf.mxu1 }
0x10fb   :  { %v6381_v51 = vpop.f32.mrf.mxu0 }
0x10fd   :  { %v6162_v20 = vpop.f32.mrf.mxu2  ;;  %v6255_v26 = vpop.f32.mrf.mxu3 }
0x10fe   :  { %v6163_v33 = vadd.f32 %v11019_v53, %v6162_v20 }
0x1100   :  { %v6252_v13 = vadd.f32 %v6251_v4, %v6163_v33 }
0x1101   :  { %v6321_v41 = vpop.f32.mrf.mxu1 }
0x1102   :  { %v6312_v61 = vadd.f32 %v6311_v59, %v6252_v13 }
0x1103   :  { %v6387_v56 = vpop.f32.mrf.mxu0 }
0x1104   :  { %v6376_v39 = vadd.f32 %v6375_v48, %v6312_v61 }
0x1105   :  { %v6170_v35 = vpop.f32.mrf.mxu2  ;;  %v6259_v2 = vpop.f32.mrf.mxu3 }
0x1106   :  { %v6171_v24 = vadd.f32 %v11019_v53, %v6170_v35 }
0x1108   :  { %v6256_v62 = vadd.f32 %v6255_v26, %v6171_v24 }
0x1109   :  { %v6326_v3 = vpop.f32.mrf.mxu1 }
0x110a   :  { %v6317_v42 = vadd.f32 %v6316_v52, %v6256_v62 }
0x110c   :  { %v6382_v28 = vadd.f32 %v6381_v51, %v6317_v42 }
0x110d   :  { %v6178_v16 = vpop.f32.mrf.mxu2  ;;  %v11012_v43 = vpop.f32.mrf.mxu3 }
0x110e   :  { %v6179_v17 = vadd.f32 %v11019_v53, %v6178_v16 }
0x1110   :  { %v6260_v25 = vadd.f32 %v6259_v2, %v6179_v17  ;;  %v6393_v2 = vpop.f32.mrf.mxu0 }
0x1111   :  { %v6331_v30 = vpop.f32.mrf.mxu1 }
0x1112   :  { %v6322_v6 = vadd.f32 %v6321_v41, %v6260_v25 }
0x1114   :  { %v6388_v20 = vadd.f32 %v6387_v56, %v6322_v6 }
0x1115   :  { %v6186_v27 = vpop.f32.mrf.mxu2  ;;  %v11014_v40 = vpop.f32.mrf.mxu3 }
0x1116   :  { %v6187_v21 = vadd.f32 %v11019_v53, %v6186_v27 }
0x1118   :  { %v6264_v4 = vadd.f32 %v11012_v43, %v6187_v21  ;;  %v6399_v59 = vpop.f32.mrf.mxu0 }
0x1119   :  { %v6336_v33 = vpop.f32.mrf.mxu1 }
0x111a   :  { %v6327_v36 = vadd.f32 %v6326_v3, %v6264_v4 }
0x111c   :  { %v6394_v43 = vadd.f32 %v6393_v2, %v6327_v36 }
0x111d   :  { %v11021_v47 = vpop.f32.mrf.mxu2  ;;  %v11023_v8 = vpop.f32.mrf.mxu3 }
0x111e   :  { %v6195_v27 = vadd.f32 %v11019_v53, %v11021_v47 }
0x1120   :  { %v6268_v19 = vadd.f32 %v11014_v40, %v6195_v27 }
0x1122   :  { %v6332_v49 = vadd.f32 %v6331_v30, %v6268_v19 }
0x1124   :  { %v6400_v40 = vadd.f32 %v6399_v59, %v6332_v49 }
0x1125   :  { %v11026_v18 = vpop.f32.mrf.mxu2  ;;  %v6491_v12 = vpop.f32.mrf.mxu3 }
0x1126   :  { %v6203_v9 = vadd.f32 %v11019_v53, %v11026_v18  ;;  %v6405_v53 = vpop.f32.mrf.mxu0 }
0x112d   :  { %v6438_v34 = vpop.f32.mrf.mxu2  ;;  %v6495_v46 = vpop.f32.mrf.mxu3 }
0x112e   :  { %v6439_v31 = vadd.f32 %v6438_v34, %v6364_v0  ;;  %v6272_v0 = vadd.f32 %v11023_v8, %v6203_v9 }
0x1130   :  { %v6492_v60 = vadd.f32 %v6491_v12, %v6439_v31  ;;  %v6337_v48 = vadd.f32 %v6336_v33, %v6272_v0 }
0x1132   :  { %7017 = vtanh.f32 %v6492_v60  ;;  %v6406_v18 = vadd.f32 %v6405_v53, %v6337_v48 }
0x1135   :  { %v6442_v22 = vpop.f32.mrf.mxu2  ;;  %v6499_v7 = vpop.f32.mrf.mxu3 }
0x1136   :  { %v6443_v29 = vadd.f32 %v6442_v22, %v6370_v37 }
0x1138   :  { %v7018_v10 = vpop.eup %7017  ;;  %v6496_v14 = vadd.f32 %v6495_v46, %v6443_v29 }
0x1139   :  { %6530 = vst.msk [vmem:[%s11077_s5] sm:$0xff] %vm1878_vm4, %v7018_v10 }
0x113a   :  { %7019 = vtanh.f32 %v6496_v14 }
0x113d   :  { %v6446_v44 = vpop.f32.mrf.mxu2  ;;  %v6503_v55 = vpop.f32.mrf.mxu3 }
0x113e   :  { %v6447_v1 = vadd.f32 %v6446_v44, %v6376_v39 }
0x1140   :  { %v7020_v54 = vpop.eup %7019  ;;  %v6500_v50 = vadd.f32 %v6499_v7, %v6447_v1 }
0x1141   :  { %6531 = vst.msk [vmem:[%s11077_s5 + $0x8] sm:$0xff] %vm1878_vm4, %v7020_v54 }
0x1142   :  { %7021 = vtanh.f32 %v6500_v50 }
0x1145   :  { %v6450_v15 = vpop.f32.mrf.mxu2  ;;  %v6507_v23 = vpop.f32.mrf.mxu3 }
0x1146   :  { %v6451_v63 = vadd.f32 %v6450_v15, %v6382_v28 }
0x1148   :  { %v7022_v45 = vpop.eup %7021  ;;  %v6504_v11 = vadd.f32 %v6503_v55, %v6451_v63 }
0x1149   :  { %6532 = vst.msk [vmem:[%s11077_s5 + $0x10] sm:$0xff] %vm1878_vm4, %v7022_v45 }
0x114a   :  { %7023 = vtanh.f32 %v6504_v11 }
0x114d   :  { %v6454_v26 = vpop.f32.mrf.mxu2  ;;  %v6511_v5 = vpop.f32.mrf.mxu3 }
0x114e   :  { %v6455_v35 = vadd.f32 %v6454_v26, %v6388_v20 }
0x1150   :  { %v7024_v16 = vpop.eup %7023  ;;  %v6508_v32 = vadd.f32 %v6507_v23, %v6455_v35 }
0x1151   :  { %6533 = vst.msk [vmem:[%s11077_s5 + $0x18] sm:$0xff] %vm1878_vm4, %v7024_v16 }
0x1152   :  { %7025 = vtanh.f32 %v6508_v32 }
0x1155   :  { %v6458_v12 = vpop.f32.mrf.mxu2  ;;  %v6515_v34 = vpop.f32.mrf.mxu3 }
0x1156   :  { %v6459_v38 = vadd.f32 %v6458_v12, %v6394_v43 }
0x1158   :  { %v7026_v58 = vpop.eup %7025  ;;  %v6512_v47 = vadd.f32 %v6511_v5, %v6459_v38 }
0x1159   :  { %6534 = vst.msk [vmem:[%s11077_s5 + $0x20] sm:$0xff] %vm1878_vm4, %v7026_v58 }
0x115a   :  { %7027 = vtanh.f32 %v6512_v47 }
0x115d   :  { %v6462_v46 = vpop.f32.mrf.mxu2  ;;  %v6519_v22 = vpop.f32.mrf.mxu3 }
0x115e   :  { %v6463_v31 = vadd.f32 %v6462_v46, %v6400_v40 }
0x1160   :  { %v7028_v60 = vpop.eup %7027  ;;  %v6516_v57 = vadd.f32 %v6515_v34, %v6463_v31 }
0x1161   :  { %6535 = vst.msk [vmem:[%s11077_s5 + $0x28] sm:$0xff] %vm1878_vm4, %v7028_v60 }
0x1162   :  { %7029 = vtanh.f32 %v6516_v57 }
0x1165   :  { %v6466_v13 = vpop.f32.mrf.mxu2 }
0x1166   :  { %v6467_v37 = vadd.f32 %v6466_v13, %v6406_v18 }
0x1168   :  { %v7030_v8 = vpop.eup %7029  ;;  %v6520_v7 = vadd.f32 %v6519_v22, %v6467_v37 }
0x1169   :  { %6536 = vst.msk [vmem:[%s11077_s5 + $0x30] sm:$0xff] %vm1878_vm4, %v7030_v8 }
0x116a   :  { %7031 = vtanh.f32 %v6520_v7 }
0x1170   :  { %v7032_v29 = vpop.eup %7031 }
0x1171   :  { %6537 = vst.msk [vmem:[%s11077_s5 + $0x38] sm:$0xff] %vm1878_vm4, %v7032_v29 }

</bundles_post_ra>
